<compile_context>
chip_gen: v7x
topology: tpu7x:2x2x1
jax: 0.10.0
libtpu: 0.0.40
codegen_flags: <defaults>
</compile_context>

<pallas_src>
import functools

import jax
import jax.numpy as jnp
from jax.experimental import pallas as pl
from jax.experimental.pallas import tpu as pltpu


_VMEM_LIMIT = 48 * 1024 * 1024   # <= v7x physical (64 MiB), ample on v5e/v6e

_MM_PARAMS = pltpu.CompilerParams(
    dimension_semantics=("parallel", "parallel", "arbitrary"),
    vmem_limit_bytes=_VMEM_LIMIT)

_EW_PARAMS = pltpu.CompilerParams(
    dimension_semantics=("parallel",),
    vmem_limit_bytes=_VMEM_LIMIT)


def _round_up(x, m):
    return (x + m - 1) // m * m


def _pick_tk(kp):
    # kp is always a multiple of 128; pick the largest K-tile <= 512 dividing it.
    for cand in (512, 384, 256, 128):
        if kp % cand == 0:
            return cand
    return 128


def _ew_tiles(m):
    tm = min(512, _round_up(m, 8))
    return tm, _round_up(m, tm)


# ----------------------------------------------------------------------------
# Pallas kernels
# ----------------------------------------------------------------------------
def _mm_stats_kernel(a_ref, b_ref, y_ref, stat_ref, acc_ref):
    """Tiled bf16 matmul with f32 accumulation.  The finalize step also emits
    per-(M-tile, channel) partial sum / sum-of-squares for train-mode BN, so
    the conv output is never re-read from HBM just for statistics."""
    k = pl.program_id(2)

    @pl.when(k == 0)
    def _():
        acc_ref[...] = jnp.zeros_like(acc_ref)

    acc_ref[...] += jnp.dot(a_ref[...], b_ref[...],
                            preferred_element_type=jnp.float32)

    @pl.when(k == pl.num_programs(2) - 1)
    def _():
        acc = acc_ref[...]
        y_ref[...] = acc
        stat_ref[...] = jnp.zeros_like(stat_ref)
        stat_ref[0:1, :] = jnp.sum(acc, axis=0, keepdims=True)
        stat_ref[1:2, :] = jnp.sum(acc * acc, axis=0, keepdims=True)


def pallas_matmul_stats(a, b):
    """(M, K) @ (K, N) -> y (M, Np) f32 plus per-channel (sum, sumsq) of y.

    K and N are zero-padded to multiples of 128, operands cast to bf16 for the
    MXU.  Np = round_up(N, 128) columns are returned (padded columns are 0)."""
    m, k_dim = a.shape
    k2, n = b.shape
    assert k_dim == k2
    kp = _round_up(k_dim, 128)
    np_ = _round_up(n, 128)
    tm = min(256, _round_up(m, 8))
    mp = _round_up(m, tm)
    tn = 128
    tk = _pick_tk(kp)
    nm, nn, nk = mp // tm, np_ // tn, kp // tk

    a_p = jnp.pad(a, ((0, mp - m), (0, kp - k_dim))).astype(jnp.bfloat16)
    b_p = jnp.pad(b, ((0, kp - k_dim), (0, np_ - n))).astype(jnp.bfloat16)

    y, stats = pl.pallas_call(
        _mm_stats_kernel,
        out_shape=(jax.ShapeDtypeStruct((mp, np_), jnp.float32),
                   jax.ShapeDtypeStruct((nm * 8, np_), jnp.float32)),
        grid=(nm, nn, nk),
        in_specs=[pl.BlockSpec((tm, tk), lambda i, j, k: (i, k)),
                  pl.BlockSpec((tk, tn), lambda i, j, k: (k, j))],
        out_specs=(pl.BlockSpec((tm, tn), lambda i, j, k: (i, j)),
                   pl.BlockSpec((8, tn), lambda i, j, k: (i, j))),
        scratch_shapes=[pltpu.VMEM((tm, tn), jnp.float32)],
        compiler_params=_MM_PARAMS,
    )(a_p, b_p)

    # Tiny cross-tile reduction in plain JAX (padded rows are zero -> no bias).
    csum = jnp.sum(stats[0::8], axis=0)
    csq = jnp.sum(stats[1::8], axis=0)
    return y[:m], csum, csq


def _affine_kernel(y_ref, s_ref, b_ref, o_ref, *, relu):
    out = y_ref[...] * s_ref[...] + b_ref[...]        # (1,C) broadcast, once per tile
    if relu:
        out = jnp.maximum(out, 0.0)
    o_ref[...] = out


def pallas_affine(y, scale, bias, relu):
    m, c = y.shape
    tm, mp = _ew_tiles(m)
    y_p = jnp.pad(y, ((0, mp - m), (0, 0)))
    out = pl.pallas_call(
        functools.partial(_affine_kernel, relu=relu),
        out_shape=jax.ShapeDtypeStruct((mp, c), jnp.float32),
        grid=(mp // tm,),
        in_specs=[pl.BlockSpec((tm, c), lambda i: (i, 0)),
                  pl.BlockSpec((1, c), lambda i: (0, 0)),
                  pl.BlockSpec((1, c), lambda i: (0, 0))],
        out_specs=pl.BlockSpec((tm, c), lambda i: (i, 0)),
        compiler_params=_EW_PARAMS,
    )(y_p, scale, bias)
    return out[:m]


def _affine_add_relu_kernel(y_ref, s_ref, b_ref, r_ref, o_ref):
    o_ref[...] = jnp.maximum(
        y_ref[...] * s_ref[...] + b_ref[...] + r_ref[...], 0.0)


def pallas_affine_add_relu(y, scale, bias, residual):
    """relu(bn(y) + identity residual) in one fused tiled pass."""
    m, c = y.shape
    tm, mp = _ew_tiles(m)
    y_p = jnp.pad(y, ((0, mp - m), (0, 0)))
    r_p = jnp.pad(residual, ((0, mp - m), (0, 0)))
    out = pl.pallas_call(
        _affine_add_relu_kernel,
        out_shape=jax.ShapeDtypeStruct((mp, c), jnp.float32),
        grid=(mp // tm,),
        in_specs=[pl.BlockSpec((tm, c), lambda i: (i, 0)),
                  pl.BlockSpec((1, c), lambda i: (0, 0)),
                  pl.BlockSpec((1, c), lambda i: (0, 0)),
                  pl.BlockSpec((tm, c), lambda i: (i, 0))],
        out_specs=pl.BlockSpec((tm, c), lambda i: (i, 0)),
        compiler_params=_EW_PARAMS,
    )(y_p, scale, bias, r_p)
    return out[:m]


def _affine2_add_relu_kernel(y1_ref, s1_ref, b1_ref, y2_ref, s2_ref, b2_ref,
                             o_ref):
    out = (y1_ref[...] * s1_ref[...] + b1_ref[...]
           + y2_ref[...] * s2_ref[...] + b2_ref[...])
    o_ref[...] = jnp.maximum(out, 0.0)


def pallas_affine2_add_relu(y1, s1, b1, y2, s2, b2):
    """relu(bn(main conv) + bn(projection shortcut conv)) in one fused pass."""
    m, c = y1.shape
    tm, mp = _ew_tiles(m)
    y1_p = jnp.pad(y1, ((0, mp - m), (0, 0)))
    y2_p = jnp.pad(y2, ((0, mp - m), (0, 0)))
    out = pl.pallas_call(
        _affine2_add_relu_kernel,
        out_shape=jax.ShapeDtypeStruct((mp, c), jnp.float32),
        grid=(mp // tm,),
        in_specs=[pl.BlockSpec((tm, c), lambda i: (i, 0)),
                  pl.BlockSpec((1, c), lambda i: (0, 0)),
                  pl.BlockSpec((1, c), lambda i: (0, 0)),
                  pl.BlockSpec((tm, c), lambda i: (i, 0)),
                  pl.BlockSpec((1, c), lambda i: (0, 0)),
                  pl.BlockSpec((1, c), lambda i: (0, 0))],
        out_specs=pl.BlockSpec((tm, c), lambda i: (i, 0)),
        compiler_params=_EW_PARAMS,
    )(y1_p, s1, b1, y2_p, s2, b2)
    return out[:m]


def _maxpool9_kernel(*refs):
    o_ref = refs[-1]
    m = refs[0][...]
    for r in refs[1:-1]:
        m = jnp.maximum(m, r[...])
    o_ref[...] = m


# ----------------------------------------------------------------------------
# Glue: im2col, conv, BN folding, maxpool
# ----------------------------------------------------------------------------
def im2col(x, kh, kw, stride, pad):
    """x: (N, H, W, C) -> (N*Ho*Wo, kh*kw*C)."""
    # TODO(synk): for 3x3 convs, an in-kernel tap loop (offset index_maps into
    # the padded NHWC activation) would avoid materializing the 9x-expanded
    # patches in HBM; here patches are at least kept in bf16.
    n, h, w, c = x.shape
    ho = (h + 2 * pad - kh) // stride + 1
    wo = (w + 2 * pad - kw) // stride + 1
    xp = jnp.pad(x, ((0, 0), (pad, pad), (pad, pad), (0, 0)))
    cols = []
    for i in range(kh):
        for j in range(kw):
            cols.append(xp[:, i:i + stride * ho:stride,
                           j:j + stride * wo:stride, :])
    patches = jnp.stack(cols, axis=3)                  # (N, Ho, Wo, kh*kw, C)
    return patches.reshape(n * ho * wo, kh * kw * c), (n, ho, wo)


def conv2d_mm(x, w, stride, pad):
    """x: (N,H,W,Cin_p) NHWC (channel axis may be zero-padded beyond real Cin);
    w: PyTorch layout (Cout, Cin, kh, kw).
    Returns y (M, Cout_p) f32, per-channel sum/sumsq, and (N, Ho, Wo)."""
    cout, cin, kh, kw = w.shape
    cin_p = x.shape[-1]
    patches, (n, ho, wo) = im2col(x.astype(jnp.bfloat16), kh, kw, stride, pad)
    w_p = jnp.pad(w, ((0, 0), (0, cin_p - cin), (0, 0), (0, 0)))
    wmat = jnp.transpose(w_p, (2, 3, 1, 0)).reshape(kh * kw * cin_p, cout)
    y, csum, csq = pallas_matmul_stats(patches, wmat)
    return y, csum, csq, (n, ho, wo)


def bn_fold(csum, csq, m_rows, gamma, beta, eps=1e-5):
    """Fold train-mode BatchNorm (batch statistics, biased variance) into a
    per-channel (scale, bias).  gamma/beta are zero-padded so padded channels
    map to scale=0, bias=0 and stay exactly zero downstream."""
    cp = csum.shape[0]
    mean = csum / m_rows
    # TODO(synk): single-pass E[x^2]-E[x]^2 can cancel for large activations;
    # a centered second pass would be safer but costs another HBM read of y.
    var = jnp.maximum(csq / m_rows - mean * mean, 0.0)
    gamma_p = jnp.pad(gamma, (0, cp - gamma.shape[0]))
    beta_p = jnp.pad(beta, (0, cp - beta.shape[0]))
    scale = gamma_p * jax.lax.rsqrt(var + eps)
    bias = beta_p - mean * scale
    return scale[None, :], bias[None, :]


def maxpool_3x3_s2_p1(x):
    """x: (N,H,W,Cp).  9 shifted/strided views -> tiled in-kernel maximum tree
    (no (9, M, C) stack materialized, no single giant VMEM block)."""
    n, h, w, c = x.shape
    ho = (h + 2 - 3) // 2 + 1
    wo = (w + 2 - 3) // 2 + 1
    xp = jnp.pad(x, ((0, 0), (1, 1), (1, 1), (0, 0)),
                 constant_values=-jnp.inf)
    m = n * ho * wo
    tm, mp = _ew_tiles(m)
    views = []
    for i in range(3):
        for j in range(3):
            v = xp[:, i:i + 2 * ho:2, j:j + 2 * wo:2, :].reshape(m, c)
            views.append(jnp.pad(v, ((0, mp - m), (0, 0))))
    out = pl.pallas_call(
        _maxpool9_kernel,
        out_shape=jax.ShapeDtypeStruct((mp, c), jnp.float32),
        grid=(mp // tm,),
        in_specs=[pl.BlockSpec((tm, c), lambda i: (i, 0))] * 9,
        out_specs=pl.BlockSpec((tm, c), lambda i: (i, 0)),
        compiler_params=_EW_PARAMS,
    )(*views)
    return out[:m].reshape(n, ho, wo, c)


# ----------------------------------------------------------------------------
# ResNet18 forward
# ----------------------------------------------------------------------------
def basic_block(x, p):
    """x: (N,H,W,Cp_in). Implements BasicBlock.forward with train-mode BN."""
    stride = p['stride']
    y1, c1s, c1q, (n, ho, wo) = conv2d_mm(x, p['conv1_w'], stride, 1)
    m = n * ho * wo
    s1, b1 = bn_fold(c1s, c1q, m, p['bn1_g'], p['bn1_b'])
    out1 = pallas_affine(y1, s1, b1, relu=True)
    cp = out1.shape[1]
    out1_img = out1.reshape(n, ho, wo, cp)

    y2, c2s, c2q, _ = conv2d_mm(out1_img, p['conv2_w'], 1, 1)
    s2, b2 = bn_fold(c2s, c2q, m, p['bn2_g'], p['bn2_b'])

    if 'sc_w' in p:                      # projection shortcut (1x1 conv + BN)
        ys, css, csq2, _ = conv2d_mm(x, p['sc_w'], stride, 0)
        ss, bs = bn_fold(css, csq2, m, p['sc_g'], p['sc_b'])
        out = pallas_affine2_add_relu(y2, s2, b2, ys, ss, bs)
    else:                                # identity shortcut
        res = x.reshape(m, cp)
        out = pallas_affine_add_relu(y2, s2, b2, res)
    return out.reshape(n, ho, wo, cp)


def resnet18_forward(params, x_nchw):
    x = jnp.transpose(x_nchw, (0, 2, 3, 1)).astype(jnp.float32)    # -> NHWC
    y, cs, cq, (n, ho, wo) = conv2d_mm(x, params['conv1_w'], 2, 3)
    m = n * ho * wo
    s, b = bn_fold(cs, cq, m, params['bn1_g'], params['bn1_b'])
    act = pallas_affine(y, s, b, relu=True)
    x = act.reshape(n, ho, wo, act.shape[1])
    x = maxpool_3x3_s2_p1(x)
    for layer in params['layers']:
        for blk in layer:
            x = basic_block(x, blk)
    c_real = params['layers'][-1][-1]['conv2_w'].shape[0]          # 512
    x = x[..., :c_real]
    return jnp.transpose(x, (0, 3, 1, 2))                          # -> NCHW


# ----------------------------------------------------------------------------
# Deterministic parameter init (same shapes as the PyTorch module)
# ----------------------------------------------------------------------------
def init_params(key):
    keys = jax.random.split(key, 64)
    idx = iter(range(64))

    def nxt():
        return keys[next(idx)]

    def conv_w(cout, cin, kh, kw):
        fan_in = cin * kh * kw
        std = (2.0 / fan_in) ** 0.5
        return std * jax.random.normal(nxt(), (cout, cin, kh, kw), jnp.float32)

    def bn(c):
        g = 1.0 + 0.1 * jax.random.normal(nxt(), (c,), jnp.float32)
        b = 0.1 * jax.random.normal(nxt(), (c,), jnp.float32)
        return g, b

    params = {'conv1_w': conv_w(64, 3, 7, 7)}
    params['bn1_g'], params['bn1_b'] = bn(64)

    layers = []
    in_planes = 64
    for planes, stride0 in ((64, 1), (128, 2), (256, 2), (512, 2)):
        blocks = []
        for stride in (stride0, 1):
            blk = {'stride': stride,
                   'conv1_w': conv_w(planes, in_planes, 3, 3)}
            blk['bn1_g'], blk['bn1_b'] = bn(planes)
            blk['conv2_w'] = conv_w(planes, planes, 3, 3)
            blk['bn2_g'], blk['bn2_b'] = bn(planes)
            if stride != 1 or in_planes != planes:
                blk['sc_w'] = conv_w(planes, in_planes, 1, 1)
                blk['sc_g'], blk['sc_b'] = bn(planes)
            blocks.append(blk)
            in_planes = planes
        layers.append(blocks)
    params['layers'] = layers
    return params


if __name__ == "__main__":
    key = jax.random.PRNGKey(0)
    pkey, xkey = jax.random.split(key)
    params = init_params(pkey)

    # Small input consistent with the module: NCHW, 3 input channels.
    x = jax.random.normal(xkey, (2, 3, 16, 16), jnp.float32)

    fwd = jax.jit(lambda inp: resnet18_forward(params, inp))
    out = jax.block_until_ready(fwd(x))

    assert out.shape == (2, 512, 1, 1), out.shape
    assert out.dtype == jnp.float32
    assert bool(jnp.all(jnp.isfinite(out)))
    print("KERNEL_OK")
</pallas_src>

<mosaic_0001>
module attributes {stable_mosaic.version = 11 : i64} {
  func.func @_mm_stats_kernel(%arg0: i32, %arg1: i32, %arg2: i32, %arg3: memref<128x256xbf16, #tpu.memory_space<vmem>>, %arg4: memref<256x128xbf16, #tpu.memory_space<vmem>>, %arg5: memref<128x128xf32, #tpu.memory_space<vmem>>, %arg6: memref<8x128xf32, #tpu.memory_space<vmem>>, %arg7: memref<128x128xf32, #tpu.memory_space<vmem>>) attributes {dimension_semantics = [#tpu.dimension_semantics<parallel>, #tpu.dimension_semantics<parallel>, #tpu.dimension_semantics<arbitrary>], iteration_bounds = array<i64: 1, 1, 1>, scalar_prefetch = 0 : i64, scratch_operands = 1 : i64, tpu.core_type = #tpu.core_type<tc>, window_params = [{transform_indices = @transform_0, window_bounds = array<i64: 128, 256>}, {transform_indices = @transform_1, window_bounds = array<i64: 256, 128>}, {transform_indices = @transform_2, window_bounds = array<i64: 128, 128>}, {transform_indices = @transform_3, window_bounds = array<i64: 8, 128>}]} {
    %c0_i32 = arith.constant 0 : i32
    %0 = arith.cmpi eq, %arg2, %c0_i32 : i32
    %1 = arith.extui %0 : i1 to i32
    %c0_i32_0 = arith.constant 0 : i32
    %2 = arith.cmpi ne, %1, %c0_i32_0 : i32
    scf.if %2 {
      %cst_10 = arith.constant 0.000000e+00 : f32
      %12 = vector.broadcast %cst_10 : f32 to vector<128x128xf32>
      %c0_11 = arith.constant 0 : index
      %c0_12 = arith.constant 0 : index
      %13 = vector.load %arg7[%c0_11, %c0_12] : memref<128x128xf32, #tpu.memory_space<vmem>>, vector<128x128xf32>
      tpu.vector_store %arg7[%c0_11, %c0_12], %12 {strides = array<i32>} : memref<128x128xf32, #tpu.memory_space<vmem>>, vector<128x128xf32>,
    } else {
    }
    %c0 = arith.constant 0 : index
    %c0_1 = arith.constant 0 : index
    %3 = vector.load %arg7[%c0, %c0_1] : memref<128x128xf32, #tpu.memory_space<vmem>>, vector<128x128xf32>
    %c0_2 = arith.constant 0 : index
    %c0_3 = arith.constant 0 : index
    %4 = vector.load %arg3[%c0_2, %c0_3] : memref<128x256xbf16, #tpu.memory_space<vmem>>, vector<128x256xbf16>
    %c0_4 = arith.constant 0 : index
    %c0_5 = arith.constant 0 : index
    %5 = vector.load %arg4[%c0_4, %c0_5] : memref<256x128xbf16, #tpu.memory_space<vmem>>, vector<256x128xbf16>
    %cst = arith.constant dense<0.000000e+00> : vector<128x128xf32>
    %6 = tpu.matmul %4, %5, %cst {dimension_numbers = #tpu.dot_dimension_numbers<[1], [0], [0], [1], [0, 0, 1, 1], [], []>} : vector<128x256xbf16>, vector<256x128xbf16>, vector<128x128xf32> -> vector<128x128xf32>
    %7 = arith.addf %3, %6 : vector<128x128xf32>
    %c0_6 = arith.constant 0 : index
    %c0_7 = arith.constant 0 : index
    %8 = vector.load %arg7[%c0_6, %c0_7] : memref<128x128xf32, #tpu.memory_space<vmem>>, vector<128x128xf32>
    tpu.vector_store %arg7[%c0_6, %c0_7], %7 {strides = array<i32>} : memref<128x128xf32, #tpu.memory_space<vmem>>, vector<128x128xf32>,
    %c0_i32_8 = arith.constant 0 : i32
    %9 = arith.cmpi eq, %arg2, %c0_i32_8 : i32
    %10 = arith.extui %9 : i1 to i32
    %c0_i32_9 = arith.constant 0 : i32
    %11 = arith.cmpi ne, %10, %c0_i32_9 : i32
    scf.if %11 {
      %c0_10 = arith.constant 0 : index
      %c0_11 = arith.constant 0 : index
      %12 = vector.load %arg7[%c0_10, %c0_11] : memref<128x128xf32, #tpu.memory_space<vmem>>, vector<128x128xf32>
      %c0_12 = arith.constant 0 : index
      %c0_13 = arith.constant 0 : index
      %13 = vector.load %arg5[%c0_12, %c0_13] : memref<128x128xf32, #tpu.memory_space<vmem>>, vector<128x128xf32>
      tpu.vector_store %arg5[%c0_12, %c0_13], %12 {strides = array<i32>} : memref<128x128xf32, #tpu.memory_space<vmem>>, vector<128x128xf32>,
      %cst_14 = arith.constant 0.000000e+00 : f32
      %14 = vector.broadcast %cst_14 : f32 to vector<8x128xf32>
      %c0_15 = arith.constant 0 : index
      %c0_16 = arith.constant 0 : index
      %15 = vector.load %arg6[%c0_15, %c0_16] : memref<8x128xf32, #tpu.memory_space<vmem>>, vector<8x128xf32>
      tpu.vector_store %arg6[%c0_15, %c0_16], %14 {strides = array<i32>} : memref<8x128xf32, #tpu.memory_space<vmem>>, vector<8x128xf32>,
      %cst_17 = arith.constant dense<0.000000e+00> : vector<128xf32>
      %16 = vector.multi_reduction <add>, %12, %cst_17 [0] : vector<128x128xf32> to vector<128xf32>
      %17 = vector.shape_cast %16 : vector<128xf32> to vector<1x128xf32>
      %c0_18 = arith.constant 0 : index
      %c0_19 = arith.constant 0 : index
      %18 = vector.load %arg6[%c0_18, %c0_19] : memref<8x128xf32, #tpu.memory_space<vmem>>, vector<1x128xf32>
      tpu.vector_store %arg6[%c0_18, %c0_19], %17 {strides = array<i32>} : memref<8x128xf32, #tpu.memory_space<vmem>>, vector<1x128xf32>,
      %19 = arith.mulf %12, %12 : vector<128x128xf32>
      %cst_20 = arith.constant dense<0.000000e+00> : vector<128xf32>
      %20 = vector.multi_reduction <add>, %19, %cst_20 [0] : vector<128x128xf32> to vector<128xf32>
      %21 = vector.shape_cast %20 : vector<128xf32> to vector<1x128xf32>
      %c1 = arith.constant 1 : index
      %c0_21 = arith.constant 0 : index
      %22 = vector.load %arg6[%c1, %c0_21] : memref<8x128xf32, #tpu.memory_space<vmem>>, vector<1x128xf32>
      tpu.vector_store %arg6[%c1, %c0_21], %21 {strides = array<i32>} : memref<8x128xf32, #tpu.memory_space<vmem>>, vector<1x128xf32>,
    } else {
    }
    return
  }
  func.func @transform_0(%arg0: i32, %arg1: i32, %arg2: i32) -> (i32, i32) {
    %c0_i32 = arith.constant 0 : i32
    return %arg0, %arg2 : i32, i32
  }
  func.func @transform_1(%arg0: i32, %arg1: i32, %arg2: i32) -> (i32, i32) {
    %c0_i32 = arith.constant 0 : i32
    return %arg2, %arg1 : i32, i32
  }
  func.func @transform_2(%arg0: i32, %arg1: i32, %arg2: i32) -> (i32, i32) {
    %c0_i32 = arith.constant 0 : i32
    return %arg0, %arg1 : i32, i32
  }
  func.func @transform_3(%arg0: i32, %arg1: i32, %arg2: i32) -> (i32, i32) {
    %c0_i32 = arith.constant 0 : i32
    return %arg0, %arg1 : i32, i32
  }
}

module attributes {stable_mosaic.version = 11 : i64} {
  func.func @_affine_kernel(%arg0: i32, %arg1: memref<128x128xf32, #tpu.memory_space<vmem>>, %arg2: memref<1x128xf32, #tpu.memory_space<vmem>>, %arg3: memref<1x128xf32, #tpu.memory_space<vmem>>, %arg4: memref<128x128xf32, #tpu.memory_space<vmem>>) attributes {dimension_semantics = [#tpu.dimension_semantics<parallel>], iteration_bounds = array<i64: 1>, scalar_prefetch = 0 : i64, scratch_operands = 0 : i64, tpu.core_type = #tpu.core_type<tc>, window_params = [{transform_indices = @transform_0, window_bounds = array<i64: 128, 128>}, {pipeline_mode = #tpu.pipeline_mode<synchronous>, transform_indices = @transform_1, window_bounds = array<i64: 1, 128>}, {pipeline_mode = #tpu.pipeline_mode<synchronous>, transform_indices = @transform_2, window_bounds = array<i64: 1, 128>}, {transform_indices = @transform_3, window_bounds = array<i64: 128, 128>}]} {
    %c0 = arith.constant 0 : index
    %c0_0 = arith.constant 0 : index
    %0 = vector.load %arg1[%c0, %c0_0] : memref<128x128xf32, #tpu.memory_space<vmem>>, vector<128x128xf32>
    %c0_1 = arith.constant 0 : index
    %c0_2 = arith.constant 0 : index
    %1 = vector.load %arg2[%c0_1, %c0_2] : memref<1x128xf32, #tpu.memory_space<vmem>>, vector<1x128xf32>
    %2 = vector.broadcast %1 : vector<1x128xf32> to vector<128x128xf32>
    %3 = arith.mulf %0, %2 : vector<128x128xf32>
    %c0_3 = arith.constant 0 : index
    %c0_4 = arith.constant 0 : index
    %4 = vector.load %arg3[%c0_3, %c0_4] : memref<1x128xf32, #tpu.memory_space<vmem>>, vector<1x128xf32>
    %5 = vector.broadcast %4 : vector<1x128xf32> to vector<128x128xf32>
    %6 = arith.addf %3, %5 : vector<128x128xf32>
    %cst = arith.constant 0.000000e+00 : f32
    %7 = vector.broadcast %cst : f32 to vector<128x128xf32>
    %8 = arith.maximumf %6, %7 : vector<128x128xf32>
    %c0_5 = arith.constant 0 : index
    %c0_6 = arith.constant 0 : index
    %9 = vector.load %arg4[%c0_5, %c0_6] : memref<128x128xf32, #tpu.memory_space<vmem>>, vector<128x128xf32>
    tpu.vector_store %arg4[%c0_5, %c0_6], %8 {strides = array<i32>} : memref<128x128xf32, #tpu.memory_space<vmem>>, vector<128x128xf32>,
    return
  }
  func.func @transform_0(%arg0: i32) -> (i32, i32) {
    %c0_i32 = arith.constant 0 : i32
    %c0_i32_0 = arith.constant 0 : i32
    return %arg0, %c0_i32 : i32, i32
  }
  func.func @transform_1(%arg0: i32) -> (i32, i32) {
    %c0_i32 = arith.constant 0 : i32
    %c0_i32_0 = arith.constant 0 : i32
    %c0_i32_1 = arith.constant 0 : i32
    return %c0_i32, %c0_i32_0 : i32, i32
  }
  func.func @transform_2(%arg0: i32) -> (i32, i32) {
    %c0_i32 = arith.constant 0 : i32
    %c0_i32_0 = arith.constant 0 : i32
    %c0_i32_1 = arith.constant 0 : i32
    return %c0_i32, %c0_i32_0 : i32, i32
  }
  func.func @transform_3(%arg0: i32) -> (i32, i32) {
    %c0_i32 = arith.constant 0 : i32
    %c0_i32_0 = arith.constant 0 : i32
    return %arg0, %c0_i32 : i32, i32
  }
}

module attributes {stable_mosaic.version = 11 : i64} {
  func.func @_maxpool9_kernel(%arg0: i32, %arg1: memref<32x128xf32, #tpu.memory_space<vmem>>, %arg2: memref<32x128xf32, #tpu.memory_space<vmem>>, %arg3: memref<32x128xf32, #tpu.memory_space<vmem>>, %arg4: memref<32x128xf32, #tpu.memory_space<vmem>>, %arg5: memref<32x128xf32, #tpu.memory_space<vmem>>, %arg6: memref<32x128xf32, #tpu.memory_space<vmem>>, %arg7: memref<32x128xf32, #tpu.memory_space<vmem>>, %arg8: memref<32x128xf32, #tpu.memory_space<vmem>>, %arg9: memref<32x128xf32, #tpu.memory_space<vmem>>, %arg10: memref<32x128xf32, #tpu.memory_space<vmem>>) attributes {dimension_semantics = [#tpu.dimension_semantics<parallel>], iteration_bounds = array<i64: 1>, scalar_prefetch = 0 : i64, scratch_operands = 0 : i64, tpu.core_type = #tpu.core_type<tc>, window_params = [{transform_indices = @transform_0, window_bounds = array<i64: 32, 128>}, {transform_indices = @transform_1, window_bounds = array<i64: 32, 128>}, {transform_indices = @transform_2, window_bounds = array<i64: 32, 128>}, {transform_indices = @transform_3, window_bounds = array<i64: 32, 128>}, {transform_indices = @transform_4, window_bounds = array<i64: 32, 128>}, {transform_indices = @transform_5, window_bounds = array<i64: 32, 128>}, {transform_indices = @transform_6, window_bounds = array<i64: 32, 128>}, {transform_indices = @transform_7, window_bounds = array<i64: 32, 128>}, {transform_indices = @transform_8, window_bounds = array<i64: 32, 128>}, {transform_indices = @transform_9, window_bounds = array<i64: 32, 128>}]} {
    %c0 = arith.constant 0 : index
    %c0_0 = arith.constant 0 : index
    %0 = vector.load %arg1[%c0, %c0_0] : memref<32x128xf32, #tpu.memory_space<vmem>>, vector<32x128xf32>
    %c0_1 = arith.constant 0 : index
    %c0_2 = arith.constant 0 : index
    %1 = vector.load %arg2[%c0_1, %c0_2] : memref<32x128xf32, #tpu.memory_space<vmem>>, vector<32x128xf32>
    %2 = arith.maximumf %0, %1 : vector<32x128xf32>
    %c0_3 = arith.constant 0 : index
    %c0_4 = arith.constant 0 : index
    %3 = vector.load %arg3[%c0_3, %c0_4] : memref<32x128xf32, #tpu.memory_space<vmem>>, vector<32x128xf32>
    %4 = arith.maximumf %2, %3 : vector<32x128xf32>
    %c0_5 = arith.constant 0 : index
    %c0_6 = arith.constant 0 : index
    %5 = vector.load %arg4[%c0_5, %c0_6] : memref<32x128xf32, #tpu.memory_space<vmem>>, vector<32x128xf32>
    %6 = arith.maximumf %4, %5 : vector<32x128xf32>
    %c0_7 = arith.constant 0 : index
    %c0_8 = arith.constant 0 : index
    %7 = vector.load %arg5[%c0_7, %c0_8] : memref<32x128xf32, #tpu.memory_space<vmem>>, vector<32x128xf32>
    %8 = arith.maximumf %6, %7 : vector<32x128xf32>
    %c0_9 = arith.constant 0 : index
    %c0_10 = arith.constant 0 : index
    %9 = vector.load %arg6[%c0_9, %c0_10] : memref<32x128xf32, #tpu.memory_space<vmem>>, vector<32x128xf32>
    %10 = arith.maximumf %8, %9 : vector<32x128xf32>
    %c0_11 = arith.constant 0 : index
    %c0_12 = arith.constant 0 : index
    %11 = vector.load %arg7[%c0_11, %c0_12] : memref<32x128xf32, #tpu.memory_space<vmem>>, vector<32x128xf32>
    %12 = arith.maximumf %10, %11 : vector<32x128xf32>
    %c0_13 = arith.constant 0 : index
    %c0_14 = arith.constant 0 : index
    %13 = vector.load %arg8[%c0_13, %c0_14] : memref<32x128xf32, #tpu.memory_space<vmem>>, vector<32x128xf32>
    %14 = arith.maximumf %12, %13 : vector<32x128xf32>
    %c0_15 = arith.constant 0 : index
    %c0_16 = arith.constant 0 : index
    %15 = vector.load %arg9[%c0_15, %c0_16] : memref<32x128xf32, #tpu.memory_space<vmem>>, vector<32x128xf32>
    %16 = arith.maximumf %14, %15 : vector<32x128xf32>
    %c0_17 = arith.constant 0 : index
    %c0_18 = arith.constant 0 : index
    %17 = vector.load %arg10[%c0_17, %c0_18] : memref<32x128xf32, #tpu.memory_space<vmem>>, vector<32x128xf32>
    tpu.vector_store %arg10[%c0_17, %c0_18], %16 {strides = array<i32>} : memref<32x128xf32, #tpu.memory_space<vmem>>, vector<32x128xf32>,
    return
  }
  func.func @transform_0(%arg0: i32) -> (i32, i32) {
    %c0_i32 = arith.constant 0 : i32
    %c0_i32_0 = arith.constant 0 : i32
    return %arg0, %c0_i32 : i32, i32
  }
  func.func @transform_1(%arg0: i32) -> (i32, i32) {
    %c0_i32 = arith.constant 0 : i32
    %c0_i32_0 = arith.constant 0 : i32
    return %arg0, %c0_i32 : i32, i32
  }
  func.func @transform_2(%arg0: i32) -> (i32, i32) {
    %c0_i32 = arith.constant 0 : i32
    %c0_i32_0 = arith.constant 0 : i32
    return %arg0, %c0_i32 : i32, i32
  }
  func.func @transform_3(%arg0: i32) -> (i32, i32) {
    %c0_i32 = arith.constant 0 : i32
    %c0_i32_0 = arith.constant 0 : i32
    return %arg0, %c0_i32 : i32, i32
  }
  func.func @transform_4(%arg0: i32) -> (i32, i32) {
    %c0_i32 = arith.constant 0 : i32
    %c0_i32_0 = arith.constant 0 : i32
    return %arg0, %c0_i32 : i32, i32
  }
  func.func @transform_5(%arg0: i32) -> (i32, i32) {
    %c0_i32 = arith.constant 0 : i32
    %c0_i32_0 = arith.constant 0 : i32
    return %arg0, %c0_i32 : i32, i32
  }
  func.func @transform_6(%arg0: i32) -> (i32, i32) {
    %c0_i32 = arith.constant 0 : i32
    %c0_i32_0 = arith.constant 0 : i32
    return %arg0, %c0_i32 : i32, i32
  }
  func.func @transform_7(%arg0: i32) -> (i32, i32) {
    %c0_i32 = arith.constant 0 : i32
    %c0_i32_0 = arith.constant 0 : i32
    return %arg0, %c0_i32 : i32, i32
  }
  func.func @transform_8(%arg0: i32) -> (i32, i32) {
    %c0_i32 = arith.constant 0 : i32
    %c0_i32_0 = arith.constant 0 : i32
    return %arg0, %c0_i32 : i32, i32
  }
  func.func @transform_9(%arg0: i32) -> (i32, i32) {
    %c0_i32 = arith.constant 0 : i32
    %c0_i32_0 = arith.constant 0 : i32
    return %arg0, %c0_i32 : i32, i32
  }
}

module attributes {stable_mosaic.version = 11 : i64} {
  func.func @_mm_stats_kernel(%arg0: i32, %arg1: i32, %arg2: i32, %arg3: memref<32x384xbf16, #tpu.memory_space<vmem>>, %arg4: memref<384x128xbf16, #tpu.memory_space<vmem>>, %arg5: memref<32x128xf32, #tpu.memory_space<vmem>>, %arg6: memref<8x128xf32, #tpu.memory_space<vmem>>, %arg7: memref<32x128xf32, #tpu.memory_space<vmem>>) attributes {dimension_semantics = [#tpu.dimension_semantics<parallel>, #tpu.dimension_semantics<parallel>, #tpu.dimension_semantics<arbitrary>], iteration_bounds = array<i64: 1, 1, 3>, scalar_prefetch = 0 : i64, scratch_operands = 1 : i64, tpu.core_type = #tpu.core_type<tc>, window_params = [{transform_indices = @transform_0, window_bounds = array<i64: 32, 384>}, {transform_indices = @transform_1, window_bounds = array<i64: 384, 128>}, {transform_indices = @transform_2, window_bounds = array<i64: 32, 128>}, {transform_indices = @transform_3, window_bounds = array<i64: 8, 128>}]} {
    %c0_i32 = arith.constant 0 : i32
    %0 = arith.cmpi eq, %arg2, %c0_i32 : i32
    %1 = arith.extui %0 : i1 to i32
    %c0_i32_0 = arith.constant 0 : i32
    %2 = arith.cmpi ne, %1, %c0_i32_0 : i32
    scf.if %2 {
      %cst_9 = arith.constant 0.000000e+00 : f32
      %12 = vector.broadcast %cst_9 : f32 to vector<32x128xf32>
      %c0_10 = arith.constant 0 : index
      %c0_11 = arith.constant 0 : index
      %13 = vector.load %arg7[%c0_10, %c0_11] : memref<32x128xf32, #tpu.memory_space<vmem>>, vector<32x128xf32>
      tpu.vector_store %arg7[%c0_10, %c0_11], %12 {strides = array<i32>} : memref<32x128xf32, #tpu.memory_space<vmem>>, vector<32x128xf32>,
    } else {
    }
    %c0 = arith.constant 0 : index
    %c0_1 = arith.constant 0 : index
    %3 = vector.load %arg7[%c0, %c0_1] : memref<32x128xf32, #tpu.memory_space<vmem>>, vector<32x128xf32>
    %c0_2 = arith.constant 0 : index
    %c0_3 = arith.constant 0 : index
    %4 = vector.load %arg3[%c0_2, %c0_3] : memref<32x384xbf16, #tpu.memory_space<vmem>>, vector<32x384xbf16>
    %c0_4 = arith.constant 0 : index
    %c0_5 = arith.constant 0 : index
    %5 = vector.load %arg4[%c0_4, %c0_5] : memref<384x128xbf16, #tpu.memory_space<vmem>>, vector<384x128xbf16>
    %cst = arith.constant dense<0.000000e+00> : vector<32x128xf32>
    %6 = tpu.matmul %4, %5, %cst {dimension_numbers = #tpu.dot_dimension_numbers<[1], [0], [0], [1], [0, 0, 1, 1], [], []>} : vector<32x384xbf16>, vector<384x128xbf16>, vector<32x128xf32> -> vector<32x128xf32>
    %7 = arith.addf %3, %6 : vector<32x128xf32>
    %c0_6 = arith.constant 0 : index
    %c0_7 = arith.constant 0 : index
    %8 = vector.load %arg7[%c0_6, %c0_7] : memref<32x128xf32, #tpu.memory_space<vmem>>, vector<32x128xf32>
    tpu.vector_store %arg7[%c0_6, %c0_7], %7 {strides = array<i32>} : memref<32x128xf32, #tpu.memory_space<vmem>>, vector<32x128xf32>,
    %c2_i32 = arith.constant 2 : i32
    %9 = arith.cmpi eq, %arg2, %c2_i32 : i32
    %10 = arith.extui %9 : i1 to i32
    %c0_i32_8 = arith.constant 0 : i32
    %11 = arith.cmpi ne, %10, %c0_i32_8 : i32
    scf.if %11 {
      %c0_9 = arith.constant 0 : index
      %c0_10 = arith.constant 0 : index
      %12 = vector.load %arg7[%c0_9, %c0_10] : memref<32x128xf32, #tpu.memory_space<vmem>>, vector<32x128xf32>
      %c0_11 = arith.constant 0 : index
      %c0_12 = arith.constant 0 : index
      %13 = vector.load %arg5[%c0_11, %c0_12] : memref<32x128xf32, #tpu.memory_space<vmem>>, vector<32x128xf32>
      tpu.vector_store %arg5[%c0_11, %c0_12], %12 {strides = array<i32>} : memref<32x128xf32, #tpu.memory_space<vmem>>, vector<32x128xf32>,
      %cst_13 = arith.constant 0.000000e+00 : f32
      %14 = vector.broadcast %cst_13 : f32 to vector<8x128xf32>
      %c0_14 = arith.constant 0 : index
      %c0_15 = arith.constant 0 : index
      %15 = vector.load %arg6[%c0_14, %c0_15] : memref<8x128xf32, #tpu.memory_space<vmem>>, vector<8x128xf32>
      tpu.vector_store %arg6[%c0_14, %c0_15], %14 {strides = array<i32>} : memref<8x128xf32, #tpu.memory_space<vmem>>, vector<8x128xf32>,
      %cst_16 = arith.constant dense<0.000000e+00> : vector<128xf32>
      %16 = vector.multi_reduction <add>, %12, %cst_16 [0] : vector<32x128xf32> to vector<128xf32>
      %17 = vector.shape_cast %16 : vector<128xf32> to vector<1x128xf32>
      %c0_17 = arith.constant 0 : index
      %c0_18 = arith.constant 0 : index
      %18 = vector.load %arg6[%c0_17, %c0_18] : memref<8x128xf32, #tpu.memory_space<vmem>>, vector<1x128xf32>
      tpu.vector_store %arg6[%c0_17, %c0_18], %17 {strides = array<i32>} : memref<8x128xf32, #tpu.memory_space<vmem>>, vector<1x128xf32>,
      %19 = arith.mulf %12, %12 : vector<32x128xf32>
      %cst_19 = arith.constant dense<0.000000e+00> : vector<128xf32>
      %20 = vector.multi_reduction <add>, %19, %cst_19 [0] : vector<32x128xf32> to vector<128xf32>
      %21 = vector.shape_cast %20 : vector<128xf32> to vector<1x128xf32>
      %c1 = arith.constant 1 : index
      %c0_20 = arith.constant 0 : index
      %22 = vector.load %arg6[%c1, %c0_20] : memref<8x128xf32, #tpu.memory_space<vmem>>, vector<1x128xf32>
      tpu.vector_store %arg6[%c1, %c0_20], %21 {strides = array<i32>} : memref<8x128xf32, #tpu.memory_space<vmem>>, vector<1x128xf32>,
    } else {
    }
    return
  }
  func.func @transform_0(%arg0: i32, %arg1: i32, %arg2: i32) -> (i32, i32) {
    %c0_i32 = arith.constant 0 : i32
    return %arg0, %arg2 : i32, i32
  }
  func.func @transform_1(%arg0: i32, %arg1: i32, %arg2: i32) -> (i32, i32) {
    %c0_i32 = arith.constant 0 : i32
    return %arg2, %arg1 : i32, i32
  }
  func.func @transform_2(%arg0: i32, %arg1: i32, %arg2: i32) -> (i32, i32) {
    %c0_i32 = arith.constant 0 : i32
    return %arg0, %arg1 : i32, i32
  }
  func.func @transform_3(%arg0: i32, %arg1: i32, %arg2: i32) -> (i32, i32) {
    %c0_i32 = arith.constant 0 : i32
    return %arg0, %arg1 : i32, i32
  }
}

module attributes {stable_mosaic.version = 11 : i64} {
  func.func @_affine_kernel(%arg0: i32, %arg1: memref<32x128xf32, #tpu.memory_space<vmem>>, %arg2: memref<1x128xf32, #tpu.memory_space<vmem>>, %arg3: memref<1x128xf32, #tpu.memory_space<vmem>>, %arg4: memref<32x128xf32, #tpu.memory_space<vmem>>) attributes {dimension_semantics = [#tpu.dimension_semantics<parallel>], iteration_bounds = array<i64: 1>, scalar_prefetch = 0 : i64, scratch_operands = 0 : i64, tpu.core_type = #tpu.core_type<tc>, window_params = [{transform_indices = @transform_0, window_bounds = array<i64: 32, 128>}, {pipeline_mode = #tpu.pipeline_mode<synchronous>, transform_indices = @transform_1, window_bounds = array<i64: 1, 128>}, {pipeline_mode = #tpu.pipeline_mode<synchronous>, transform_indices = @transform_2, window_bounds = array<i64: 1, 128>}, {transform_indices = @transform_3, window_bounds = array<i64: 32, 128>}]} {
    %c0 = arith.constant 0 : index
    %c0_0 = arith.constant 0 : index
    %0 = vector.load %arg1[%c0, %c0_0] : memref<32x128xf32, #tpu.memory_space<vmem>>, vector<32x128xf32>
    %c0_1 = arith.constant 0 : index
    %c0_2 = arith.constant 0 : index
    %1 = vector.load %arg2[%c0_1, %c0_2] : memref<1x128xf32, #tpu.memory_space<vmem>>, vector<1x128xf32>
    %2 = vector.broadcast %1 : vector<1x128xf32> to vector<32x128xf32>
    %3 = arith.mulf %0, %2 : vector<32x128xf32>
    %c0_3 = arith.constant 0 : index
    %c0_4 = arith.constant 0 : index
    %4 = vector.load %arg3[%c0_3, %c0_4] : memref<1x128xf32, #tpu.memory_space<vmem>>, vector<1x128xf32>
    %5 = vector.broadcast %4 : vector<1x128xf32> to vector<32x128xf32>
    %6 = arith.addf %3, %5 : vector<32x128xf32>
    %cst = arith.constant 0.000000e+00 : f32
    %7 = vector.broadcast %cst : f32 to vector<32x128xf32>
    %8 = arith.maximumf %6, %7 : vector<32x128xf32>
    %c0_5 = arith.constant 0 : index
    %c0_6 = arith.constant 0 : index
    %9 = vector.load %arg4[%c0_5, %c0_6] : memref<32x128xf32, #tpu.memory_space<vmem>>, vector<32x128xf32>
    tpu.vector_store %arg4[%c0_5, %c0_6], %8 {strides = array<i32>} : memref<32x128xf32, #tpu.memory_space<vmem>>, vector<32x128xf32>,
    return
  }
  func.func @transform_0(%arg0: i32) -> (i32, i32) {
    %c0_i32 = arith.constant 0 : i32
    %c0_i32_0 = arith.constant 0 : i32
    return %arg0, %c0_i32 : i32, i32
  }
  func.func @transform_1(%arg0: i32) -> (i32, i32) {
    %c0_i32 = arith.constant 0 : i32
    %c0_i32_0 = arith.constant 0 : i32
    %c0_i32_1 = arith.constant 0 : i32
    return %c0_i32, %c0_i32_0 : i32, i32
  }
  func.func @transform_2(%arg0: i32) -> (i32, i32) {
    %c0_i32 = arith.constant 0 : i32
    %c0_i32_0 = arith.constant 0 : i32
    %c0_i32_1 = arith.constant 0 : i32
    return %c0_i32, %c0_i32_0 : i32, i32
  }
  func.func @transform_3(%arg0: i32) -> (i32, i32) {
    %c0_i32 = arith.constant 0 : i32
    %c0_i32_0 = arith.constant 0 : i32
    return %arg0, %c0_i32 : i32, i32
  }
}

module attributes {stable_mosaic.version = 11 : i64} {
  func.func @_affine_add_relu_kernel(%arg0: i32, %arg1: memref<32x128xf32, #tpu.memory_space<vmem>>, %arg2: memref<1x128xf32, #tpu.memory_space<vmem>>, %arg3: memref<1x128xf32, #tpu.memory_space<vmem>>, %arg4: memref<32x128xf32, #tpu.memory_space<vmem>>, %arg5: memref<32x128xf32, #tpu.memory_space<vmem>>) attributes {dimension_semantics = [#tpu.dimension_semantics<parallel>], iteration_bounds = array<i64: 1>, scalar_prefetch = 0 : i64, scratch_operands = 0 : i64, tpu.core_type = #tpu.core_type<tc>, window_params = [{transform_indices = @transform_0, window_bounds = array<i64: 32, 128>}, {pipeline_mode = #tpu.pipeline_mode<synchronous>, transform_indices = @transform_1, window_bounds = array<i64: 1, 128>}, {pipeline_mode = #tpu.pipeline_mode<synchronous>, transform_indices = @transform_2, window_bounds = array<i64: 1, 128>}, {transform_indices = @transform_3, window_bounds = array<i64: 32, 128>}, {transform_indices = @transform_4, window_bounds = array<i64: 32, 128>}]} {
    %c0 = arith.constant 0 : index
    %c0_0 = arith.constant 0 : index
    %0 = vector.load %arg1[%c0, %c0_0] : memref<32x128xf32, #tpu.memory_space<vmem>>, vector<32x128xf32>
    %c0_1 = arith.constant 0 : index
    %c0_2 = arith.constant 0 : index
    %1 = vector.load %arg2[%c0_1, %c0_2] : memref<1x128xf32, #tpu.memory_space<vmem>>, vector<1x128xf32>
    %2 = vector.broadcast %1 : vector<1x128xf32> to vector<32x128xf32>
    %3 = arith.mulf %0, %2 : vector<32x128xf32>
    %c0_3 = arith.constant 0 : index
    %c0_4 = arith.constant 0 : index
    %4 = vector.load %arg3[%c0_3, %c0_4] : memref<1x128xf32, #tpu.memory_space<vmem>>, vector<1x128xf32>
    %5 = vector.broadcast %4 : vector<1x128xf32> to vector<32x128xf32>
    %6 = arith.addf %3, %5 : vector<32x128xf32>
    %c0_5 = arith.constant 0 : index
    %c0_6 = arith.constant 0 : index
    %7 = vector.load %arg4[%c0_5, %c0_6] : memref<32x128xf32, #tpu.memory_space<vmem>>, vector<32x128xf32>
    %8 = arith.addf %6, %7 : vector<32x128xf32>
    %cst = arith.constant 0.000000e+00 : f32
    %9 = vector.broadcast %cst : f32 to vector<32x128xf32>
    %10 = arith.maximumf %8, %9 : vector<32x128xf32>
    %c0_7 = arith.constant 0 : index
    %c0_8 = arith.constant 0 : index
    %11 = vector.load %arg5[%c0_7, %c0_8] : memref<32x128xf32, #tpu.memory_space<vmem>>, vector<32x128xf32>
    tpu.vector_store %arg5[%c0_7, %c0_8], %10 {strides = array<i32>} : memref<32x128xf32, #tpu.memory_space<vmem>>, vector<32x128xf32>,
    return
  }
  func.func @transform_0(%arg0: i32) -> (i32, i32) {
    %c0_i32 = arith.constant 0 : i32
    %c0_i32_0 = arith.constant 0 : i32
    return %arg0, %c0_i32 : i32, i32
  }
  func.func @transform_1(%arg0: i32) -> (i32, i32) {
    %c0_i32 = arith.constant 0 : i32
    %c0_i32_0 = arith.constant 0 : i32
    %c0_i32_1 = arith.constant 0 : i32
    return %c0_i32, %c0_i32_0 : i32, i32
  }
  func.func @transform_2(%arg0: i32) -> (i32, i32) {
    %c0_i32 = arith.constant 0 : i32
    %c0_i32_0 = arith.constant 0 : i32
    %c0_i32_1 = arith.constant 0 : i32
    return %c0_i32, %c0_i32_0 : i32, i32
  }
  func.func @transform_3(%arg0: i32) -> (i32, i32) {
    %c0_i32 = arith.constant 0 : i32
    %c0_i32_0 = arith.constant 0 : i32
    return %arg0, %c0_i32 : i32, i32
  }
  func.func @transform_4(%arg0: i32) -> (i32, i32) {
    %c0_i32 = arith.constant 0 : i32
    %c0_i32_0 = arith.constant 0 : i32
    return %arg0, %c0_i32 : i32, i32
  }
}

module attributes {stable_mosaic.version = 11 : i64} {
  func.func @_affine_kernel(%arg0: i32, %arg1: memref<8x128xf32, #tpu.memory_space<vmem>>, %arg2: memref<1x128xf32, #tpu.memory_space<vmem>>, %arg3: memref<1x128xf32, #tpu.memory_space<vmem>>, %arg4: memref<8x128xf32, #tpu.memory_space<vmem>>) attributes {dimension_semantics = [#tpu.dimension_semantics<parallel>], iteration_bounds = array<i64: 1>, scalar_prefetch = 0 : i64, scratch_operands = 0 : i64, tpu.core_type = #tpu.core_type<tc>, window_params = [{transform_indices = @transform_0, window_bounds = array<i64: 8, 128>}, {pipeline_mode = #tpu.pipeline_mode<synchronous>, transform_indices = @transform_1, window_bounds = array<i64: 1, 128>}, {pipeline_mode = #tpu.pipeline_mode<synchronous>, transform_indices = @transform_2, window_bounds = array<i64: 1, 128>}, {transform_indices = @transform_3, window_bounds = array<i64: 8, 128>}]} {
    %c0 = arith.constant 0 : index
    %c0_0 = arith.constant 0 : index
    %0 = vector.load %arg1[%c0, %c0_0] : memref<8x128xf32, #tpu.memory_space<vmem>>, vector<8x128xf32>
    %c0_1 = arith.constant 0 : index
    %c0_2 = arith.constant 0 : index
    %1 = vector.load %arg2[%c0_1, %c0_2] : memref<1x128xf32, #tpu.memory_space<vmem>>, vector<1x128xf32>
    %2 = vector.broadcast %1 : vector<1x128xf32> to vector<8x128xf32>
    %3 = arith.mulf %0, %2 : vector<8x128xf32>
    %c0_3 = arith.constant 0 : index
    %c0_4 = arith.constant 0 : index
    %4 = vector.load %arg3[%c0_3, %c0_4] : memref<1x128xf32, #tpu.memory_space<vmem>>, vector<1x128xf32>
    %5 = vector.broadcast %4 : vector<1x128xf32> to vector<8x128xf32>
    %6 = arith.addf %3, %5 : vector<8x128xf32>
    %cst = arith.constant 0.000000e+00 : f32
    %7 = vector.broadcast %cst : f32 to vector<8x128xf32>
    %8 = arith.maximumf %6, %7 : vector<8x128xf32>
    %c0_5 = arith.constant 0 : index
    %c0_6 = arith.constant 0 : index
    %9 = vector.load %arg4[%c0_5, %c0_6] : memref<8x128xf32, #tpu.memory_space<vmem>>, vector<8x128xf32>
    tpu.vector_store %arg4[%c0_5, %c0_6], %8 {strides = array<i32>} : memref<8x128xf32, #tpu.memory_space<vmem>>, vector<8x128xf32>,
    return
  }
  func.func @transform_0(%arg0: i32) -> (i32, i32) {
    %c0_i32 = arith.constant 0 : i32
    %c0_i32_0 = arith.constant 0 : i32
    return %arg0, %c0_i32 : i32, i32
  }
  func.func @transform_1(%arg0: i32) -> (i32, i32) {
    %c0_i32 = arith.constant 0 : i32
    %c0_i32_0 = arith.constant 0 : i32
    %c0_i32_1 = arith.constant 0 : i32
    return %c0_i32, %c0_i32_0 : i32, i32
  }
  func.func @transform_2(%arg0: i32) -> (i32, i32) {
    %c0_i32 = arith.constant 0 : i32
    %c0_i32_0 = arith.constant 0 : i32
    %c0_i32_1 = arith.constant 0 : i32
    return %c0_i32, %c0_i32_0 : i32, i32
  }
  func.func @transform_3(%arg0: i32) -> (i32, i32) {
    %c0_i32 = arith.constant 0 : i32
    %c0_i32_0 = arith.constant 0 : i32
    return %arg0, %c0_i32 : i32, i32
  }
}

module attributes {stable_mosaic.version = 11 : i64} {
  func.func @_mm_stats_kernel(%arg0: i32, %arg1: i32, %arg2: i32, %arg3: memref<8x384xbf16, #tpu.memory_space<vmem>>, %arg4: memref<384x128xbf16, #tpu.memory_space<vmem>>, %arg5: memref<8x128xf32, #tpu.memory_space<vmem>>, %arg6: memref<8x128xf32, #tpu.memory_space<vmem>>, %arg7: memref<8x128xf32, #tpu.memory_space<vmem>>) attributes {dimension_semantics = [#tpu.dimension_semantics<parallel>, #tpu.dimension_semantics<parallel>, #tpu.dimension_semantics<arbitrary>], iteration_bounds = array<i64: 1, 1, 3>, scalar_prefetch = 0 : i64, scratch_operands = 1 : i64, tpu.core_type = #tpu.core_type<tc>, window_params = [{transform_indices = @transform_0, window_bounds = array<i64: 8, 384>}, {transform_indices = @transform_1, window_bounds = array<i64: 384, 128>}, {transform_indices = @transform_2, window_bounds = array<i64: 8, 128>}, {transform_indices = @transform_3, window_bounds = array<i64: 8, 128>}]} {
    %c0_i32 = arith.constant 0 : i32
    %0 = arith.cmpi eq, %arg2, %c0_i32 : i32
    %1 = arith.extui %0 : i1 to i32
    %c0_i32_0 = arith.constant 0 : i32
    %2 = arith.cmpi ne, %1, %c0_i32_0 : i32
    scf.if %2 {
      %cst_9 = arith.constant 0.000000e+00 : f32
      %12 = vector.broadcast %cst_9 : f32 to vector<8x128xf32>
      %c0_10 = arith.constant 0 : index
      %c0_11 = arith.constant 0 : index
      %13 = vector.load %arg7[%c0_10, %c0_11] : memref<8x128xf32, #tpu.memory_space<vmem>>, vector<8x128xf32>
      tpu.vector_store %arg7[%c0_10, %c0_11], %12 {strides = array<i32>} : memref<8x128xf32, #tpu.memory_space<vmem>>, vector<8x128xf32>,
    } else {
    }
    %c0 = arith.constant 0 : index
    %c0_1 = arith.constant 0 : index
    %3 = vector.load %arg7[%c0, %c0_1] : memref<8x128xf32, #tpu.memory_space<vmem>>, vector<8x128xf32>
    %c0_2 = arith.constant 0 : index
    %c0_3 = arith.constant 0 : index
    %4 = vector.load %arg3[%c0_2, %c0_3] : memref<8x384xbf16, #tpu.memory_space<vmem>>, vector<8x384xbf16>
    %c0_4 = arith.constant 0 : index
    %c0_5 = arith.constant 0 : index
    %5 = vector.load %arg4[%c0_4, %c0_5] : memref<384x128xbf16, #tpu.memory_space<vmem>>, vector<384x128xbf16>
    %cst = arith.constant dense<0.000000e+00> : vector<8x128xf32>
    %6 = tpu.matmul %4, %5, %cst {dimension_numbers = #tpu.dot_dimension_numbers<[1], [0], [0], [1], [0, 0, 1, 1], [], []>} : vector<8x384xbf16>, vector<384x128xbf16>, vector<8x128xf32> -> vector<8x128xf32>
    %7 = arith.addf %3, %6 : vector<8x128xf32>
    %c0_6 = arith.constant 0 : index
    %c0_7 = arith.constant 0 : index
    %8 = vector.load %arg7[%c0_6, %c0_7] : memref<8x128xf32, #tpu.memory_space<vmem>>, vector<8x128xf32>
    tpu.vector_store %arg7[%c0_6, %c0_7], %7 {strides = array<i32>} : memref<8x128xf32, #tpu.memory_space<vmem>>, vector<8x128xf32>,
    %c2_i32 = arith.constant 2 : i32
    %9 = arith.cmpi eq, %arg2, %c2_i32 : i32
    %10 = arith.extui %9 : i1 to i32
    %c0_i32_8 = arith.constant 0 : i32
    %11 = arith.cmpi ne, %10, %c0_i32_8 : i32
    scf.if %11 {
      %c0_9 = arith.constant 0 : index
      %c0_10 = arith.constant 0 : index
      %12 = vector.load %arg7[%c0_9, %c0_10] : memref<8x128xf32, #tpu.memory_space<vmem>>, vector<8x128xf32>
      %c0_11 = arith.constant 0 : index
      %c0_12 = arith.constant 0 : index
      %13 = vector.load %arg5[%c0_11, %c0_12] : memref<8x128xf32, #tpu.memory_space<vmem>>, vector<8x128xf32>
      tpu.vector_store %arg5[%c0_11, %c0_12], %12 {strides = array<i32>} : memref<8x128xf32, #tpu.memory_space<vmem>>, vector<8x128xf32>,
      %cst_13 = arith.constant 0.000000e+00 : f32
      %14 = vector.broadcast %cst_13 : f32 to vector<8x128xf32>
      %c0_14 = arith.constant 0 : index
      %c0_15 = arith.constant 0 : index
      %15 = vector.load %arg6[%c0_14, %c0_15] : memref<8x128xf32, #tpu.memory_space<vmem>>, vector<8x128xf32>
      tpu.vector_store %arg6[%c0_14, %c0_15], %14 {strides = array<i32>} : memref<8x128xf32, #tpu.memory_space<vmem>>, vector<8x128xf32>,
      %cst_16 = arith.constant dense<0.000000e+00> : vector<128xf32>
      %16 = vector.multi_reduction <add>, %12, %cst_16 [0] : vector<8x128xf32> to vector<128xf32>
      %17 = vector.shape_cast %16 : vector<128xf32> to vector<1x128xf32>
      %c0_17 = arith.constant 0 : index
      %c0_18 = arith.constant 0 : index
      %18 = vector.load %arg6[%c0_17, %c0_18] : memref<8x128xf32, #tpu.memory_space<vmem>>, vector<1x128xf32>
      tpu.vector_store %arg6[%c0_17, %c0_18], %17 {strides = array<i32>} : memref<8x128xf32, #tpu.memory_space<vmem>>, vector<1x128xf32>,
      %19 = arith.mulf %12, %12 : vector<8x128xf32>
      %cst_19 = arith.constant dense<0.000000e+00> : vector<128xf32>
      %20 = vector.multi_reduction <add>, %19, %cst_19 [0] : vector<8x128xf32> to vector<128xf32>
      %21 = vector.shape_cast %20 : vector<128xf32> to vector<1x128xf32>
      %c1 = arith.constant 1 : index
      %c0_20 = arith.constant 0 : index
      %22 = vector.load %arg6[%c1, %c0_20] : memref<8x128xf32, #tpu.memory_space<vmem>>, vector<1x128xf32>
      tpu.vector_store %arg6[%c1, %c0_20], %21 {strides = array<i32>} : memref<8x128xf32, #tpu.memory_space<vmem>>, vector<1x128xf32>,
    } else {
    }
    return
  }
  func.func @transform_0(%arg0: i32, %arg1: i32, %arg2: i32) -> (i32, i32) {
    %c0_i32 = arith.constant 0 : i32
    return %arg0, %arg2 : i32, i32
  }
  func.func @transform_1(%arg0: i32, %arg1: i32, %arg2: i32) -> (i32, i32) {
    %c0_i32 = arith.constant 0 : i32
    return %arg2, %arg1 : i32, i32
  }
  func.func @transform_2(%arg0: i32, %arg1: i32, %arg2: i32) -> (i32, i32) {
    %c0_i32 = arith.constant 0 : i32
    return %arg0, %arg1 : i32, i32
  }
  func.func @transform_3(%arg0: i32, %arg1: i32, %arg2: i32) -> (i32, i32) {
    %c0_i32 = arith.constant 0 : i32
    return %arg0, %arg1 : i32, i32
  }
}

module attributes {stable_mosaic.version = 11 : i64} {
  func.func @_mm_stats_kernel(%arg0: i32, %arg1: i32, %arg2: i32, %arg3: memref<8x128xbf16, #tpu.memory_space<vmem>>, %arg4: memref<128x128xbf16, #tpu.memory_space<vmem>>, %arg5: memref<8x128xf32, #tpu.memory_space<vmem>>, %arg6: memref<8x128xf32, #tpu.memory_space<vmem>>, %arg7: memref<8x128xf32, #tpu.memory_space<vmem>>) attributes {dimension_semantics = [#tpu.dimension_semantics<parallel>, #tpu.dimension_semantics<parallel>, #tpu.dimension_semantics<arbitrary>], iteration_bounds = array<i64: 1, 1, 1>, scalar_prefetch = 0 : i64, scratch_operands = 1 : i64, tpu.core_type = #tpu.core_type<tc>, window_params = [{transform_indices = @transform_0, window_bounds = array<i64: 8, 128>}, {transform_indices = @transform_1, window_bounds = array<i64: 128, 128>}, {transform_indices = @transform_2, window_bounds = array<i64: 8, 128>}, {transform_indices = @transform_3, window_bounds = array<i64: 8, 128>}]} {
    %c0_i32 = arith.constant 0 : i32
    %0 = arith.cmpi eq, %arg2, %c0_i32 : i32
    %1 = arith.extui %0 : i1 to i32
    %c0_i32_0 = arith.constant 0 : i32
    %2 = arith.cmpi ne, %1, %c0_i32_0 : i32
    scf.if %2 {
      %cst_10 = arith.constant 0.000000e+00 : f32
      %12 = vector.broadcast %cst_10 : f32 to vector<8x128xf32>
      %c0_11 = arith.constant 0 : index
      %c0_12 = arith.constant 0 : index
      %13 = vector.load %arg7[%c0_11, %c0_12] : memref<8x128xf32, #tpu.memory_space<vmem>>, vector<8x128xf32>
      tpu.vector_store %arg7[%c0_11, %c0_12], %12 {strides = array<i32>} : memref<8x128xf32, #tpu.memory_space<vmem>>, vector<8x128xf32>,
    } else {
    }
    %c0 = arith.constant 0 : index
    %c0_1 = arith.constant 0 : index
    %3 = vector.load %arg7[%c0, %c0_1] : memref<8x128xf32, #tpu.memory_space<vmem>>, vector<8x128xf32>
    %c0_2 = arith.constant 0 : index
    %c0_3 = arith.constant 0 : index
    %4 = vector.load %arg3[%c0_2, %c0_3] : memref<8x128xbf16, #tpu.memory_space<vmem>>, vector<8x128xbf16>
    %c0_4 = arith.constant 0 : index
    %c0_5 = arith.constant 0 : index
    %5 = vector.load %arg4[%c0_4, %c0_5] : memref<128x128xbf16, #tpu.memory_space<vmem>>, vector<128x128xbf16>
    %cst = arith.constant dense<0.000000e+00> : vector<8x128xf32>
    %6 = tpu.matmul %4, %5, %cst {dimension_numbers = #tpu.dot_dimension_numbers<[1], [0], [0], [1], [0, 0, 1, 1], [], []>} : vector<8x128xbf16>, vector<128x128xbf16>, vector<8x128xf32> -> vector<8x128xf32>
    %7 = arith.addf %3, %6 : vector<8x128xf32>
    %c0_6 = arith.constant 0 : index
    %c0_7 = arith.constant 0 : index
    %8 = vector.load %arg7[%c0_6, %c0_7] : memref<8x128xf32, #tpu.memory_space<vmem>>, vector<8x128xf32>
    tpu.vector_store %arg7[%c0_6, %c0_7], %7 {strides = array<i32>} : memref<8x128xf32, #tpu.memory_space<vmem>>, vector<8x128xf32>,
    %c0_i32_8 = arith.constant 0 : i32
    %9 = arith.cmpi eq, %arg2, %c0_i32_8 : i32
    %10 = arith.extui %9 : i1 to i32
    %c0_i32_9 = arith.constant 0 : i32
    %11 = arith.cmpi ne, %10, %c0_i32_9 : i32
    scf.if %11 {
      %c0_10 = arith.constant 0 : index
      %c0_11 = arith.constant 0 : index
      %12 = vector.load %arg7[%c0_10, %c0_11] : memref<8x128xf32, #tpu.memory_space<vmem>>, vector<8x128xf32>
      %c0_12 = arith.constant 0 : index
      %c0_13 = arith.constant 0 : index
      %13 = vector.load %arg5[%c0_12, %c0_13] : memref<8x128xf32, #tpu.memory_space<vmem>>, vector<8x128xf32>
      tpu.vector_store %arg5[%c0_12, %c0_13], %12 {strides = array<i32>} : memref<8x128xf32, #tpu.memory_space<vmem>>, vector<8x128xf32>,
      %cst_14 = arith.constant 0.000000e+00 : f32
      %14 = vector.broadcast %cst_14 : f32 to vector<8x128xf32>
      %c0_15 = arith.constant 0 : index
      %c0_16 = arith.constant 0 : index
      %15 = vector.load %arg6[%c0_15, %c0_16] : memref<8x128xf32, #tpu.memory_space<vmem>>, vector<8x128xf32>
      tpu.vector_store %arg6[%c0_15, %c0_16], %14 {strides = array<i32>} : memref<8x128xf32, #tpu.memory_space<vmem>>, vector<8x128xf32>,
      %cst_17 = arith.constant dense<0.000000e+00> : vector<128xf32>
      %16 = vector.multi_reduction <add>, %12, %cst_17 [0] : vector<8x128xf32> to vector<128xf32>
      %17 = vector.shape_cast %16 : vector<128xf32> to vector<1x128xf32>
      %c0_18 = arith.constant 0 : index
      %c0_19 = arith.constant 0 : index
      %18 = vector.load %arg6[%c0_18, %c0_19] : memref<8x128xf32, #tpu.memory_space<vmem>>, vector<1x128xf32>
      tpu.vector_store %arg6[%c0_18, %c0_19], %17 {strides = array<i32>} : memref<8x128xf32, #tpu.memory_space<vmem>>, vector<1x128xf32>,
      %19 = arith.mulf %12, %12 : vector<8x128xf32>
      %cst_20 = arith.constant dense<0.000000e+00> : vector<128xf32>
      %20 = vector.multi_reduction <add>, %19, %cst_20 [0] : vector<8x128xf32> to vector<128xf32>
      %21 = vector.shape_cast %20 : vector<128xf32> to vector<1x128xf32>
      %c1 = arith.constant 1 : index
      %c0_21 = arith.constant 0 : index
      %22 = vector.load %arg6[%c1, %c0_21] : memref<8x128xf32, #tpu.memory_space<vmem>>, vector<1x128xf32>
      tpu.vector_store %arg6[%c1, %c0_21], %21 {strides = array<i32>} : memref<8x128xf32, #tpu.memory_space<vmem>>, vector<1x128xf32>,
    } else {
    }
    return
  }
  func.func @transform_0(%arg0: i32, %arg1: i32, %arg2: i32) -> (i32, i32) {
    %c0_i32 = arith.constant 0 : i32
    return %arg0, %arg2 : i32, i32
  }
  func.func @transform_1(%arg0: i32, %arg1: i32, %arg2: i32) -> (i32, i32) {
    %c0_i32 = arith.constant 0 : i32
    return %arg2, %arg1 : i32, i32
  }
  func.func @transform_2(%arg0: i32, %arg1: i32, %arg2: i32) -> (i32, i32) {
    %c0_i32 = arith.constant 0 : i32
    return %arg0, %arg1 : i32, i32
  }
  func.func @transform_3(%arg0: i32, %arg1: i32, %arg2: i32) -> (i32, i32) {
    %c0_i32 = arith.constant 0 : i32
    return %arg0, %arg1 : i32, i32
  }
}

module attributes {stable_mosaic.version = 11 : i64} {
  func.func @_affine2_add_relu_kernel(%arg0: i32, %arg1: memref<8x128xf32, #tpu.memory_space<vmem>>, %arg2: memref<1x128xf32, #tpu.memory_space<vmem>>, %arg3: memref<1x128xf32, #tpu.memory_space<vmem>>, %arg4: memref<8x128xf32, #tpu.memory_space<vmem>>, %arg5: memref<1x128xf32, #tpu.memory_space<vmem>>, %arg6: memref<1x128xf32, #tpu.memory_space<vmem>>, %arg7: memref<8x128xf32, #tpu.memory_space<vmem>>) attributes {dimension_semantics = [#tpu.dimension_semantics<parallel>], iteration_bounds = array<i64: 1>, scalar_prefetch = 0 : i64, scratch_operands = 0 : i64, tpu.core_type = #tpu.core_type<tc>, window_params = [{transform_indices = @transform_0, window_bounds = array<i64: 8, 128>}, {pipeline_mode = #tpu.pipeline_mode<synchronous>, transform_indices = @transform_1, window_bounds = array<i64: 1, 128>}, {pipeline_mode = #tpu.pipeline_mode<synchronous>, transform_indices = @transform_2, window_bounds = array<i64: 1, 128>}, {transform_indices = @transform_3, window_bounds = array<i64: 8, 128>}, {pipeline_mode = #tpu.pipeline_mode<synchronous>, transform_indices = @transform_4, window_bounds = array<i64: 1, 128>}, {pipeline_mode = #tpu.pipeline_mode<synchronous>, transform_indices = @transform_5, window_bounds = array<i64: 1, 128>}, {transform_indices = @transform_6, window_bounds = array<i64: 8, 128>}]} {
    %c0 = arith.constant 0 : index
    %c0_0 = arith.constant 0 : index
    %0 = vector.load %arg1[%c0, %c0_0] : memref<8x128xf32, #tpu.memory_space<vmem>>, vector<8x128xf32>
    %c0_1 = arith.constant 0 : index
    %c0_2 = arith.constant 0 : index
    %1 = vector.load %arg2[%c0_1, %c0_2] : memref<1x128xf32, #tpu.memory_space<vmem>>, vector<1x128xf32>
    %2 = vector.broadcast %1 : vector<1x128xf32> to vector<8x128xf32>
    %3 = arith.mulf %0, %2 : vector<8x128xf32>
    %c0_3 = arith.constant 0 : index
    %c0_4 = arith.constant 0 : index
    %4 = vector.load %arg3[%c0_3, %c0_4] : memref<1x128xf32, #tpu.memory_space<vmem>>, vector<1x128xf32>
    %5 = vector.broadcast %4 : vector<1x128xf32> to vector<8x128xf32>
    %6 = arith.addf %3, %5 : vector<8x128xf32>
    %c0_5 = arith.constant 0 : index
    %c0_6 = arith.constant 0 : index
    %7 = vector.load %arg4[%c0_5, %c0_6] : memref<8x128xf32, #tpu.memory_space<vmem>>, vector<8x128xf32>
    %c0_7 = arith.constant 0 : index
    %c0_8 = arith.constant 0 : index
    %8 = vector.load %arg5[%c0_7, %c0_8] : memref<1x128xf32, #tpu.memory_space<vmem>>, vector<1x128xf32>
    %9 = vector.broadcast %8 : vector<1x128xf32> to vector<8x128xf32>
    %10 = arith.mulf %7, %9 : vector<8x128xf32>
    %11 = arith.addf %6, %10 : vector<8x128xf32>
    %c0_9 = arith.constant 0 : index
    %c0_10 = arith.constant 0 : index
    %12 = vector.load %arg6[%c0_9, %c0_10] : memref<1x128xf32, #tpu.memory_space<vmem>>, vector<1x128xf32>
    %13 = vector.broadcast %12 : vector<1x128xf32> to vector<8x128xf32>
    %14 = arith.addf %11, %13 : vector<8x128xf32>
    %cst = arith.constant 0.000000e+00 : f32
    %15 = vector.broadcast %cst : f32 to vector<8x128xf32>
    %16 = arith.maximumf %14, %15 : vector<8x128xf32>
    %c0_11 = arith.constant 0 : index
    %c0_12 = arith.constant 0 : index
    %17 = vector.load %arg7[%c0_11, %c0_12] : memref<8x128xf32, #tpu.memory_space<vmem>>, vector<8x128xf32>
    tpu.vector_store %arg7[%c0_11, %c0_12], %16 {strides = array<i32>} : memref<8x128xf32, #tpu.memory_space<vmem>>, vector<8x128xf32>,
    return
  }
  func.func @transform_0(%arg0: i32) -> (i32, i32) {
    %c0_i32 = arith.constant 0 : i32
    %c0_i32_0 = arith.constant 0 : i32
    return %arg0, %c0_i32 : i32, i32
  }
  func.func @transform_1(%arg0: i32) -> (i32, i32) {
    %c0_i32 = arith.constant 0 : i32
    %c0_i32_0 = arith.constant 0 : i32
    %c0_i32_1 = arith.constant 0 : i32
    return %c0_i32, %c0_i32_0 : i32, i32
  }
  func.func @transform_2(%arg0: i32) -> (i32, i32) {
    %c0_i32 = arith.constant 0 : i32
    %c0_i32_0 = arith.constant 0 : i32
    %c0_i32_1 = arith.constant 0 : i32
    return %c0_i32, %c0_i32_0 : i32, i32
  }
  func.func @transform_3(%arg0: i32) -> (i32, i32) {
    %c0_i32 = arith.constant 0 : i32
    %c0_i32_0 = arith.constant 0 : i32
    return %arg0, %c0_i32 : i32, i32
  }
  func.func @transform_4(%arg0: i32) -> (i32, i32) {
    %c0_i32 = arith.constant 0 : i32
    %c0_i32_0 = arith.constant 0 : i32
    %c0_i32_1 = arith.constant 0 : i32
    return %c0_i32, %c0_i32_0 : i32, i32
  }
  func.func @transform_5(%arg0: i32) -> (i32, i32) {
    %c0_i32 = arith.constant 0 : i32
    %c0_i32_0 = arith.constant 0 : i32
    %c0_i32_1 = arith.constant 0 : i32
    return %c0_i32, %c0_i32_0 : i32, i32
  }
  func.func @transform_6(%arg0: i32) -> (i32, i32) {
    %c0_i32 = arith.constant 0 : i32
    %c0_i32_0 = arith.constant 0 : i32
    return %arg0, %c0_i32 : i32, i32
  }
}

module attributes {stable_mosaic.version = 11 : i64} {
  func.func @_affine_add_relu_kernel(%arg0: i32, %arg1: memref<8x128xf32, #tpu.memory_space<vmem>>, %arg2: memref<1x128xf32, #tpu.memory_space<vmem>>, %arg3: memref<1x128xf32, #tpu.memory_space<vmem>>, %arg4: memref<8x128xf32, #tpu.memory_space<vmem>>, %arg5: memref<8x128xf32, #tpu.memory_space<vmem>>) attributes {dimension_semantics = [#tpu.dimension_semantics<parallel>], iteration_bounds = array<i64: 1>, scalar_prefetch = 0 : i64, scratch_operands = 0 : i64, tpu.core_type = #tpu.core_type<tc>, window_params = [{transform_indices = @transform_0, window_bounds = array<i64: 8, 128>}, {pipeline_mode = #tpu.pipeline_mode<synchronous>, transform_indices = @transform_1, window_bounds = array<i64: 1, 128>}, {pipeline_mode = #tpu.pipeline_mode<synchronous>, transform_indices = @transform_2, window_bounds = array<i64: 1, 128>}, {transform_indices = @transform_3, window_bounds = array<i64: 8, 128>}, {transform_indices = @transform_4, window_bounds = array<i64: 8, 128>}]} {
    %c0 = arith.constant 0 : index
    %c0_0 = arith.constant 0 : index
    %0 = vector.load %arg1[%c0, %c0_0] : memref<8x128xf32, #tpu.memory_space<vmem>>, vector<8x128xf32>
    %c0_1 = arith.constant 0 : index
    %c0_2 = arith.constant 0 : index
    %1 = vector.load %arg2[%c0_1, %c0_2] : memref<1x128xf32, #tpu.memory_space<vmem>>, vector<1x128xf32>
    %2 = vector.broadcast %1 : vector<1x128xf32> to vector<8x128xf32>
    %3 = arith.mulf %0, %2 : vector<8x128xf32>
    %c0_3 = arith.constant 0 : index
    %c0_4 = arith.constant 0 : index
    %4 = vector.load %arg3[%c0_3, %c0_4] : memref<1x128xf32, #tpu.memory_space<vmem>>, vector<1x128xf32>
    %5 = vector.broadcast %4 : vector<1x128xf32> to vector<8x128xf32>
    %6 = arith.addf %3, %5 : vector<8x128xf32>
    %c0_5 = arith.constant 0 : index
    %c0_6 = arith.constant 0 : index
    %7 = vector.load %arg4[%c0_5, %c0_6] : memref<8x128xf32, #tpu.memory_space<vmem>>, vector<8x128xf32>
    %8 = arith.addf %6, %7 : vector<8x128xf32>
    %cst = arith.constant 0.000000e+00 : f32
    %9 = vector.broadcast %cst : f32 to vector<8x128xf32>
    %10 = arith.maximumf %8, %9 : vector<8x128xf32>
    %c0_7 = arith.constant 0 : index
    %c0_8 = arith.constant 0 : index
    %11 = vector.load %arg5[%c0_7, %c0_8] : memref<8x128xf32, #tpu.memory_space<vmem>>, vector<8x128xf32>
    tpu.vector_store %arg5[%c0_7, %c0_8], %10 {strides = array<i32>} : memref<8x128xf32, #tpu.memory_space<vmem>>, vector<8x128xf32>,
    return
  }
  func.func @transform_0(%arg0: i32) -> (i32, i32) {
    %c0_i32 = arith.constant 0 : i32
    %c0_i32_0 = arith.constant 0 : i32
    return %arg0, %c0_i32 : i32, i32
  }
  func.func @transform_1(%arg0: i32) -> (i32, i32) {
    %c0_i32 = arith.constant 0 : i32
    %c0_i32_0 = arith.constant 0 : i32
    %c0_i32_1 = arith.constant 0 : i32
    return %c0_i32, %c0_i32_0 : i32, i32
  }
  func.func @transform_2(%arg0: i32) -> (i32, i32) {
    %c0_i32 = arith.constant 0 : i32
    %c0_i32_0 = arith.constant 0 : i32
    %c0_i32_1 = arith.constant 0 : i32
    return %c0_i32, %c0_i32_0 : i32, i32
  }
  func.func @transform_3(%arg0: i32) -> (i32, i32) {
    %c0_i32 = arith.constant 0 : i32
    %c0_i32_0 = arith.constant 0 : i32
    return %arg0, %c0_i32 : i32, i32
  }
  func.func @transform_4(%arg0: i32) -> (i32, i32) {
    %c0_i32 = arith.constant 0 : i32
    %c0_i32_0 = arith.constant 0 : i32
    return %arg0, %c0_i32 : i32, i32
  }
}

module attributes {stable_mosaic.version = 11 : i64} {
  func.func @_mm_stats_kernel(%arg0: i32, %arg1: i32, %arg2: i32, %arg3: memref<8x384xbf16, #tpu.memory_space<vmem>>, %arg4: memref<384x128xbf16, #tpu.memory_space<vmem>>, %arg5: memref<8x128xf32, #tpu.memory_space<vmem>>, %arg6: memref<8x128xf32, #tpu.memory_space<vmem>>, %arg7: memref<8x128xf32, #tpu.memory_space<vmem>>) attributes {dimension_semantics = [#tpu.dimension_semantics<parallel>, #tpu.dimension_semantics<parallel>, #tpu.dimension_semantics<arbitrary>], iteration_bounds = array<i64: 1, 2, 3>, scalar_prefetch = 0 : i64, scratch_operands = 1 : i64, tpu.core_type = #tpu.core_type<tc>, window_params = [{transform_indices = @transform_0, window_bounds = array<i64: 8, 384>}, {transform_indices = @transform_1, window_bounds = array<i64: 384, 128>}, {transform_indices = @transform_2, window_bounds = array<i64: 8, 128>}, {transform_indices = @transform_3, window_bounds = array<i64: 8, 128>}]} {
    %c0_i32 = arith.constant 0 : i32
    %0 = arith.cmpi eq, %arg2, %c0_i32 : i32
    %1 = arith.extui %0 : i1 to i32
    %c0_i32_0 = arith.constant 0 : i32
    %2 = arith.cmpi ne, %1, %c0_i32_0 : i32
    scf.if %2 {
      %cst_9 = arith.constant 0.000000e+00 : f32
      %12 = vector.broadcast %cst_9 : f32 to vector<8x128xf32>
      %c0_10 = arith.constant 0 : index
      %c0_11 = arith.constant 0 : index
      %13 = vector.load %arg7[%c0_10, %c0_11] : memref<8x128xf32, #tpu.memory_space<vmem>>, vector<8x128xf32>
      tpu.vector_store %arg7[%c0_10, %c0_11], %12 {strides = array<i32>} : memref<8x128xf32, #tpu.memory_space<vmem>>, vector<8x128xf32>,
    } else {
    }
    %c0 = arith.constant 0 : index
    %c0_1 = arith.constant 0 : index
    %3 = vector.load %arg7[%c0, %c0_1] : memref<8x128xf32, #tpu.memory_space<vmem>>, vector<8x128xf32>
    %c0_2 = arith.constant 0 : index
    %c0_3 = arith.constant 0 : index
    %4 = vector.load %arg3[%c0_2, %c0_3] : memref<8x384xbf16, #tpu.memory_space<vmem>>, vector<8x384xbf16>
    %c0_4 = arith.constant 0 : index
    %c0_5 = arith.constant 0 : index
    %5 = vector.load %arg4[%c0_4, %c0_5] : memref<384x128xbf16, #tpu.memory_space<vmem>>, vector<384x128xbf16>
    %cst = arith.constant dense<0.000000e+00> : vector<8x128xf32>
    %6 = tpu.matmul %4, %5, %cst {dimension_numbers = #tpu.dot_dimension_numbers<[1], [0], [0], [1], [0, 0, 1, 1], [], []>} : vector<8x384xbf16>, vector<384x128xbf16>, vector<8x128xf32> -> vector<8x128xf32>
    %7 = arith.addf %3, %6 : vector<8x128xf32>
    %c0_6 = arith.constant 0 : index
    %c0_7 = arith.constant 0 : index
    %8 = vector.load %arg7[%c0_6, %c0_7] : memref<8x128xf32, #tpu.memory_space<vmem>>, vector<8x128xf32>
    tpu.vector_store %arg7[%c0_6, %c0_7], %7 {strides = array<i32>} : memref<8x128xf32, #tpu.memory_space<vmem>>, vector<8x128xf32>,
    %c2_i32 = arith.constant 2 : i32
    %9 = arith.cmpi eq, %arg2, %c2_i32 : i32
    %10 = arith.extui %9 : i1 to i32
    %c0_i32_8 = arith.constant 0 : i32
    %11 = arith.cmpi ne, %10, %c0_i32_8 : i32
    scf.if %11 {
      %c0_9 = arith.constant 0 : index
      %c0_10 = arith.constant 0 : index
      %12 = vector.load %arg7[%c0_9, %c0_10] : memref<8x128xf32, #tpu.memory_space<vmem>>, vector<8x128xf32>
      %c0_11 = arith.constant 0 : index
      %c0_12 = arith.constant 0 : index
      %13 = vector.load %arg5[%c0_11, %c0_12] : memref<8x128xf32, #tpu.memory_space<vmem>>, vector<8x128xf32>
      tpu.vector_store %arg5[%c0_11, %c0_12], %12 {strides = array<i32>} : memref<8x128xf32, #tpu.memory_space<vmem>>, vector<8x128xf32>,
      %cst_13 = arith.constant 0.000000e+00 : f32
      %14 = vector.broadcast %cst_13 : f32 to vector<8x128xf32>
      %c0_14 = arith.constant 0 : index
      %c0_15 = arith.constant 0 : index
      %15 = vector.load %arg6[%c0_14, %c0_15] : memref<8x128xf32, #tpu.memory_space<vmem>>, vector<8x128xf32>
      tpu.vector_store %arg6[%c0_14, %c0_15], %14 {strides = array<i32>} : memref<8x128xf32, #tpu.memory_space<vmem>>, vector<8x128xf32>,
      %cst_16 = arith.constant dense<0.000000e+00> : vector<128xf32>
      %16 = vector.multi_reduction <add>, %12, %cst_16 [0] : vector<8x128xf32> to vector<128xf32>
      %17 = vector.shape_cast %16 : vector<128xf32> to vector<1x128xf32>
      %c0_17 = arith.constant 0 : index
      %c0_18 = arith.constant 0 : index
      %18 = vector.load %arg6[%c0_17, %c0_18] : memref<8x128xf32, #tpu.memory_space<vmem>>, vector<1x128xf32>
      tpu.vector_store %arg6[%c0_17, %c0_18], %17 {strides = array<i32>} : memref<8x128xf32, #tpu.memory_space<vmem>>, vector<1x128xf32>,
      %19 = arith.mulf %12, %12 : vector<8x128xf32>
      %cst_19 = arith.constant dense<0.000000e+00> : vector<128xf32>
      %20 = vector.multi_reduction <add>, %19, %cst_19 [0] : vector<8x128xf32> to vector<128xf32>
      %21 = vector.shape_cast %20 : vector<128xf32> to vector<1x128xf32>
      %c1 = arith.constant 1 : index
      %c0_20 = arith.constant 0 : index
      %22 = vector.load %arg6[%c1, %c0_20] : memref<8x128xf32, #tpu.memory_space<vmem>>, vector<1x128xf32>
      tpu.vector_store %arg6[%c1, %c0_20], %21 {strides = array<i32>} : memref<8x128xf32, #tpu.memory_space<vmem>>, vector<1x128xf32>,
    } else {
    }
    return
  }
  func.func @transform_0(%arg0: i32, %arg1: i32, %arg2: i32) -> (i32, i32) {
    %c0_i32 = arith.constant 0 : i32
    return %arg0, %arg2 : i32, i32
  }
  func.func @transform_1(%arg0: i32, %arg1: i32, %arg2: i32) -> (i32, i32) {
    %c0_i32 = arith.constant 0 : i32
    return %arg2, %arg1 : i32, i32
  }
  func.func @transform_2(%arg0: i32, %arg1: i32, %arg2: i32) -> (i32, i32) {
    %c0_i32 = arith.constant 0 : i32
    return %arg0, %arg1 : i32, i32
  }
  func.func @transform_3(%arg0: i32, %arg1: i32, %arg2: i32) -> (i32, i32) {
    %c0_i32 = arith.constant 0 : i32
    return %arg0, %arg1 : i32, i32
  }
}

module attributes {stable_mosaic.version = 11 : i64} {
  func.func @_affine_kernel(%arg0: i32, %arg1: memref<8x256xf32, #tpu.memory_space<vmem>>, %arg2: memref<1x256xf32, #tpu.memory_space<vmem>>, %arg3: memref<1x256xf32, #tpu.memory_space<vmem>>, %arg4: memref<8x256xf32, #tpu.memory_space<vmem>>) attributes {dimension_semantics = [#tpu.dimension_semantics<parallel>], iteration_bounds = array<i64: 1>, scalar_prefetch = 0 : i64, scratch_operands = 0 : i64, tpu.core_type = #tpu.core_type<tc>, window_params = [{transform_indices = @transform_0, window_bounds = array<i64: 8, 256>}, {pipeline_mode = #tpu.pipeline_mode<synchronous>, transform_indices = @transform_1, window_bounds = array<i64: 1, 256>}, {pipeline_mode = #tpu.pipeline_mode<synchronous>, transform_indices = @transform_2, window_bounds = array<i64: 1, 256>}, {transform_indices = @transform_3, window_bounds = array<i64: 8, 256>}]} {
    %c0 = arith.constant 0 : index
    %c0_0 = arith.constant 0 : index
    %0 = vector.load %arg1[%c0, %c0_0] : memref<8x256xf32, #tpu.memory_space<vmem>>, vector<8x256xf32>
    %c0_1 = arith.constant 0 : index
    %c0_2 = arith.constant 0 : index
    %1 = vector.load %arg2[%c0_1, %c0_2] : memref<1x256xf32, #tpu.memory_space<vmem>>, vector<1x256xf32>
    %2 = vector.broadcast %1 : vector<1x256xf32> to vector<8x256xf32>
    %3 = arith.mulf %0, %2 : vector<8x256xf32>
    %c0_3 = arith.constant 0 : index
    %c0_4 = arith.constant 0 : index
    %4 = vector.load %arg3[%c0_3, %c0_4] : memref<1x256xf32, #tpu.memory_space<vmem>>, vector<1x256xf32>
    %5 = vector.broadcast %4 : vector<1x256xf32> to vector<8x256xf32>
    %6 = arith.addf %3, %5 : vector<8x256xf32>
    %cst = arith.constant 0.000000e+00 : f32
    %7 = vector.broadcast %cst : f32 to vector<8x256xf32>
    %8 = arith.maximumf %6, %7 : vector<8x256xf32>
    %c0_5 = arith.constant 0 : index
    %c0_6 = arith.constant 0 : index
    %9 = vector.load %arg4[%c0_5, %c0_6] : memref<8x256xf32, #tpu.memory_space<vmem>>, vector<8x256xf32>
    tpu.vector_store %arg4[%c0_5, %c0_6], %8 {strides = array<i32>} : memref<8x256xf32, #tpu.memory_space<vmem>>, vector<8x256xf32>,
    return
  }
  func.func @transform_0(%arg0: i32) -> (i32, i32) {
    %c0_i32 = arith.constant 0 : i32
    %c0_i32_0 = arith.constant 0 : i32
    return %arg0, %c0_i32 : i32, i32
  }
  func.func @transform_1(%arg0: i32) -> (i32, i32) {
    %c0_i32 = arith.constant 0 : i32
    %c0_i32_0 = arith.constant 0 : i32
    %c0_i32_1 = arith.constant 0 : i32
    return %c0_i32, %c0_i32_0 : i32, i32
  }
  func.func @transform_2(%arg0: i32) -> (i32, i32) {
    %c0_i32 = arith.constant 0 : i32
    %c0_i32_0 = arith.constant 0 : i32
    %c0_i32_1 = arith.constant 0 : i32
    return %c0_i32, %c0_i32_0 : i32, i32
  }
  func.func @transform_3(%arg0: i32) -> (i32, i32) {
    %c0_i32 = arith.constant 0 : i32
    %c0_i32_0 = arith.constant 0 : i32
    return %arg0, %c0_i32 : i32, i32
  }
}

module attributes {stable_mosaic.version = 11 : i64} {
  func.func @_mm_stats_kernel(%arg0: i32, %arg1: i32, %arg2: i32, %arg3: memref<8x384xbf16, #tpu.memory_space<vmem>>, %arg4: memref<384x128xbf16, #tpu.memory_space<vmem>>, %arg5: memref<8x128xf32, #tpu.memory_space<vmem>>, %arg6: memref<8x128xf32, #tpu.memory_space<vmem>>, %arg7: memref<8x128xf32, #tpu.memory_space<vmem>>) attributes {dimension_semantics = [#tpu.dimension_semantics<parallel>, #tpu.dimension_semantics<parallel>, #tpu.dimension_semantics<arbitrary>], iteration_bounds = array<i64: 1, 2, 6>, scalar_prefetch = 0 : i64, scratch_operands = 1 : i64, tpu.core_type = #tpu.core_type<tc>, window_params = [{transform_indices = @transform_0, window_bounds = array<i64: 8, 384>}, {transform_indices = @transform_1, window_bounds = array<i64: 384, 128>}, {transform_indices = @transform_2, window_bounds = array<i64: 8, 128>}, {transform_indices = @transform_3, window_bounds = array<i64: 8, 128>}]} {
    %c0_i32 = arith.constant 0 : i32
    %0 = arith.cmpi eq, %arg2, %c0_i32 : i32
    %1 = arith.extui %0 : i1 to i32
    %c0_i32_0 = arith.constant 0 : i32
    %2 = arith.cmpi ne, %1, %c0_i32_0 : i32
    scf.if %2 {
      %cst_9 = arith.constant 0.000000e+00 : f32
      %12 = vector.broadcast %cst_9 : f32 to vector<8x128xf32>
      %c0_10 = arith.constant 0 : index
      %c0_11 = arith.constant 0 : index
      %13 = vector.load %arg7[%c0_10, %c0_11] : memref<8x128xf32, #tpu.memory_space<vmem>>, vector<8x128xf32>
      tpu.vector_store %arg7[%c0_10, %c0_11], %12 {strides = array<i32>} : memref<8x128xf32, #tpu.memory_space<vmem>>, vector<8x128xf32>,
    } else {
    }
    %c0 = arith.constant 0 : index
    %c0_1 = arith.constant 0 : index
    %3 = vector.load %arg7[%c0, %c0_1] : memref<8x128xf32, #tpu.memory_space<vmem>>, vector<8x128xf32>
    %c0_2 = arith.constant 0 : index
    %c0_3 = arith.constant 0 : index
    %4 = vector.load %arg3[%c0_2, %c0_3] : memref<8x384xbf16, #tpu.memory_space<vmem>>, vector<8x384xbf16>
    %c0_4 = arith.constant 0 : index
    %c0_5 = arith.constant 0 : index
    %5 = vector.load %arg4[%c0_4, %c0_5] : memref<384x128xbf16, #tpu.memory_space<vmem>>, vector<384x128xbf16>
    %cst = arith.constant dense<0.000000e+00> : vector<8x128xf32>
    %6 = tpu.matmul %4, %5, %cst {dimension_numbers = #tpu.dot_dimension_numbers<[1], [0], [0], [1], [0, 0, 1, 1], [], []>} : vector<8x384xbf16>, vector<384x128xbf16>, vector<8x128xf32> -> vector<8x128xf32>
    %7 = arith.addf %3, %6 : vector<8x128xf32>
    %c0_6 = arith.constant 0 : index
    %c0_7 = arith.constant 0 : index
    %8 = vector.load %arg7[%c0_6, %c0_7] : memref<8x128xf32, #tpu.memory_space<vmem>>, vector<8x128xf32>
    tpu.vector_store %arg7[%c0_6, %c0_7], %7 {strides = array<i32>} : memref<8x128xf32, #tpu.memory_space<vmem>>, vector<8x128xf32>,
    %c5_i32 = arith.constant 5 : i32
    %9 = arith.cmpi eq, %arg2, %c5_i32 : i32
    %10 = arith.extui %9 : i1 to i32
    %c0_i32_8 = arith.constant 0 : i32
    %11 = arith.cmpi ne, %10, %c0_i32_8 : i32
    scf.if %11 {
      %c0_9 = arith.constant 0 : index
      %c0_10 = arith.constant 0 : index
      %12 = vector.load %arg7[%c0_9, %c0_10] : memref<8x128xf32, #tpu.memory_space<vmem>>, vector<8x128xf32>
      %c0_11 = arith.constant 0 : index
      %c0_12 = arith.constant 0 : index
      %13 = vector.load %arg5[%c0_11, %c0_12] : memref<8x128xf32, #tpu.memory_space<vmem>>, vector<8x128xf32>
      tpu.vector_store %arg5[%c0_11, %c0_12], %12 {strides = array<i32>} : memref<8x128xf32, #tpu.memory_space<vmem>>, vector<8x128xf32>,
      %cst_13 = arith.constant 0.000000e+00 : f32
      %14 = vector.broadcast %cst_13 : f32 to vector<8x128xf32>
      %c0_14 = arith.constant 0 : index
      %c0_15 = arith.constant 0 : index
      %15 = vector.load %arg6[%c0_14, %c0_15] : memref<8x128xf32, #tpu.memory_space<vmem>>, vector<8x128xf32>
      tpu.vector_store %arg6[%c0_14, %c0_15], %14 {strides = array<i32>} : memref<8x128xf32, #tpu.memory_space<vmem>>, vector<8x128xf32>,
      %cst_16 = arith.constant dense<0.000000e+00> : vector<128xf32>
      %16 = vector.multi_reduction <add>, %12, %cst_16 [0] : vector<8x128xf32> to vector<128xf32>
      %17 = vector.shape_cast %16 : vector<128xf32> to vector<1x128xf32>
      %c0_17 = arith.constant 0 : index
      %c0_18 = arith.constant 0 : index
      %18 = vector.load %arg6[%c0_17, %c0_18] : memref<8x128xf32, #tpu.memory_space<vmem>>, vector<1x128xf32>
      tpu.vector_store %arg6[%c0_17, %c0_18], %17 {strides = array<i32>} : memref<8x128xf32, #tpu.memory_space<vmem>>, vector<1x128xf32>,
      %19 = arith.mulf %12, %12 : vector<8x128xf32>
      %cst_19 = arith.constant dense<0.000000e+00> : vector<128xf32>
      %20 = vector.multi_reduction <add>, %19, %cst_19 [0] : vector<8x128xf32> to vector<128xf32>
      %21 = vector.shape_cast %20 : vector<128xf32> to vector<1x128xf32>
      %c1 = arith.constant 1 : index
      %c0_20 = arith.constant 0 : index
      %22 = vector.load %arg6[%c1, %c0_20] : memref<8x128xf32, #tpu.memory_space<vmem>>, vector<1x128xf32>
      tpu.vector_store %arg6[%c1, %c0_20], %21 {strides = array<i32>} : memref<8x128xf32, #tpu.memory_space<vmem>>, vector<1x128xf32>,
    } else {
    }
    return
  }
  func.func @transform_0(%arg0: i32, %arg1: i32, %arg2: i32) -> (i32, i32) {
    %c0_i32 = arith.constant 0 : i32
    return %arg0, %arg2 : i32, i32
  }
  func.func @transform_1(%arg0: i32, %arg1: i32, %arg2: i32) -> (i32, i32) {
    %c0_i32 = arith.constant 0 : i32
    return %arg2, %arg1 : i32, i32
  }
  func.func @transform_2(%arg0: i32, %arg1: i32, %arg2: i32) -> (i32, i32) {
    %c0_i32 = arith.constant 0 : i32
    return %arg0, %arg1 : i32, i32
  }
  func.func @transform_3(%arg0: i32, %arg1: i32, %arg2: i32) -> (i32, i32) {
    %c0_i32 = arith.constant 0 : i32
    return %arg0, %arg1 : i32, i32
  }
}

module attributes {stable_mosaic.version = 11 : i64} {
  func.func @_mm_stats_kernel(%arg0: i32, %arg1: i32, %arg2: i32, %arg3: memref<8x128xbf16, #tpu.memory_space<vmem>>, %arg4: memref<128x128xbf16, #tpu.memory_space<vmem>>, %arg5: memref<8x128xf32, #tpu.memory_space<vmem>>, %arg6: memref<8x128xf32, #tpu.memory_space<vmem>>, %arg7: memref<8x128xf32, #tpu.memory_space<vmem>>) attributes {dimension_semantics = [#tpu.dimension_semantics<parallel>, #tpu.dimension_semantics<parallel>, #tpu.dimension_semantics<arbitrary>], iteration_bounds = array<i64: 1, 2, 1>, scalar_prefetch = 0 : i64, scratch_operands = 1 : i64, tpu.core_type = #tpu.core_type<tc>, window_params = [{transform_indices = @transform_0, window_bounds = array<i64: 8, 128>}, {transform_indices = @transform_1, window_bounds = array<i64: 128, 128>}, {transform_indices = @transform_2, window_bounds = array<i64: 8, 128>}, {transform_indices = @transform_3, window_bounds = array<i64: 8, 128>}]} {
    %c0_i32 = arith.constant 0 : i32
    %0 = arith.cmpi eq, %arg2, %c0_i32 : i32
    %1 = arith.extui %0 : i1 to i32
    %c0_i32_0 = arith.constant 0 : i32
    %2 = arith.cmpi ne, %1, %c0_i32_0 : i32
    scf.if %2 {
      %cst_10 = arith.constant 0.000000e+00 : f32
      %12 = vector.broadcast %cst_10 : f32 to vector<8x128xf32>
      %c0_11 = arith.constant 0 : index
      %c0_12 = arith.constant 0 : index
      %13 = vector.load %arg7[%c0_11, %c0_12] : memref<8x128xf32, #tpu.memory_space<vmem>>, vector<8x128xf32>
      tpu.vector_store %arg7[%c0_11, %c0_12], %12 {strides = array<i32>} : memref<8x128xf32, #tpu.memory_space<vmem>>, vector<8x128xf32>,
    } else {
    }
    %c0 = arith.constant 0 : index
    %c0_1 = arith.constant 0 : index
    %3 = vector.load %arg7[%c0, %c0_1] : memref<8x128xf32, #tpu.memory_space<vmem>>, vector<8x128xf32>
    %c0_2 = arith.constant 0 : index
    %c0_3 = arith.constant 0 : index
    %4 = vector.load %arg3[%c0_2, %c0_3] : memref<8x128xbf16, #tpu.memory_space<vmem>>, vector<8x128xbf16>
    %c0_4 = arith.constant 0 : index
    %c0_5 = arith.constant 0 : index
    %5 = vector.load %arg4[%c0_4, %c0_5] : memref<128x128xbf16, #tpu.memory_space<vmem>>, vector<128x128xbf16>
    %cst = arith.constant dense<0.000000e+00> : vector<8x128xf32>
    %6 = tpu.matmul %4, %5, %cst {dimension_numbers = #tpu.dot_dimension_numbers<[1], [0], [0], [1], [0, 0, 1, 1], [], []>} : vector<8x128xbf16>, vector<128x128xbf16>, vector<8x128xf32> -> vector<8x128xf32>
    %7 = arith.addf %3, %6 : vector<8x128xf32>
    %c0_6 = arith.constant 0 : index
    %c0_7 = arith.constant 0 : index
    %8 = vector.load %arg7[%c0_6, %c0_7] : memref<8x128xf32, #tpu.memory_space<vmem>>, vector<8x128xf32>
    tpu.vector_store %arg7[%c0_6, %c0_7], %7 {strides = array<i32>} : memref<8x128xf32, #tpu.memory_space<vmem>>, vector<8x128xf32>,
    %c0_i32_8 = arith.constant 0 : i32
    %9 = arith.cmpi eq, %arg2, %c0_i32_8 : i32
    %10 = arith.extui %9 : i1 to i32
    %c0_i32_9 = arith.constant 0 : i32
    %11 = arith.cmpi ne, %10, %c0_i32_9 : i32
    scf.if %11 {
      %c0_10 = arith.constant 0 : index
      %c0_11 = arith.constant 0 : index
      %12 = vector.load %arg7[%c0_10, %c0_11] : memref<8x128xf32, #tpu.memory_space<vmem>>, vector<8x128xf32>
      %c0_12 = arith.constant 0 : index
      %c0_13 = arith.constant 0 : index
      %13 = vector.load %arg5[%c0_12, %c0_13] : memref<8x128xf32, #tpu.memory_space<vmem>>, vector<8x128xf32>
      tpu.vector_store %arg5[%c0_12, %c0_13], %12 {strides = array<i32>} : memref<8x128xf32, #tpu.memory_space<vmem>>, vector<8x128xf32>,
      %cst_14 = arith.constant 0.000000e+00 : f32
      %14 = vector.broadcast %cst_14 : f32 to vector<8x128xf32>
      %c0_15 = arith.constant 0 : index
      %c0_16 = arith.constant 0 : index
      %15 = vector.load %arg6[%c0_15, %c0_16] : memref<8x128xf32, #tpu.memory_space<vmem>>, vector<8x128xf32>
      tpu.vector_store %arg6[%c0_15, %c0_16], %14 {strides = array<i32>} : memref<8x128xf32, #tpu.memory_space<vmem>>, vector<8x128xf32>,
      %cst_17 = arith.constant dense<0.000000e+00> : vector<128xf32>
      %16 = vector.multi_reduction <add>, %12, %cst_17 [0] : vector<8x128xf32> to vector<128xf32>
      %17 = vector.shape_cast %16 : vector<128xf32> to vector<1x128xf32>
      %c0_18 = arith.constant 0 : index
      %c0_19 = arith.constant 0 : index
      %18 = vector.load %arg6[%c0_18, %c0_19] : memref<8x128xf32, #tpu.memory_space<vmem>>, vector<1x128xf32>
      tpu.vector_store %arg6[%c0_18, %c0_19], %17 {strides = array<i32>} : memref<8x128xf32, #tpu.memory_space<vmem>>, vector<1x128xf32>,
      %19 = arith.mulf %12, %12 : vector<8x128xf32>
      %cst_20 = arith.constant dense<0.000000e+00> : vector<128xf32>
      %20 = vector.multi_reduction <add>, %19, %cst_20 [0] : vector<8x128xf32> to vector<128xf32>
      %21 = vector.shape_cast %20 : vector<128xf32> to vector<1x128xf32>
      %c1 = arith.constant 1 : index
      %c0_21 = arith.constant 0 : index
      %22 = vector.load %arg6[%c1, %c0_21] : memref<8x128xf32, #tpu.memory_space<vmem>>, vector<1x128xf32>
      tpu.vector_store %arg6[%c1, %c0_21], %21 {strides = array<i32>} : memref<8x128xf32, #tpu.memory_space<vmem>>, vector<1x128xf32>,
    } else {
    }
    return
  }
  func.func @transform_0(%arg0: i32, %arg1: i32, %arg2: i32) -> (i32, i32) {
    %c0_i32 = arith.constant 0 : i32
    return %arg0, %arg2 : i32, i32
  }
  func.func @transform_1(%arg0: i32, %arg1: i32, %arg2: i32) -> (i32, i32) {
    %c0_i32 = arith.constant 0 : i32
    return %arg2, %arg1 : i32, i32
  }
  func.func @transform_2(%arg0: i32, %arg1: i32, %arg2: i32) -> (i32, i32) {
    %c0_i32 = arith.constant 0 : i32
    return %arg0, %arg1 : i32, i32
  }
  func.func @transform_3(%arg0: i32, %arg1: i32, %arg2: i32) -> (i32, i32) {
    %c0_i32 = arith.constant 0 : i32
    return %arg0, %arg1 : i32, i32
  }
}

module attributes {stable_mosaic.version = 11 : i64} {
  func.func @_affine2_add_relu_kernel(%arg0: i32, %arg1: memref<8x256xf32, #tpu.memory_space<vmem>>, %arg2: memref<1x256xf32, #tpu.memory_space<vmem>>, %arg3: memref<1x256xf32, #tpu.memory_space<vmem>>, %arg4: memref<8x256xf32, #tpu.memory_space<vmem>>, %arg5: memref<1x256xf32, #tpu.memory_space<vmem>>, %arg6: memref<1x256xf32, #tpu.memory_space<vmem>>, %arg7: memref<8x256xf32, #tpu.memory_space<vmem>>) attributes {dimension_semantics = [#tpu.dimension_semantics<parallel>], iteration_bounds = array<i64: 1>, scalar_prefetch = 0 : i64, scratch_operands = 0 : i64, tpu.core_type = #tpu.core_type<tc>, window_params = [{transform_indices = @transform_0, window_bounds = array<i64: 8, 256>}, {pipeline_mode = #tpu.pipeline_mode<synchronous>, transform_indices = @transform_1, window_bounds = array<i64: 1, 256>}, {pipeline_mode = #tpu.pipeline_mode<synchronous>, transform_indices = @transform_2, window_bounds = array<i64: 1, 256>}, {transform_indices = @transform_3, window_bounds = array<i64: 8, 256>}, {pipeline_mode = #tpu.pipeline_mode<synchronous>, transform_indices = @transform_4, window_bounds = array<i64: 1, 256>}, {pipeline_mode = #tpu.pipeline_mode<synchronous>, transform_indices = @transform_5, window_bounds = array<i64: 1, 256>}, {transform_indices = @transform_6, window_bounds = array<i64: 8, 256>}]} {
    %c0 = arith.constant 0 : index
    %c0_0 = arith.constant 0 : index
    %0 = vector.load %arg1[%c0, %c0_0] : memref<8x256xf32, #tpu.memory_space<vmem>>, vector<8x256xf32>
    %c0_1 = arith.constant 0 : index
    %c0_2 = arith.constant 0 : index
    %1 = vector.load %arg2[%c0_1, %c0_2] : memref<1x256xf32, #tpu.memory_space<vmem>>, vector<1x256xf32>
    %2 = vector.broadcast %1 : vector<1x256xf32> to vector<8x256xf32>
    %3 = arith.mulf %0, %2 : vector<8x256xf32>
    %c0_3 = arith.constant 0 : index
    %c0_4 = arith.constant 0 : index
    %4 = vector.load %arg3[%c0_3, %c0_4] : memref<1x256xf32, #tpu.memory_space<vmem>>, vector<1x256xf32>
    %5 = vector.broadcast %4 : vector<1x256xf32> to vector<8x256xf32>
    %6 = arith.addf %3, %5 : vector<8x256xf32>
    %c0_5 = arith.constant 0 : index
    %c0_6 = arith.constant 0 : index
    %7 = vector.load %arg4[%c0_5, %c0_6] : memref<8x256xf32, #tpu.memory_space<vmem>>, vector<8x256xf32>
    %c0_7 = arith.constant 0 : index
    %c0_8 = arith.constant 0 : index
    %8 = vector.load %arg5[%c0_7, %c0_8] : memref<1x256xf32, #tpu.memory_space<vmem>>, vector<1x256xf32>
    %9 = vector.broadcast %8 : vector<1x256xf32> to vector<8x256xf32>
    %10 = arith.mulf %7, %9 : vector<8x256xf32>
    %11 = arith.addf %6, %10 : vector<8x256xf32>
    %c0_9 = arith.constant 0 : index
    %c0_10 = arith.constant 0 : index
    %12 = vector.load %arg6[%c0_9, %c0_10] : memref<1x256xf32, #tpu.memory_space<vmem>>, vector<1x256xf32>
    %13 = vector.broadcast %12 : vector<1x256xf32> to vector<8x256xf32>
    %14 = arith.addf %11, %13 : vector<8x256xf32>
    %cst = arith.constant 0.000000e+00 : f32
    %15 = vector.broadcast %cst : f32 to vector<8x256xf32>
    %16 = arith.maximumf %14, %15 : vector<8x256xf32>
    %c0_11 = arith.constant 0 : index
    %c0_12 = arith.constant 0 : index
    %17 = vector.load %arg7[%c0_11, %c0_12] : memref<8x256xf32, #tpu.memory_space<vmem>>, vector<8x256xf32>
    tpu.vector_store %arg7[%c0_11, %c0_12], %16 {strides = array<i32>} : memref<8x256xf32, #tpu.memory_space<vmem>>, vector<8x256xf32>,
    return
  }
  func.func @transform_0(%arg0: i32) -> (i32, i32) {
    %c0_i32 = arith.constant 0 : i32
    %c0_i32_0 = arith.constant 0 : i32
    return %arg0, %c0_i32 : i32, i32
  }
  func.func @transform_1(%arg0: i32) -> (i32, i32) {
    %c0_i32 = arith.constant 0 : i32
    %c0_i32_0 = arith.constant 0 : i32
    %c0_i32_1 = arith.constant 0 : i32
    return %c0_i32, %c0_i32_0 : i32, i32
  }
  func.func @transform_2(%arg0: i32) -> (i32, i32) {
    %c0_i32 = arith.constant 0 : i32
    %c0_i32_0 = arith.constant 0 : i32
    %c0_i32_1 = arith.constant 0 : i32
    return %c0_i32, %c0_i32_0 : i32, i32
  }
  func.func @transform_3(%arg0: i32) -> (i32, i32) {
    %c0_i32 = arith.constant 0 : i32
    %c0_i32_0 = arith.constant 0 : i32
    return %arg0, %c0_i32 : i32, i32
  }
  func.func @transform_4(%arg0: i32) -> (i32, i32) {
    %c0_i32 = arith.constant 0 : i32
    %c0_i32_0 = arith.constant 0 : i32
    %c0_i32_1 = arith.constant 0 : i32
    return %c0_i32, %c0_i32_0 : i32, i32
  }
  func.func @transform_5(%arg0: i32) -> (i32, i32) {
    %c0_i32 = arith.constant 0 : i32
    %c0_i32_0 = arith.constant 0 : i32
    %c0_i32_1 = arith.constant 0 : i32
    return %c0_i32, %c0_i32_0 : i32, i32
  }
  func.func @transform_6(%arg0: i32) -> (i32, i32) {
    %c0_i32 = arith.constant 0 : i32
    %c0_i32_0 = arith.constant 0 : i32
    return %arg0, %c0_i32 : i32, i32
  }
}

module attributes {stable_mosaic.version = 11 : i64} {
  func.func @_affine_add_relu_kernel(%arg0: i32, %arg1: memref<8x256xf32, #tpu.memory_space<vmem>>, %arg2: memref<1x256xf32, #tpu.memory_space<vmem>>, %arg3: memref<1x256xf32, #tpu.memory_space<vmem>>, %arg4: memref<8x256xf32, #tpu.memory_space<vmem>>, %arg5: memref<8x256xf32, #tpu.memory_space<vmem>>) attributes {dimension_semantics = [#tpu.dimension_semantics<parallel>], iteration_bounds = array<i64: 1>, scalar_prefetch = 0 : i64, scratch_operands = 0 : i64, tpu.core_type = #tpu.core_type<tc>, window_params = [{transform_indices = @transform_0, window_bounds = array<i64: 8, 256>}, {pipeline_mode = #tpu.pipeline_mode<synchronous>, transform_indices = @transform_1, window_bounds = array<i64: 1, 256>}, {pipeline_mode = #tpu.pipeline_mode<synchronous>, transform_indices = @transform_2, window_bounds = array<i64: 1, 256>}, {transform_indices = @transform_3, window_bounds = array<i64: 8, 256>}, {transform_indices = @transform_4, window_bounds = array<i64: 8, 256>}]} {
    %c0 = arith.constant 0 : index
    %c0_0 = arith.constant 0 : index
    %0 = vector.load %arg1[%c0, %c0_0] : memref<8x256xf32, #tpu.memory_space<vmem>>, vector<8x256xf32>
    %c0_1 = arith.constant 0 : index
    %c0_2 = arith.constant 0 : index
    %1 = vector.load %arg2[%c0_1, %c0_2] : memref<1x256xf32, #tpu.memory_space<vmem>>, vector<1x256xf32>
    %2 = vector.broadcast %1 : vector<1x256xf32> to vector<8x256xf32>
    %3 = arith.mulf %0, %2 : vector<8x256xf32>
    %c0_3 = arith.constant 0 : index
    %c0_4 = arith.constant 0 : index
    %4 = vector.load %arg3[%c0_3, %c0_4] : memref<1x256xf32, #tpu.memory_space<vmem>>, vector<1x256xf32>
    %5 = vector.broadcast %4 : vector<1x256xf32> to vector<8x256xf32>
    %6 = arith.addf %3, %5 : vector<8x256xf32>
    %c0_5 = arith.constant 0 : index
    %c0_6 = arith.constant 0 : index
    %7 = vector.load %arg4[%c0_5, %c0_6] : memref<8x256xf32, #tpu.memory_space<vmem>>, vector<8x256xf32>
    %8 = arith.addf %6, %7 : vector<8x256xf32>
    %cst = arith.constant 0.000000e+00 : f32
    %9 = vector.broadcast %cst : f32 to vector<8x256xf32>
    %10 = arith.maximumf %8, %9 : vector<8x256xf32>
    %c0_7 = arith.constant 0 : index
    %c0_8 = arith.constant 0 : index
    %11 = vector.load %arg5[%c0_7, %c0_8] : memref<8x256xf32, #tpu.memory_space<vmem>>, vector<8x256xf32>
    tpu.vector_store %arg5[%c0_7, %c0_8], %10 {strides = array<i32>} : memref<8x256xf32, #tpu.memory_space<vmem>>, vector<8x256xf32>,
    return
  }
  func.func @transform_0(%arg0: i32) -> (i32, i32) {
    %c0_i32 = arith.constant 0 : i32
    %c0_i32_0 = arith.constant 0 : i32
    return %arg0, %c0_i32 : i32, i32
  }
  func.func @transform_1(%arg0: i32) -> (i32, i32) {
    %c0_i32 = arith.constant 0 : i32
    %c0_i32_0 = arith.constant 0 : i32
    %c0_i32_1 = arith.constant 0 : i32
    return %c0_i32, %c0_i32_0 : i32, i32
  }
  func.func @transform_2(%arg0: i32) -> (i32, i32) {
    %c0_i32 = arith.constant 0 : i32
    %c0_i32_0 = arith.constant 0 : i32
    %c0_i32_1 = arith.constant 0 : i32
    return %c0_i32, %c0_i32_0 : i32, i32
  }
  func.func @transform_3(%arg0: i32) -> (i32, i32) {
    %c0_i32 = arith.constant 0 : i32
    %c0_i32_0 = arith.constant 0 : i32
    return %arg0, %c0_i32 : i32, i32
  }
  func.func @transform_4(%arg0: i32) -> (i32, i32) {
    %c0_i32 = arith.constant 0 : i32
    %c0_i32_0 = arith.constant 0 : i32
    return %arg0, %c0_i32 : i32, i32
  }
}

module attributes {stable_mosaic.version = 11 : i64} {
  func.func @_mm_stats_kernel(%arg0: i32, %arg1: i32, %arg2: i32, %arg3: memref<8x384xbf16, #tpu.memory_space<vmem>>, %arg4: memref<384x128xbf16, #tpu.memory_space<vmem>>, %arg5: memref<8x128xf32, #tpu.memory_space<vmem>>, %arg6: memref<8x128xf32, #tpu.memory_space<vmem>>, %arg7: memref<8x128xf32, #tpu.memory_space<vmem>>) attributes {dimension_semantics = [#tpu.dimension_semantics<parallel>, #tpu.dimension_semantics<parallel>, #tpu.dimension_semantics<arbitrary>], iteration_bounds = array<i64: 1, 4, 6>, scalar_prefetch = 0 : i64, scratch_operands = 1 : i64, tpu.core_type = #tpu.core_type<tc>, window_params = [{transform_indices = @transform_0, window_bounds = array<i64: 8, 384>}, {transform_indices = @transform_1, window_bounds = array<i64: 384, 128>}, {transform_indices = @transform_2, window_bounds = array<i64: 8, 128>}, {transform_indices = @transform_3, window_bounds = array<i64: 8, 128>}]} {
    %c0_i32 = arith.constant 0 : i32
    %0 = arith.cmpi eq, %arg2, %c0_i32 : i32
    %1 = arith.extui %0 : i1 to i32
    %c0_i32_0 = arith.constant 0 : i32
    %2 = arith.cmpi ne, %1, %c0_i32_0 : i32
    scf.if %2 {
      %cst_9 = arith.constant 0.000000e+00 : f32
      %12 = vector.broadcast %cst_9 : f32 to vector<8x128xf32>
      %c0_10 = arith.constant 0 : index
      %c0_11 = arith.constant 0 : index
      %13 = vector.load %arg7[%c0_10, %c0_11] : memref<8x128xf32, #tpu.memory_space<vmem>>, vector<8x128xf32>
      tpu.vector_store %arg7[%c0_10, %c0_11], %12 {strides = array<i32>} : memref<8x128xf32, #tpu.memory_space<vmem>>, vector<8x128xf32>,
    } else {
    }
    %c0 = arith.constant 0 : index
    %c0_1 = arith.constant 0 : index
    %3 = vector.load %arg7[%c0, %c0_1] : memref<8x128xf32, #tpu.memory_space<vmem>>, vector<8x128xf32>
    %c0_2 = arith.constant 0 : index
    %c0_3 = arith.constant 0 : index
    %4 = vector.load %arg3[%c0_2, %c0_3] : memref<8x384xbf16, #tpu.memory_space<vmem>>, vector<8x384xbf16>
    %c0_4 = arith.constant 0 : index
    %c0_5 = arith.constant 0 : index
    %5 = vector.load %arg4[%c0_4, %c0_5] : memref<384x128xbf16, #tpu.memory_space<vmem>>, vector<384x128xbf16>
    %cst = arith.constant dense<0.000000e+00> : vector<8x128xf32>
    %6 = tpu.matmul %4, %5, %cst {dimension_numbers = #tpu.dot_dimension_numbers<[1], [0], [0], [1], [0, 0, 1, 1], [], []>} : vector<8x384xbf16>, vector<384x128xbf16>, vector<8x128xf32> -> vector<8x128xf32>
    %7 = arith.addf %3, %6 : vector<8x128xf32>
    %c0_6 = arith.constant 0 : index
    %c0_7 = arith.constant 0 : index
    %8 = vector.load %arg7[%c0_6, %c0_7] : memref<8x128xf32, #tpu.memory_space<vmem>>, vector<8x128xf32>
    tpu.vector_store %arg7[%c0_6, %c0_7], %7 {strides = array<i32>} : memref<8x128xf32, #tpu.memory_space<vmem>>, vector<8x128xf32>,
    %c5_i32 = arith.constant 5 : i32
    %9 = arith.cmpi eq, %arg2, %c5_i32 : i32
    %10 = arith.extui %9 : i1 to i32
    %c0_i32_8 = arith.constant 0 : i32
    %11 = arith.cmpi ne, %10, %c0_i32_8 : i32
    scf.if %11 {
      %c0_9 = arith.constant 0 : index
      %c0_10 = arith.constant 0 : index
      %12 = vector.load %arg7[%c0_9, %c0_10] : memref<8x128xf32, #tpu.memory_space<vmem>>, vector<8x128xf32>
      %c0_11 = arith.constant 0 : index
      %c0_12 = arith.constant 0 : index
      %13 = vector.load %arg5[%c0_11, %c0_12] : memref<8x128xf32, #tpu.memory_space<vmem>>, vector<8x128xf32>
      tpu.vector_store %arg5[%c0_11, %c0_12], %12 {strides = array<i32>} : memref<8x128xf32, #tpu.memory_space<vmem>>, vector<8x128xf32>,
      %cst_13 = arith.constant 0.000000e+00 : f32
      %14 = vector.broadcast %cst_13 : f32 to vector<8x128xf32>
      %c0_14 = arith.constant 0 : index
      %c0_15 = arith.constant 0 : index
      %15 = vector.load %arg6[%c0_14, %c0_15] : memref<8x128xf32, #tpu.memory_space<vmem>>, vector<8x128xf32>
      tpu.vector_store %arg6[%c0_14, %c0_15], %14 {strides = array<i32>} : memref<8x128xf32, #tpu.memory_space<vmem>>, vector<8x128xf32>,
      %cst_16 = arith.constant dense<0.000000e+00> : vector<128xf32>
      %16 = vector.multi_reduction <add>, %12, %cst_16 [0] : vector<8x128xf32> to vector<128xf32>
      %17 = vector.shape_cast %16 : vector<128xf32> to vector<1x128xf32>
      %c0_17 = arith.constant 0 : index
      %c0_18 = arith.constant 0 : index
      %18 = vector.load %arg6[%c0_17, %c0_18] : memref<8x128xf32, #tpu.memory_space<vmem>>, vector<1x128xf32>
      tpu.vector_store %arg6[%c0_17, %c0_18], %17 {strides = array<i32>} : memref<8x128xf32, #tpu.memory_space<vmem>>, vector<1x128xf32>,
      %19 = arith.mulf %12, %12 : vector<8x128xf32>
      %cst_19 = arith.constant dense<0.000000e+00> : vector<128xf32>
      %20 = vector.multi_reduction <add>, %19, %cst_19 [0] : vector<8x128xf32> to vector<128xf32>
      %21 = vector.shape_cast %20 : vector<128xf32> to vector<1x128xf32>
      %c1 = arith.constant 1 : index
      %c0_20 = arith.constant 0 : index
      %22 = vector.load %arg6[%c1, %c0_20] : memref<8x128xf32, #tpu.memory_space<vmem>>, vector<1x128xf32>
      tpu.vector_store %arg6[%c1, %c0_20], %21 {strides = array<i32>} : memref<8x128xf32, #tpu.memory_space<vmem>>, vector<1x128xf32>,
    } else {
    }
    return
  }
  func.func @transform_0(%arg0: i32, %arg1: i32, %arg2: i32) -> (i32, i32) {
    %c0_i32 = arith.constant 0 : i32
    return %arg0, %arg2 : i32, i32
  }
  func.func @transform_1(%arg0: i32, %arg1: i32, %arg2: i32) -> (i32, i32) {
    %c0_i32 = arith.constant 0 : i32
    return %arg2, %arg1 : i32, i32
  }
  func.func @transform_2(%arg0: i32, %arg1: i32, %arg2: i32) -> (i32, i32) {
    %c0_i32 = arith.constant 0 : i32
    return %arg0, %arg1 : i32, i32
  }
  func.func @transform_3(%arg0: i32, %arg1: i32, %arg2: i32) -> (i32, i32) {
    %c0_i32 = arith.constant 0 : i32
    return %arg0, %arg1 : i32, i32
  }
}

module attributes {stable_mosaic.version = 11 : i64} {
  func.func @_affine_kernel(%arg0: i32, %arg1: memref<8x512xf32, #tpu.memory_space<vmem>>, %arg2: memref<1x512xf32, #tpu.memory_space<vmem>>, %arg3: memref<1x512xf32, #tpu.memory_space<vmem>>, %arg4: memref<8x512xf32, #tpu.memory_space<vmem>>) attributes {dimension_semantics = [#tpu.dimension_semantics<parallel>], iteration_bounds = array<i64: 1>, scalar_prefetch = 0 : i64, scratch_operands = 0 : i64, tpu.core_type = #tpu.core_type<tc>, window_params = [{transform_indices = @transform_0, window_bounds = array<i64: 8, 512>}, {pipeline_mode = #tpu.pipeline_mode<synchronous>, transform_indices = @transform_1, window_bounds = array<i64: 1, 512>}, {pipeline_mode = #tpu.pipeline_mode<synchronous>, transform_indices = @transform_2, window_bounds = array<i64: 1, 512>}, {transform_indices = @transform_3, window_bounds = array<i64: 8, 512>}]} {
    %c0 = arith.constant 0 : index
    %c0_0 = arith.constant 0 : index
    %0 = vector.load %arg1[%c0, %c0_0] : memref<8x512xf32, #tpu.memory_space<vmem>>, vector<8x512xf32>
    %c0_1 = arith.constant 0 : index
    %c0_2 = arith.constant 0 : index
    %1 = vector.load %arg2[%c0_1, %c0_2] : memref<1x512xf32, #tpu.memory_space<vmem>>, vector<1x512xf32>
    %2 = vector.broadcast %1 : vector<1x512xf32> to vector<8x512xf32>
    %3 = arith.mulf %0, %2 : vector<8x512xf32>
    %c0_3 = arith.constant 0 : index
    %c0_4 = arith.constant 0 : index
    %4 = vector.load %arg3[%c0_3, %c0_4] : memref<1x512xf32, #tpu.memory_space<vmem>>, vector<1x512xf32>
    %5 = vector.broadcast %4 : vector<1x512xf32> to vector<8x512xf32>
    %6 = arith.addf %3, %5 : vector<8x512xf32>
    %cst = arith.constant 0.000000e+00 : f32
    %7 = vector.broadcast %cst : f32 to vector<8x512xf32>
    %8 = arith.maximumf %6, %7 : vector<8x512xf32>
    %c0_5 = arith.constant 0 : index
    %c0_6 = arith.constant 0 : index
    %9 = vector.load %arg4[%c0_5, %c0_6] : memref<8x512xf32, #tpu.memory_space<vmem>>, vector<8x512xf32>
    tpu.vector_store %arg4[%c0_5, %c0_6], %8 {strides = array<i32>} : memref<8x512xf32, #tpu.memory_space<vmem>>, vector<8x512xf32>,
    return
  }
  func.func @transform_0(%arg0: i32) -> (i32, i32) {
    %c0_i32 = arith.constant 0 : i32
    %c0_i32_0 = arith.constant 0 : i32
    return %arg0, %c0_i32 : i32, i32
  }
  func.func @transform_1(%arg0: i32) -> (i32, i32) {
    %c0_i32 = arith.constant 0 : i32
    %c0_i32_0 = arith.constant 0 : i32
    %c0_i32_1 = arith.constant 0 : i32
    return %c0_i32, %c0_i32_0 : i32, i32
  }
  func.func @transform_2(%arg0: i32) -> (i32, i32) {
    %c0_i32 = arith.constant 0 : i32
    %c0_i32_0 = arith.constant 0 : i32
    %c0_i32_1 = arith.constant 0 : i32
    return %c0_i32, %c0_i32_0 : i32, i32
  }
  func.func @transform_3(%arg0: i32) -> (i32, i32) {
    %c0_i32 = arith.constant 0 : i32
    %c0_i32_0 = arith.constant 0 : i32
    return %arg0, %c0_i32 : i32, i32
  }
}

module attributes {stable_mosaic.version = 11 : i64} {
  func.func @_mm_stats_kernel(%arg0: i32, %arg1: i32, %arg2: i32, %arg3: memref<8x512xbf16, #tpu.memory_space<vmem>>, %arg4: memref<512x128xbf16, #tpu.memory_space<vmem>>, %arg5: memref<8x128xf32, #tpu.memory_space<vmem>>, %arg6: memref<8x128xf32, #tpu.memory_space<vmem>>, %arg7: memref<8x128xf32, #tpu.memory_space<vmem>>) attributes {dimension_semantics = [#tpu.dimension_semantics<parallel>, #tpu.dimension_semantics<parallel>, #tpu.dimension_semantics<arbitrary>], iteration_bounds = array<i64: 1, 4, 9>, scalar_prefetch = 0 : i64, scratch_operands = 1 : i64, tpu.core_type = #tpu.core_type<tc>, window_params = [{transform_indices = @transform_0, window_bounds = array<i64: 8, 512>}, {transform_indices = @transform_1, window_bounds = array<i64: 512, 128>}, {transform_indices = @transform_2, window_bounds = array<i64: 8, 128>}, {transform_indices = @transform_3, window_bounds = array<i64: 8, 128>}]} {
    %c0_i32 = arith.constant 0 : i32
    %0 = arith.cmpi eq, %arg2, %c0_i32 : i32
    %1 = arith.extui %0 : i1 to i32
    %c0_i32_0 = arith.constant 0 : i32
    %2 = arith.cmpi ne, %1, %c0_i32_0 : i32
    scf.if %2 {
      %cst_9 = arith.constant 0.000000e+00 : f32
      %12 = vector.broadcast %cst_9 : f32 to vector<8x128xf32>
      %c0_10 = arith.constant 0 : index
      %c0_11 = arith.constant 0 : index
      %13 = vector.load %arg7[%c0_10, %c0_11] : memref<8x128xf32, #tpu.memory_space<vmem>>, vector<8x128xf32>
      tpu.vector_store %arg7[%c0_10, %c0_11], %12 {strides = array<i32>} : memref<8x128xf32, #tpu.memory_space<vmem>>, vector<8x128xf32>,
    } else {
    }
    %c0 = arith.constant 0 : index
    %c0_1 = arith.constant 0 : index
    %3 = vector.load %arg7[%c0, %c0_1] : memref<8x128xf32, #tpu.memory_space<vmem>>, vector<8x128xf32>
    %c0_2 = arith.constant 0 : index
    %c0_3 = arith.constant 0 : index
    %4 = vector.load %arg3[%c0_2, %c0_3] : memref<8x512xbf16, #tpu.memory_space<vmem>>, vector<8x512xbf16>
    %c0_4 = arith.constant 0 : index
    %c0_5 = arith.constant 0 : index
    %5 = vector.load %arg4[%c0_4, %c0_5] : memref<512x128xbf16, #tpu.memory_space<vmem>>, vector<512x128xbf16>
    %cst = arith.constant dense<0.000000e+00> : vector<8x128xf32>
    %6 = tpu.matmul %4, %5, %cst {dimension_numbers = #tpu.dot_dimension_numbers<[1], [0], [0], [1], [0, 0, 1, 1], [], []>} : vector<8x512xbf16>, vector<512x128xbf16>, vector<8x128xf32> -> vector<8x128xf32>
    %7 = arith.addf %3, %6 : vector<8x128xf32>
    %c0_6 = arith.constant 0 : index
    %c0_7 = arith.constant 0 : index
    %8 = vector.load %arg7[%c0_6, %c0_7] : memref<8x128xf32, #tpu.memory_space<vmem>>, vector<8x128xf32>
    tpu.vector_store %arg7[%c0_6, %c0_7], %7 {strides = array<i32>} : memref<8x128xf32, #tpu.memory_space<vmem>>, vector<8x128xf32>,
    %c8_i32 = arith.constant 8 : i32
    %9 = arith.cmpi eq, %arg2, %c8_i32 : i32
    %10 = arith.extui %9 : i1 to i32
    %c0_i32_8 = arith.constant 0 : i32
    %11 = arith.cmpi ne, %10, %c0_i32_8 : i32
    scf.if %11 {
      %c0_9 = arith.constant 0 : index
      %c0_10 = arith.constant 0 : index
      %12 = vector.load %arg7[%c0_9, %c0_10] : memref<8x128xf32, #tpu.memory_space<vmem>>, vector<8x128xf32>
      %c0_11 = arith.constant 0 : index
      %c0_12 = arith.constant 0 : index
      %13 = vector.load %arg5[%c0_11, %c0_12] : memref<8x128xf32, #tpu.memory_space<vmem>>, vector<8x128xf32>
      tpu.vector_store %arg5[%c0_11, %c0_12], %12 {strides = array<i32>} : memref<8x128xf32, #tpu.memory_space<vmem>>, vector<8x128xf32>,
      %cst_13 = arith.constant 0.000000e+00 : f32
      %14 = vector.broadcast %cst_13 : f32 to vector<8x128xf32>
      %c0_14 = arith.constant 0 : index
      %c0_15 = arith.constant 0 : index
      %15 = vector.load %arg6[%c0_14, %c0_15] : memref<8x128xf32, #tpu.memory_space<vmem>>, vector<8x128xf32>
      tpu.vector_store %arg6[%c0_14, %c0_15], %14 {strides = array<i32>} : memref<8x128xf32, #tpu.memory_space<vmem>>, vector<8x128xf32>,
      %cst_16 = arith.constant dense<0.000000e+00> : vector<128xf32>
      %16 = vector.multi_reduction <add>, %12, %cst_16 [0] : vector<8x128xf32> to vector<128xf32>
      %17 = vector.shape_cast %16 : vector<128xf32> to vector<1x128xf32>
      %c0_17 = arith.constant 0 : index
      %c0_18 = arith.constant 0 : index
      %18 = vector.load %arg6[%c0_17, %c0_18] : memref<8x128xf32, #tpu.memory_space<vmem>>, vector<1x128xf32>
      tpu.vector_store %arg6[%c0_17, %c0_18], %17 {strides = array<i32>} : memref<8x128xf32, #tpu.memory_space<vmem>>, vector<1x128xf32>,
      %19 = arith.mulf %12, %12 : vector<8x128xf32>
      %cst_19 = arith.constant dense<0.000000e+00> : vector<128xf32>
      %20 = vector.multi_reduction <add>, %19, %cst_19 [0] : vector<8x128xf32> to vector<128xf32>
      %21 = vector.shape_cast %20 : vector<128xf32> to vector<1x128xf32>
      %c1 = arith.constant 1 : index
      %c0_20 = arith.constant 0 : index
      %22 = vector.load %arg6[%c1, %c0_20] : memref<8x128xf32, #tpu.memory_space<vmem>>, vector<1x128xf32>
      tpu.vector_store %arg6[%c1, %c0_20], %21 {strides = array<i32>} : memref<8x128xf32, #tpu.memory_space<vmem>>, vector<1x128xf32>,
    } else {
    }
    return
  }
  func.func @transform_0(%arg0: i32, %arg1: i32, %arg2: i32) -> (i32, i32) {
    %c0_i32 = arith.constant 0 : i32
    return %arg0, %arg2 : i32, i32
  }
  func.func @transform_1(%arg0: i32, %arg1: i32, %arg2: i32) -> (i32, i32) {
    %c0_i32 = arith.constant 0 : i32
    return %arg2, %arg1 : i32, i32
  }
  func.func @transform_2(%arg0: i32, %arg1: i32, %arg2: i32) -> (i32, i32) {
    %c0_i32 = arith.constant 0 : i32
    return %arg0, %arg1 : i32, i32
  }
  func.func @transform_3(%arg0: i32, %arg1: i32, %arg2: i32) -> (i32, i32) {
    %c0_i32 = arith.constant 0 : i32
    return %arg0, %arg1 : i32, i32
  }
}

module attributes {stable_mosaic.version = 11 : i64} {
  func.func @_mm_stats_kernel(%arg0: i32, %arg1: i32, %arg2: i32, %arg3: memref<8x256xbf16, #tpu.memory_space<vmem>>, %arg4: memref<256x128xbf16, #tpu.memory_space<vmem>>, %arg5: memref<8x128xf32, #tpu.memory_space<vmem>>, %arg6: memref<8x128xf32, #tpu.memory_space<vmem>>, %arg7: memref<8x128xf32, #tpu.memory_space<vmem>>) attributes {dimension_semantics = [#tpu.dimension_semantics<parallel>, #tpu.dimension_semantics<parallel>, #tpu.dimension_semantics<arbitrary>], iteration_bounds = array<i64: 1, 4, 1>, scalar_prefetch = 0 : i64, scratch_operands = 1 : i64, tpu.core_type = #tpu.core_type<tc>, window_params = [{transform_indices = @transform_0, window_bounds = array<i64: 8, 256>}, {transform_indices = @transform_1, window_bounds = array<i64: 256, 128>}, {transform_indices = @transform_2, window_bounds = array<i64: 8, 128>}, {transform_indices = @transform_3, window_bounds = array<i64: 8, 128>}]} {
    %c0_i32 = arith.constant 0 : i32
    %0 = arith.cmpi eq, %arg2, %c0_i32 : i32
    %1 = arith.extui %0 : i1 to i32
    %c0_i32_0 = arith.constant 0 : i32
    %2 = arith.cmpi ne, %1, %c0_i32_0 : i32
    scf.if %2 {
      %cst_10 = arith.constant 0.000000e+00 : f32
      %12 = vector.broadcast %cst_10 : f32 to vector<8x128xf32>
      %c0_11 = arith.constant 0 : index
      %c0_12 = arith.constant 0 : index
      %13 = vector.load %arg7[%c0_11, %c0_12] : memref<8x128xf32, #tpu.memory_space<vmem>>, vector<8x128xf32>
      tpu.vector_store %arg7[%c0_11, %c0_12], %12 {strides = array<i32>} : memref<8x128xf32, #tpu.memory_space<vmem>>, vector<8x128xf32>,
    } else {
    }
    %c0 = arith.constant 0 : index
    %c0_1 = arith.constant 0 : index
    %3 = vector.load %arg7[%c0, %c0_1] : memref<8x128xf32, #tpu.memory_space<vmem>>, vector<8x128xf32>
    %c0_2 = arith.constant 0 : index
    %c0_3 = arith.constant 0 : index
    %4 = vector.load %arg3[%c0_2, %c0_3] : memref<8x256xbf16, #tpu.memory_space<vmem>>, vector<8x256xbf16>
    %c0_4 = arith.constant 0 : index
    %c0_5 = arith.constant 0 : index
    %5 = vector.load %arg4[%c0_4, %c0_5] : memref<256x128xbf16, #tpu.memory_space<vmem>>, vector<256x128xbf16>
    %cst = arith.constant dense<0.000000e+00> : vector<8x128xf32>
    %6 = tpu.matmul %4, %5, %cst {dimension_numbers = #tpu.dot_dimension_numbers<[1], [0], [0], [1], [0, 0, 1, 1], [], []>} : vector<8x256xbf16>, vector<256x128xbf16>, vector<8x128xf32> -> vector<8x128xf32>
    %7 = arith.addf %3, %6 : vector<8x128xf32>
    %c0_6 = arith.constant 0 : index
    %c0_7 = arith.constant 0 : index
    %8 = vector.load %arg7[%c0_6, %c0_7] : memref<8x128xf32, #tpu.memory_space<vmem>>, vector<8x128xf32>
    tpu.vector_store %arg7[%c0_6, %c0_7], %7 {strides = array<i32>} : memref<8x128xf32, #tpu.memory_space<vmem>>, vector<8x128xf32>,
    %c0_i32_8 = arith.constant 0 : i32
    %9 = arith.cmpi eq, %arg2, %c0_i32_8 : i32
    %10 = arith.extui %9 : i1 to i32
    %c0_i32_9 = arith.constant 0 : i32
    %11 = arith.cmpi ne, %10, %c0_i32_9 : i32
    scf.if %11 {
      %c0_10 = arith.constant 0 : index
      %c0_11 = arith.constant 0 : index
      %12 = vector.load %arg7[%c0_10, %c0_11] : memref<8x128xf32, #tpu.memory_space<vmem>>, vector<8x128xf32>
      %c0_12 = arith.constant 0 : index
      %c0_13 = arith.constant 0 : index
      %13 = vector.load %arg5[%c0_12, %c0_13] : memref<8x128xf32, #tpu.memory_space<vmem>>, vector<8x128xf32>
      tpu.vector_store %arg5[%c0_12, %c0_13], %12 {strides = array<i32>} : memref<8x128xf32, #tpu.memory_space<vmem>>, vector<8x128xf32>,
      %cst_14 = arith.constant 0.000000e+00 : f32
      %14 = vector.broadcast %cst_14 : f32 to vector<8x128xf32>
      %c0_15 = arith.constant 0 : index
      %c0_16 = arith.constant 0 : index
      %15 = vector.load %arg6[%c0_15, %c0_16] : memref<8x128xf32, #tpu.memory_space<vmem>>, vector<8x128xf32>
      tpu.vector_store %arg6[%c0_15, %c0_16], %14 {strides = array<i32>} : memref<8x128xf32, #tpu.memory_space<vmem>>, vector<8x128xf32>,
      %cst_17 = arith.constant dense<0.000000e+00> : vector<128xf32>
      %16 = vector.multi_reduction <add>, %12, %cst_17 [0] : vector<8x128xf32> to vector<128xf32>
      %17 = vector.shape_cast %16 : vector<128xf32> to vector<1x128xf32>
      %c0_18 = arith.constant 0 : index
      %c0_19 = arith.constant 0 : index
      %18 = vector.load %arg6[%c0_18, %c0_19] : memref<8x128xf32, #tpu.memory_space<vmem>>, vector<1x128xf32>
      tpu.vector_store %arg6[%c0_18, %c0_19], %17 {strides = array<i32>} : memref<8x128xf32, #tpu.memory_space<vmem>>, vector<1x128xf32>,
      %19 = arith.mulf %12, %12 : vector<8x128xf32>
      %cst_20 = arith.constant dense<0.000000e+00> : vector<128xf32>
      %20 = vector.multi_reduction <add>, %19, %cst_20 [0] : vector<8x128xf32> to vector<128xf32>
      %21 = vector.shape_cast %20 : vector<128xf32> to vector<1x128xf32>
      %c1 = arith.constant 1 : index
      %c0_21 = arith.constant 0 : index
      %22 = vector.load %arg6[%c1, %c0_21] : memref<8x128xf32, #tpu.memory_space<vmem>>, vector<1x128xf32>
      tpu.vector_store %arg6[%c1, %c0_21], %21 {strides = array<i32>} : memref<8x128xf32, #tpu.memory_space<vmem>>, vector<1x128xf32>,
    } else {
    }
    return
  }
  func.func @transform_0(%arg0: i32, %arg1: i32, %arg2: i32) -> (i32, i32) {
    %c0_i32 = arith.constant 0 : i32
    return %arg0, %arg2 : i32, i32
  }
  func.func @transform_1(%arg0: i32, %arg1: i32, %arg2: i32) -> (i32, i32) {
    %c0_i32 = arith.constant 0 : i32
    return %arg2, %arg1 : i32, i32
  }
  func.func @transform_2(%arg0: i32, %arg1: i32, %arg2: i32) -> (i32, i32) {
    %c0_i32 = arith.constant 0 : i32
    return %arg0, %arg1 : i32, i32
  }
  func.func @transform_3(%arg0: i32, %arg1: i32, %arg2: i32) -> (i32, i32) {
    %c0_i32 = arith.constant 0 : i32
    return %arg0, %arg1 : i32, i32
  }
}

module attributes {stable_mosaic.version = 11 : i64} {
  func.func @_affine2_add_relu_kernel(%arg0: i32, %arg1: memref<8x512xf32, #tpu.memory_space<vmem>>, %arg2: memref<1x512xf32, #tpu.memory_space<vmem>>, %arg3: memref<1x512xf32, #tpu.memory_space<vmem>>, %arg4: memref<8x512xf32, #tpu.memory_space<vmem>>, %arg5: memref<1x512xf32, #tpu.memory_space<vmem>>, %arg6: memref<1x512xf32, #tpu.memory_space<vmem>>, %arg7: memref<8x512xf32, #tpu.memory_space<vmem>>) attributes {dimension_semantics = [#tpu.dimension_semantics<parallel>], iteration_bounds = array<i64: 1>, scalar_prefetch = 0 : i64, scratch_operands = 0 : i64, tpu.core_type = #tpu.core_type<tc>, window_params = [{transform_indices = @transform_0, window_bounds = array<i64: 8, 512>}, {pipeline_mode = #tpu.pipeline_mode<synchronous>, transform_indices = @transform_1, window_bounds = array<i64: 1, 512>}, {pipeline_mode = #tpu.pipeline_mode<synchronous>, transform_indices = @transform_2, window_bounds = array<i64: 1, 512>}, {transform_indices = @transform_3, window_bounds = array<i64: 8, 512>}, {pipeline_mode = #tpu.pipeline_mode<synchronous>, transform_indices = @transform_4, window_bounds = array<i64: 1, 512>}, {pipeline_mode = #tpu.pipeline_mode<synchronous>, transform_indices = @transform_5, window_bounds = array<i64: 1, 512>}, {transform_indices = @transform_6, window_bounds = array<i64: 8, 512>}]} {
    %c0 = arith.constant 0 : index
    %c0_0 = arith.constant 0 : index
    %0 = vector.load %arg1[%c0, %c0_0] : memref<8x512xf32, #tpu.memory_space<vmem>>, vector<8x512xf32>
    %c0_1 = arith.constant 0 : index
    %c0_2 = arith.constant 0 : index
    %1 = vector.load %arg2[%c0_1, %c0_2] : memref<1x512xf32, #tpu.memory_space<vmem>>, vector<1x512xf32>
    %2 = vector.broadcast %1 : vector<1x512xf32> to vector<8x512xf32>
    %3 = arith.mulf %0, %2 : vector<8x512xf32>
    %c0_3 = arith.constant 0 : index
    %c0_4 = arith.constant 0 : index
    %4 = vector.load %arg3[%c0_3, %c0_4] : memref<1x512xf32, #tpu.memory_space<vmem>>, vector<1x512xf32>
    %5 = vector.broadcast %4 : vector<1x512xf32> to vector<8x512xf32>
    %6 = arith.addf %3, %5 : vector<8x512xf32>
    %c0_5 = arith.constant 0 : index
    %c0_6 = arith.constant 0 : index
    %7 = vector.load %arg4[%c0_5, %c0_6] : memref<8x512xf32, #tpu.memory_space<vmem>>, vector<8x512xf32>
    %c0_7 = arith.constant 0 : index
    %c0_8 = arith.constant 0 : index
    %8 = vector.load %arg5[%c0_7, %c0_8] : memref<1x512xf32, #tpu.memory_space<vmem>>, vector<1x512xf32>
    %9 = vector.broadcast %8 : vector<1x512xf32> to vector<8x512xf32>
    %10 = arith.mulf %7, %9 : vector<8x512xf32>
    %11 = arith.addf %6, %10 : vector<8x512xf32>
    %c0_9 = arith.constant 0 : index
    %c0_10 = arith.constant 0 : index
    %12 = vector.load %arg6[%c0_9, %c0_10] : memref<1x512xf32, #tpu.memory_space<vmem>>, vector<1x512xf32>
    %13 = vector.broadcast %12 : vector<1x512xf32> to vector<8x512xf32>
    %14 = arith.addf %11, %13 : vector<8x512xf32>
    %cst = arith.constant 0.000000e+00 : f32
    %15 = vector.broadcast %cst : f32 to vector<8x512xf32>
    %16 = arith.maximumf %14, %15 : vector<8x512xf32>
    %c0_11 = arith.constant 0 : index
    %c0_12 = arith.constant 0 : index
    %17 = vector.load %arg7[%c0_11, %c0_12] : memref<8x512xf32, #tpu.memory_space<vmem>>, vector<8x512xf32>
    tpu.vector_store %arg7[%c0_11, %c0_12], %16 {strides = array<i32>} : memref<8x512xf32, #tpu.memory_space<vmem>>, vector<8x512xf32>,
    return
  }
  func.func @transform_0(%arg0: i32) -> (i32, i32) {
    %c0_i32 = arith.constant 0 : i32
    %c0_i32_0 = arith.constant 0 : i32
    return %arg0, %c0_i32 : i32, i32
  }
  func.func @transform_1(%arg0: i32) -> (i32, i32) {
    %c0_i32 = arith.constant 0 : i32
    %c0_i32_0 = arith.constant 0 : i32
    %c0_i32_1 = arith.constant 0 : i32
    return %c0_i32, %c0_i32_0 : i32, i32
  }
  func.func @transform_2(%arg0: i32) -> (i32, i32) {
    %c0_i32 = arith.constant 0 : i32
    %c0_i32_0 = arith.constant 0 : i32
    %c0_i32_1 = arith.constant 0 : i32
    return %c0_i32, %c0_i32_0 : i32, i32
  }
  func.func @transform_3(%arg0: i32) -> (i32, i32) {
    %c0_i32 = arith.constant 0 : i32
    %c0_i32_0 = arith.constant 0 : i32
    return %arg0, %c0_i32 : i32, i32
  }
  func.func @transform_4(%arg0: i32) -> (i32, i32) {
    %c0_i32 = arith.constant 0 : i32
    %c0_i32_0 = arith.constant 0 : i32
    %c0_i32_1 = arith.constant 0 : i32
    return %c0_i32, %c0_i32_0 : i32, i32
  }
  func.func @transform_5(%arg0: i32) -> (i32, i32) {
    %c0_i32 = arith.constant 0 : i32
    %c0_i32_0 = arith.constant 0 : i32
    %c0_i32_1 = arith.constant 0 : i32
    return %c0_i32, %c0_i32_0 : i32, i32
  }
  func.func @transform_6(%arg0: i32) -> (i32, i32) {
    %c0_i32 = arith.constant 0 : i32
    %c0_i32_0 = arith.constant 0 : i32
    return %arg0, %c0_i32 : i32, i32
  }
}

module attributes {stable_mosaic.version = 11 : i64} {
  func.func @_affine_add_relu_kernel(%arg0: i32, %arg1: memref<8x512xf32, #tpu.memory_space<vmem>>, %arg2: memref<1x512xf32, #tpu.memory_space<vmem>>, %arg3: memref<1x512xf32, #tpu.memory_space<vmem>>, %arg4: memref<8x512xf32, #tpu.memory_space<vmem>>, %arg5: memref<8x512xf32, #tpu.memory_space<vmem>>) attributes {dimension_semantics = [#tpu.dimension_semantics<parallel>], iteration_bounds = array<i64: 1>, scalar_prefetch = 0 : i64, scratch_operands = 0 : i64, tpu.core_type = #tpu.core_type<tc>, window_params = [{transform_indices = @transform_0, window_bounds = array<i64: 8, 512>}, {pipeline_mode = #tpu.pipeline_mode<synchronous>, transform_indices = @transform_1, window_bounds = array<i64: 1, 512>}, {pipeline_mode = #tpu.pipeline_mode<synchronous>, transform_indices = @transform_2, window_bounds = array<i64: 1, 512>}, {transform_indices = @transform_3, window_bounds = array<i64: 8, 512>}, {transform_indices = @transform_4, window_bounds = array<i64: 8, 512>}]} {
    %c0 = arith.constant 0 : index
    %c0_0 = arith.constant 0 : index
    %0 = vector.load %arg1[%c0, %c0_0] : memref<8x512xf32, #tpu.memory_space<vmem>>, vector<8x512xf32>
    %c0_1 = arith.constant 0 : index
    %c0_2 = arith.constant 0 : index
    %1 = vector.load %arg2[%c0_1, %c0_2] : memref<1x512xf32, #tpu.memory_space<vmem>>, vector<1x512xf32>
    %2 = vector.broadcast %1 : vector<1x512xf32> to vector<8x512xf32>
    %3 = arith.mulf %0, %2 : vector<8x512xf32>
    %c0_3 = arith.constant 0 : index
    %c0_4 = arith.constant 0 : index
    %4 = vector.load %arg3[%c0_3, %c0_4] : memref<1x512xf32, #tpu.memory_space<vmem>>, vector<1x512xf32>
    %5 = vector.broadcast %4 : vector<1x512xf32> to vector<8x512xf32>
    %6 = arith.addf %3, %5 : vector<8x512xf32>
    %c0_5 = arith.constant 0 : index
    %c0_6 = arith.constant 0 : index
    %7 = vector.load %arg4[%c0_5, %c0_6] : memref<8x512xf32, #tpu.memory_space<vmem>>, vector<8x512xf32>
    %8 = arith.addf %6, %7 : vector<8x512xf32>
    %cst = arith.constant 0.000000e+00 : f32
    %9 = vector.broadcast %cst : f32 to vector<8x512xf32>
    %10 = arith.maximumf %8, %9 : vector<8x512xf32>
    %c0_7 = arith.constant 0 : index
    %c0_8 = arith.constant 0 : index
    %11 = vector.load %arg5[%c0_7, %c0_8] : memref<8x512xf32, #tpu.memory_space<vmem>>, vector<8x512xf32>
    tpu.vector_store %arg5[%c0_7, %c0_8], %10 {strides = array<i32>} : memref<8x512xf32, #tpu.memory_space<vmem>>, vector<8x512xf32>,
    return
  }
  func.func @transform_0(%arg0: i32) -> (i32, i32) {
    %c0_i32 = arith.constant 0 : i32
    %c0_i32_0 = arith.constant 0 : i32
    return %arg0, %c0_i32 : i32, i32
  }
  func.func @transform_1(%arg0: i32) -> (i32, i32) {
    %c0_i32 = arith.constant 0 : i32
    %c0_i32_0 = arith.constant 0 : i32
    %c0_i32_1 = arith.constant 0 : i32
    return %c0_i32, %c0_i32_0 : i32, i32
  }
  func.func @transform_2(%arg0: i32) -> (i32, i32) {
    %c0_i32 = arith.constant 0 : i32
    %c0_i32_0 = arith.constant 0 : i32
    %c0_i32_1 = arith.constant 0 : i32
    return %c0_i32, %c0_i32_0 : i32, i32
  }
  func.func @transform_3(%arg0: i32) -> (i32, i32) {
    %c0_i32 = arith.constant 0 : i32
    %c0_i32_0 = arith.constant 0 : i32
    return %arg0, %c0_i32 : i32, i32
  }
  func.func @transform_4(%arg0: i32) -> (i32, i32) {
    %c0_i32 = arith.constant 0 : i32
    %c0_i32_0 = arith.constant 0 : i32
    return %arg0, %c0_i32 : i32, i32
  }
}

</mosaic_0001>

<bundles_post_ra>
// kernel: _lambda_.39
= control target key start
LH: loop header
LB: loop body
LE: loop exit
PB: predicated region body
PF: predicated region fallthrough
CT: control target
= control target key end

     0   :  { %s254_s0 = inlined_call_operand.vmem [shape: f32[128,128], index: 0, kind: input, shape index: {}]   ;;  %s255_s1 = inlined_call_operand.vmem [shape: f32[1,128], index: 1, kind: input, shape index: {}]   ;;  %s256_s2 = inlined_call_operand.vmem [shape: f32[1,128], index: 2, kind: input, shape index: {}]   ;;  %s257_s3 = inlined_call_operand.vmem [shape: f32[128,128], index: 3, kind: output, shape index: {}]  }
   0x1   :  { %v14_v0 = vld [vmem:[%s254_s0] sm:$0xff]  ;;  %v15_v4 = vld [vmem:[%s254_s0 + $0x8] sm:$0xff]  ;;  %v16_v5 = vld [vmem:[%s254_s0 + $0x10] sm:$0xff] }
   0x2   :  { %v112_v1 = vld [vmem:[%s255_s1] ss:$0 sm:$0xff]  ;;  %v17_v6 = vld [vmem:[%s254_s0 + $0x18] sm:$0xff]  ;;  %v19_v11 = vld [vmem:[%s254_s0 + $0x28] sm:$0xff] }
   0x3   :  { %v143_v2 = vld [vmem:[%s256_s2] ss:$0 sm:$0xff]  ;;  %v37_v3 = vmul.f32 %v112_v1, %v14_v0  ;;  %v38_v7 = vmul.f32 %v112_v1, %v15_v4  ;;  %v39_v8 = vmul.f32 %v112_v1, %v16_v5  ;;  %v40_v9 = vmul.f32 %v112_v1, %v17_v6  ;;  %v20_v12 = vld [vmem:[%s254_s0 + $0x30] sm:$0xff]  ;;  %v21_v17 = vld [vmem:[%s254_s0 + $0x38] sm:$0xff] }
   0x4   :  { %v18_v10 = vld [vmem:[%s254_s0 + $0x20] sm:$0xff]  ;;  %v42_v15 = vmul.f32 %v112_v1, %v19_v11  ;;  %v43_v16 = vmul.f32 %v112_v1, %v20_v12  ;;  %v44_v21 = vmul.f32 %v112_v1, %v21_v17  ;;  %v23_v27 = vld [vmem:[%s254_s0 + $0x48] sm:$0xff]  ;;  %v24_v28 = vld [vmem:[%s254_s0 + $0x50] sm:$0xff] }
   0x5   :  { %v60_v13 = vadd.f32 %v143_v2, %v37_v3  ;;  %v41_v14 = vmul.f32 %v112_v1, %v18_v10  ;;  %v61_v18 = vadd.f32 %v143_v2, %v38_v7  ;;  %v62_v19 = vadd.f32 %v143_v2, %v39_v8  ;;  %v22_v22 = vld [vmem:[%s254_s0 + $0x40] sm:$0xff]  ;;  %v25_v29 = vld [vmem:[%s254_s0 + $0x58] sm:$0xff]  ;;  %v27_v35 = vld [vmem:[%s254_s0 + $0x68] sm:$0xff] }
   0x6   :  { %v63_v20 = vadd.f32 %v143_v2, %v40_v9  ;;  %v65_v25 = vadd.f32 %v143_v2, %v42_v15  ;;  %v66_v26 = vadd.f32 %v143_v2, %v43_v16  ;;  %v67_v33 = vadd.f32 %v143_v2, %v44_v21  ;;  %v26_v34 = vld [vmem:[%s254_s0 + $0x60] sm:$0xff]  ;;  %v28_v36 = vld [vmem:[%s254_s0 + $0x70] sm:$0xff]  ;;  %v29_v41 = vld [vmem:[%s254_s0 + $0x78] sm:$0xff] }
   0x7   :  { %v76_v23 = vmax.f32 %v60_v13, 0.0  ;;  %v64_v24 = vadd.f32 %v143_v2, %v41_v14  ;;  %v77_v30 = vmax.f32 %v61_v18, 0.0  ;;  %v78_v31 = vmax.f32 %v62_v19, 0.0 }
   0x8   :  { %v79_v32 = vmax.f32 %v63_v20, 0.0  ;;  %v81_v38 = vmax.f32 %v65_v25, 0.0  ;;  %v82_v39 = vmax.f32 %v66_v26, 0.0  ;;  %v45_v40 = vmul.f32 %v112_v1, %v22_v22 }
   0x9   :  { %92 = vst [vmem:[%s257_s3] sm:$0xff] %v76_v23  ;;  %v80_v37 = vmax.f32 %v64_v24, 0.0  ;;  %93 = vst [vmem:[%s257_s3 + $0x8] sm:$0xff] %v77_v30  ;;  %v83_v42 = vmax.f32 %v67_v33, 0.0  ;;  %v46_v43 = vmul.f32 %v112_v1, %v23_v27  ;;  %v47_v44 = vmul.f32 %v112_v1, %v24_v28 }
   0xa   :  { %94 = vst [vmem:[%s257_s3 + $0x10] sm:$0xff] %v78_v31  ;;  %95 = vst [vmem:[%s257_s3 + $0x18] sm:$0xff] %v79_v32  ;;  %v48_v45 = vmul.f32 %v112_v1, %v25_v29  ;;  %v68_v46 = vadd.f32 %v143_v2, %v45_v40  ;;  %v49_v47 = vmul.f32 %v112_v1, %v26_v34 }
   0xb   :  { %96 = vst [vmem:[%s257_s3 + $0x20] sm:$0xff] %v80_v37  ;;  %97 = vst [vmem:[%s257_s3 + $0x28] sm:$0xff] %v81_v38  ;;  %v50_v48 = vmul.f32 %v112_v1, %v27_v35  ;;  %v51_v49 = vmul.f32 %v112_v1, %v28_v36  ;;  %v69_v50 = vadd.f32 %v143_v2, %v46_v43 }
   0xc   :  { %98 = vst [vmem:[%s257_s3 + $0x30] sm:$0xff] %v82_v39  ;;  %99 = vst [vmem:[%s257_s3 + $0x38] sm:$0xff] %v83_v42  ;;  %v70_v51 = vadd.f32 %v143_v2, %v47_v44  ;;  %v71_v52 = vadd.f32 %v143_v2, %v48_v45  ;;  %v52_v53 = vmul.f32 %v112_v1, %v29_v41  ;;  %v84_v54 = vmax.f32 %v68_v46, 0.0 }
   0xd   :  { %v72_v55 = vadd.f32 %v143_v2, %v49_v47  ;;  %v73_v56 = vadd.f32 %v143_v2, %v50_v48  ;;  %v74_v57 = vadd.f32 %v143_v2, %v51_v49  ;;  %v85_v58 = vmax.f32 %v69_v50, 0.0 }
   0xe   :  { %v86_v59 = vmax.f32 %v70_v51, 0.0  ;;  %v87_v60 = vmax.f32 %v71_v52, 0.0  ;;  %v75_v61 = vadd.f32 %v143_v2, %v52_v53  ;;  %100 = vst [vmem:[%s257_s3 + $0x40] sm:$0xff] %v84_v54 }
   0xf   :  { %v88_v62 = vmax.f32 %v72_v55, 0.0  ;;  %v89_v63 = vmax.f32 %v73_v56, 0.0  ;;  %v90_v0 = vmax.f32 %v74_v57, 0.0  ;;  %101 = vst [vmem:[%s257_s3 + $0x48] sm:$0xff] %v85_v58 }
  0x10   :  { %102 = vst [vmem:[%s257_s3 + $0x50] sm:$0xff] %v86_v59  ;;  %103 = vst [vmem:[%s257_s3 + $0x58] sm:$0xff] %v87_v60  ;;  %v91_v1 = vmax.f32 %v75_v61, 0.0 }
  0x11   :  { %104 = vst [vmem:[%s257_s3 + $0x60] sm:$0xff] %v88_v62  ;;  %105 = vst [vmem:[%s257_s3 + $0x68] sm:$0xff] %v89_v63 }
  0x12   :  { %106 = vst [vmem:[%s257_s3 + $0x70] sm:$0xff] %v90_v0  ;;  %107 = vst [vmem:[%s257_s3 + $0x78] sm:$0xff] %v91_v1 }

// kernel: _lambda_.38
= control target key start
LH: loop header
LB: loop body
LE: loop exit
PB: predicated region body
PF: predicated region fallthrough
CT: control target
= control target key end

     0   :  { %v660_v32 = vmov 0.0   ;;  %s852_s1 = inlined_call_operand.vmem [shape: bf16[256,128], index: 1, kind: input, shape index: {}]   ;;  %s853_s0 = inlined_call_operand.vmem [shape: bf16[128,256], index: 0, kind: input, shape index: {}]   ;;  %s854_s3 = inlined_call_operand.vmem [shape: f32[8,128], index: 3, kind: output, shape index: {1}]   ;;  %s855_s2 = inlined_call_operand.vmem [shape: f32[128,128], index: 2, kind: output, shape index: {0}]  }
   0x1   :  { %v620_v0 = vld [vmem:[%s852_s1 + $0x40] sm:$0xff]   ;;  %v622_v2 = vld [vmem:[%s852_s1 + $0x48] sm:$0xff]   ;;  %v624_v4 = vld [vmem:[%s852_s1 + $0x50] sm:$0xff]   ;;  %438 = vst [vmem:[%s854_s3] sm:$0xff] %v660_v32 }
   0x2   :  { %v621_v1 = vld [vmem:[%s852_s1] sm:$0xff]   ;;  %539 = vmatprep.subr.bf16.mxu0 %v620_v0  ;;  %603 = vmatprep.subr.bf16.mxu1 %v620_v0  ;;  %v623_v3 = vld [vmem:[%s852_s1 + $0x8] sm:$0xff]   ;;  %v625_v5 = vld [vmem:[%s852_s1 + $0x10] sm:$0xff]  }
   0x3   :  { %540 = vmatpush3.bf16.msra.mxu0 %v621_v1  ;;  %611 = vmatpush3.bf16.msra.mxu1 %v621_v1  ;;  %v626_v6 = vld [vmem:[%s852_s1 + $0x58] sm:$0xff]   ;;  %v628_v8 = vld [vmem:[%s852_s1 + $0x60] sm:$0xff]   ;;  %v630_v10 = vld [vmem:[%s852_s1 + $0x68] sm:$0xff]  }
   0x4   :  { %541 = vmatprep.subr.bf16.mxu0 %v622_v2  ;;  %604 = vmatprep.subr.bf16.mxu1 %v622_v2  ;;  %v627_v7 = vld [vmem:[%s852_s1 + $0x18] sm:$0xff]   ;;  %v629_v9 = vld [vmem:[%s852_s1 + $0x20] sm:$0xff]   ;;  %v631_v12 = vld [vmem:[%s852_s1 + $0x28] sm:$0xff]  }
   0x5   :  { %v638_v11 = vld [vmem:[%s853_s0 + $0x4] ss:$8 sps:$4 sm:$0xff]   ;;  %v632_v14 = vld [vmem:[%s852_s1 + $0x70] sm:$0xff]   ;;  %v634_v16 = vld [vmem:[%s852_s1 + $0x78] sm:$0xff]  }
   0x6   :  { %v644_v13 = vld [vmem:[%s853_s0 + $0x44] ss:$8 sps:$4 sm:$0xff]   ;;  %306 = vmatprep.mubr.bf16.mxu0 %v638_v11  ;;  %v633_v15 = vld [vmem:[%s852_s1 + $0x30] sm:$0xff]   ;;  %v635_v17 = vld [vmem:[%s852_s1 + $0x38] sm:$0xff]  }
   0x7   :  { %542 = vmatpush3.bf16.msra.mxu0 %v623_v3  ;;  %612 = vmatpush3.bf16.msra.mxu1 %v623_v3  ;;  %v636_v18 = vld [vmem:[%s853_s0] ss:$8 sps:$4 sm:$0xff]   ;;  %v639_v20 = vld [vmem:[%s853_s0 + $0x14] ss:$8 sps:$4 sm:$0xff]   ;;  %v641_v22 = vld [vmem:[%s853_s0 + $0x10] ss:$8 sps:$4 sm:$0xff]  }
   0x8   :  { %543 = vmatprep.subr.bf16.mxu0 %v624_v4  ;;  %605 = vmatprep.subr.bf16.mxu1 %v624_v4  ;;  %v642_v19 = vld [vmem:[%s853_s0 + $0x40] ss:$8 sps:$4 sm:$0xff]   ;;  %v648_v21 = vld [vmem:[%s853_s0 + $0x54] ss:$8 sps:$4 sm:$0xff]   ;;  %v650_v23 = vld [vmem:[%s853_s0 + $0x50] ss:$8 sps:$4 sm:$0xff]  }
   0x9   :  { %338 = vmatprep.mubr.bf16.mxu1 %v644_v13  ;;  %v645_v24 = vld [vmem:[%s853_s0 + $0x24] ss:$8 sps:$4 sm:$0xff]   ;;  %v647_v26 = vld [vmem:[%s853_s0 + $0x20] ss:$8 sps:$4 sm:$0xff]   ;;  %v651_v28 = vld [vmem:[%s853_s0 + $0x34] ss:$8 sps:$4 sm:$0xff]  }
   0xa   :  { %v654_v25 = vld [vmem:[%s853_s0 + $0x64] ss:$8 sps:$4 sm:$0xff]   ;;  %v656_v27 = vld [vmem:[%s853_s0 + $0x60] ss:$8 sps:$4 sm:$0xff]   ;;  %v657_v29 = vld [vmem:[%s853_s0 + $0x74] ss:$8 sps:$4 sm:$0xff]  }
   0xb   :  { %544 = vmatpush3.bf16.msra.mxu0 %v625_v5  ;;  %613 = vmatpush3.bf16.msra.mxu1 %v625_v5  ;;  %v653_v30 = vld [vmem:[%s853_s0 + $0x30] ss:$8 sps:$4 sm:$0xff]  }
   0xc   :  { %545 = vmatprep.subr.bf16.mxu0 %v626_v6  ;;  %606 = vmatprep.subr.bf16.mxu1 %v626_v6  ;;  %v659_v31 = vld [vmem:[%s853_s0 + $0x70] ss:$8 sps:$4 sm:$0xff]  }
   0xf   :  { %546 = vmatpush3.bf16.msra.mxu0 %v627_v7  ;;  %614 = vmatpush3.bf16.msra.mxu1 %v627_v7 }
  0x10   :  { %547 = vmatprep.subr.bf16.mxu0 %v628_v8  ;;  %607 = vmatprep.subr.bf16.mxu1 %v628_v8 }
  0x13   :  { %548 = vmatpush3.bf16.msra.mxu0 %v629_v9  ;;  %615 = vmatpush3.bf16.msra.mxu1 %v629_v9 }
  0x14   :  { %549 = vmatprep.subr.bf16.mxu0 %v630_v10  ;;  %608 = vmatprep.subr.bf16.mxu1 %v630_v10 }
  0x17   :  { %550 = vmatpush3.bf16.msra.mxu0 %v631_v12  ;;  %616 = vmatpush3.bf16.msra.mxu1 %v631_v12 }
  0x18   :  { %551 = vmatprep.subr.bf16.mxu0 %v632_v14  ;;  %609 = vmatprep.subr.bf16.mxu1 %v632_v14 }
  0x1b   :  { %552 = vmatpush3.bf16.msra.mxu0 %v633_v15  ;;  %617 = vmatpush3.bf16.msra.mxu1 %v633_v15 }
  0x1c   :  { %553 = vmatprep.subr.bf16.mxu0 %v634_v16  ;;  %610 = vmatprep.subr.bf16.mxu1 %v634_v16 }
  0x1f   :  { %554 = vmatpush3.bf16.msra.mxu0 %v635_v17  ;;  %618 = vmatpush3.bf16.msra.mxu1 %v635_v17 }
  0x22   :  { %307 = vmatmul.mubr.bf16.vlgmr.msra.gmra.mrb[0].mxu0 %v636_v18  ;;  %339 = vmatmul.mubr.bf16.vlgmr.msra.gmra.mrb[0].mxu1 %v642_v19 }
  0x23   :  { %314 = vmatprep.mubr.bf16.mxu0 %v639_v20  ;;  %346 = vmatprep.mubr.bf16.mxu1 %v648_v21 }
  0x2a   :  { %315 = vmatmul.mubr.bf16.gmra.mrb[4].mxu0 %v641_v22  ;;  %347 = vmatmul.mubr.bf16.gmra.mrb[4].mxu1 %v650_v23 }
  0x2b   :  { %322 = vmatprep.mubr.bf16.mxu0 %v645_v24  ;;  %354 = vmatprep.mubr.bf16.mxu1 %v654_v25 }
  0x32   :  { %323 = vmatmul.mubr.bf16.gmra.mrb[8].mxu0 %v647_v26  ;;  %355 = vmatmul.mubr.bf16.gmra.mrb[8].mxu1 %v656_v27 }
  0x33   :  { %330 = vmatprep.mubr.bf16.mxu0 %v651_v28  ;;  %362 = vmatprep.mubr.bf16.mxu1 %v657_v29 }
  0x3a   :  { %331 = vmatmul.mubr.bf16.gmra.mrb[12].mxu0 %v653_v30  ;;  %363 = vmatmul.mubr.bf16.gmra.mrb[12].mxu1 %v659_v31 }
  0xf5   :  { %v555_v33 = vpop.f32.mrb[0].mxu0  ;;  %v579_v34 = vpop.f32.mrb[0].mxu1 }
  0xf6   :  { %v556_v35 = vpop.f32.mrb[1].mxu0  ;;  %v580_v36 = vpop.f32.mrb[1].mxu1 }
  0xf7   :  { %v557_v37 = vadd.f32 %v556_v35, %v555_v33  ;;  %v558_v38 = vpop.f32.mrb[2].mxu0  ;;  %v780_v39 = vadd.f32 %v580_v36, %v579_v34  ;;  %v582_v40 = vpop.f32.mrb[2].mxu1 }
  0xf8   :  { %v559_v41 = vpop.f32.mrb[3].mxu0  ;;  %v583_v42 = vpop.f32.mrb[3].mxu1 }
  0xf9   :  { %422 = vst [vmem:[%s855_s2] sm:$0xff] %v557_v37  ;;  %v560_v43 = vadd.f32 %v559_v41, %v558_v38  ;;  %430 = vst [vmem:[%s855_s2 + $0x40] sm:$0xff] %v780_v39  ;;  %v789_v44 = vadd.f32 %v583_v42, %v582_v40  ;;  %v461_v45 = vmul.f32 %v557_v37, %v557_v37 }
  0xfa   :  { %v469_v38 = vmul.f32 %v780_v39, %v780_v39 }
  0xfb   :  { %423 = vst [vmem:[%s855_s2 + $0x8] sm:$0xff] %v560_v43  ;;  %v439_v46 = vadd.f32 %v560_v43, %v557_v37  ;;  %v462_v47 = vmul.f32 %v560_v43, %v560_v43  ;;  %431 = vst [vmem:[%s855_s2 + $0x48] sm:$0xff] %v789_v44  ;;  %v470_v42 = vmul.f32 %v789_v44, %v789_v44 }
  0xfd   :  { %v477_v48 = vadd.f32 %v462_v47, %v461_v45  ;;  %v561_v49 = vpop.f32.mrb[4].mxu0  ;;  %v585_v50 = vpop.f32.mrb[4].mxu1 }
  0xfe   :  { %v562_v51 = vpop.f32.mrb[5].mxu0  ;;  %v586_v52 = vpop.f32.mrb[5].mxu1 }
  0xff   :  { %v563_v53 = vadd.f32 %v562_v51, %v561_v49  ;;  %v564_v54 = vpop.f32.mrb[6].mxu0  ;;  %v798_v55 = vadd.f32 %v586_v52, %v585_v50  ;;  %v588_v56 = vpop.f32.mrb[6].mxu1 }
 0x100   :  { %v565_v57 = vpop.f32.mrb[7].mxu0  ;;  %v589_v58 = vpop.f32.mrb[7].mxu1 }
 0x101   :  { %424 = vst [vmem:[%s855_s2 + $0x10] sm:$0xff] %v563_v53  ;;  %v440_v59 = vadd.f32 %v563_v53, %v439_v46  ;;  %v463_v60 = vmul.f32 %v563_v53, %v563_v53  ;;  %v566_v61 = vadd.f32 %v565_v57, %v564_v54  ;;  %432 = vst [vmem:[%s855_s2 + $0x50] sm:$0xff] %v798_v55 }
 0x102   :  { %v590_v62 = vadd.f32 %v589_v58, %v588_v56  ;;  %v471_v46 = vmul.f32 %v798_v55, %v798_v55 }
 0x103   :  { %v478_v63 = vadd.f32 %v477_v48, %v463_v60  ;;  %425 = vst [vmem:[%s855_s2 + $0x18] sm:$0xff] %v566_v61  ;;  %v441_v0 = vadd.f32 %v566_v61, %v440_v59  ;;  %v464_v1 = vmul.f32 %v566_v61, %v566_v61 }
 0x104   :  { %433 = vst [vmem:[%s855_s2 + $0x58] sm:$0xff] %v590_v62  ;;  %v472_v49 = vmul.f32 %v590_v62, %v590_v62 }
 0x105   :  { %v479_v2 = vadd.f32 %v478_v63, %v464_v1  ;;  %v567_v3 = vpop.f32.mrb[8].mxu0  ;;  %v591_v4 = vpop.f32.mrb[8].mxu1 }
 0x106   :  { %v568_v5 = vpop.f32.mrb[9].mxu0  ;;  %v592_v6 = vpop.f32.mrb[9].mxu1 }
 0x107   :  { %v569_v7 = vadd.f32 %v568_v5, %v567_v3  ;;  %v570_v8 = vpop.f32.mrb[10].mxu0  ;;  %v593_v9 = vadd.f32 %v592_v6, %v591_v4  ;;  %v594_v10 = vpop.f32.mrb[10].mxu1 }
 0x108   :  { %v571_v11 = vpop.f32.mrb[11].mxu0  ;;  %v595_v12 = vpop.f32.mrb[11].mxu1 }
 0x109   :  { %426 = vst [vmem:[%s855_s2 + $0x20] sm:$0xff] %v569_v7  ;;  %v442_v13 = vadd.f32 %v569_v7, %v441_v0  ;;  %v465_v14 = vmul.f32 %v569_v7, %v569_v7  ;;  %v572_v15 = vadd.f32 %v571_v11, %v570_v8  ;;  %434 = vst [vmem:[%s855_s2 + $0x60] sm:$0xff] %v593_v9 }
 0x10a   :  { %v596_v16 = vadd.f32 %v595_v12, %v594_v10  ;;  %v473_v53 = vmul.f32 %v593_v9, %v593_v9 }
 0x10b   :  { %v480_v17 = vadd.f32 %v479_v2, %v465_v14  ;;  %427 = vst [vmem:[%s855_s2 + $0x28] sm:$0xff] %v572_v15  ;;  %v443_v18 = vadd.f32 %v572_v15, %v442_v13  ;;  %v466_v19 = vmul.f32 %v572_v15, %v572_v15 }
 0x10c   :  { %435 = vst [vmem:[%s855_s2 + $0x68] sm:$0xff] %v596_v16  ;;  %v474_v57 = vmul.f32 %v596_v16, %v596_v16 }
 0x10d   :  { %v481_v20 = vadd.f32 %v480_v17, %v466_v19  ;;  %v573_v21 = vpop.f32.mrb[12].mxu0  ;;  %v597_v22 = vpop.f32.mrb[12].mxu1 }
 0x10e   :  { %v574_v23 = vpop.f32.mrb[13].mxu0  ;;  %v598_v24 = vpop.f32.mrb[13].mxu1 }
 0x10f   :  { %v575_v25 = vadd.f32 %v574_v23, %v573_v21  ;;  %v576_v26 = vpop.f32.mrb[14].mxu0  ;;  %v599_v27 = vadd.f32 %v598_v24, %v597_v22  ;;  %v600_v28 = vpop.f32.mrb[14].mxu1 }
 0x110   :  { %v577_v29 = vpop.f32.mrb[15].mxu0  ;;  %v601_v30 = vpop.f32.mrb[15].mxu1 }
 0x111   :  { %428 = vst [vmem:[%s855_s2 + $0x30] sm:$0xff] %v575_v25  ;;  %v444_v31 = vadd.f32 %v575_v25, %v443_v18  ;;  %v467_v32 = vmul.f32 %v575_v25, %v575_v25  ;;  %v578_v33 = vadd.f32 %v577_v29, %v576_v26  ;;  %436 = vst [vmem:[%s855_s2 + $0x70] sm:$0xff] %v599_v27 }
 0x112   :  { %v602_v34 = vadd.f32 %v601_v30, %v600_v28  ;;  %v475_v58 = vmul.f32 %v599_v27, %v599_v27 }
 0x113   :  { %v482_v35 = vadd.f32 %v481_v20, %v467_v32  ;;  %429 = vst [vmem:[%s855_s2 + $0x38] sm:$0xff] %v578_v33  ;;  %v445_v36 = vadd.f32 %v578_v33, %v444_v31  ;;  %v468_v37 = vmul.f32 %v578_v33, %v578_v33 }
 0x114   :  { %437 = vst [vmem:[%s855_s2 + $0x78] sm:$0xff] %v602_v34  ;;  %v476_v63 = vmul.f32 %v602_v34, %v602_v34 }
 0x115   :  { %v446_v40 = vadd.f32 %v780_v39, %v445_v36  ;;  %v483_v41 = vadd.f32 %v482_v35, %v468_v37 }
 0x117   :  { %v447_v43 = vadd.f32 %v789_v44, %v446_v40  ;;  %v484_v45 = vadd.f32 %v483_v41, %v469_v38 }
 0x119   :  { %v485_v47 = vadd.f32 %v484_v45, %v470_v42  ;;  %v448_v48 = vadd.f32 %v798_v55, %v447_v43 }
 0x11b   :  { %v449_v50 = vadd.f32 %v590_v62, %v448_v48  ;;  %v486_v51 = vadd.f32 %v485_v47, %v471_v46 }
 0x11d   :  { %v450_v52 = vadd.f32 %v593_v9, %v449_v50  ;;  %v487_v54 = vadd.f32 %v486_v51, %v472_v49 }
 0x11f   :  { %v488_v39 = vadd.f32 %v487_v54, %v473_v53  ;;  %v451_v56 = vadd.f32 %v596_v16, %v450_v52 }
 0x121   :  { %v489_v59 = vadd.f32 %v488_v39, %v474_v57  ;;  %v452_v60 = vadd.f32 %v599_v27, %v451_v56 }
 0x123   :  { %v490_v44 = vadd.f32 %v489_v59, %v475_v58  ;;  %v453_v61 = vadd.f32 %v602_v34, %v452_v60 }
 0x125   :  { %v454_v0 = vrot.slane %v453_v61, 4  ;;  %v491_v1 = vadd.f32 %v490_v44, %v476_v63 }
 0x127   :  { %v455_v2 = vadd.f32 %v454_v0, %v453_v61  ;;  %v492_v3 = vrot.slane %v491_v1, 4 }
 0x129   :  { %v456_v55 = vrot.slane %v455_v2, 2  ;;  %v493_v4 = vadd.f32 %v492_v3, %v491_v1 }
 0x12b   :  { %v457_v62 = vadd.f32 %v456_v55, %v455_v2  ;;  %v494_v5 = vrot.slane %v493_v4, 2 }
 0x12d   :  { %v458_v6 = vrot.slane %v457_v62, 1  ;;  %v495_v7 = vadd.f32 %v494_v5, %v493_v4 }
 0x12f   :  { %v459_v8 = vadd.f32 %v458_v6, %v457_v62  ;;  %v496_v9 = vrot.slane %v495_v7, 1 }
 0x131   :  { %460 = vst [vmem:[%s854_s3] sm:$0x1] %v459_v8  ;;  %v497_v10 = vadd.f32 %v496_v9, %v495_v7 }
 0x133   :  { %498 = vst [vmem:[%s854_s3 + $0x1] sm:$0x1] %v497_v10 }

// kernel: _lambda_.40
= control target key start
LH: loop header
LB: loop body
LE: loop exit
PB: predicated region body
PF: predicated region fallthrough
CT: control target
= control target key end

     0   :  { %s278_s0 = inlined_call_operand.vmem [shape: f32[32,128], index: 0, kind: input, shape index: {}]   ;;  %s279_s1 = inlined_call_operand.vmem [shape: f32[32,128], index: 1, kind: input, shape index: {}]   ;;  %s280_s2 = inlined_call_operand.vmem [shape: f32[32,128], index: 2, kind: input, shape index: {}]   ;;  %s281_s3 = inlined_call_operand.vmem [shape: f32[32,128], index: 3, kind: input, shape index: {}]   ;;  %s282_s4 = inlined_call_operand.vmem [shape: f32[32,128], index: 4, kind: input, shape index: {}]   ;;  %s283_s5 = inlined_call_operand.vmem [shape: f32[32,128], index: 5, kind: input, shape index: {}]   ;;  %s284_s6 = inlined_call_operand.vmem [shape: f32[32,128], index: 6, kind: input, shape index: {}]   ;;  %s285_s7 = inlined_call_operand.vmem [shape: f32[32,128], index: 7, kind: input, shape index: {}]   ;;  %s286_s8 = inlined_call_operand.vmem [shape: f32[32,128], index: 8, kind: input, shape index: {}]   ;;  %s287_s9 = inlined_call_operand.vmem [shape: f32[32,128], index: 9, kind: output, shape index: {}]  }
   0x1   :  { %v32_v0 = vld [vmem:[%s278_s0] sm:$0xff]  ;;  %v33_v6 = vld [vmem:[%s278_s0 + $0x8] sm:$0xff]  ;;  %v34_v15 = vld [vmem:[%s278_s0 + $0x10] sm:$0xff] }
   0x2   :  { %v36_v1 = vld [vmem:[%s279_s1] sm:$0xff]  ;;  %v37_v7 = vld [vmem:[%s279_s1 + $0x8] sm:$0xff]  ;;  %v38_v16 = vld [vmem:[%s279_s1 + $0x10] sm:$0xff] }
   0x3   :  { %v44_v2 = vld [vmem:[%s280_s2] sm:$0xff]  ;;  %v40_v3 = vmax.f32 %v32_v0, %v36_v1  ;;  %v45_v8 = vld [vmem:[%s280_s2 + $0x8] sm:$0xff]  ;;  %v41_v10 = vmax.f32 %v33_v6, %v37_v7  ;;  %v46_v17 = vld [vmem:[%s280_s2 + $0x10] sm:$0xff]  ;;  %v42_v20 = vmax.f32 %v34_v15, %v38_v16 }
   0x4   :  { %v52_v4 = vld [vmem:[%s281_s3] sm:$0xff]  ;;  %v53_v13 = vld [vmem:[%s281_s3 + $0x8] sm:$0xff]  ;;  %v54_v24 = vld [vmem:[%s281_s3 + $0x10] sm:$0xff] }
   0x5   :  { %v48_v5 = vmax.f32 %v40_v3, %v44_v2  ;;  %v60_v9 = vld [vmem:[%s282_s4] sm:$0xff]  ;;  %v49_v14 = vmax.f32 %v41_v10, %v45_v8  ;;  %v61_v19 = vld [vmem:[%s282_s4 + $0x8] sm:$0xff]  ;;  %v50_v26 = vmax.f32 %v42_v20, %v46_v17  ;;  %v35_v27 = vld [vmem:[%s278_s0 + $0x18] sm:$0xff] }
   0x6   :  { %v68_v12 = vld [vmem:[%s283_s5] sm:$0xff]  ;;  %v69_v23 = vld [vmem:[%s283_s5 + $0x8] sm:$0xff]  ;;  %v39_v28 = vld [vmem:[%s279_s1 + $0x18] sm:$0xff] }
   0x7   :  { %v56_v11 = vmax.f32 %v48_v5, %v52_v4  ;;  %v76_v21 = vld [vmem:[%s284_s6] sm:$0xff]  ;;  %v57_v22 = vmax.f32 %v49_v14, %v53_v13  ;;  %v47_v29 = vld [vmem:[%s280_s2 + $0x18] sm:$0xff]  ;;  %v62_v32 = vld [vmem:[%s282_s4 + $0x10] sm:$0xff]  ;;  %v43_v33 = vmax.f32 %v35_v27, %v39_v28  ;;  %v58_v36 = vmax.f32 %v50_v26, %v54_v24 }
   0x8   :  { %v84_v30 = vld [vmem:[%s285_s7] sm:$0xff]  ;;  %v77_v35 = vld [vmem:[%s284_s6 + $0x8] sm:$0xff]  ;;  %v55_v37 = vld [vmem:[%s281_s3 + $0x18] sm:$0xff] }
   0x9   :  { %v64_v18 = vmax.f32 %v56_v11, %v60_v9  ;;  %v65_v31 = vmax.f32 %v57_v22, %v61_v19  ;;  %v92_v38 = vld [vmem:[%s286_s8] sm:$0xff]  ;;  %v70_v40 = vld [vmem:[%s283_s5 + $0x10] sm:$0xff]  ;;  %v51_v41 = vmax.f32 %v43_v33, %v47_v29  ;;  %v85_v43 = vld [vmem:[%s285_s7 + $0x8] sm:$0xff]  ;;  %v66_v44 = vmax.f32 %v58_v36, %v62_v32 }
   0xa   :  { %v63_v45 = vld [vmem:[%s282_s4 + $0x18] sm:$0xff]  ;;  %v78_v47 = vld [vmem:[%s284_s6 + $0x10] sm:$0xff]  ;;  %v93_v50 = vld [vmem:[%s286_s8 + $0x8] sm:$0xff] }
   0xb   :  { %v72_v25 = vmax.f32 %v64_v18, %v68_v12  ;;  %v73_v39 = vmax.f32 %v65_v31, %v69_v23  ;;  %v59_v48 = vmax.f32 %v51_v41, %v55_v37  ;;  %v74_v51 = vmax.f32 %v66_v44, %v70_v40  ;;  %v71_v52 = vld [vmem:[%s283_s5 + $0x18] sm:$0xff]  ;;  %v86_v54 = vld [vmem:[%s285_s7 + $0x10] sm:$0xff] }
   0xc   :  { %v79_v57 = vld [vmem:[%s284_s6 + $0x18] sm:$0xff]  ;;  %v94_v59 = vld [vmem:[%s286_s8 + $0x10] sm:$0xff] }
   0xd   :  { %v80_v34 = vmax.f32 %v72_v25, %v76_v21  ;;  %v81_v46 = vmax.f32 %v73_v39, %v77_v35  ;;  %v67_v55 = vmax.f32 %v59_v48, %v63_v45  ;;  %v82_v56 = vmax.f32 %v74_v51, %v78_v47  ;;  %v87_v62 = vld [vmem:[%s285_s7 + $0x18] sm:$0xff] }
   0xe   :  { %v95_v1 = vld [vmem:[%s286_s8 + $0x18] sm:$0xff] }
   0xf   :  { %v88_v42 = vmax.f32 %v80_v34, %v84_v30  ;;  %v89_v53 = vmax.f32 %v81_v46, %v85_v43  ;;  %v75_v60 = vmax.f32 %v67_v55, %v71_v52  ;;  %v90_v61 = vmax.f32 %v82_v56, %v86_v54 }
  0x11   :  { %v96_v49 = vmax.f32 %v88_v42, %v92_v38  ;;  %v97_v58 = vmax.f32 %v89_v53, %v93_v50  ;;  %v83_v63 = vmax.f32 %v75_v60, %v79_v57  ;;  %v98_v0 = vmax.f32 %v90_v61, %v94_v59 }
  0x13   :  { %100 = vst [vmem:[%s287_s9] sm:$0xff] %v96_v49  ;;  %101 = vst [vmem:[%s287_s9 + $0x8] sm:$0xff] %v97_v58  ;;  %v91_v2 = vmax.f32 %v83_v63, %v87_v62 }
  0x14   :  { %102 = vst [vmem:[%s287_s9 + $0x10] sm:$0xff] %v98_v0 }
  0x15   :  { %v99_v3 = vmax.f32 %v91_v2, %v95_v1 }
  0x17   :  { %103 = vst [vmem:[%s287_s9 + $0x18] sm:$0xff] %v99_v3 }

// kernel: _lambda_.42
= control target key start
LH: loop header
LB: loop body
LE: loop exit
PB: predicated region body
PF: predicated region fallthrough
CT: control target
= control target key end

     0   :  { %s104_s0 = inlined_call_operand.vmem [shape: f32[32,128], index: 0, kind: input, shape index: {}]   ;;  %s105_s1 = inlined_call_operand.vmem [shape: f32[1,128], index: 1, kind: input, shape index: {}]   ;;  %s106_s2 = inlined_call_operand.vmem [shape: f32[1,128], index: 2, kind: input, shape index: {}]   ;;  %s107_s3 = inlined_call_operand.vmem [shape: f32[32,128], index: 3, kind: output, shape index: {}]  }
   0x1   :  { %v14_v0 = vld [vmem:[%s104_s0] sm:$0xff]  ;;  %v15_v4 = vld [vmem:[%s104_s0 + $0x8] sm:$0xff]  ;;  %v16_v5 = vld [vmem:[%s104_s0 + $0x10] sm:$0xff] }
   0x2   :  { %v52_v1 = vld [vmem:[%s105_s1] ss:$0 sm:$0xff]  ;;  %v17_v6 = vld [vmem:[%s104_s0 + $0x18] sm:$0xff] }
   0x3   :  { %v53_v2 = vld [vmem:[%s106_s2] ss:$0 sm:$0xff]  ;;  %v25_v3 = vmul.f32 %v52_v1, %v14_v0  ;;  %v26_v7 = vmul.f32 %v52_v1, %v15_v4  ;;  %v27_v8 = vmul.f32 %v52_v1, %v16_v5  ;;  %v28_v9 = vmul.f32 %v52_v1, %v17_v6 }
   0x5   :  { %v36_v10 = vadd.f32 %v53_v2, %v25_v3  ;;  %v37_v11 = vadd.f32 %v53_v2, %v26_v7  ;;  %v38_v12 = vadd.f32 %v53_v2, %v27_v8  ;;  %v39_v13 = vadd.f32 %v53_v2, %v28_v9 }
   0x7   :  { %v40_v14 = vmax.f32 %v36_v10, 0.0  ;;  %v41_v15 = vmax.f32 %v37_v11, 0.0  ;;  %v42_v16 = vmax.f32 %v38_v12, 0.0  ;;  %v43_v17 = vmax.f32 %v39_v13, 0.0 }
   0x9   :  { %44 = vst [vmem:[%s107_s3] sm:$0xff] %v40_v14  ;;  %45 = vst [vmem:[%s107_s3 + $0x8] sm:$0xff] %v41_v15 }
   0xa   :  { %46 = vst [vmem:[%s107_s3 + $0x10] sm:$0xff] %v42_v16  ;;  %47 = vst [vmem:[%s107_s3 + $0x18] sm:$0xff] %v43_v17 }

// kernel: _lambda_.41
= control target key start
LH: loop header
LB: loop body
LE: loop exit
PB: predicated region body
PF: predicated region fallthrough
CT: control target
= control target key end

     0   :  { %s1078_s12 = smov 0   ;;  %s1080_s13 = smov 0   ;;  %s1200_s0 = inlined_call_operand.vmem [shape: bf16[32,1152], index: 0, kind: input, shape index: {}]   ;;  %s1201_s1 = inlined_call_operand.vmem [shape: bf16[1152,128], index: 1, kind: input, shape index: {}]   ;;  %s1202_s2 = inlined_call_operand.vmem [shape: f32[32,128], index: 2, kind: output, shape index: {0}]   ;;  %s1203_s3 = inlined_call_operand.vmem [shape: f32[8,128], index: 3, kind: output, shape index: {1}]  }
   0x1   :  { %s1082_s14 = smov 0   ;;  %s1084_s15 = smov 0  }
   0x2   :  { %s1086_s16 = smov 0  }
   0x3 LB: > { %s26_s17 = sadd.s32 1, %s1050_s15  ;;  %p49_p1 = scmp.ne.s32.totalorder %s1042_s13, %s1038_s12  ;;  %s1054_s16 = sphi %s1086_s16, %s14_s16   ;;  %s1050_s15 = sphi %s1084_s15, %s1207_s15   ;;  %s1046_s14 = sphi %s1082_s14, %s1206_s14   ;;  %s1042_s13 = sphi %s1080_s13, %s1205_s13   ;;  %s1038_s12 = sphi %s1078_s12, %s1204_s12  }
   0x4   : > { %p27_p0 = scmp.ge.s32.totalorder %s26_s17, 3  ;;  %p50_p2 = scmp.eq.s32.totalorder %s1054_s16, 0 }
   0x5   : > { %s42_s19 = sadd.s32 1, %s1042_s13  ;;  %p832_p5 = scmp.ge.s32.totalorder %s1054_s16, 3 }
   0x6   : > { %s1209_s17 = smov (%p27_p0, %s26_s17), 0  ;;  %p51_p3 = por %p50_p2, %p49_p1 }
   0x7   : > { %s38_s18 = ssub.s32 %s1050_s15, %s1209_s17  ;;  %159 = sbr.rel (%p832_p5) target bundleno = 23 (0x17), region = 16 }
   0x8   : > { %p40_p4 = scmp.eq.s32.totalorder %s38_s18, 0 }
   0xa   : > { %s1113_s20 = scalar_select %p40_p4, %s1042_s13, %s42_s19  }
   0xe   : > { %162 = sbr.rel (!%p51_p3) target bundleno = 23 (0x17), region = 20  ;;  %s164_s21 = sand.u32 (%p51_p3), 1, %s1042_s13  }
   0xf   : > { %s881_s22 = smul.u32 (%p51_p3), 12, %s1050_s15 }
  0x10   : > { %s940_s23 = smul.u32 (%p51_p3), 48, %s164_s21 }
  0x11   : > { %s172_s26 = scalar_lea.vmem (%p51_p3), %s1200_s0, %s881_s22 }
  0x12   : > { %v187_v0 = vld [vmem:[%s172_s26] sm:$0xff] (%p51_p3)  ;;  %v191_v2 = vld [vmem:[%s172_s26 + $0x48] sm:$0xff] (%p51_p3)  ;;  %s166_s27 = scalar_lea.vmem (%p51_p3), [#allocation3], %s940_s23  ;;  %v838_v6 = vld [vmem:[%s172_s26 + $0x50] sm:$0xf] (%p51_p3) }
  0x13   : > { %v189_v1 = vld [vmem:[%s172_s26 + $0x24] sm:$0xff] (%p51_p3)  ;;  %188 = vst [vmem:[%s166_s27] sm:$0xff] (%p51_p3), %v187_v0  ;;  %192 = vst [vmem:[%s166_s27 + $0x18] sm:$0xff] (%p51_p3), %v191_v2  ;;  %v193_v3 = vld [vmem:[%s172_s26 + $0x6c] sm:$0xff] (%p51_p3) }
  0x14   : > { %190 = vst [vmem:[%s166_s27 + $0xc] sm:$0xff] (%p51_p3), %v189_v1  ;;  %v834_v4 = vld [vmem:[%s172_s26 + $0x8] sm:$0xf] (%p51_p3)  ;;  %v836_v5 = vld [vmem:[%s172_s26 + $0x2c] sm:$0xf] (%p51_p3)  ;;  %194 = vst [vmem:[%s166_s27 + $0x24] sm:$0xff] (%p51_p3), %v193_v3 }
  0x15   : > { %835 = vst [vmem:[%s166_s27 + $0x8] sm:$0xf] %v834_v4  ;;  %837 = vst [vmem:[%s166_s27 + $0x14] sm:$0xf] %v836_v5  ;;  %v840_v7 = vld [vmem:[%s172_s26 + $0x74] sm:$0xf] }
  0x16   : > { %839 = vst [vmem:[%s166_s27 + $0x20] sm:$0xf] %v838_v6  ;;  %841 = vst [vmem:[%s166_s27 + $0x2c] sm:$0xf] %v840_v7 }
  0x17 PF: > { %p842_p6 = scmp.ge.s32.totalorder %s1054_s16, 1  ;;  %p226_p7 = scmp.lt.s32.totalorder %s1054_s16, 4 }
  0x19   : > { %p227_p8 = pnand %p842_p6, %p226_p7 }
  0x1a   : > { %s233_s28 = sand.u32 (!%p227_p8), 1, %s1038_s12   ;;  %s276_s29 = smul.u32 (!%p227_p8), 48, %s1046_s14 }
  0x1b   : > { %230 = sbr.rel (%p227_p8) target bundleno = 328 (0x148), region = 50  ;;  %p844_p10 = scmp.ne.s32.totalorder (!%p227_p8), %s1046_s14, 0 }
  0x1c   : > { %s941_s30 = smul.u32 (!%p227_p8), 48, %s233_s28  ;;  %p277_p9 = scmp.lt.s32.totalorder (!%p227_p8), %s276_s29, 143 }
  0x1e   : > { %s1130_s8 = scalar_lea.vmem (!%p227_p8), [#allocation3], %s941_s30 }
  0x22   : > { %s1211_s29 = smov (!%p277_p9, %s276_s29), 143  ;;  %305 = sbr.rel (%p844_p10) target bundleno = 41 (0x29), region = 58 }
  0x23   : > { %s843_s4 = sshll.u32 %s1211_s29, 2  ;;  %v1056_v8 = vmov (!%p844_p10), 0.0  }
  0x24   : > { %s1128_s7 = scalar_lea.vmem %s1201_s1, %s843_s4  ;;  %306 = vst [vmem:[#allocation2] sm:$0xff] (!%p844_p10), %v1056_v8  ;;  %307 = vst [vmem:[#allocation2 + $0x8] sm:$0xff] (!%p844_p10), %v1056_v8 }
  0x25   : > { %308 = vst [vmem:[#allocation2 + $0x10] sm:$0xff] (!%p844_p10), %v1056_v8  ;;  %309 = vst [vmem:[#allocation2 + $0x18] sm:$0xff] (!%p844_p10), %v1056_v8 }
  0x29 PF: > { %v984_v9 = vld [vmem:[%s1128_s7 + $0x40] sm:$0xff]   ;;  %v987_v12 = vld [vmem:[%s1128_s7 + $0x48] sm:$0xff]   ;;  %v990_v15 = vld [vmem:[%s1128_s7 + $0x50] sm:$0xff]   ;;  %p875_p11 = scmp.ne.s32.totalorder %s1046_s14, 2 }
  0x2a   : > { %v985_v10 = vld [vmem:[%s1128_s7] sm:$0xff]   ;;  %882 = vmatprep.subr.bf16.mxu0 %v984_v9  ;;  %v988_v13 = vld [vmem:[%s1128_s7 + $0x8] sm:$0xff]   ;;  %v991_v16 = vld [vmem:[%s1128_s7 + $0x10] sm:$0xff]   ;;  %v1057_v6 = vmov (!%p875_p11), 0.0  }
  0x2b   : > { %v986_v11 = vld [vmem:[%s1128_s7 + $0x80] sm:$0xff]   ;;  %883 = vmatpush3.bf16.msra.mxu0 %v985_v10  ;;  %v989_v14 = vld [vmem:[%s1128_s7 + $0x88] sm:$0xff]   ;;  %v992_v17 = vld [vmem:[%s1128_s7 + $0x90] sm:$0xff]   ;;  %664 = vst [vmem:[%s1203_s3] sm:$0xff] (!%p875_p11), %v1057_v6 }
  0x2c   : > { %920 = vmatprep.subr.bf16.mxu1 %v986_v11  ;;  %884 = vmatprep.subr.bf16.mxu0 %v987_v12  ;;  %v993_v18 = vld [vmem:[%s1128_s7 + $0x58] sm:$0xff]   ;;  %v996_v21 = vld [vmem:[%s1128_s7 + $0x60] sm:$0xff]   ;;  %v999_v24 = vld [vmem:[%s1128_s7 + $0x68] sm:$0xff]  }
  0x2d   : > { %921 = vmatpush3.bf16.msra.mxu1 %v986_v11  ;;  %v994_v19 = vld [vmem:[%s1128_s7 + $0x18] sm:$0xff]   ;;  %v998_v22 = vld [vmem:[%s1128_s7 + $0xa0] sm:$0xff]   ;;  %v1001_v25 = vld [vmem:[%s1128_s7 + $0xa8] sm:$0xff]  }
  0x2e   : > { %922 = vmatprep.subr.bf16.mxu1 %v989_v14  ;;  %v995_v20 = vld [vmem:[%s1128_s7 + $0x98] sm:$0xff]   ;;  %v997_v23 = vld [vmem:[%s1128_s7 + $0x20] sm:$0xff]   ;;  %v1000_v26 = vld [vmem:[%s1128_s7 + $0x28] sm:$0xff]  }
  0x2f   : > { %885 = vmatpush3.bf16.msra.mxu0 %v988_v13  ;;  %v1002_v27 = vld [vmem:[%s1128_s7 + $0x70] sm:$0xff]   ;;  %v1005_v30 = vld [vmem:[%s1128_s7 + $0x78] sm:$0xff]   ;;  %v310_v45 = vld [vmem:[#allocation2] sm:$0xff] }
  0x30   : > { %886 = vmatprep.subr.bf16.mxu0 %v990_v15  ;;  %v1003_v28 = vld [vmem:[%s1128_s7 + $0x30] sm:$0xff]   ;;  %v1007_v31 = vld [vmem:[%s1128_s7 + $0xb8] sm:$0xff]   ;;  %v311_v50 = vld [vmem:[#allocation2 + $0x8] sm:$0xff] }
  0x31   : > { %923 = vmatpush3.bf16.msra.mxu1 %v989_v14  ;;  %v1004_v29 = vld [vmem:[%s1128_s7 + $0xb0] sm:$0xff]   ;;  %v1006_v34 = vld [vmem:[%s1128_s7 + $0x38] sm:$0xff]  }
  0x32   : > { %924 = vmatprep.subr.bf16.mxu1 %v992_v17  ;;  %v1010_v32 = vld [vmem:[%s1130_s8 + $0x4] ss:$12 sps:$4 sm:$0xff]   ;;  %v1011_v33 = vld [vmem:[%s1130_s8 + $0x8] ss:$12 sps:$4 sm:$0xff]   ;;  %v1008_v35 = vld [vmem:[%s1130_s8] ss:$12 sps:$4 sm:$0xff]  }
  0x33   : > { %887 = vmatpush3.bf16.msra.mxu0 %v991_v16  ;;  %578 = vmatprep.mubr.bf16.mxu0 %v1010_v32  ;;  %v1013_v36 = vld [vmem:[%s1130_s8 + $0x1c] ss:$12 sps:$4 sm:$0xff]   ;;  %v1012_v37 = vld [vmem:[%s1130_s8 + $0x20] ss:$12 sps:$4 sm:$0xff]   ;;  %v1015_v38 = vld [vmem:[%s1130_s8 + $0x18] ss:$12 sps:$4 sm:$0xff]  }
  0x34   : > { %888 = vmatprep.subr.bf16.mxu0 %v993_v18  ;;  %936 = vmatprep.mubr.bf16.mxu1 %v1011_v33  ;;  %v312_v59 = vld [vmem:[#allocation2 + $0x10] sm:$0xff]  ;;  %v313_v63 = vld [vmem:[#allocation2 + $0x18] sm:$0xff] }
  0x35   : > { %925 = vmatpush3.bf16.msra.mxu1 %v992_v17 }
  0x36   : > { %926 = vmatprep.subr.bf16.mxu1 %v995_v20 }
  0x37   : > { %889 = vmatpush3.bf16.msra.mxu0 %v994_v19 }
  0x38   : > { %890 = vmatprep.subr.bf16.mxu0 %v996_v21 }
  0x39   : > { %927 = vmatpush3.bf16.msra.mxu1 %v995_v20 }
  0x3a   : > { %928 = vmatprep.subr.bf16.mxu1 %v998_v22 }
  0x3b   : > { %891 = vmatpush3.bf16.msra.mxu0 %v997_v23 }
  0x3c   : > { %892 = vmatprep.subr.bf16.mxu0 %v999_v24 }
  0x3d   : > { %929 = vmatpush3.bf16.msra.mxu1 %v998_v22 }
  0x3e   : > { %930 = vmatprep.subr.bf16.mxu1 %v1001_v25 }
  0x3f   : > { %893 = vmatpush3.bf16.msra.mxu0 %v1000_v26 }
  0x40   : > { %894 = vmatprep.subr.bf16.mxu0 %v1002_v27 }
  0x41   : > { %931 = vmatpush3.bf16.msra.mxu1 %v1001_v25 }
  0x42   : > { %932 = vmatprep.subr.bf16.mxu1 %v1004_v29 }
  0x43   : > { %895 = vmatpush3.bf16.msra.mxu0 %v1003_v28 }
  0x44   : > { %896 = vmatprep.subr.bf16.mxu0 %v1005_v30 }
  0x45   : > { %933 = vmatpush3.bf16.msra.mxu1 %v1004_v29 }
  0x46   : > { %934 = vmatprep.subr.bf16.mxu1 %v1007_v31 }
  0x47   : > { %897 = vmatpush3.bf16.msra.mxu0 %v1006_v34 }
  0x49   : > { %935 = vmatpush3.bf16.msra.mxu1 %v1007_v31 }
  0x4a   : > { %579 = vmatmul.mubr.bf16.vlgmr.msra.gmra.mrb[0].mxu0 %v1008_v35 }
  0x4b   : > { %586 = vmatprep.mubr.bf16.mxu0 %v1013_v36 }
  0x4c   : > { %937 = vmatmul.mubr.bf16.vlgmr.msra.gmra.mrb[0].mxu1 %v1012_v37 }
  0x52   : > { %587 = vmatmul.mubr.bf16.gmra.mrb[4].mxu0 %v1015_v38 }
 0x11d   : > { %v898_v39 = vpop.f32.mrb[0].mxu0 }
 0x11e   : > { %v899_v40 = vpop.f32.mrb[1].mxu0 }
 0x11f   : > { %v900_v41 = vadd.f32 %v899_v40, %v898_v39  ;;  %v901_v42 = vpop.f32.mrb[2].mxu0  ;;  %v938_v43 = vpop.f32.mrb[0].mxu1 }
 0x120   : > { %v902_v44 = vpop.f32.mrb[3].mxu0  ;;  %v629_v46 = vpop.f32.mrb[1].mxu1 }
 0x121   : > { %v903_v47 = vadd.f32 %v902_v44, %v901_v42  ;;  %v630_v48 = vadd.f32 %v900_v41, %v629_v46  ;;  %v939_v49 = vpop.f32.mrb[2].mxu1 }
 0x122   : > { %v632_v51 = vpop.f32.mrb[3].mxu1 }
 0x123   : > { %v644_v52 = vadd.f32 %v630_v48, %v310_v45  ;;  %v633_v53 = vadd.f32 %v903_v47, %v632_v51 }
 0x125   : > { %648 = vst [vmem:[#allocation2] sm:$0xff] %v644_v52  ;;  %v645_v54 = vadd.f32 %v633_v53, %v311_v50  ;;  %v904_v55 = vpop.f32.mrb[4].mxu0 }
 0x126   : > { %v905_v56 = vpop.f32.mrb[5].mxu0 }
 0x127   : > { %649 = vst [vmem:[#allocation2 + $0x8] sm:$0xff] %v645_v54  ;;  %v906_v57 = vadd.f32 %v905_v56, %v904_v55  ;;  %v907_v58 = vpop.f32.mrb[6].mxu0 }
 0x128   : > { %v908_v60 = vpop.f32.mrb[7].mxu0 }
 0x129   : > { %v638_v61 = vadd.f32 %v938_v43, %v906_v57  ;;  %v909_v62 = vadd.f32 %v908_v60, %v907_v58  ;;  %655 = sbr.rel (%p875_p11) target bundleno = 328 (0x148), region = 62 }
 0x12b   : > { %v646_v0 = vadd.f32 %v638_v61, %v312_v59  ;;  %v641_v1 = vadd.f32 %v939_v49, %v909_v62 }
 0x12c   : > { %v656_v3 = vld [vmem:[#allocation2] sm:$0xff] (!%p875_p11) }
 0x12d   : > { %650 = vst [vmem:[#allocation2 + $0x10] sm:$0xff] %v646_v0  ;;  %v647_v2 = vadd.f32 %v641_v1, %v313_v63  ;;  %660 = vst [vmem:[%s1202_s2] sm:$0xff] (!%p875_p11), %v656_v3  ;;  %v675_v7 = vmul.f32 (!%p875_p11), %v656_v3, %v656_v3 }
 0x12e   : > { %v657_v4 = vld [vmem:[#allocation2 + $0x8] sm:$0xff] (!%p875_p11) }
 0x12f   : > { %651 = vst [vmem:[#allocation2 + $0x18] sm:$0xff] %v647_v2  ;;  %661 = vst [vmem:[%s1202_s2 + $0x8] sm:$0xff] (!%p875_p11), %v657_v4  ;;  %v665_v8 = vadd.f32 (!%p875_p11), %v657_v4, %v656_v3  ;;  %v676_v9 = vmul.f32 (!%p875_p11), %v657_v4, %v657_v4 }
 0x131   : > { %v679_v12 = vadd.f32 %v676_v9, %v675_v7 }
 0x134   : > { %v658_v5 = vld [vmem:[#allocation2 + $0x10] sm:$0xff] }
 0x135   : > { %662 = vst [vmem:[%s1202_s2 + $0x10] sm:$0xff] %v658_v5  ;;  %v677_v10 = vmul.f32 %v658_v5, %v658_v5  ;;  %v666_v13 = vadd.f32 %v665_v8, %v658_v5 }
 0x136   : > { %v659_v11 = vld [vmem:[#allocation2 + $0x18] sm:$0xff] }
 0x137   : > { %663 = vst [vmem:[%s1202_s2 + $0x18] sm:$0xff] %v659_v11  ;;  %v678_v14 = vmul.f32 %v659_v11, %v659_v11  ;;  %v680_v15 = vadd.f32 %v679_v12, %v677_v10  ;;  %v667_v16 = vadd.f32 %v666_v13, %v659_v11 }
 0x139   : > { %v668_v17 = vrot.slane %v667_v16, 4  ;;  %v681_v18 = vadd.f32 %v680_v15, %v678_v14 }
 0x13b   : > { %v669_v19 = vadd.f32 %v668_v17, %v667_v16  ;;  %v682_v20 = vrot.slane %v681_v18, 4 }
 0x13d   : > { %v670_v21 = vrot.slane %v669_v19, 2  ;;  %v683_v22 = vadd.f32 %v682_v20, %v681_v18 }
 0x13f   : > { %v671_v23 = vadd.f32 %v670_v21, %v669_v19  ;;  %v684_v24 = vrot.slane %v683_v22, 2 }
 0x141   : > { %v672_v25 = vrot.slane %v671_v23, 1  ;;  %v685_v26 = vadd.f32 %v684_v24, %v683_v22 }
 0x143   : > { %v673_v27 = vadd.f32 %v672_v25, %v671_v23  ;;  %v686_v28 = vrot.slane %v685_v26, 1 }
 0x145   : > { %674 = vst [vmem:[%s1203_s3] sm:$0x1] %v673_v27  ;;  %v687_v29 = vadd.f32 %v686_v28, %v685_v26 }
 0x147   : > { %688 = vst [vmem:[%s1203_s3 + $0x1] sm:$0x1] %v687_v29 }
 0x148 PF: > { %s14_s16 = sadd.s32 1, %s1054_s16   ;;  %s1204_s12 = smov %s1042_s13 }
 0x149   : > { %p11_p12 = scmp.ge.s32.totalorder %s14_s16, 5   ;;  %s1205_s13 = smov %s1113_s20 }
 0x14a   : > { %s1206_s14 = smov %s1050_s15  ;;  %s1207_s15 = smov %s1209_s17 }
 0x14b   :  { %13 = sbr.rel (!%p11_p12) target bundleno = 3 (0x3), region = 118 }

// kernel: _lambda_.44
= control target key start
LH: loop header
LB: loop body
LE: loop exit
PB: predicated region body
PF: predicated region fallthrough
CT: control target
= control target key end

     0   :  { %s132_s0 = inlined_call_operand.vmem [shape: f32[32,128], index: 0, kind: input, shape index: {}]   ;;  %s133_s1 = inlined_call_operand.vmem [shape: f32[1,128], index: 1, kind: input, shape index: {}]   ;;  %s134_s2 = inlined_call_operand.vmem [shape: f32[1,128], index: 2, kind: input, shape index: {}]   ;;  %s135_s3 = inlined_call_operand.vmem [shape: f32[32,128], index: 3, kind: input, shape index: {}]   ;;  %s136_s4 = inlined_call_operand.vmem [shape: f32[32,128], index: 4, kind: output, shape index: {}]  }
   0x1   :  { %v17_v0 = vld [vmem:[%s132_s0] sm:$0xff]  ;;  %v18_v4 = vld [vmem:[%s132_s0 + $0x8] sm:$0xff]  ;;  %v19_v7 = vld [vmem:[%s132_s0 + $0x10] sm:$0xff] }
   0x2   :  { %v63_v1 = vld [vmem:[%s133_s1] ss:$0 sm:$0xff]  ;;  %v20_v8 = vld [vmem:[%s132_s0 + $0x18] sm:$0xff]  ;;  %v44_v10 = vld [vmem:[%s135_s3 + $0x8] sm:$0xff] }
   0x3   :  { %v64_v2 = vld [vmem:[%s134_s2] ss:$0 sm:$0xff]  ;;  %v28_v3 = vmul.f32 %v63_v1, %v17_v0  ;;  %v29_v6 = vmul.f32 %v63_v1, %v18_v4  ;;  %v30_v11 = vmul.f32 %v63_v1, %v19_v7  ;;  %v31_v12 = vmul.f32 %v63_v1, %v20_v8  ;;  %v45_v14 = vld [vmem:[%s135_s3 + $0x10] sm:$0xff]  ;;  %v46_v15 = vld [vmem:[%s135_s3 + $0x18] sm:$0xff] }
   0x4   :  { %v43_v5 = vld [vmem:[%s135_s3] sm:$0xff] }
   0x5   :  { %v39_v9 = vadd.f32 %v64_v2, %v28_v3  ;;  %v40_v13 = vadd.f32 %v64_v2, %v29_v6  ;;  %v41_v17 = vadd.f32 %v64_v2, %v30_v11  ;;  %v42_v18 = vadd.f32 %v64_v2, %v31_v12 }
   0x7   :  { %v47_v16 = vadd.f32 %v43_v5, %v39_v9  ;;  %v48_v19 = vadd.f32 %v44_v10, %v40_v13  ;;  %v49_v21 = vadd.f32 %v45_v14, %v41_v17  ;;  %v50_v22 = vadd.f32 %v46_v15, %v42_v18 }
   0x9   :  { %v51_v20 = vmax.f32 %v47_v16, 0.0  ;;  %v52_v23 = vmax.f32 %v48_v19, 0.0  ;;  %v53_v24 = vmax.f32 %v49_v21, 0.0  ;;  %v54_v25 = vmax.f32 %v50_v22, 0.0 }
   0xb   :  { %55 = vst [vmem:[%s136_s4] sm:$0xff] %v51_v20  ;;  %56 = vst [vmem:[%s136_s4 + $0x8] sm:$0xff] %v52_v23 }
   0xc   :  { %57 = vst [vmem:[%s136_s4 + $0x10] sm:$0xff] %v53_v24  ;;  %58 = vst [vmem:[%s136_s4 + $0x18] sm:$0xff] %v54_v25 }

// kernel: _lambda_.50
= control target key start
LH: loop header
LB: loop body
LE: loop exit
PB: predicated region body
PF: predicated region fallthrough
CT: control target
= control target key end

     0   :  { %s71_s0 = inlined_call_operand.vmem [shape: f32[8,128], index: 0, kind: input, shape index: {}]   ;;  %s72_s1 = inlined_call_operand.vmem [shape: f32[1,128], index: 1, kind: input, shape index: {}]   ;;  %s73_s2 = inlined_call_operand.vmem [shape: f32[1,128], index: 2, kind: input, shape index: {}]   ;;  %s74_s3 = inlined_call_operand.vmem [shape: f32[8,128], index: 3, kind: output, shape index: {}]  }
   0x1   :  { %v14_v0 = vld [vmem:[%s71_s0] sm:$0xff] }
   0x2   :  { %v37_v1 = vld [vmem:[%s72_s1] ss:$0 sm:$0xff] }
   0x3   :  { %v38_v2 = vld [vmem:[%s73_s2] ss:$0 sm:$0xff]  ;;  %v22_v3 = vmul.f32 %v37_v1, %v14_v0 }
   0x5   :  { %v30_v4 = vadd.f32 %v38_v2, %v22_v3 }
   0x7   :  { %v31_v5 = vmax.f32 %v30_v4, 0.0 }
   0x9   :  { %32 = vst [vmem:[%s74_s3] sm:$0xff] %v31_v5 }

// kernel: _lambda_.49
= control target key start
LH: loop header
LB: loop body
LE: loop exit
PB: predicated region body
PF: predicated region fallthrough
CT: control target
= control target key end

     0   :  { %s904_s12 = smov 0   ;;  %s906_s13 = smov 0   ;;  %s985_s0 = inlined_call_operand.vmem [shape: bf16[8,1152], index: 0, kind: input, shape index: {}]   ;;  %s986_s1 = inlined_call_operand.vmem [shape: bf16[1152,128], index: 1, kind: input, shape index: {}]   ;;  %s987_s2 = inlined_call_operand.vmem [shape: f32[8,128], index: 2, kind: output, shape index: {0}]   ;;  %s988_s3 = inlined_call_operand.vmem [shape: f32[8,128], index: 3, kind: output, shape index: {1}]  }
   0x1   :  { %s908_s14 = smov 0  }
   0x2 LB: > { %s26_s15 = sadd.s32 1, %s874_s13  ;;  %p714_p0 = scmp.ge.s32.totalorder %s878_s14, 1  ;;  %s878_s14 = sphi %s908_s14, %s14_s14   ;;  %s874_s13 = sphi %s906_s13, %s990_s13   ;;  %s870_s12 = sphi %s904_s12, %s989_s12  }
   0x3   : > { %p27_p1 = scmp.ge.s32.totalorder %s26_s15, 3  ;;  %p186_p2 = scmp.lt.s32.totalorder %s878_s14, 4 }
   0x5   : > { %s992_s15 = smov (%p27_p1, %s26_s15), 0  ;;  %p187_p3 = pnand %p714_p0, %p186_p2 }
   0x6   : > { %s231_s16 = smul.u32 (!%p187_p3), 3, %s870_s12  ;;  %p717_p6 = scmp.ne.s32.totalorder (!%p187_p3), %s870_s12, 0 }
   0x7   : > { %190 = sbr.rel (%p187_p3) target bundleno = 299 (0x12b), region = 28 }
   0x8   : > { %s241_s17 = smul.u32 (!%p187_p3), 48, %s870_s12  ;;  %p234_p4 = scmp.lt.s32.totalorder (!%p187_p3), %s231_s16, 8 }
   0xa   : > { %p242_p5 = scmp.lt.s32.totalorder (!%p187_p3), %s241_s17, 143 }
   0xe   : > { %s994_s16 = smov (!%p234_p4, %s231_s16), 8  ;;  %s996_s17 = smov (!%p242_p5, %s241_s17), 143 }
   0xf   : > { %s715_s18 = sshll.u32 %s994_s16, 2  ;;  %s716_s22 = sshll.u32 %s996_s17, 2  ;;  %v880_v0 = vmov (!%p717_p6), 0.0  }
  0x10   : > { %s929_s21 = scalar_lea.vmem %s985_s0, %s715_s18  ;;  %s934_s25 = scalar_lea.vmem %s986_s1, %s716_s22  ;;  %269 = vst [vmem:[#allocation2] sm:$0xff] (!%p717_p6), %v880_v0 }
  0x11   : > { %268 = sbr.rel (%p717_p6) target bundleno = 24 (0x18), region = 32 }
  0x18 PF: > { %v829_v1 = vld [vmem:[%s934_s25 + $0x40] sm:$0xff]   ;;  %v881_v2 = vmov 0.0   ;;  %vm882_vm0 = vmmov 0   ;;  %v832_v5 = vld [vmem:[%s934_s25 + $0x48] sm:$0xff]   ;;  %v835_v8 = vld [vmem:[%s934_s25 + $0x50] sm:$0xff]   ;;  %p745_p7 = scmp.ne.s32.totalorder %s870_s12, 2 }
  0x19   : > { %781 = vmatprep.subr.bf16.mxu1 %v881_v2  ;;  %v830_v3 = vld [vmem:[%s934_s25] sm:$0xff]   ;;  %750 = vmatprep.subr.bf16.mxu0 %v829_v1  ;;  %v833_v6 = vld [vmem:[%s934_s25 + $0x8] sm:$0xff]   ;;  %v836_v9 = vld [vmem:[%s934_s25 + $0x10] sm:$0xff]   ;;  %v883_v43 = vmov (!%p745_p7), 0.0  }
  0x1a   : > { %v831_v4 = vld [vmem:[%s934_s25 + $0x80] sm:$0xff]   ;;  %797 = vmatprep.mubr.msk.bf16.mxu1 %vm882_vm0, %v881_v2  ;;  %751 = vmatpush3.bf16.msra.mxu0 %v830_v3  ;;  %v834_v7 = vld [vmem:[%s934_s25 + $0x88] sm:$0xff]   ;;  %v837_v10 = vld [vmem:[%s934_s25 + $0x90] sm:$0xff]   ;;  %564 = vst [vmem:[%s988_s3] sm:$0xff] (!%p745_p7), %v883_v43 }
  0x1b   : > { %782 = vmatpush3.bf16.msra.mxu1 %v831_v4  ;;  %752 = vmatprep.subr.bf16.mxu0 %v832_v5  ;;  %v838_v11 = vld [vmem:[%s934_s25 + $0x58] sm:$0xff]   ;;  %v841_v14 = vld [vmem:[%s934_s25 + $0x60] sm:$0xff]   ;;  %v844_v17 = vld [vmem:[%s934_s25 + $0x68] sm:$0xff]  }
  0x1c   : > { %783 = vmatprep.subr.bf16.mxu1 %v881_v2  ;;  %v839_v12 = vld [vmem:[%s934_s25 + $0x18] sm:$0xff]   ;;  %v842_v15 = vld [vmem:[%s934_s25 + $0x20] sm:$0xff]   ;;  %v845_v18 = vld [vmem:[%s934_s25 + $0x28] sm:$0xff]  }
  0x1d   : > { %v840_v13 = vld [vmem:[%s934_s25 + $0x98] sm:$0xff]   ;;  %v843_v16 = vld [vmem:[%s934_s25 + $0xa0] sm:$0xff]   ;;  %v846_v19 = vld [vmem:[%s934_s25 + $0xa8] sm:$0xff]  }
  0x1e   : > { %753 = vmatpush3.bf16.msra.mxu0 %v833_v6  ;;  %v847_v20 = vld [vmem:[%s934_s25 + $0x70] sm:$0xff]   ;;  %v850_v23 = vld [vmem:[%s934_s25 + $0x78] sm:$0xff]   ;;  %v271_v24 = vld [vmem:[%s929_s21] sm:$0xff] }
  0x1f   : > { %784 = vmatpush3.bf16.msra.mxu1 %v834_v7  ;;  %754 = vmatprep.subr.bf16.mxu0 %v835_v8  ;;  %v848_v21 = vld [vmem:[%s934_s25 + $0x30] sm:$0xff]   ;;  %v719_v25 = vcombine.high %v271_v24, %v271_v24  ;;  %v851_v26 = vld [vmem:[%s934_s25 + $0x38] sm:$0xff]   ;;  %v718_v28 = vcombine.low %v271_v24, %v271_v24  ;;  %v855_v29 = vld [vmem:[%s929_s21 + $0x8] ss:$0 sps:$4 sm:$0xff]  }
  0x20   : > { %785 = vmatprep.subr.bf16.mxu1 %v881_v2  ;;  %v849_v22 = vld [vmem:[%s934_s25 + $0xb0] sm:$0xff]   ;;  %v852_v27 = vld [vmem:[%s934_s25 + $0xb8] sm:$0xff]   ;;  %v270_v36 = vld [vmem:[#allocation2] sm:$0xff] }
  0x21   : > { %508 = vmatprep.mubr.bf16.mxu0 %v719_v25 }
  0x22   : > { %755 = vmatpush3.bf16.msra.mxu0 %v836_v9 }
  0x23   : > { %786 = vmatpush3.bf16.msra.mxu1 %v837_v10  ;;  %756 = vmatprep.subr.bf16.mxu0 %v838_v11 }
  0x24   : > { %787 = vmatprep.subr.bf16.mxu1 %v881_v2 }
  0x26   : > { %757 = vmatpush3.bf16.msra.mxu0 %v839_v12 }
  0x27   : > { %788 = vmatpush3.bf16.msra.mxu1 %v840_v13  ;;  %758 = vmatprep.subr.bf16.mxu0 %v841_v14 }
  0x28   : > { %789 = vmatprep.subr.bf16.mxu1 %v881_v2 }
  0x2a   : > { %759 = vmatpush3.bf16.msra.mxu0 %v842_v15 }
  0x2b   : > { %790 = vmatpush3.bf16.msra.mxu1 %v843_v16  ;;  %760 = vmatprep.subr.bf16.mxu0 %v844_v17 }
  0x2c   : > { %791 = vmatprep.subr.bf16.mxu1 %v881_v2 }
  0x2e   : > { %761 = vmatpush3.bf16.msra.mxu0 %v845_v18 }
  0x2f   : > { %792 = vmatpush3.bf16.msra.mxu1 %v846_v19  ;;  %762 = vmatprep.subr.bf16.mxu0 %v847_v20 }
  0x30   : > { %793 = vmatprep.subr.bf16.mxu1 %v881_v2 }
  0x32   : > { %763 = vmatpush3.bf16.msra.mxu0 %v848_v21 }
  0x33   : > { %794 = vmatpush3.bf16.msra.mxu1 %v849_v22  ;;  %764 = vmatprep.subr.bf16.mxu0 %v850_v23 }
  0x34   : > { %795 = vmatprep.subr.bf16.mxu1 %v881_v2 }
  0x36   : > { %765 = vmatpush3.bf16.msra.mxu0 %v851_v26 }
  0x37   : > { %796 = vmatpush3.bf16.msra.mxu1 %v852_v27 }
  0x39   : > { %509 = vmatmul.mubr.bf16.vlgmr.msra.gmra.mrb[0].mxu0 %v718_v28 }
  0x3a   : > { %798 = vmatmul.mubr.bf16.vlgmr.msra.gmra.mrb[0].mxu1 %v855_v29 }
 0x10c   : > { %v766_v30 = vpop.f32.mrb[0].mxu0 }
 0x10d   : > { %v550_v31 = vpop.f32.mrb[0].mxu1  ;;  %v767_v32 = vpop.f32.mrb[1].mxu0 }
 0x10e   : > { %v768_v33 = vadd.f32 %v767_v32, %v766_v30  ;;  %v799_v34 = vpop.f32.mrb[1].mxu1  ;;  %v769_v35 = vpop.f32.mrb[2].mxu0  ;;  %561 = sbr.rel (%p745_p7) target bundleno = 299 (0x12b), region = 36 }
 0x10f   : > { %v553_v37 = vpop.f32.mrb[2].mxu1  ;;  %v770_v38 = vpop.f32.mrb[3].mxu0 }
 0x110   : > { %v551_v39 = vadd.f32 %v768_v33, %v550_v31  ;;  %v800_v40 = vpop.f32.mrb[3].mxu1 }
 0x112   : > { %v556_v41 = vadd.f32 %v551_v39, %v270_v36 }
 0x114   : > { %557 = vst [vmem:[#allocation2] sm:$0xff] %v556_v41 }
 0x11b   : > { %v562_v42 = vld [vmem:[#allocation2] sm:$0xff] }
 0x11c   : > { %563 = vst [vmem:[%s987_s2] sm:$0xff] %v562_v42  ;;  %v565_v44 = vrot.slane %v562_v42, 4  ;;  %v572_v45 = vmul.f32 %v562_v42, %v562_v42 }
 0x11e   : > { %v566_v46 = vadd.f32 %v565_v44, %v562_v42  ;;  %v573_v47 = vrot.slane %v572_v45, 4 }
 0x120   : > { %v567_v48 = vrot.slane %v566_v46, 2  ;;  %v574_v49 = vadd.f32 %v573_v47, %v572_v45 }
 0x122   : > { %v568_v50 = vadd.f32 %v567_v48, %v566_v46  ;;  %v575_v51 = vrot.slane %v574_v49, 2 }
 0x124   : > { %v569_v52 = vrot.slane %v568_v50, 1  ;;  %v576_v53 = vadd.f32 %v575_v51, %v574_v49 }
 0x126   : > { %v570_v54 = vadd.f32 %v569_v52, %v568_v50  ;;  %v577_v55 = vrot.slane %v576_v53, 1 }
 0x128   : > { %571 = vst [vmem:[%s988_s3] sm:$0x1] %v570_v54  ;;  %v578_v56 = vadd.f32 %v577_v55, %v576_v53 }
 0x12a   : > { %579 = vst [vmem:[%s988_s3 + $0x1] sm:$0x1] %v578_v56 }
 0x12b PF: > { %s14_s14 = sadd.s32 1, %s878_s14   ;;  %s989_s12 = smov %s874_s13 }
 0x12c   : > { %p11_p8 = scmp.ge.s32.totalorder %s14_s14, 5   ;;  %s990_s13 = smov %s992_s15 }
 0x12e   :  { %13 = sbr.rel (!%p11_p8) target bundleno = 2 (0x2), region = 81 }

// kernel: _lambda_.52
= control target key start
LH: loop header
LB: loop body
LE: loop exit
PB: predicated region body
PF: predicated region fallthrough
CT: control target
= control target key end

     0   :  { %v203_v0 = vmov 0.0   ;;  %vm204_vm0 = vmmov 0   ;;  %s264_s1 = inlined_call_operand.vmem [shape: bf16[128,128], index: 1, kind: input, shape index: {}]   ;;  %s265_s3 = inlined_call_operand.vmem [shape: f32[8,128], index: 3, kind: output, shape index: {1}]   ;;  %s266_s0 = inlined_call_operand.vmem [shape: bf16[8,128], index: 0, kind: input, shape index: {}]   ;;  %s267_s2 = inlined_call_operand.vmem [shape: f32[8,128], index: 2, kind: output, shape index: {0}]  }
   0x1   :  { %173 = vmatprep.subr.bf16.mxu0 %v203_v0  ;;  %v195_v1 = vld [vmem:[%s264_s1] sm:$0xff]   ;;  %189 = vmatprep.mubr.msk.bf16.mxu0 %vm204_vm0, %v203_v0  ;;  %132 = vst [vmem:[%s265_s3] sm:$0xff] %v203_v0  ;;  %v196_v2 = vld [vmem:[%s264_s1 + $0x8] sm:$0xff]   ;;  %v197_v3 = vld [vmem:[%s264_s1 + $0x10] sm:$0xff]  }
   0x2   :  { %174 = vmatpush3.bf16.msra.mxu0 %v195_v1  ;;  %v198_v4 = vld [vmem:[%s264_s1 + $0x18] sm:$0xff]   ;;  %v199_v5 = vld [vmem:[%s264_s1 + $0x20] sm:$0xff]   ;;  %v200_v6 = vld [vmem:[%s264_s1 + $0x28] sm:$0xff]  }
   0x3   :  { %175 = vmatprep.subr.bf16.mxu0 %v203_v0  ;;  %v201_v7 = vld [vmem:[%s264_s1 + $0x30] sm:$0xff]   ;;  %v202_v8 = vld [vmem:[%s264_s1 + $0x38] sm:$0xff]   ;;  %v20_v9 = vld [vmem:[%s266_s0] sm:$0xf] }
   0x6   :  { %176 = vmatpush3.bf16.msra.mxu0 %v196_v2 }
   0x7   :  { %177 = vmatprep.subr.bf16.mxu0 %v203_v0 }
   0xa   :  { %178 = vmatpush3.bf16.msra.mxu0 %v197_v3 }
   0xb   :  { %179 = vmatprep.subr.bf16.mxu0 %v203_v0 }
   0xe   :  { %180 = vmatpush3.bf16.msra.mxu0 %v198_v4 }
   0xf   :  { %181 = vmatprep.subr.bf16.mxu0 %v203_v0 }
  0x12   :  { %182 = vmatpush3.bf16.msra.mxu0 %v199_v5 }
  0x13   :  { %183 = vmatprep.subr.bf16.mxu0 %v203_v0 }
  0x16   :  { %184 = vmatpush3.bf16.msra.mxu0 %v200_v6 }
  0x17   :  { %185 = vmatprep.subr.bf16.mxu0 %v203_v0 }
  0x1a   :  { %186 = vmatpush3.bf16.msra.mxu0 %v201_v7 }
  0x1b   :  { %187 = vmatprep.subr.bf16.mxu0 %v203_v0 }
  0x1e   :  { %188 = vmatpush3.bf16.msra.mxu0 %v202_v8 }
  0x21   :  { %190 = vmatmul.mubr.bf16.vlgmr.msra.gmra.mrb[0].mxu0 %v20_v9 }
  0xf4   :  { %v119_v10 = vpop.f32.mrb[0].mxu0 }
  0xf5   :  { %131 = vst [vmem:[%s267_s2] sm:$0xff] %v119_v10  ;;  %v133_v11 = vrot.slane %v119_v10, 4  ;;  %v140_v12 = vmul.f32 %v119_v10, %v119_v10  ;;  %v191_v13 = vpop.f32.mrb[1].mxu0 }
  0xf6   :  { %v122_v14 = vpop.f32.mrb[2].mxu0 }
  0xf7   :  { %v134_v15 = vadd.f32 %v133_v11, %v119_v10  ;;  %v141_v16 = vrot.slane %v140_v12, 4  ;;  %v192_v17 = vpop.f32.mrb[3].mxu0 }
  0xf9   :  { %v135_v18 = vrot.slane %v134_v15, 2  ;;  %v142_v19 = vadd.f32 %v141_v16, %v140_v12 }
  0xfb   :  { %v136_v20 = vadd.f32 %v135_v18, %v134_v15  ;;  %v143_v21 = vrot.slane %v142_v19, 2 }
  0xfd   :  { %v137_v22 = vrot.slane %v136_v20, 1  ;;  %v144_v23 = vadd.f32 %v143_v21, %v142_v19 }
  0xff   :  { %v138_v24 = vadd.f32 %v137_v22, %v136_v20  ;;  %v145_v25 = vrot.slane %v144_v23, 1 }
 0x101   :  { %139 = vst [vmem:[%s265_s3] sm:$0x1] %v138_v24  ;;  %v146_v26 = vadd.f32 %v145_v25, %v144_v23 }
 0x103   :  { %147 = vst [vmem:[%s265_s3 + $0x1] sm:$0x1] %v146_v26 }

// kernel: _lambda_.53
= control target key start
LH: loop header
LB: loop body
LE: loop exit
PB: predicated region body
PF: predicated region fallthrough
CT: control target
= control target key end

     0   :  { %s124_s0 = inlined_call_operand.vmem [shape: f32[8,128], index: 0, kind: input, shape index: {}]   ;;  %s125_s1 = inlined_call_operand.vmem [shape: f32[1,128], index: 1, kind: input, shape index: {}]   ;;  %s126_s2 = inlined_call_operand.vmem [shape: f32[1,128], index: 2, kind: input, shape index: {}]   ;;  %s127_s3 = inlined_call_operand.vmem [shape: f32[8,128], index: 3, kind: input, shape index: {}]   ;;  %s128_s4 = inlined_call_operand.vmem [shape: f32[1,128], index: 4, kind: input, shape index: {}]   ;;  %s129_s5 = inlined_call_operand.vmem [shape: f32[1,128], index: 5, kind: input, shape index: {}]   ;;  %s130_s6 = inlined_call_operand.vmem [shape: f32[8,128], index: 6, kind: output, shape index: {}]  }
   0x1   :  { %v23_v0 = vld [vmem:[%s124_s0] sm:$0xff] }
   0x2   :  { %v64_v1 = vld [vmem:[%s125_s1] ss:$0 sm:$0xff] }
   0x3   :  { %v65_v2 = vld [vmem:[%s126_s2] ss:$0 sm:$0xff]  ;;  %v31_v3 = vmul.f32 %v64_v1, %v23_v0 }
   0x4   :  { %v40_v4 = vld [vmem:[%s127_s3] sm:$0xff] }
   0x5   :  { %v66_v5 = vld [vmem:[%s128_s4] ss:$0 sm:$0xff]  ;;  %v39_v7 = vadd.f32 %v65_v2, %v31_v3 }
   0x6   :  { %v48_v6 = vmul.f32 %v66_v5, %v40_v4  ;;  %v67_v8 = vld [vmem:[%s129_s5] ss:$0 sm:$0xff] }
   0x8   :  { %v49_v9 = vadd.f32 %v48_v6, %v39_v7 }
   0xa   :  { %v57_v10 = vadd.f32 %v67_v8, %v49_v9 }
   0xc   :  { %v58_v11 = vmax.f32 %v57_v10, 0.0 }
   0xe   :  { %59 = vst [vmem:[%s130_s6] sm:$0xff] %v58_v11 }

// kernel: _lambda_.57
= control target key start
LH: loop header
LB: loop body
LE: loop exit
PB: predicated region body
PF: predicated region fallthrough
CT: control target
= control target key end

     0   :  { %s84_s0 = inlined_call_operand.vmem [shape: f32[8,128], index: 0, kind: input, shape index: {}]   ;;  %s85_s1 = inlined_call_operand.vmem [shape: f32[1,128], index: 1, kind: input, shape index: {}]   ;;  %s86_s2 = inlined_call_operand.vmem [shape: f32[1,128], index: 2, kind: input, shape index: {}]   ;;  %s87_s3 = inlined_call_operand.vmem [shape: f32[8,128], index: 3, kind: input, shape index: {}]   ;;  %s88_s4 = inlined_call_operand.vmem [shape: f32[8,128], index: 4, kind: output, shape index: {}]  }
   0x1   :  { %v17_v0 = vld [vmem:[%s84_s0] sm:$0xff] }
   0x2   :  { %v42_v1 = vld [vmem:[%s85_s1] ss:$0 sm:$0xff] }
   0x3   :  { %v43_v2 = vld [vmem:[%s86_s2] ss:$0 sm:$0xff]  ;;  %v25_v3 = vmul.f32 %v42_v1, %v17_v0 }
   0x4   :  { %v34_v4 = vld [vmem:[%s87_s3] sm:$0xff] }
   0x5   :  { %v33_v5 = vadd.f32 %v43_v2, %v25_v3 }
   0x7   :  { %v35_v6 = vadd.f32 %v34_v4, %v33_v5 }
   0x9   :  { %v36_v7 = vmax.f32 %v35_v6, 0.0 }
   0xb   :  { %37 = vst [vmem:[%s88_s4] sm:$0xff] %v36_v7 }

// kernel: _lambda_.58
= control target key start
LH: loop header
LB: loop body
LE: loop exit
PB: predicated region body
PF: predicated region fallthrough
CT: control target
= control target key end

     0   :  { %s1224_s12 = smov 0   ;;  %s1226_s13 = smov 0   ;;  %s1460_s0 = inlined_call_operand.vmem [shape: bf16[8,1152], index: 0, kind: input, shape index: {}]   ;;  %s1461_s1 = inlined_call_operand.vmem [shape: bf16[1152,256], index: 1, kind: input, shape index: {}]   ;;  %s1462_s2 = inlined_call_operand.vmem [shape: f32[8,256], index: 2, kind: output, shape index: {0}]   ;;  %s1463_s3 = inlined_call_operand.vmem [shape: f32[8,256], index: 3, kind: output, shape index: {1}]  }
   0x1   :  { %s1228_s14 = smov 0   ;;  %s1230_s15 = smov 0  }
   0x2   :  { %s1232_s16 = smov 0   ;;  %s1234_s17 = smov 0  }
   0x3   :  { %s1236_s18 = smov 0  }
   0x4 LB: > { %s26_s19 = sadd.s32 1, %s1190_s16  ;;  %s29_s20 = sadd.s32 1, %s1194_s17  ;;  %s1198_s18 = sphi %s1236_s18, %s14_s18   ;;  %s1194_s17 = sphi %s1234_s17, %s1469_s17   ;;  %s1190_s16 = sphi %s1232_s16, %s1468_s16   ;;  %s1186_s15 = sphi %s1230_s15, %s1467_s15   ;;  %s1182_s14 = sphi %s1228_s14, %s1466_s14   ;;  %s1178_s13 = sphi %s1226_s13, %s1465_s13   ;;  %s1174_s12 = sphi %s1224_s12, %s1464_s12  }
   0x5   : > { %p27_p0 = scmp.ge.s32.totalorder %s26_s19, 3  ;;  %p77_p1 = scmp.ne.s32.totalorder %s1178_s13, %s1174_s12 }
   0x6   : > { %p78_p2 = scmp.eq.s32.totalorder %s1198_s18, 0  ;;  %s70_s24 = sadd.s32 1, %s1178_s13 }
   0x7   : > { %s1471_s19 = smov (%p27_p0, %s26_s19), 0  ;;  %s1473_s20 = smov (!%p27_p0, %s29_s20), %s1194_s17 }
   0x8   : > { %p79_p3 = por %p78_p2, %p77_p1  ;;  %p31_p4 = scmp.ge.s32.totalorder %s1473_s20, 2 }
   0x9   : > { %s65_s21 = ssub.s32 %s1190_s16, %s1471_s19  ;;  %p965_p6 = scmp.ge.s32.totalorder %s1198_s18, 6 }
   0xa   : > { %s1475_s20 = smov (%p31_p4, %s1473_s20), 0 }
   0xb   : > { %s66_s22 = ssub.s32 %s1194_s17, %s1475_s20  ;;  %159 = sbr.rel (%p965_p6) target bundleno = 57 (0x39), region = 16 }
   0xc   : > { %s67_s23 = sor.u32 %s66_s22, %s65_s21 }
   0xd   : > { %p68_p5 = scmp.eq.s32.totalorder %s67_s23, 0 }
   0xf   : > { %s1275_s25 = scalar_select %p68_p5, %s1178_s13, %s70_s24  }
  0x12   : > { %175 = sbr.rel (!%p79_p3) target bundleno = 57 (0x39), region = 24  ;;  %s177_s26 = sand.u32 (%p79_p3), 1, %s1178_s13  }
  0x13   : > { %s1003_s27 = smul.u32 (%p79_p3), 96, %s1190_s16 }
  0x14   : > { %s1055_s28 = smul.u32 (%p79_p3), 192, %s177_s26 }
  0x15   : > { %s182_s29 = sadd.s32 (%p79_p3), %s1194_s17, %s1003_s27 }
  0x16   : > { %s967_s30 = sshll.u32 (%p79_p3), %s182_s29, 2  ;;  %s1289_s7 = scalar_lea.vmem (%p79_p3), [#allocation3], %s1055_s28 }
  0x17   : > { %s1284_s6 = scalar_lea.vmem (%p79_p3), %s1461_s1, %s967_s30 }
  0x18   : > { %v200_v0 = vld [vmem:[%s1284_s6] sm:$0xf] (%p79_p3)  ;;  %v202_v1 = vld [vmem:[%s1284_s6 + $0x8] sm:$0xf] (%p79_p3)  ;;  %v204_v2 = vld [vmem:[%s1284_s6 + $0x10] sm:$0xf] (%p79_p3) }
  0x19   : > { %201 = vst [vmem:[%s1289_s7] sm:$0xf] %v200_v0  ;;  %203 = vst [vmem:[%s1289_s7 + $0x4] sm:$0xf] %v202_v1  ;;  %v206_v3 = vld [vmem:[%s1284_s6 + $0x18] sm:$0xf] }
  0x1a   : > { %205 = vst [vmem:[%s1289_s7 + $0x8] sm:$0xf] %v204_v2  ;;  %v208_v4 = vld [vmem:[%s1284_s6 + $0x20] sm:$0xf]  ;;  %v210_v5 = vld [vmem:[%s1284_s6 + $0x28] sm:$0xf] }
  0x1b   : > { %207 = vst [vmem:[%s1289_s7 + $0xc] sm:$0xf] %v206_v3  ;;  %209 = vst [vmem:[%s1289_s7 + $0x10] sm:$0xf] %v208_v4  ;;  %v212_v6 = vld [vmem:[%s1284_s6 + $0x30] sm:$0xf] }
  0x1c   : > { %211 = vst [vmem:[%s1289_s7 + $0x14] sm:$0xf] %v210_v5  ;;  %v214_v7 = vld [vmem:[%s1284_s6 + $0x38] sm:$0xf]  ;;  %v216_v8 = vld [vmem:[%s1284_s6 + $0x40] sm:$0xf] }
  0x1d   : > { %213 = vst [vmem:[%s1289_s7 + $0x18] sm:$0xf] %v212_v6  ;;  %215 = vst [vmem:[%s1289_s7 + $0x1c] sm:$0xf] %v214_v7  ;;  %v218_v9 = vld [vmem:[%s1284_s6 + $0x48] sm:$0xf] }
  0x1e   : > { %217 = vst [vmem:[%s1289_s7 + $0x20] sm:$0xf] %v216_v8  ;;  %v220_v10 = vld [vmem:[%s1284_s6 + $0x50] sm:$0xf]  ;;  %v222_v11 = vld [vmem:[%s1284_s6 + $0x58] sm:$0xf] }
  0x1f   : > { %219 = vst [vmem:[%s1289_s7 + $0x24] sm:$0xf] %v218_v9  ;;  %221 = vst [vmem:[%s1289_s7 + $0x28] sm:$0xf] %v220_v10  ;;  %v224_v12 = vld [vmem:[%s1284_s6 + $0x60] sm:$0xf] }
  0x20   : > { %223 = vst [vmem:[%s1289_s7 + $0x2c] sm:$0xf] %v222_v11  ;;  %v226_v13 = vld [vmem:[%s1284_s6 + $0x68] sm:$0xf]  ;;  %v228_v14 = vld [vmem:[%s1284_s6 + $0x70] sm:$0xf] }
  0x21   : > { %225 = vst [vmem:[%s1289_s7 + $0x30] sm:$0xf] %v224_v12  ;;  %227 = vst [vmem:[%s1289_s7 + $0x34] sm:$0xf] %v226_v13  ;;  %v230_v15 = vld [vmem:[%s1284_s6 + $0x78] sm:$0xf] }
  0x22   : > { %229 = vst [vmem:[%s1289_s7 + $0x38] sm:$0xf] %v228_v14  ;;  %v232_v16 = vld [vmem:[%s1284_s6 + $0x80] sm:$0xf]  ;;  %v234_v17 = vld [vmem:[%s1284_s6 + $0x88] sm:$0xf] }
  0x23   : > { %231 = vst [vmem:[%s1289_s7 + $0x3c] sm:$0xf] %v230_v15  ;;  %233 = vst [vmem:[%s1289_s7 + $0x40] sm:$0xf] %v232_v16  ;;  %v236_v18 = vld [vmem:[%s1284_s6 + $0x90] sm:$0xf] }
  0x24   : > { %235 = vst [vmem:[%s1289_s7 + $0x44] sm:$0xf] %v234_v17  ;;  %v238_v19 = vld [vmem:[%s1284_s6 + $0x98] sm:$0xf]  ;;  %v240_v20 = vld [vmem:[%s1284_s6 + $0xa0] sm:$0xf] }
  0x25   : > { %237 = vst [vmem:[%s1289_s7 + $0x48] sm:$0xf] %v236_v18  ;;  %239 = vst [vmem:[%s1289_s7 + $0x4c] sm:$0xf] %v238_v19  ;;  %v242_v21 = vld [vmem:[%s1284_s6 + $0xa8] sm:$0xf] }
  0x26   : > { %241 = vst [vmem:[%s1289_s7 + $0x50] sm:$0xf] %v240_v20  ;;  %v244_v22 = vld [vmem:[%s1284_s6 + $0xb0] sm:$0xf]  ;;  %v246_v23 = vld [vmem:[%s1284_s6 + $0xb8] sm:$0xf] }
  0x27   : > { %243 = vst [vmem:[%s1289_s7 + $0x54] sm:$0xf] %v242_v21  ;;  %245 = vst [vmem:[%s1289_s7 + $0x58] sm:$0xf] %v244_v22  ;;  %v248_v24 = vld [vmem:[%s1284_s6 + $0xc0] sm:$0xf] }
  0x28   : > { %247 = vst [vmem:[%s1289_s7 + $0x5c] sm:$0xf] %v246_v23  ;;  %v250_v25 = vld [vmem:[%s1284_s6 + $0xc8] sm:$0xf]  ;;  %v252_v26 = vld [vmem:[%s1284_s6 + $0xd0] sm:$0xf] }
  0x29   : > { %249 = vst [vmem:[%s1289_s7 + $0x60] sm:$0xf] %v248_v24  ;;  %251 = vst [vmem:[%s1289_s7 + $0x64] sm:$0xf] %v250_v25  ;;  %v254_v27 = vld [vmem:[%s1284_s6 + $0xd8] sm:$0xf] }
  0x2a   : > { %253 = vst [vmem:[%s1289_s7 + $0x68] sm:$0xf] %v252_v26  ;;  %v256_v28 = vld [vmem:[%s1284_s6 + $0xe0] sm:$0xf]  ;;  %v258_v29 = vld [vmem:[%s1284_s6 + $0xe8] sm:$0xf] }
  0x2b   : > { %255 = vst [vmem:[%s1289_s7 + $0x6c] sm:$0xf] %v254_v27  ;;  %257 = vst [vmem:[%s1289_s7 + $0x70] sm:$0xf] %v256_v28  ;;  %v260_v30 = vld [vmem:[%s1284_s6 + $0xf0] sm:$0xf] }
  0x2c   : > { %259 = vst [vmem:[%s1289_s7 + $0x74] sm:$0xf] %v258_v29  ;;  %v262_v31 = vld [vmem:[%s1284_s6 + $0xf8] sm:$0xf]  ;;  %v264_v32 = vld [vmem:[%s1284_s6 + $0x100] sm:$0xf] }
  0x2d   : > { %261 = vst [vmem:[%s1289_s7 + $0x78] sm:$0xf] %v260_v30  ;;  %263 = vst [vmem:[%s1289_s7 + $0x7c] sm:$0xf] %v262_v31  ;;  %v266_v33 = vld [vmem:[%s1284_s6 + $0x108] sm:$0xf] }
  0x2e   : > { %265 = vst [vmem:[%s1289_s7 + $0x80] sm:$0xf] %v264_v32  ;;  %v268_v34 = vld [vmem:[%s1284_s6 + $0x110] sm:$0xf]  ;;  %v270_v35 = vld [vmem:[%s1284_s6 + $0x118] sm:$0xf] }
  0x2f   : > { %267 = vst [vmem:[%s1289_s7 + $0x84] sm:$0xf] %v266_v33  ;;  %269 = vst [vmem:[%s1289_s7 + $0x88] sm:$0xf] %v268_v34  ;;  %v272_v36 = vld [vmem:[%s1284_s6 + $0x120] sm:$0xf] }
  0x30   : > { %271 = vst [vmem:[%s1289_s7 + $0x8c] sm:$0xf] %v270_v35  ;;  %v274_v37 = vld [vmem:[%s1284_s6 + $0x128] sm:$0xf]  ;;  %v276_v38 = vld [vmem:[%s1284_s6 + $0x130] sm:$0xf] }
  0x31   : > { %273 = vst [vmem:[%s1289_s7 + $0x90] sm:$0xf] %v272_v36  ;;  %275 = vst [vmem:[%s1289_s7 + $0x94] sm:$0xf] %v274_v37  ;;  %v278_v39 = vld [vmem:[%s1284_s6 + $0x138] sm:$0xf] }
  0x32   : > { %277 = vst [vmem:[%s1289_s7 + $0x98] sm:$0xf] %v276_v38  ;;  %v280_v40 = vld [vmem:[%s1284_s6 + $0x140] sm:$0xf]  ;;  %v282_v41 = vld [vmem:[%s1284_s6 + $0x148] sm:$0xf] }
  0x33   : > { %279 = vst [vmem:[%s1289_s7 + $0x9c] sm:$0xf] %v278_v39  ;;  %281 = vst [vmem:[%s1289_s7 + $0xa0] sm:$0xf] %v280_v40  ;;  %v284_v42 = vld [vmem:[%s1284_s6 + $0x150] sm:$0xf] }
  0x34   : > { %283 = vst [vmem:[%s1289_s7 + $0xa4] sm:$0xf] %v282_v41  ;;  %v286_v43 = vld [vmem:[%s1284_s6 + $0x158] sm:$0xf]  ;;  %v288_v44 = vld [vmem:[%s1284_s6 + $0x160] sm:$0xf] }
  0x35   : > { %285 = vst [vmem:[%s1289_s7 + $0xa8] sm:$0xf] %v284_v42  ;;  %287 = vst [vmem:[%s1289_s7 + $0xac] sm:$0xf] %v286_v43  ;;  %v290_v45 = vld [vmem:[%s1284_s6 + $0x168] sm:$0xf] }
  0x36   : > { %289 = vst [vmem:[%s1289_s7 + $0xb0] sm:$0xf] %v288_v44  ;;  %v292_v46 = vld [vmem:[%s1284_s6 + $0x170] sm:$0xf]  ;;  %v294_v47 = vld [vmem:[%s1284_s6 + $0x178] sm:$0xf] }
  0x37   : > { %291 = vst [vmem:[%s1289_s7 + $0xb4] sm:$0xf] %v290_v45  ;;  %293 = vst [vmem:[%s1289_s7 + $0xb8] sm:$0xf] %v292_v46 }
  0x38   : > { %295 = vst [vmem:[%s1289_s7 + $0xbc] sm:$0xf] %v294_v47 }
  0x39 PF: > { %p968_p7 = scmp.ge.s32.totalorder %s1198_s18, 1  ;;  %p413_p8 = scmp.lt.s32.totalorder %s1198_s18, 7 }
  0x3b   : > { %p414_p9 = pnand %p968_p7, %p413_p8 }
  0x3c   : > { %s420_s8 = sand.u32 (!%p414_p9), 1, %s1174_s12   ;;  %s463_s9 = smul.u32 (!%p414_p9), 3, %s1182_s14 }
  0x3d   : > { %417 = sbr.rel (%p414_p9) target bundleno = 353 (0x161), region = 65  ;;  %p476_p10 = scmp.lt.s32.totalorder (!%p414_p9), %s1186_s15, 1 }
  0x3e   : > { %s1056_s10 = smul.u32 (!%p414_p9), 192, %s420_s8  ;;  %p466_p11 = scmp.lt.s32.totalorder (!%p414_p9), %s463_s9, 8 }
  0x3f   : > { %p972_p12 = scmp.ne.s32.totalorder (!%p414_p9), %s1182_s14, 0 }
  0x40   : > { %s1405_s4 = scalar_lea.vmem (!%p414_p9), [#allocation3], %s1056_s10 }
  0x44   : > { %s1477_s9 = smov (!%p466_p11, %s463_s9), 8  ;;  %s1479_s15 = smov (!%p476_p10, %s1186_s15), 1 }
  0x45   : > { %s969_s11 = sshll.u32 %s1477_s9, 2  ;;  %s970_s24 = sshll.u32 %s1479_s15, 3  ;;  %v1200_v48 = vmov (!%p972_p12), 0.0  }
  0x46   : > { %s1393_s23 = scalar_lea.vmem %s1460_s0, %s969_s11  ;;  %s1398_s28 = scalar_lea.vmem %s1462_s2, %s970_s24  ;;  %495 = vst [vmem:[#allocation2] sm:$0xff] (!%p972_p12), %v1200_v48 }
  0x47   : > { %s1403_s30 = scalar_lea.vmem %s1463_s3, %s970_s24  ;;  %494 = sbr.rel (%p972_p12) target bundleno = 78 (0x4e), region = 73 }
  0x4e PF: > { %v1117_v49 = vld [vmem:[%s1405_s4 + $0x40] sm:$0xff]   ;;  %v1201_v50 = vmov 0.0   ;;  %vm1202_vm0 = vmmov 0   ;;  %v1120_v53 = vld [vmem:[%s1405_s4 + $0x48] sm:$0xff]   ;;  %v1123_v56 = vld [vmem:[%s1405_s4 + $0x50] sm:$0xff]   ;;  %p1000_p13 = scmp.ne.s32.totalorder %s1182_s14, 2 }
  0x4f   : > { %1035 = vmatprep.subr.bf16.mxu1 %v1201_v50  ;;  %v1118_v51 = vld [vmem:[%s1405_s4] sm:$0xff]   ;;  %1004 = vmatprep.subr.bf16.mxu0 %v1117_v49  ;;  %v1121_v54 = vld [vmem:[%s1405_s4 + $0x8] sm:$0xff]   ;;  %v1124_v57 = vld [vmem:[%s1405_s4 + $0x10] sm:$0xff]   ;;  %v1203_v27 = vmov (!%p1000_p13), 0.0  }
  0x50   : > { %v1119_v52 = vld [vmem:[%s1405_s4 + $0x80] sm:$0xff]   ;;  %1051 = vmatprep.mubr.msk.bf16.mxu1 %vm1202_vm0, %v1201_v50  ;;  %1005 = vmatpush3.bf16.msra.mxu0 %v1118_v51  ;;  %v1122_v55 = vld [vmem:[%s1405_s4 + $0x88] sm:$0xff]   ;;  %v1125_v58 = vld [vmem:[%s1405_s4 + $0x90] sm:$0xff]   ;;  %790 = vst [vmem:[%s1403_s30] sm:$0xff] (!%p1000_p13), %v1203_v27 }
  0x51   : > { %1036 = vmatpush3.bf16.msra.mxu1 %v1119_v52  ;;  %1006 = vmatprep.subr.bf16.mxu0 %v1120_v53  ;;  %v1126_v59 = vld [vmem:[%s1405_s4 + $0x58] sm:$0xff]   ;;  %v1129_v62 = vld [vmem:[%s1405_s4 + $0x60] sm:$0xff]   ;;  %v1132_v1 = vld [vmem:[%s1405_s4 + $0x68] sm:$0xff]  }
  0x52   : > { %1037 = vmatprep.subr.bf16.mxu1 %v1201_v50  ;;  %v1127_v60 = vld [vmem:[%s1405_s4 + $0x18] sm:$0xff]   ;;  %v1130_v63 = vld [vmem:[%s1405_s4 + $0x20] sm:$0xff]   ;;  %v1133_v2 = vld [vmem:[%s1405_s4 + $0x28] sm:$0xff]  }
  0x53   : > { %v1128_v61 = vld [vmem:[%s1405_s4 + $0x98] sm:$0xff]   ;;  %v1131_v0 = vld [vmem:[%s1405_s4 + $0xa0] sm:$0xff]   ;;  %v1134_v3 = vld [vmem:[%s1405_s4 + $0xa8] sm:$0xff]  }
  0x54   : > { %1007 = vmatpush3.bf16.msra.mxu0 %v1121_v54  ;;  %v1135_v4 = vld [vmem:[%s1405_s4 + $0x70] sm:$0xff]   ;;  %v1138_v7 = vld [vmem:[%s1405_s4 + $0x78] sm:$0xff]   ;;  %v1143_v13 = vld [vmem:[%s1393_s23 + $0x8] ss:$0 sps:$4 sm:$0xff]  }
  0x55   : > { %1038 = vmatpush3.bf16.msra.mxu1 %v1122_v55  ;;  %1008 = vmatprep.subr.bf16.mxu0 %v1123_v56  ;;  %v1136_v5 = vld [vmem:[%s1405_s4 + $0x30] sm:$0xff]   ;;  %v497_v8 = vld [vmem:[%s1393_s23] sm:$0xff] }
  0x56   : > { %1039 = vmatprep.subr.bf16.mxu1 %v1201_v50  ;;  %v1137_v6 = vld [vmem:[%s1405_s4 + $0xb0] sm:$0xff]   ;;  %v974_v9 = vcombine.high %v497_v8, %v497_v8  ;;  %v1139_v10 = vld [vmem:[%s1405_s4 + $0x38] sm:$0xff]   ;;  %v973_v12 = vcombine.low %v497_v8, %v497_v8 }
  0x57   : > { %v1140_v11 = vld [vmem:[%s1405_s4 + $0xb8] sm:$0xff]  }
  0x58   : > { %1009 = vmatpush3.bf16.msra.mxu0 %v1124_v57  ;;  %734 = vmatprep.mubr.bf16.mxu0 %v974_v9  ;;  %v496_v20 = vld [vmem:[#allocation2] sm:$0xff] }
  0x59   : > { %1040 = vmatpush3.bf16.msra.mxu1 %v1125_v58  ;;  %1010 = vmatprep.subr.bf16.mxu0 %v1126_v59 }
  0x5a   : > { %1041 = vmatprep.subr.bf16.mxu1 %v1201_v50 }
  0x5c   : > { %1011 = vmatpush3.bf16.msra.mxu0 %v1127_v60 }
  0x5d   : > { %1042 = vmatpush3.bf16.msra.mxu1 %v1128_v61  ;;  %1012 = vmatprep.subr.bf16.mxu0 %v1129_v62 }
  0x5e   : > { %1043 = vmatprep.subr.bf16.mxu1 %v1201_v50 }
  0x60   : > { %1013 = vmatpush3.bf16.msra.mxu0 %v1130_v63 }
  0x61   : > { %1044 = vmatpush3.bf16.msra.mxu1 %v1131_v0  ;;  %1014 = vmatprep.subr.bf16.mxu0 %v1132_v1 }
  0x62   : > { %1045 = vmatprep.subr.bf16.mxu1 %v1201_v50 }
  0x64   : > { %1015 = vmatpush3.bf16.msra.mxu0 %v1133_v2 }
  0x65   : > { %1046 = vmatpush3.bf16.msra.mxu1 %v1134_v3  ;;  %1016 = vmatprep.subr.bf16.mxu0 %v1135_v4 }
  0x66   : > { %1047 = vmatprep.subr.bf16.mxu1 %v1201_v50 }
  0x68   : > { %1017 = vmatpush3.bf16.msra.mxu0 %v1136_v5 }
  0x69   : > { %1048 = vmatpush3.bf16.msra.mxu1 %v1137_v6  ;;  %1018 = vmatprep.subr.bf16.mxu0 %v1138_v7 }
  0x6a   : > { %1049 = vmatprep.subr.bf16.mxu1 %v1201_v50 }
  0x6c   : > { %1019 = vmatpush3.bf16.msra.mxu0 %v1139_v10 }
  0x6d   : > { %1050 = vmatpush3.bf16.msra.mxu1 %v1140_v11 }
  0x6f   : > { %735 = vmatmul.mubr.bf16.vlgmr.msra.gmra.mrb[0].mxu0 %v973_v12 }
  0x70   : > { %1052 = vmatmul.mubr.bf16.vlgmr.msra.gmra.mrb[0].mxu1 %v1143_v13 }
 0x142   : > { %v1020_v14 = vpop.f32.mrb[0].mxu0 }
 0x143   : > { %v776_v15 = vpop.f32.mrb[0].mxu1  ;;  %v1021_v16 = vpop.f32.mrb[1].mxu0 }
 0x144   : > { %v1022_v17 = vadd.f32 %v1021_v16, %v1020_v14  ;;  %v1053_v18 = vpop.f32.mrb[1].mxu1  ;;  %v1023_v19 = vpop.f32.mrb[2].mxu0  ;;  %787 = sbr.rel (%p1000_p13) target bundleno = 353 (0x161), region = 77 }
 0x145   : > { %v779_v21 = vpop.f32.mrb[2].mxu1  ;;  %v1024_v22 = vpop.f32.mrb[3].mxu0 }
 0x146   : > { %v777_v23 = vadd.f32 %v1022_v17, %v776_v15  ;;  %v1054_v24 = vpop.f32.mrb[3].mxu1 }
 0x148   : > { %v782_v25 = vadd.f32 %v777_v23, %v496_v20 }
 0x14a   : > { %783 = vst [vmem:[#allocation2] sm:$0xff] %v782_v25 }
 0x151   : > { %v788_v26 = vld [vmem:[#allocation2] sm:$0xff] }
 0x152   : > { %789 = vst [vmem:[%s1398_s28] sm:$0xff] %v788_v26  ;;  %v791_v28 = vrot.slane %v788_v26, 4  ;;  %v798_v29 = vmul.f32 %v788_v26, %v788_v26 }
 0x154   : > { %v792_v30 = vadd.f32 %v791_v28, %v788_v26  ;;  %v799_v31 = vrot.slane %v798_v29, 4 }
 0x156   : > { %v793_v32 = vrot.slane %v792_v30, 2  ;;  %v800_v33 = vadd.f32 %v799_v31, %v798_v29 }
 0x158   : > { %v794_v34 = vadd.f32 %v793_v32, %v792_v30  ;;  %v801_v35 = vrot.slane %v800_v33, 2 }
 0x15a   : > { %v795_v36 = vrot.slane %v794_v34, 1  ;;  %v802_v37 = vadd.f32 %v801_v35, %v800_v33 }
 0x15c   : > { %v796_v38 = vadd.f32 %v795_v36, %v794_v34  ;;  %v803_v39 = vrot.slane %v802_v37, 1 }
 0x15e   : > { %797 = vst [vmem:[%s1403_s30] sm:$0x1] %v796_v38  ;;  %v804_v40 = vadd.f32 %v803_v39, %v802_v37 }
 0x160   : > { %805 = vst [vmem:[%s1403_s30 + $0x1] sm:$0x1] %v804_v40 }
 0x161 PF: > { %s14_s18 = sadd.s32 1, %s1198_s18   ;;  %s1464_s12 = smov %s1178_s13 }
 0x162   : > { %p11_p0 = scmp.ge.s32.totalorder %s14_s18, 8   ;;  %s1465_s13 = smov %s1275_s25 }
 0x163   : > { %s1466_s14 = smov %s1190_s16  ;;  %s1467_s15 = smov %s1194_s17 }
 0x164   : > { %s1468_s16 = smov %s1471_s19  ;;  %s1469_s17 = smov %s1475_s20 }
 0x165   :  { %13 = sbr.rel (!%p11_p0) target bundleno = 4 (0x4), region = 127 }

// kernel: _lambda_.59
= control target key start
LH: loop header
LB: loop body
LE: loop exit
PB: predicated region body
PF: predicated region fallthrough
CT: control target
= control target key end

     0   :  { %v18_v0 = vlaneseq  ;;  %s90_s1 = inlined_call_operand.vmem [shape: f32[1,256], index: 1, kind: input, shape index: {}]   ;;  %s91_s2 = inlined_call_operand.vmem [shape: f32[1,256], index: 2, kind: input, shape index: {}]   ;;  %s92_s0 = inlined_call_operand.vmem [shape: f32[8,256], index: 0, kind: input, shape index: {}]   ;;  %s93_s3 = inlined_call_operand.vmem [shape: f32[8,256], index: 3, kind: output, shape index: {}]  }
   0x1   :  { %v16_v2 = vld [vmem:[%s90_s1] sm:$0x3]  ;;  %v15_v7 = vld [vmem:[%s92_s0 + $0x8] sm:$0xff] }
   0x2   :  { %v19_v1 = vshrl.u32 %v18_v0, 7  ;;  %v30_v3 = vld [vmem:[%s91_s2] sm:$0x3] }
   0x3   :  { %v14_v6 = vld [vmem:[%s92_s0] sm:$0xff] }
   0x4   :  { %v20_v4 = vsub.s32 0, %v19_v1  ;;  %v24_v5 = vsub.s32 1, %v19_v1 }
   0x6   :  { %v21_v8 = vrot.slane %v16_v2, %v20_v4  ;;  %v35_v9 = vrot.slane %v30_v3, %v20_v4  ;;  %v25_v10 = vrot.slane %v16_v2, %v24_v5  ;;  %v39_v11 = vrot.slane %v30_v3, %v24_v5 }
   0x8   :  { %v28_v12 = vmul.f32 %v21_v8, %v14_v6  ;;  %v29_v13 = vmul.f32 %v25_v10, %v15_v7 }
   0xa   :  { %v42_v14 = vadd.f32 %v35_v9, %v28_v12  ;;  %v43_v15 = vadd.f32 %v39_v11, %v29_v13 }
   0xc   :  { %v44_v16 = vmax.f32 %v42_v14, 0.0  ;;  %v45_v17 = vmax.f32 %v43_v15, 0.0 }
   0xe   :  { %46 = vst [vmem:[%s93_s3] sm:$0xff] %v44_v16  ;;  %47 = vst [vmem:[%s93_s3 + $0x8] sm:$0xff] %v45_v17 }

// kernel: _lambda_.60
= control target key start
LH: loop header
LB: loop body
LE: loop exit
PB: predicated region body
PF: predicated region fallthrough
CT: control target
= control target key end

     0   :  { %s1224_s12 = smov 0   ;;  %s1226_s13 = smov 0   ;;  %s1460_s0 = inlined_call_operand.vmem [shape: bf16[8,2304], index: 0, kind: input, shape index: {}]   ;;  %s1461_s1 = inlined_call_operand.vmem [shape: bf16[2304,256], index: 1, kind: input, shape index: {}]   ;;  %s1462_s2 = inlined_call_operand.vmem [shape: f32[8,256], index: 2, kind: output, shape index: {0}]   ;;  %s1463_s3 = inlined_call_operand.vmem [shape: f32[8,256], index: 3, kind: output, shape index: {1}]  }
   0x1   :  { %s1228_s14 = smov 0   ;;  %s1230_s15 = smov 0  }
   0x2   :  { %s1232_s16 = smov 0   ;;  %s1234_s17 = smov 0  }
   0x3   :  { %s1236_s18 = smov 0  }
   0x4 LB: > { %s26_s19 = sadd.s32 1, %s1190_s16  ;;  %s29_s20 = sadd.s32 1, %s1194_s17  ;;  %s1198_s18 = sphi %s1236_s18, %s14_s18   ;;  %s1194_s17 = sphi %s1234_s17, %s1469_s17   ;;  %s1190_s16 = sphi %s1232_s16, %s1468_s16   ;;  %s1186_s15 = sphi %s1230_s15, %s1467_s15   ;;  %s1182_s14 = sphi %s1228_s14, %s1466_s14   ;;  %s1178_s13 = sphi %s1226_s13, %s1465_s13   ;;  %s1174_s12 = sphi %s1224_s12, %s1464_s12  }
   0x5   : > { %p27_p0 = scmp.ge.s32.totalorder %s26_s19, 6  ;;  %p77_p1 = scmp.ne.s32.totalorder %s1178_s13, %s1174_s12 }
   0x6   : > { %p78_p2 = scmp.eq.s32.totalorder %s1198_s18, 0  ;;  %s70_s24 = sadd.s32 1, %s1178_s13 }
   0x7   : > { %s1471_s19 = smov (%p27_p0, %s26_s19), 0  ;;  %s1473_s20 = smov (!%p27_p0, %s29_s20), %s1194_s17 }
   0x8   : > { %p79_p3 = por %p78_p2, %p77_p1  ;;  %p31_p4 = scmp.ge.s32.totalorder %s1473_s20, 2 }
   0x9   : > { %s65_s21 = ssub.s32 %s1190_s16, %s1471_s19  ;;  %p965_p6 = scmp.ge.s32.totalorder %s1198_s18, 12 }
   0xa   : > { %s1475_s20 = smov (%p31_p4, %s1473_s20), 0 }
   0xb   : > { %s66_s22 = ssub.s32 %s1194_s17, %s1475_s20  ;;  %159 = sbr.rel (%p965_p6) target bundleno = 57 (0x39), region = 16 }
   0xc   : > { %s67_s23 = sor.u32 %s66_s22, %s65_s21 }
   0xd   : > { %p68_p5 = scmp.eq.s32.totalorder %s67_s23, 0 }
   0xf   : > { %s1275_s25 = scalar_select %p68_p5, %s1178_s13, %s70_s24  }
  0x12   : > { %175 = sbr.rel (!%p79_p3) target bundleno = 57 (0x39), region = 24  ;;  %s177_s26 = sand.u32 (%p79_p3), 1, %s1178_s13  }
  0x13   : > { %s1003_s27 = smul.u32 (%p79_p3), 96, %s1190_s16 }
  0x14   : > { %s1055_s28 = smul.u32 (%p79_p3), 192, %s177_s26 }
  0x15   : > { %s182_s29 = sadd.s32 (%p79_p3), %s1194_s17, %s1003_s27 }
  0x16   : > { %s967_s30 = sshll.u32 (%p79_p3), %s182_s29, 2  ;;  %s1289_s7 = scalar_lea.vmem (%p79_p3), [#allocation3], %s1055_s28 }
  0x17   : > { %s1284_s6 = scalar_lea.vmem (%p79_p3), %s1461_s1, %s967_s30 }
  0x18   : > { %v200_v0 = vld [vmem:[%s1284_s6] sm:$0xf] (%p79_p3)  ;;  %v202_v1 = vld [vmem:[%s1284_s6 + $0x8] sm:$0xf] (%p79_p3)  ;;  %v204_v2 = vld [vmem:[%s1284_s6 + $0x10] sm:$0xf] (%p79_p3) }
  0x19   : > { %201 = vst [vmem:[%s1289_s7] sm:$0xf] %v200_v0  ;;  %203 = vst [vmem:[%s1289_s7 + $0x4] sm:$0xf] %v202_v1  ;;  %v206_v3 = vld [vmem:[%s1284_s6 + $0x18] sm:$0xf] }
  0x1a   : > { %205 = vst [vmem:[%s1289_s7 + $0x8] sm:$0xf] %v204_v2  ;;  %v208_v4 = vld [vmem:[%s1284_s6 + $0x20] sm:$0xf]  ;;  %v210_v5 = vld [vmem:[%s1284_s6 + $0x28] sm:$0xf] }
  0x1b   : > { %207 = vst [vmem:[%s1289_s7 + $0xc] sm:$0xf] %v206_v3  ;;  %209 = vst [vmem:[%s1289_s7 + $0x10] sm:$0xf] %v208_v4  ;;  %v212_v6 = vld [vmem:[%s1284_s6 + $0x30] sm:$0xf] }
  0x1c   : > { %211 = vst [vmem:[%s1289_s7 + $0x14] sm:$0xf] %v210_v5  ;;  %v214_v7 = vld [vmem:[%s1284_s6 + $0x38] sm:$0xf]  ;;  %v216_v8 = vld [vmem:[%s1284_s6 + $0x40] sm:$0xf] }
  0x1d   : > { %213 = vst [vmem:[%s1289_s7 + $0x18] sm:$0xf] %v212_v6  ;;  %215 = vst [vmem:[%s1289_s7 + $0x1c] sm:$0xf] %v214_v7  ;;  %v218_v9 = vld [vmem:[%s1284_s6 + $0x48] sm:$0xf] }
  0x1e   : > { %217 = vst [vmem:[%s1289_s7 + $0x20] sm:$0xf] %v216_v8  ;;  %v220_v10 = vld [vmem:[%s1284_s6 + $0x50] sm:$0xf]  ;;  %v222_v11 = vld [vmem:[%s1284_s6 + $0x58] sm:$0xf] }
  0x1f   : > { %219 = vst [vmem:[%s1289_s7 + $0x24] sm:$0xf] %v218_v9  ;;  %221 = vst [vmem:[%s1289_s7 + $0x28] sm:$0xf] %v220_v10  ;;  %v224_v12 = vld [vmem:[%s1284_s6 + $0x60] sm:$0xf] }
  0x20   : > { %223 = vst [vmem:[%s1289_s7 + $0x2c] sm:$0xf] %v222_v11  ;;  %v226_v13 = vld [vmem:[%s1284_s6 + $0x68] sm:$0xf]  ;;  %v228_v14 = vld [vmem:[%s1284_s6 + $0x70] sm:$0xf] }
  0x21   : > { %225 = vst [vmem:[%s1289_s7 + $0x30] sm:$0xf] %v224_v12  ;;  %227 = vst [vmem:[%s1289_s7 + $0x34] sm:$0xf] %v226_v13  ;;  %v230_v15 = vld [vmem:[%s1284_s6 + $0x78] sm:$0xf] }
  0x22   : > { %229 = vst [vmem:[%s1289_s7 + $0x38] sm:$0xf] %v228_v14  ;;  %v232_v16 = vld [vmem:[%s1284_s6 + $0x80] sm:$0xf]  ;;  %v234_v17 = vld [vmem:[%s1284_s6 + $0x88] sm:$0xf] }
  0x23   : > { %231 = vst [vmem:[%s1289_s7 + $0x3c] sm:$0xf] %v230_v15  ;;  %233 = vst [vmem:[%s1289_s7 + $0x40] sm:$0xf] %v232_v16  ;;  %v236_v18 = vld [vmem:[%s1284_s6 + $0x90] sm:$0xf] }
  0x24   : > { %235 = vst [vmem:[%s1289_s7 + $0x44] sm:$0xf] %v234_v17  ;;  %v238_v19 = vld [vmem:[%s1284_s6 + $0x98] sm:$0xf]  ;;  %v240_v20 = vld [vmem:[%s1284_s6 + $0xa0] sm:$0xf] }
  0x25   : > { %237 = vst [vmem:[%s1289_s7 + $0x48] sm:$0xf] %v236_v18  ;;  %239 = vst [vmem:[%s1289_s7 + $0x4c] sm:$0xf] %v238_v19  ;;  %v242_v21 = vld [vmem:[%s1284_s6 + $0xa8] sm:$0xf] }
  0x26   : > { %241 = vst [vmem:[%s1289_s7 + $0x50] sm:$0xf] %v240_v20  ;;  %v244_v22 = vld [vmem:[%s1284_s6 + $0xb0] sm:$0xf]  ;;  %v246_v23 = vld [vmem:[%s1284_s6 + $0xb8] sm:$0xf] }
  0x27   : > { %243 = vst [vmem:[%s1289_s7 + $0x54] sm:$0xf] %v242_v21  ;;  %245 = vst [vmem:[%s1289_s7 + $0x58] sm:$0xf] %v244_v22  ;;  %v248_v24 = vld [vmem:[%s1284_s6 + $0xc0] sm:$0xf] }
  0x28   : > { %247 = vst [vmem:[%s1289_s7 + $0x5c] sm:$0xf] %v246_v23  ;;  %v250_v25 = vld [vmem:[%s1284_s6 + $0xc8] sm:$0xf]  ;;  %v252_v26 = vld [vmem:[%s1284_s6 + $0xd0] sm:$0xf] }
  0x29   : > { %249 = vst [vmem:[%s1289_s7 + $0x60] sm:$0xf] %v248_v24  ;;  %251 = vst [vmem:[%s1289_s7 + $0x64] sm:$0xf] %v250_v25  ;;  %v254_v27 = vld [vmem:[%s1284_s6 + $0xd8] sm:$0xf] }
  0x2a   : > { %253 = vst [vmem:[%s1289_s7 + $0x68] sm:$0xf] %v252_v26  ;;  %v256_v28 = vld [vmem:[%s1284_s6 + $0xe0] sm:$0xf]  ;;  %v258_v29 = vld [vmem:[%s1284_s6 + $0xe8] sm:$0xf] }
  0x2b   : > { %255 = vst [vmem:[%s1289_s7 + $0x6c] sm:$0xf] %v254_v27  ;;  %257 = vst [vmem:[%s1289_s7 + $0x70] sm:$0xf] %v256_v28  ;;  %v260_v30 = vld [vmem:[%s1284_s6 + $0xf0] sm:$0xf] }
  0x2c   : > { %259 = vst [vmem:[%s1289_s7 + $0x74] sm:$0xf] %v258_v29  ;;  %v262_v31 = vld [vmem:[%s1284_s6 + $0xf8] sm:$0xf]  ;;  %v264_v32 = vld [vmem:[%s1284_s6 + $0x100] sm:$0xf] }
  0x2d   : > { %261 = vst [vmem:[%s1289_s7 + $0x78] sm:$0xf] %v260_v30  ;;  %263 = vst [vmem:[%s1289_s7 + $0x7c] sm:$0xf] %v262_v31  ;;  %v266_v33 = vld [vmem:[%s1284_s6 + $0x108] sm:$0xf] }
  0x2e   : > { %265 = vst [vmem:[%s1289_s7 + $0x80] sm:$0xf] %v264_v32  ;;  %v268_v34 = vld [vmem:[%s1284_s6 + $0x110] sm:$0xf]  ;;  %v270_v35 = vld [vmem:[%s1284_s6 + $0x118] sm:$0xf] }
  0x2f   : > { %267 = vst [vmem:[%s1289_s7 + $0x84] sm:$0xf] %v266_v33  ;;  %269 = vst [vmem:[%s1289_s7 + $0x88] sm:$0xf] %v268_v34  ;;  %v272_v36 = vld [vmem:[%s1284_s6 + $0x120] sm:$0xf] }
  0x30   : > { %271 = vst [vmem:[%s1289_s7 + $0x8c] sm:$0xf] %v270_v35  ;;  %v274_v37 = vld [vmem:[%s1284_s6 + $0x128] sm:$0xf]  ;;  %v276_v38 = vld [vmem:[%s1284_s6 + $0x130] sm:$0xf] }
  0x31   : > { %273 = vst [vmem:[%s1289_s7 + $0x90] sm:$0xf] %v272_v36  ;;  %275 = vst [vmem:[%s1289_s7 + $0x94] sm:$0xf] %v274_v37  ;;  %v278_v39 = vld [vmem:[%s1284_s6 + $0x138] sm:$0xf] }
  0x32   : > { %277 = vst [vmem:[%s1289_s7 + $0x98] sm:$0xf] %v276_v38  ;;  %v280_v40 = vld [vmem:[%s1284_s6 + $0x140] sm:$0xf]  ;;  %v282_v41 = vld [vmem:[%s1284_s6 + $0x148] sm:$0xf] }
  0x33   : > { %279 = vst [vmem:[%s1289_s7 + $0x9c] sm:$0xf] %v278_v39  ;;  %281 = vst [vmem:[%s1289_s7 + $0xa0] sm:$0xf] %v280_v40  ;;  %v284_v42 = vld [vmem:[%s1284_s6 + $0x150] sm:$0xf] }
  0x34   : > { %283 = vst [vmem:[%s1289_s7 + $0xa4] sm:$0xf] %v282_v41  ;;  %v286_v43 = vld [vmem:[%s1284_s6 + $0x158] sm:$0xf]  ;;  %v288_v44 = vld [vmem:[%s1284_s6 + $0x160] sm:$0xf] }
  0x35   : > { %285 = vst [vmem:[%s1289_s7 + $0xa8] sm:$0xf] %v284_v42  ;;  %287 = vst [vmem:[%s1289_s7 + $0xac] sm:$0xf] %v286_v43  ;;  %v290_v45 = vld [vmem:[%s1284_s6 + $0x168] sm:$0xf] }
  0x36   : > { %289 = vst [vmem:[%s1289_s7 + $0xb0] sm:$0xf] %v288_v44  ;;  %v292_v46 = vld [vmem:[%s1284_s6 + $0x170] sm:$0xf]  ;;  %v294_v47 = vld [vmem:[%s1284_s6 + $0x178] sm:$0xf] }
  0x37   : > { %291 = vst [vmem:[%s1289_s7 + $0xb4] sm:$0xf] %v290_v45  ;;  %293 = vst [vmem:[%s1289_s7 + $0xb8] sm:$0xf] %v292_v46 }
  0x38   : > { %295 = vst [vmem:[%s1289_s7 + $0xbc] sm:$0xf] %v294_v47 }
  0x39 PF: > { %p968_p7 = scmp.ge.s32.totalorder %s1198_s18, 1  ;;  %p413_p8 = scmp.lt.s32.totalorder %s1198_s18, 13 }
  0x3b   : > { %p414_p9 = pnand %p968_p7, %p413_p8 }
  0x3c   : > { %s420_s8 = sand.u32 (!%p414_p9), 1, %s1174_s12   ;;  %s463_s9 = smul.u32 (!%p414_p9), 3, %s1182_s14 }
  0x3d   : > { %417 = sbr.rel (%p414_p9) target bundleno = 353 (0x161), region = 65  ;;  %p476_p10 = scmp.lt.s32.totalorder (!%p414_p9), %s1186_s15, 1 }
  0x3e   : > { %s1056_s10 = smul.u32 (!%p414_p9), 192, %s420_s8  ;;  %p466_p11 = scmp.lt.s32.totalorder (!%p414_p9), %s463_s9, 17 }
  0x3f   : > { %p972_p12 = scmp.ne.s32.totalorder (!%p414_p9), %s1182_s14, 0 }
  0x40   : > { %s1405_s4 = scalar_lea.vmem (!%p414_p9), [#allocation3], %s1056_s10 }
  0x44   : > { %s1477_s9 = smov (!%p466_p11, %s463_s9), 17  ;;  %s1479_s15 = smov (!%p476_p10, %s1186_s15), 1 }
  0x45   : > { %s969_s11 = sshll.u32 %s1477_s9, 2  ;;  %s970_s24 = sshll.u32 %s1479_s15, 3  ;;  %v1200_v48 = vmov (!%p972_p12), 0.0  }
  0x46   : > { %s1393_s23 = scalar_lea.vmem %s1460_s0, %s969_s11  ;;  %s1398_s28 = scalar_lea.vmem %s1462_s2, %s970_s24  ;;  %495 = vst [vmem:[#allocation2] sm:$0xff] (!%p972_p12), %v1200_v48 }
  0x47   : > { %s1403_s30 = scalar_lea.vmem %s1463_s3, %s970_s24  ;;  %494 = sbr.rel (%p972_p12) target bundleno = 78 (0x4e), region = 73 }
  0x4e PF: > { %v1117_v49 = vld [vmem:[%s1405_s4 + $0x40] sm:$0xff]   ;;  %v1201_v50 = vmov 0.0   ;;  %vm1202_vm0 = vmmov 0   ;;  %v1120_v53 = vld [vmem:[%s1405_s4 + $0x48] sm:$0xff]   ;;  %v1123_v56 = vld [vmem:[%s1405_s4 + $0x50] sm:$0xff]   ;;  %p1000_p13 = scmp.ne.s32.totalorder %s1182_s14, 5 }
  0x4f   : > { %1035 = vmatprep.subr.bf16.mxu1 %v1201_v50  ;;  %v1118_v51 = vld [vmem:[%s1405_s4] sm:$0xff]   ;;  %1004 = vmatprep.subr.bf16.mxu0 %v1117_v49  ;;  %v1121_v54 = vld [vmem:[%s1405_s4 + $0x8] sm:$0xff]   ;;  %v1124_v57 = vld [vmem:[%s1405_s4 + $0x10] sm:$0xff]   ;;  %v1203_v27 = vmov (!%p1000_p13), 0.0  }
  0x50   : > { %v1119_v52 = vld [vmem:[%s1405_s4 + $0x80] sm:$0xff]   ;;  %1051 = vmatprep.mubr.msk.bf16.mxu1 %vm1202_vm0, %v1201_v50  ;;  %1005 = vmatpush3.bf16.msra.mxu0 %v1118_v51  ;;  %v1122_v55 = vld [vmem:[%s1405_s4 + $0x88] sm:$0xff]   ;;  %v1125_v58 = vld [vmem:[%s1405_s4 + $0x90] sm:$0xff]   ;;  %790 = vst [vmem:[%s1403_s30] sm:$0xff] (!%p1000_p13), %v1203_v27 }
  0x51   : > { %1036 = vmatpush3.bf16.msra.mxu1 %v1119_v52  ;;  %1006 = vmatprep.subr.bf16.mxu0 %v1120_v53  ;;  %v1126_v59 = vld [vmem:[%s1405_s4 + $0x58] sm:$0xff]   ;;  %v1129_v62 = vld [vmem:[%s1405_s4 + $0x60] sm:$0xff]   ;;  %v1132_v1 = vld [vmem:[%s1405_s4 + $0x68] sm:$0xff]  }
  0x52   : > { %1037 = vmatprep.subr.bf16.mxu1 %v1201_v50  ;;  %v1127_v60 = vld [vmem:[%s1405_s4 + $0x18] sm:$0xff]   ;;  %v1130_v63 = vld [vmem:[%s1405_s4 + $0x20] sm:$0xff]   ;;  %v1133_v2 = vld [vmem:[%s1405_s4 + $0x28] sm:$0xff]  }
  0x53   : > { %v1128_v61 = vld [vmem:[%s1405_s4 + $0x98] sm:$0xff]   ;;  %v1131_v0 = vld [vmem:[%s1405_s4 + $0xa0] sm:$0xff]   ;;  %v1134_v3 = vld [vmem:[%s1405_s4 + $0xa8] sm:$0xff]  }
  0x54   : > { %1007 = vmatpush3.bf16.msra.mxu0 %v1121_v54  ;;  %v1135_v4 = vld [vmem:[%s1405_s4 + $0x70] sm:$0xff]   ;;  %v1138_v7 = vld [vmem:[%s1405_s4 + $0x78] sm:$0xff]   ;;  %v1143_v13 = vld [vmem:[%s1393_s23 + $0x8] ss:$0 sps:$4 sm:$0xff]  }
  0x55   : > { %1038 = vmatpush3.bf16.msra.mxu1 %v1122_v55  ;;  %1008 = vmatprep.subr.bf16.mxu0 %v1123_v56  ;;  %v1136_v5 = vld [vmem:[%s1405_s4 + $0x30] sm:$0xff]   ;;  %v497_v8 = vld [vmem:[%s1393_s23] sm:$0xff] }
  0x56   : > { %1039 = vmatprep.subr.bf16.mxu1 %v1201_v50  ;;  %v1137_v6 = vld [vmem:[%s1405_s4 + $0xb0] sm:$0xff]   ;;  %v974_v9 = vcombine.high %v497_v8, %v497_v8  ;;  %v1139_v10 = vld [vmem:[%s1405_s4 + $0x38] sm:$0xff]   ;;  %v973_v12 = vcombine.low %v497_v8, %v497_v8 }
  0x57   : > { %v1140_v11 = vld [vmem:[%s1405_s4 + $0xb8] sm:$0xff]  }
  0x58   : > { %1009 = vmatpush3.bf16.msra.mxu0 %v1124_v57  ;;  %734 = vmatprep.mubr.bf16.mxu0 %v974_v9  ;;  %v496_v20 = vld [vmem:[#allocation2] sm:$0xff] }
  0x59   : > { %1040 = vmatpush3.bf16.msra.mxu1 %v1125_v58  ;;  %1010 = vmatprep.subr.bf16.mxu0 %v1126_v59 }
  0x5a   : > { %1041 = vmatprep.subr.bf16.mxu1 %v1201_v50 }
  0x5c   : > { %1011 = vmatpush3.bf16.msra.mxu0 %v1127_v60 }
  0x5d   : > { %1042 = vmatpush3.bf16.msra.mxu1 %v1128_v61  ;;  %1012 = vmatprep.subr.bf16.mxu0 %v1129_v62 }
  0x5e   : > { %1043 = vmatprep.subr.bf16.mxu1 %v1201_v50 }
  0x60   : > { %1013 = vmatpush3.bf16.msra.mxu0 %v1130_v63 }
  0x61   : > { %1044 = vmatpush3.bf16.msra.mxu1 %v1131_v0  ;;  %1014 = vmatprep.subr.bf16.mxu0 %v1132_v1 }
  0x62   : > { %1045 = vmatprep.subr.bf16.mxu1 %v1201_v50 }
  0x64   : > { %1015 = vmatpush3.bf16.msra.mxu0 %v1133_v2 }
  0x65   : > { %1046 = vmatpush3.bf16.msra.mxu1 %v1134_v3  ;;  %1016 = vmatprep.subr.bf16.mxu0 %v1135_v4 }
  0x66   : > { %1047 = vmatprep.subr.bf16.mxu1 %v1201_v50 }
  0x68   : > { %1017 = vmatpush3.bf16.msra.mxu0 %v1136_v5 }
  0x69   : > { %1048 = vmatpush3.bf16.msra.mxu1 %v1137_v6  ;;  %1018 = vmatprep.subr.bf16.mxu0 %v1138_v7 }
  0x6a   : > { %1049 = vmatprep.subr.bf16.mxu1 %v1201_v50 }
  0x6c   : > { %1019 = vmatpush3.bf16.msra.mxu0 %v1139_v10 }
  0x6d   : > { %1050 = vmatpush3.bf16.msra.mxu1 %v1140_v11 }
  0x6f   : > { %735 = vmatmul.mubr.bf16.vlgmr.msra.gmra.mrb[0].mxu0 %v973_v12 }
  0x70   : > { %1052 = vmatmul.mubr.bf16.vlgmr.msra.gmra.mrb[0].mxu1 %v1143_v13 }
 0x142   : > { %v1020_v14 = vpop.f32.mrb[0].mxu0 }
 0x143   : > { %v776_v15 = vpop.f32.mrb[0].mxu1  ;;  %v1021_v16 = vpop.f32.mrb[1].mxu0 }
 0x144   : > { %v1022_v17 = vadd.f32 %v1021_v16, %v1020_v14  ;;  %v1053_v18 = vpop.f32.mrb[1].mxu1  ;;  %v1023_v19 = vpop.f32.mrb[2].mxu0  ;;  %787 = sbr.rel (%p1000_p13) target bundleno = 353 (0x161), region = 77 }
 0x145   : > { %v779_v21 = vpop.f32.mrb[2].mxu1  ;;  %v1024_v22 = vpop.f32.mrb[3].mxu0 }
 0x146   : > { %v777_v23 = vadd.f32 %v1022_v17, %v776_v15  ;;  %v1054_v24 = vpop.f32.mrb[3].mxu1 }
 0x148   : > { %v782_v25 = vadd.f32 %v777_v23, %v496_v20 }
 0x14a   : > { %783 = vst [vmem:[#allocation2] sm:$0xff] %v782_v25 }
 0x151   : > { %v788_v26 = vld [vmem:[#allocation2] sm:$0xff] }
 0x152   : > { %789 = vst [vmem:[%s1398_s28] sm:$0xff] %v788_v26  ;;  %v791_v28 = vrot.slane %v788_v26, 4  ;;  %v798_v29 = vmul.f32 %v788_v26, %v788_v26 }
 0x154   : > { %v792_v30 = vadd.f32 %v791_v28, %v788_v26  ;;  %v799_v31 = vrot.slane %v798_v29, 4 }
 0x156   : > { %v793_v32 = vrot.slane %v792_v30, 2  ;;  %v800_v33 = vadd.f32 %v799_v31, %v798_v29 }
 0x158   : > { %v794_v34 = vadd.f32 %v793_v32, %v792_v30  ;;  %v801_v35 = vrot.slane %v800_v33, 2 }
 0x15a   : > { %v795_v36 = vrot.slane %v794_v34, 1  ;;  %v802_v37 = vadd.f32 %v801_v35, %v800_v33 }
 0x15c   : > { %v796_v38 = vadd.f32 %v795_v36, %v794_v34  ;;  %v803_v39 = vrot.slane %v802_v37, 1 }
 0x15e   : > { %797 = vst [vmem:[%s1403_s30] sm:$0x1] %v796_v38  ;;  %v804_v40 = vadd.f32 %v803_v39, %v802_v37 }
 0x160   : > { %805 = vst [vmem:[%s1403_s30 + $0x1] sm:$0x1] %v804_v40 }
 0x161 PF: > { %s14_s18 = sadd.s32 1, %s1198_s18   ;;  %s1464_s12 = smov %s1178_s13 }
 0x162   : > { %p11_p0 = scmp.ge.s32.totalorder %s14_s18, 14   ;;  %s1465_s13 = smov %s1275_s25 }
 0x163   : > { %s1466_s14 = smov %s1190_s16  ;;  %s1467_s15 = smov %s1194_s17 }
 0x164   : > { %s1468_s16 = smov %s1471_s19  ;;  %s1469_s17 = smov %s1475_s20 }
 0x165   :  { %13 = sbr.rel (!%p11_p0) target bundleno = 4 (0x4), region = 127 }

// kernel: _lambda_.61
= control target key start
LH: loop header
LB: loop body
LE: loop exit
PB: predicated region body
PF: predicated region fallthrough
CT: control target
= control target key end

     0   :  { %s805_s12 = smov 0   ;;  %s807_s13 = smov 0   ;;  %s903_s0 = inlined_call_operand.vmem [shape: bf16[8,128], index: 0, kind: input, shape index: {}]   ;;  %s904_s1 = inlined_call_operand.vmem [shape: bf16[128,256], index: 1, kind: input, shape index: {}]   ;;  %s905_s2 = inlined_call_operand.vmem [shape: f32[8,256], index: 2, kind: output, shape index: {0}]   ;;  %s906_s3 = inlined_call_operand.vmem [shape: f32[8,256], index: 3, kind: output, shape index: {1}]  }
   0x1   :  { %s809_s14 = smov 0   ;;  %s811_s15 = smov 0  }
   0x2   :  { %s813_s16 = smov 0  }
   0x3 LB: > { %s29_s17 = sadd.s32 1, %s777_s15  ;;  %p77_p1 = scmp.ne.s32.totalorder %s769_s13, %s765_s12  ;;  %s781_s16 = sphi %s813_s16, %s14_s16   ;;  %s777_s15 = sphi %s811_s15, %s910_s15   ;;  %s773_s14 = sphi %s809_s14, %s909_s14   ;;  %s769_s13 = sphi %s807_s13, %s908_s13   ;;  %s765_s12 = sphi %s805_s12, %s907_s12  }
   0x4   : > { %p31_p0 = scmp.ge.s32.totalorder %s29_s17, 2  ;;  %p78_p2 = scmp.eq.s32.totalorder %s781_s16, 0 }
   0x5   : > { %s70_s19 = sadd.s32 1, %s769_s13  ;;  %p647_p5 = scmp.ge.s32.totalorder %s781_s16, 2 }
   0x6   : > { %s912_s17 = smov (%p31_p0, %s29_s17), 0  ;;  %p79_p3 = por %p78_p2, %p77_p1 }
   0x7   : > { %s66_s18 = ssub.s32 %s777_s15, %s912_s17  ;;  %169 = sbr.rel (%p647_p5) target bundleno = 28 (0x1c), region = 20 }
   0x8   : > { %p68_p4 = scmp.eq.s32.totalorder %s66_s18, 0 }
   0xa   : > { %s840_s20 = scalar_select %p68_p4, %s769_s13, %s70_s19  }
   0xe   : > { %172 = sbr.rel (!%p79_p3) target bundleno = 28 (0x1c), region = 24  ;;  %s174_s21 = sand.u32 (%p79_p3), 1, %s769_s13  }
   0xf   : > { %s649_s22 = sshll.u32 (%p79_p3), %s777_s15, 2  ;;  %s648_s23 = sshll.u32 (%p79_p3), %s174_s21, 6 }
  0x10   : > { %s848_s26 = scalar_lea.vmem (%p79_p3), %s904_s1, %s649_s22  ;;  %s176_s27 = scalar_lea.vmem (%p79_p3), [#allocation3], %s648_s23 }
  0x11   : > { %v197_v0 = vld [vmem:[%s848_s26] sm:$0xf] (%p79_p3)  ;;  %v199_v1 = vld [vmem:[%s848_s26 + $0x8] sm:$0xf] (%p79_p3)  ;;  %v201_v2 = vld [vmem:[%s848_s26 + $0x10] sm:$0xf] (%p79_p3) }
  0x12   : > { %198 = vst [vmem:[%s176_s27] sm:$0xf] (%p79_p3), %v197_v0  ;;  %200 = vst [vmem:[%s176_s27 + $0x4] sm:$0xf] (%p79_p3), %v199_v1  ;;  %v203_v3 = vld [vmem:[%s848_s26 + $0x18] sm:$0xf] (%p79_p3) }
  0x13   : > { %v205_v4 = vld [vmem:[%s848_s26 + $0x20] sm:$0xf] (%p79_p3)  ;;  %202 = vst [vmem:[%s176_s27 + $0x8] sm:$0xf] (%p79_p3), %v201_v2  ;;  %204 = vst [vmem:[%s176_s27 + $0xc] sm:$0xf] (%p79_p3), %v203_v3 }
  0x14   : > { %206 = vst [vmem:[%s176_s27 + $0x10] sm:$0xf] (%p79_p3), %v205_v4  ;;  %v207_v5 = vld [vmem:[%s848_s26 + $0x28] sm:$0xf] (%p79_p3)  ;;  %v209_v6 = vld [vmem:[%s848_s26 + $0x30] sm:$0xf] (%p79_p3) }
  0x15   : > { %v211_v7 = vld [vmem:[%s848_s26 + $0x38] sm:$0xf]  ;;  %208 = vst [vmem:[%s176_s27 + $0x14] sm:$0xf] %v207_v5  ;;  %210 = vst [vmem:[%s176_s27 + $0x18] sm:$0xf] %v209_v6 }
  0x16   : > { %212 = vst [vmem:[%s176_s27 + $0x1c] sm:$0xf] %v211_v7  ;;  %v213_v8 = vld [vmem:[%s848_s26 + $0x40] sm:$0xf]  ;;  %v215_v9 = vld [vmem:[%s848_s26 + $0x48] sm:$0xf] }
  0x17   : > { %v217_v10 = vld [vmem:[%s848_s26 + $0x50] sm:$0xf]  ;;  %214 = vst [vmem:[%s176_s27 + $0x20] sm:$0xf] %v213_v8  ;;  %216 = vst [vmem:[%s176_s27 + $0x24] sm:$0xf] %v215_v9 }
  0x18   : > { %218 = vst [vmem:[%s176_s27 + $0x28] sm:$0xf] %v217_v10  ;;  %v219_v11 = vld [vmem:[%s848_s26 + $0x58] sm:$0xf]  ;;  %v221_v12 = vld [vmem:[%s848_s26 + $0x60] sm:$0xf] }
  0x19   : > { %v223_v13 = vld [vmem:[%s848_s26 + $0x68] sm:$0xf]  ;;  %220 = vst [vmem:[%s176_s27 + $0x2c] sm:$0xf] %v219_v11  ;;  %222 = vst [vmem:[%s176_s27 + $0x30] sm:$0xf] %v221_v12 }
  0x1a   : > { %224 = vst [vmem:[%s176_s27 + $0x34] sm:$0xf] %v223_v13  ;;  %v225_v14 = vld [vmem:[%s848_s26 + $0x70] sm:$0xf]  ;;  %v227_v15 = vld [vmem:[%s848_s26 + $0x78] sm:$0xf] }
  0x1b   : > { %226 = vst [vmem:[%s176_s27 + $0x38] sm:$0xf] %v225_v14  ;;  %228 = vst [vmem:[%s176_s27 + $0x3c] sm:$0xf] %v227_v15 }
  0x1c PF: > { %p650_p6 = scmp.ge.s32.totalorder %s781_s16, 1  ;;  %p282_p7 = scmp.lt.s32.totalorder %s781_s16, 3 }
  0x1e   : > { %p283_p8 = pnand %p650_p6, %p282_p7 }
  0x1f   : > { %s289_s28 = sand.u32 (!%p283_p8), 1, %s765_s12   ;;  %p340_p9 = scmp.lt.s32.totalorder (!%p283_p8), %s773_s14, 1  ;;  %v783_v16 = vmov (!%p283_p8), 0.0   ;;  %vm784_vm0 = vmmov (!%p283_p8), 0   ;;  %v361_v25 = vld [vmem:[%s903_s0] sm:$0xf] (!%p283_p8) }
  0x20   : > { %286 = sbr.rel (%p283_p8) target bundleno = 293 (0x125), region = 65  ;;  %673 = vmatprep.subr.bf16.mxu0 (!%p283_p8), %v783_v16  ;;  %s651_s29 = sshll.u32 (!%p283_p8), %s289_s28, 6  ;;  %689 = vmatprep.mubr.msk.bf16.mxu0 (!%p283_p8), %vm784_vm0, %v783_v16 }
  0x21   : > { %s291_s30 = scalar_lea.vmem (!%p283_p8), [#allocation3], %s651_s29 }
  0x22   : > { %v735_v17 = vld [vmem:[%s291_s30] sm:$0xff] (!%p283_p8)   ;;  %v736_v18 = vld [vmem:[%s291_s30 + $0x8] sm:$0xff] (!%p283_p8)   ;;  %v737_v19 = vld [vmem:[%s291_s30 + $0x10] sm:$0xff] (!%p283_p8)  }
  0x23   : > { %674 = vmatpush3.bf16.msra.mxu0 (!%p283_p8), %v735_v17  ;;  %v738_v20 = vld [vmem:[%s291_s30 + $0x18] sm:$0xff] (!%p283_p8)   ;;  %v739_v21 = vld [vmem:[%s291_s30 + $0x20] sm:$0xff] (!%p283_p8)   ;;  %v740_v22 = vld [vmem:[%s291_s30 + $0x28] sm:$0xff] (!%p283_p8)  }
  0x24   : > { %675 = vmatprep.subr.bf16.mxu0 (!%p283_p8), %v783_v16  ;;  %v741_v23 = vld [vmem:[%s291_s30 + $0x30] sm:$0xff] (!%p283_p8)   ;;  %v742_v24 = vld [vmem:[%s291_s30 + $0x38] sm:$0xff] (!%p283_p8)  }
  0x27   : > { %s914_s14 = smov (!%p340_p9, %s773_s14), 1  ;;  %676 = vmatpush3.bf16.msra.mxu0 %v736_v18 }
  0x28   : > { %s652_s4 = sshll.u32 %s914_s14, 3  ;;  %677 = vmatprep.subr.bf16.mxu0 %v783_v16 }
  0x29   : > { %s877_s7 = scalar_lea.vmem %s906_s3, %s652_s4  ;;  %s345_s12 = scalar_lea.vmem %s905_s2, %s652_s4 }
  0x2a   : > { %473 = vst [vmem:[%s877_s7] sm:$0xff] %v783_v16 }
  0x2b   : > { %678 = vmatpush3.bf16.msra.mxu0 %v737_v19 }
  0x2c   : > { %679 = vmatprep.subr.bf16.mxu0 %v783_v16 }
  0x2f   : > { %680 = vmatpush3.bf16.msra.mxu0 %v738_v20 }
  0x30   : > { %681 = vmatprep.subr.bf16.mxu0 %v783_v16 }
  0x33   : > { %682 = vmatpush3.bf16.msra.mxu0 %v739_v21 }
  0x34   : > { %683 = vmatprep.subr.bf16.mxu0 %v783_v16 }
  0x37   : > { %684 = vmatpush3.bf16.msra.mxu0 %v740_v22 }
  0x38   : > { %685 = vmatprep.subr.bf16.mxu0 %v783_v16 }
  0x3b   : > { %686 = vmatpush3.bf16.msra.mxu0 %v741_v23 }
  0x3c   : > { %687 = vmatprep.subr.bf16.mxu0 %v783_v16 }
  0x3f   : > { %688 = vmatpush3.bf16.msra.mxu0 %v742_v24 }
  0x42   : > { %690 = vmatmul.mubr.bf16.vlgmr.msra.gmra.mrb[0].mxu0 %v361_v25 }
 0x115   : > { %v460_v26 = vpop.f32.mrb[0].mxu0 }
 0x116   : > { %472 = vst [vmem:[%s345_s12] sm:$0xff] %v460_v26  ;;  %v474_v27 = vrot.slane %v460_v26, 4  ;;  %v481_v28 = vmul.f32 %v460_v26, %v460_v26  ;;  %v691_v29 = vpop.f32.mrb[1].mxu0 }
 0x117   : > { %v463_v30 = vpop.f32.mrb[2].mxu0 }
 0x118   : > { %v475_v31 = vadd.f32 %v474_v27, %v460_v26  ;;  %v482_v32 = vrot.slane %v481_v28, 4  ;;  %v692_v33 = vpop.f32.mrb[3].mxu0 }
 0x11a   : > { %v476_v34 = vrot.slane %v475_v31, 2  ;;  %v483_v35 = vadd.f32 %v482_v32, %v481_v28 }
 0x11c   : > { %v477_v36 = vadd.f32 %v476_v34, %v475_v31  ;;  %v484_v37 = vrot.slane %v483_v35, 2 }
 0x11e   : > { %v478_v38 = vrot.slane %v477_v36, 1  ;;  %v485_v39 = vadd.f32 %v484_v37, %v483_v35 }
 0x120   : > { %v479_v40 = vadd.f32 %v478_v38, %v477_v36  ;;  %v486_v41 = vrot.slane %v485_v39, 1 }
 0x122   : > { %480 = vst [vmem:[%s877_s7] sm:$0x1] %v479_v40  ;;  %v487_v42 = vadd.f32 %v486_v41, %v485_v39 }
 0x124   : > { %488 = vst [vmem:[%s877_s7 + $0x1] sm:$0x1] %v487_v42 }
 0x125 PF: > { %s14_s16 = sadd.s32 1, %s781_s16   ;;  %s907_s12 = smov %s769_s13 }
 0x126   : > { %p11_p10 = scmp.ge.s32.totalorder %s14_s16, 4   ;;  %s908_s13 = smov %s840_s20 }
 0x127   : > { %s909_s14 = smov %s777_s15  ;;  %s910_s15 = smov %s912_s17 }
 0x128   :  { %13 = sbr.rel (!%p11_p10) target bundleno = 3 (0x3), region = 127 }

// kernel: _lambda_.62
= control target key start
LH: loop header
LB: loop body
LE: loop exit
PB: predicated region body
PF: predicated region fallthrough
CT: control target
= control target key end

     0   :  { %v27_v0 = vlaneseq  ;;  %s158_s1 = inlined_call_operand.vmem [shape: f32[1,256], index: 1, kind: input, shape index: {}]   ;;  %s159_s2 = inlined_call_operand.vmem [shape: f32[1,256], index: 2, kind: input, shape index: {}]   ;;  %s160_s4 = inlined_call_operand.vmem [shape: f32[1,256], index: 4, kind: input, shape index: {}]   ;;  %s161_s0 = inlined_call_operand.vmem [shape: f32[8,256], index: 0, kind: input, shape index: {}]   ;;  %s162_s3 = inlined_call_operand.vmem [shape: f32[8,256], index: 3, kind: input, shape index: {}]   ;;  %s163_s5 = inlined_call_operand.vmem [shape: f32[1,256], index: 5, kind: input, shape index: {}]   ;;  %s164_s6 = inlined_call_operand.vmem [shape: f32[8,256], index: 6, kind: output, shape index: {}]  }
   0x1   :  { %v25_v2 = vld [vmem:[%s158_s1] sm:$0x3]  ;;  %v24_v12 = vld [vmem:[%s161_s0 + $0x8] sm:$0xff] }
   0x2   :  { %v28_v1 = vshrl.u32 %v27_v0, 7  ;;  %v39_v3 = vld [vmem:[%s159_s2] sm:$0x3]  ;;  %v54_v13 = vld [vmem:[%s162_s3 + $0x8] sm:$0xff] }
   0x3   :  { %v55_v4 = vld [vmem:[%s160_s4] sm:$0x3] }
   0x4   :  { %v29_v5 = vsub.s32 0, %v28_v1  ;;  %v33_v6 = vsub.s32 1, %v28_v1  ;;  %v23_v7 = vld [vmem:[%s161_s0] sm:$0xff] }
   0x5   :  { %v53_v8 = vld [vmem:[%s162_s3] sm:$0xff] }
   0x6   :  { %v30_v9 = vrot.slane %v25_v2, %v29_v5  ;;  %v44_v10 = vrot.slane %v39_v3, %v29_v5  ;;  %v60_v11 = vrot.slane %v55_v4, %v29_v5  ;;  %v71_v14 = vld [vmem:[%s163_s5] sm:$0x3]  ;;  %v34_v15 = vrot.slane %v25_v2, %v33_v6 }
   0x7   :  { %v48_v16 = vrot.slane %v39_v3, %v33_v6  ;;  %v64_v17 = vrot.slane %v55_v4, %v33_v6  ;;  %v76_v23 = vrot.slane %v71_v14, %v29_v5  ;;  %v80_v25 = vrot.slane %v71_v14, %v33_v6 }
   0x8   :  { %v37_v18 = vmul.f32 %v30_v9, %v23_v7  ;;  %v67_v19 = vmul.f32 %v60_v11, %v53_v8  ;;  %v38_v20 = vmul.f32 %v34_v15, %v24_v12 }
   0x9   :  { %v68_v21 = vmul.f32 %v64_v17, %v54_v13 }
   0xa   :  { %v51_v22 = vadd.f32 %v44_v10, %v37_v18  ;;  %v52_v24 = vadd.f32 %v48_v16, %v38_v20 }
   0xc   :  { %v69_v26 = vadd.f32 %v67_v19, %v51_v22  ;;  %v70_v27 = vadd.f32 %v68_v21, %v52_v24 }
   0xe   :  { %v83_v28 = vadd.f32 %v76_v23, %v69_v26  ;;  %v84_v29 = vadd.f32 %v80_v25, %v70_v27 }
  0x10   :  { %v85_v30 = vmax.f32 %v83_v28, 0.0  ;;  %v86_v31 = vmax.f32 %v84_v29, 0.0 }
  0x12   :  { %87 = vst [vmem:[%s164_s6] sm:$0xff] %v85_v30  ;;  %88 = vst [vmem:[%s164_s6 + $0x8] sm:$0xff] %v86_v31 }

// kernel: _lambda_.66
= control target key start
LH: loop header
LB: loop body
LE: loop exit
PB: predicated region body
PF: predicated region fallthrough
CT: control target
= control target key end

     0   :  { %v21_v0 = vlaneseq  ;;  %s108_s1 = inlined_call_operand.vmem [shape: f32[1,256], index: 1, kind: input, shape index: {}]   ;;  %s109_s2 = inlined_call_operand.vmem [shape: f32[1,256], index: 2, kind: input, shape index: {}]   ;;  %s110_s0 = inlined_call_operand.vmem [shape: f32[8,256], index: 0, kind: input, shape index: {}]   ;;  %s111_s3 = inlined_call_operand.vmem [shape: f32[8,256], index: 3, kind: input, shape index: {}]   ;;  %s112_s4 = inlined_call_operand.vmem [shape: f32[8,256], index: 4, kind: output, shape index: {}]  }
   0x1   :  { %v19_v2 = vld [vmem:[%s108_s1] sm:$0x3]  ;;  %v18_v7 = vld [vmem:[%s110_s0 + $0x8] sm:$0xff] }
   0x2   :  { %v22_v1 = vshrl.u32 %v21_v0, 7  ;;  %v33_v3 = vld [vmem:[%s109_s2] sm:$0x3]  ;;  %v48_v15 = vld [vmem:[%s111_s3 + $0x8] sm:$0xff] }
   0x3   :  { %v17_v6 = vld [vmem:[%s110_s0] sm:$0xff] }
   0x4   :  { %v23_v4 = vsub.s32 0, %v22_v1  ;;  %v27_v5 = vsub.s32 1, %v22_v1  ;;  %v47_v14 = vld [vmem:[%s111_s3] sm:$0xff] }
   0x6   :  { %v24_v8 = vrot.slane %v19_v2, %v23_v4  ;;  %v38_v9 = vrot.slane %v33_v3, %v23_v4  ;;  %v28_v10 = vrot.slane %v19_v2, %v27_v5  ;;  %v42_v11 = vrot.slane %v33_v3, %v27_v5 }
   0x8   :  { %v31_v12 = vmul.f32 %v24_v8, %v17_v6  ;;  %v32_v13 = vmul.f32 %v28_v10, %v18_v7 }
   0xa   :  { %v45_v16 = vadd.f32 %v38_v9, %v31_v12  ;;  %v46_v17 = vadd.f32 %v42_v11, %v32_v13 }
   0xc   :  { %v49_v18 = vadd.f32 %v47_v14, %v45_v16  ;;  %v50_v19 = vadd.f32 %v48_v15, %v46_v17 }
   0xe   :  { %v51_v20 = vmax.f32 %v49_v18, 0.0  ;;  %v52_v21 = vmax.f32 %v50_v19, 0.0 }
  0x10   :  { %53 = vst [vmem:[%s112_s4] sm:$0xff] %v51_v20  ;;  %54 = vst [vmem:[%s112_s4 + $0x8] sm:$0xff] %v52_v21 }

// kernel: _lambda_.67
= control target key start
LH: loop header
LB: loop body
LE: loop exit
PB: predicated region body
PF: predicated region fallthrough
CT: control target
= control target key end

     0   :  { %s1224_s12 = smov 0   ;;  %s1226_s13 = smov 0   ;;  %s1460_s0 = inlined_call_operand.vmem [shape: bf16[8,2304], index: 0, kind: input, shape index: {}]   ;;  %s1461_s1 = inlined_call_operand.vmem [shape: bf16[2304,512], index: 1, kind: input, shape index: {}]   ;;  %s1462_s2 = inlined_call_operand.vmem [shape: f32[8,512], index: 2, kind: output, shape index: {0}]   ;;  %s1463_s3 = inlined_call_operand.vmem [shape: f32[8,512], index: 3, kind: output, shape index: {1}]  }
   0x1   :  { %s1228_s14 = smov 0   ;;  %s1230_s15 = smov 0  }
   0x2   :  { %s1232_s16 = smov 0   ;;  %s1234_s17 = smov 0  }
   0x3   :  { %s1236_s18 = smov 0  }
   0x4 LB: > { %s26_s19 = sadd.s32 1, %s1190_s16  ;;  %s29_s20 = sadd.s32 1, %s1194_s17  ;;  %s1198_s18 = sphi %s1236_s18, %s14_s18   ;;  %s1194_s17 = sphi %s1234_s17, %s1469_s17   ;;  %s1190_s16 = sphi %s1232_s16, %s1468_s16   ;;  %s1186_s15 = sphi %s1230_s15, %s1467_s15   ;;  %s1182_s14 = sphi %s1228_s14, %s1466_s14   ;;  %s1178_s13 = sphi %s1226_s13, %s1465_s13   ;;  %s1174_s12 = sphi %s1224_s12, %s1464_s12  }
   0x5   : > { %p27_p0 = scmp.ge.s32.totalorder %s26_s19, 6  ;;  %p77_p1 = scmp.ne.s32.totalorder %s1178_s13, %s1174_s12 }
   0x6   : > { %p78_p2 = scmp.eq.s32.totalorder %s1198_s18, 0  ;;  %s70_s24 = sadd.s32 1, %s1178_s13 }
   0x7   : > { %s1471_s19 = smov (%p27_p0, %s26_s19), 0  ;;  %s1473_s20 = smov (!%p27_p0, %s29_s20), %s1194_s17 }
   0x8   : > { %p79_p3 = por %p78_p2, %p77_p1  ;;  %p31_p4 = scmp.ge.s32.totalorder %s1473_s20, 4 }
   0x9   : > { %s65_s21 = ssub.s32 %s1190_s16, %s1471_s19  ;;  %p965_p6 = scmp.ge.s32.totalorder %s1198_s18, 24 }
   0xa   : > { %s1475_s20 = smov (%p31_p4, %s1473_s20), 0 }
   0xb   : > { %s66_s22 = ssub.s32 %s1194_s17, %s1475_s20  ;;  %159 = sbr.rel (%p965_p6) target bundleno = 57 (0x39), region = 16 }
   0xc   : > { %s67_s23 = sor.u32 %s66_s22, %s65_s21 }
   0xd   : > { %p68_p5 = scmp.eq.s32.totalorder %s67_s23, 0 }
   0xf   : > { %s1275_s25 = scalar_select %p68_p5, %s1178_s13, %s70_s24  }
  0x12   : > { %175 = sbr.rel (!%p79_p3) target bundleno = 57 (0x39), region = 24  ;;  %s177_s26 = sand.u32 (%p79_p3), 1, %s1178_s13  }
  0x13   : > { %s1003_s27 = smul.u32 (%p79_p3), 192, %s1190_s16 }
  0x14   : > { %s1055_s28 = smul.u32 (%p79_p3), 192, %s177_s26 }
  0x15   : > { %s182_s29 = sadd.s32 (%p79_p3), %s1194_s17, %s1003_s27 }
  0x16   : > { %s967_s30 = sshll.u32 (%p79_p3), %s182_s29, 2  ;;  %s1289_s7 = scalar_lea.vmem (%p79_p3), [#allocation3], %s1055_s28 }
  0x17   : > { %s1284_s6 = scalar_lea.vmem (%p79_p3), %s1461_s1, %s967_s30 }
  0x18   : > { %v200_v0 = vld [vmem:[%s1284_s6] sm:$0xf] (%p79_p3)  ;;  %v202_v1 = vld [vmem:[%s1284_s6 + $0x10] sm:$0xf] (%p79_p3) }
  0x19   : > { %v204_v2 = vld [vmem:[%s1284_s6 + $0x20] sm:$0xf]  ;;  %201 = vst [vmem:[%s1289_s7] sm:$0xf] %v200_v0  ;;  %203 = vst [vmem:[%s1289_s7 + $0x4] sm:$0xf] %v202_v1 }
  0x1a   : > { %205 = vst [vmem:[%s1289_s7 + $0x8] sm:$0xf] %v204_v2  ;;  %v206_v3 = vld [vmem:[%s1284_s6 + $0x30] sm:$0xf]  ;;  %v208_v4 = vld [vmem:[%s1284_s6 + $0x40] sm:$0xf] }
  0x1b   : > { %v210_v5 = vld [vmem:[%s1284_s6 + $0x50] sm:$0xf]  ;;  %207 = vst [vmem:[%s1289_s7 + $0xc] sm:$0xf] %v206_v3  ;;  %209 = vst [vmem:[%s1289_s7 + $0x10] sm:$0xf] %v208_v4 }
  0x1c   : > { %211 = vst [vmem:[%s1289_s7 + $0x14] sm:$0xf] %v210_v5  ;;  %v212_v6 = vld [vmem:[%s1284_s6 + $0x60] sm:$0xf]  ;;  %v214_v7 = vld [vmem:[%s1284_s6 + $0x70] sm:$0xf] }
  0x1d   : > { %v216_v8 = vld [vmem:[%s1284_s6 + $0x80] sm:$0xf]  ;;  %213 = vst [vmem:[%s1289_s7 + $0x18] sm:$0xf] %v212_v6  ;;  %215 = vst [vmem:[%s1289_s7 + $0x1c] sm:$0xf] %v214_v7 }
  0x1e   : > { %217 = vst [vmem:[%s1289_s7 + $0x20] sm:$0xf] %v216_v8  ;;  %v218_v9 = vld [vmem:[%s1284_s6 + $0x90] sm:$0xf]  ;;  %v220_v10 = vld [vmem:[%s1284_s6 + $0xa0] sm:$0xf] }
  0x1f   : > { %v222_v11 = vld [vmem:[%s1284_s6 + $0xb0] sm:$0xf]  ;;  %219 = vst [vmem:[%s1289_s7 + $0x24] sm:$0xf] %v218_v9  ;;  %221 = vst [vmem:[%s1289_s7 + $0x28] sm:$0xf] %v220_v10 }
  0x20   : > { %223 = vst [vmem:[%s1289_s7 + $0x2c] sm:$0xf] %v222_v11  ;;  %v224_v12 = vld [vmem:[%s1284_s6 + $0xc0] sm:$0xf]  ;;  %v226_v13 = vld [vmem:[%s1284_s6 + $0xd0] sm:$0xf] }
  0x21   : > { %v228_v14 = vld [vmem:[%s1284_s6 + $0xe0] sm:$0xf]  ;;  %225 = vst [vmem:[%s1289_s7 + $0x30] sm:$0xf] %v224_v12  ;;  %227 = vst [vmem:[%s1289_s7 + $0x34] sm:$0xf] %v226_v13 }
  0x22   : > { %229 = vst [vmem:[%s1289_s7 + $0x38] sm:$0xf] %v228_v14  ;;  %v230_v15 = vld [vmem:[%s1284_s6 + $0xf0] sm:$0xf]  ;;  %v232_v16 = vld [vmem:[%s1284_s6 + $0x100] sm:$0xf] }
  0x23   : > { %v234_v17 = vld [vmem:[%s1284_s6 + $0x110] sm:$0xf]  ;;  %231 = vst [vmem:[%s1289_s7 + $0x3c] sm:$0xf] %v230_v15  ;;  %233 = vst [vmem:[%s1289_s7 + $0x40] sm:$0xf] %v232_v16 }
  0x24   : > { %235 = vst [vmem:[%s1289_s7 + $0x44] sm:$0xf] %v234_v17  ;;  %v236_v18 = vld [vmem:[%s1284_s6 + $0x120] sm:$0xf]  ;;  %v238_v19 = vld [vmem:[%s1284_s6 + $0x130] sm:$0xf] }
  0x25   : > { %v240_v20 = vld [vmem:[%s1284_s6 + $0x140] sm:$0xf]  ;;  %237 = vst [vmem:[%s1289_s7 + $0x48] sm:$0xf] %v236_v18  ;;  %239 = vst [vmem:[%s1289_s7 + $0x4c] sm:$0xf] %v238_v19 }
  0x26   : > { %241 = vst [vmem:[%s1289_s7 + $0x50] sm:$0xf] %v240_v20  ;;  %v242_v21 = vld [vmem:[%s1284_s6 + $0x150] sm:$0xf]  ;;  %v244_v22 = vld [vmem:[%s1284_s6 + $0x160] sm:$0xf] }
  0x27   : > { %v246_v23 = vld [vmem:[%s1284_s6 + $0x170] sm:$0xf]  ;;  %243 = vst [vmem:[%s1289_s7 + $0x54] sm:$0xf] %v242_v21  ;;  %245 = vst [vmem:[%s1289_s7 + $0x58] sm:$0xf] %v244_v22 }
  0x28   : > { %247 = vst [vmem:[%s1289_s7 + $0x5c] sm:$0xf] %v246_v23  ;;  %v248_v24 = vld [vmem:[%s1284_s6 + $0x180] sm:$0xf]  ;;  %v250_v25 = vld [vmem:[%s1284_s6 + $0x190] sm:$0xf] }
  0x29   : > { %v252_v26 = vld [vmem:[%s1284_s6 + $0x1a0] sm:$0xf]  ;;  %249 = vst [vmem:[%s1289_s7 + $0x60] sm:$0xf] %v248_v24  ;;  %251 = vst [vmem:[%s1289_s7 + $0x64] sm:$0xf] %v250_v25 }
  0x2a   : > { %253 = vst [vmem:[%s1289_s7 + $0x68] sm:$0xf] %v252_v26  ;;  %v254_v27 = vld [vmem:[%s1284_s6 + $0x1b0] sm:$0xf]  ;;  %v256_v28 = vld [vmem:[%s1284_s6 + $0x1c0] sm:$0xf] }
  0x2b   : > { %v258_v29 = vld [vmem:[%s1284_s6 + $0x1d0] sm:$0xf]  ;;  %255 = vst [vmem:[%s1289_s7 + $0x6c] sm:$0xf] %v254_v27  ;;  %257 = vst [vmem:[%s1289_s7 + $0x70] sm:$0xf] %v256_v28 }
  0x2c   : > { %259 = vst [vmem:[%s1289_s7 + $0x74] sm:$0xf] %v258_v29  ;;  %v260_v30 = vld [vmem:[%s1284_s6 + $0x1e0] sm:$0xf]  ;;  %v262_v31 = vld [vmem:[%s1284_s6 + $0x1f0] sm:$0xf] }
  0x2d   : > { %v264_v32 = vld [vmem:[%s1284_s6 + $0x200] sm:$0xf]  ;;  %261 = vst [vmem:[%s1289_s7 + $0x78] sm:$0xf] %v260_v30  ;;  %263 = vst [vmem:[%s1289_s7 + $0x7c] sm:$0xf] %v262_v31 }
  0x2e   : > { %265 = vst [vmem:[%s1289_s7 + $0x80] sm:$0xf] %v264_v32  ;;  %v266_v33 = vld [vmem:[%s1284_s6 + $0x210] sm:$0xf]  ;;  %v268_v34 = vld [vmem:[%s1284_s6 + $0x220] sm:$0xf] }
  0x2f   : > { %v270_v35 = vld [vmem:[%s1284_s6 + $0x230] sm:$0xf]  ;;  %267 = vst [vmem:[%s1289_s7 + $0x84] sm:$0xf] %v266_v33  ;;  %269 = vst [vmem:[%s1289_s7 + $0x88] sm:$0xf] %v268_v34 }
  0x30   : > { %271 = vst [vmem:[%s1289_s7 + $0x8c] sm:$0xf] %v270_v35  ;;  %v272_v36 = vld [vmem:[%s1284_s6 + $0x240] sm:$0xf]  ;;  %v274_v37 = vld [vmem:[%s1284_s6 + $0x250] sm:$0xf] }
  0x31   : > { %v276_v38 = vld [vmem:[%s1284_s6 + $0x260] sm:$0xf]  ;;  %273 = vst [vmem:[%s1289_s7 + $0x90] sm:$0xf] %v272_v36  ;;  %275 = vst [vmem:[%s1289_s7 + $0x94] sm:$0xf] %v274_v37 }
  0x32   : > { %277 = vst [vmem:[%s1289_s7 + $0x98] sm:$0xf] %v276_v38  ;;  %v278_v39 = vld [vmem:[%s1284_s6 + $0x270] sm:$0xf]  ;;  %v280_v40 = vld [vmem:[%s1284_s6 + $0x280] sm:$0xf] }
  0x33   : > { %v282_v41 = vld [vmem:[%s1284_s6 + $0x290] sm:$0xf]  ;;  %279 = vst [vmem:[%s1289_s7 + $0x9c] sm:$0xf] %v278_v39  ;;  %281 = vst [vmem:[%s1289_s7 + $0xa0] sm:$0xf] %v280_v40 }
  0x34   : > { %283 = vst [vmem:[%s1289_s7 + $0xa4] sm:$0xf] %v282_v41  ;;  %v284_v42 = vld [vmem:[%s1284_s6 + $0x2a0] sm:$0xf]  ;;  %v286_v43 = vld [vmem:[%s1284_s6 + $0x2b0] sm:$0xf] }
  0x35   : > { %v288_v44 = vld [vmem:[%s1284_s6 + $0x2c0] sm:$0xf]  ;;  %285 = vst [vmem:[%s1289_s7 + $0xa8] sm:$0xf] %v284_v42  ;;  %287 = vst [vmem:[%s1289_s7 + $0xac] sm:$0xf] %v286_v43 }
  0x36   : > { %289 = vst [vmem:[%s1289_s7 + $0xb0] sm:$0xf] %v288_v44  ;;  %v290_v45 = vld [vmem:[%s1284_s6 + $0x2d0] sm:$0xf]  ;;  %v292_v46 = vld [vmem:[%s1284_s6 + $0x2e0] sm:$0xf] }
  0x37   : > { %v294_v47 = vld [vmem:[%s1284_s6 + $0x2f0] sm:$0xf]  ;;  %291 = vst [vmem:[%s1289_s7 + $0xb4] sm:$0xf] %v290_v45  ;;  %293 = vst [vmem:[%s1289_s7 + $0xb8] sm:$0xf] %v292_v46 }
  0x38   : > { %295 = vst [vmem:[%s1289_s7 + $0xbc] sm:$0xf] %v294_v47 }
  0x39 PF: > { %p968_p7 = scmp.ge.s32.totalorder %s1198_s18, 1  ;;  %p413_p8 = scmp.lt.s32.totalorder %s1198_s18, 25 }
  0x3b   : > { %p414_p9 = pnand %p968_p7, %p413_p8 }
  0x3c   : > { %s420_s8 = sand.u32 (!%p414_p9), 1, %s1174_s12   ;;  %s463_s9 = smul.u32 (!%p414_p9), 3, %s1182_s14 }
  0x3d   : > { %417 = sbr.rel (%p414_p9) target bundleno = 353 (0x161), region = 65  ;;  %p476_p10 = scmp.lt.s32.totalorder (!%p414_p9), %s1186_s15, 3 }
  0x3e   : > { %s1056_s10 = smul.u32 (!%p414_p9), 192, %s420_s8  ;;  %p466_p11 = scmp.lt.s32.totalorder (!%p414_p9), %s463_s9, 17 }
  0x3f   : > { %p972_p12 = scmp.ne.s32.totalorder (!%p414_p9), %s1182_s14, 0 }
  0x40   : > { %s1405_s4 = scalar_lea.vmem (!%p414_p9), [#allocation3], %s1056_s10 }
  0x44   : > { %s1477_s9 = smov (!%p466_p11, %s463_s9), 17  ;;  %s1479_s15 = smov (!%p476_p10, %s1186_s15), 3 }
  0x45   : > { %s969_s11 = sshll.u32 %s1477_s9, 2  ;;  %s970_s24 = sshll.u32 %s1479_s15, 3  ;;  %v1200_v48 = vmov (!%p972_p12), 0.0  }
  0x46   : > { %s1393_s23 = scalar_lea.vmem %s1460_s0, %s969_s11  ;;  %s1398_s28 = scalar_lea.vmem %s1462_s2, %s970_s24  ;;  %495 = vst [vmem:[#allocation2] sm:$0xff] (!%p972_p12), %v1200_v48 }
  0x47   : > { %s1403_s30 = scalar_lea.vmem %s1463_s3, %s970_s24  ;;  %494 = sbr.rel (%p972_p12) target bundleno = 78 (0x4e), region = 73 }
  0x4e PF: > { %v1117_v49 = vld [vmem:[%s1405_s4 + $0x40] sm:$0xff]   ;;  %v1201_v50 = vmov 0.0   ;;  %vm1202_vm0 = vmmov 0   ;;  %v1120_v53 = vld [vmem:[%s1405_s4 + $0x48] sm:$0xff]   ;;  %v1123_v56 = vld [vmem:[%s1405_s4 + $0x50] sm:$0xff]   ;;  %p1000_p13 = scmp.ne.s32.totalorder %s1182_s14, 5 }
  0x4f   : > { %1035 = vmatprep.subr.bf16.mxu1 %v1201_v50  ;;  %v1118_v51 = vld [vmem:[%s1405_s4] sm:$0xff]   ;;  %1004 = vmatprep.subr.bf16.mxu0 %v1117_v49  ;;  %v1121_v54 = vld [vmem:[%s1405_s4 + $0x8] sm:$0xff]   ;;  %v1124_v57 = vld [vmem:[%s1405_s4 + $0x10] sm:$0xff]   ;;  %v1203_v27 = vmov (!%p1000_p13), 0.0  }
  0x50   : > { %v1119_v52 = vld [vmem:[%s1405_s4 + $0x80] sm:$0xff]   ;;  %1051 = vmatprep.mubr.msk.bf16.mxu1 %vm1202_vm0, %v1201_v50  ;;  %1005 = vmatpush3.bf16.msra.mxu0 %v1118_v51  ;;  %v1122_v55 = vld [vmem:[%s1405_s4 + $0x88] sm:$0xff]   ;;  %v1125_v58 = vld [vmem:[%s1405_s4 + $0x90] sm:$0xff]   ;;  %790 = vst [vmem:[%s1403_s30] sm:$0xff] (!%p1000_p13), %v1203_v27 }
  0x51   : > { %1036 = vmatpush3.bf16.msra.mxu1 %v1119_v52  ;;  %1006 = vmatprep.subr.bf16.mxu0 %v1120_v53  ;;  %v1126_v59 = vld [vmem:[%s1405_s4 + $0x58] sm:$0xff]   ;;  %v1129_v62 = vld [vmem:[%s1405_s4 + $0x60] sm:$0xff]   ;;  %v1132_v1 = vld [vmem:[%s1405_s4 + $0x68] sm:$0xff]  }
  0x52   : > { %1037 = vmatprep.subr.bf16.mxu1 %v1201_v50  ;;  %v1127_v60 = vld [vmem:[%s1405_s4 + $0x18] sm:$0xff]   ;;  %v1130_v63 = vld [vmem:[%s1405_s4 + $0x20] sm:$0xff]   ;;  %v1133_v2 = vld [vmem:[%s1405_s4 + $0x28] sm:$0xff]  }
  0x53   : > { %v1128_v61 = vld [vmem:[%s1405_s4 + $0x98] sm:$0xff]   ;;  %v1131_v0 = vld [vmem:[%s1405_s4 + $0xa0] sm:$0xff]   ;;  %v1134_v3 = vld [vmem:[%s1405_s4 + $0xa8] sm:$0xff]  }
  0x54   : > { %1007 = vmatpush3.bf16.msra.mxu0 %v1121_v54  ;;  %v1135_v4 = vld [vmem:[%s1405_s4 + $0x70] sm:$0xff]   ;;  %v1138_v7 = vld [vmem:[%s1405_s4 + $0x78] sm:$0xff]   ;;  %v1143_v13 = vld [vmem:[%s1393_s23 + $0x8] ss:$0 sps:$4 sm:$0xff]  }
  0x55   : > { %1038 = vmatpush3.bf16.msra.mxu1 %v1122_v55  ;;  %1008 = vmatprep.subr.bf16.mxu0 %v1123_v56  ;;  %v1136_v5 = vld [vmem:[%s1405_s4 + $0x30] sm:$0xff]   ;;  %v497_v8 = vld [vmem:[%s1393_s23] sm:$0xff] }
  0x56   : > { %1039 = vmatprep.subr.bf16.mxu1 %v1201_v50  ;;  %v1137_v6 = vld [vmem:[%s1405_s4 + $0xb0] sm:$0xff]   ;;  %v974_v9 = vcombine.high %v497_v8, %v497_v8  ;;  %v1139_v10 = vld [vmem:[%s1405_s4 + $0x38] sm:$0xff]   ;;  %v973_v12 = vcombine.low %v497_v8, %v497_v8 }
  0x57   : > { %v1140_v11 = vld [vmem:[%s1405_s4 + $0xb8] sm:$0xff]  }
  0x58   : > { %1009 = vmatpush3.bf16.msra.mxu0 %v1124_v57  ;;  %734 = vmatprep.mubr.bf16.mxu0 %v974_v9  ;;  %v496_v20 = vld [vmem:[#allocation2] sm:$0xff] }
  0x59   : > { %1040 = vmatpush3.bf16.msra.mxu1 %v1125_v58  ;;  %1010 = vmatprep.subr.bf16.mxu0 %v1126_v59 }
  0x5a   : > { %1041 = vmatprep.subr.bf16.mxu1 %v1201_v50 }
  0x5c   : > { %1011 = vmatpush3.bf16.msra.mxu0 %v1127_v60 }
  0x5d   : > { %1042 = vmatpush3.bf16.msra.mxu1 %v1128_v61  ;;  %1012 = vmatprep.subr.bf16.mxu0 %v1129_v62 }
  0x5e   : > { %1043 = vmatprep.subr.bf16.mxu1 %v1201_v50 }
  0x60   : > { %1013 = vmatpush3.bf16.msra.mxu0 %v1130_v63 }
  0x61   : > { %1044 = vmatpush3.bf16.msra.mxu1 %v1131_v0  ;;  %1014 = vmatprep.subr.bf16.mxu0 %v1132_v1 }
  0x62   : > { %1045 = vmatprep.subr.bf16.mxu1 %v1201_v50 }
  0x64   : > { %1015 = vmatpush3.bf16.msra.mxu0 %v1133_v2 }
  0x65   : > { %1046 = vmatpush3.bf16.msra.mxu1 %v1134_v3  ;;  %1016 = vmatprep.subr.bf16.mxu0 %v1135_v4 }
  0x66   : > { %1047 = vmatprep.subr.bf16.mxu1 %v1201_v50 }
  0x68   : > { %1017 = vmatpush3.bf16.msra.mxu0 %v1136_v5 }
  0x69   : > { %1048 = vmatpush3.bf16.msra.mxu1 %v1137_v6  ;;  %1018 = vmatprep.subr.bf16.mxu0 %v1138_v7 }
  0x6a   : > { %1049 = vmatprep.subr.bf16.mxu1 %v1201_v50 }
  0x6c   : > { %1019 = vmatpush3.bf16.msra.mxu0 %v1139_v10 }
  0x6d   : > { %1050 = vmatpush3.bf16.msra.mxu1 %v1140_v11 }
  0x6f   : > { %735 = vmatmul.mubr.bf16.vlgmr.msra.gmra.mrb[0].mxu0 %v973_v12 }
  0x70   : > { %1052 = vmatmul.mubr.bf16.vlgmr.msra.gmra.mrb[0].mxu1 %v1143_v13 }
 0x142   : > { %v1020_v14 = vpop.f32.mrb[0].mxu0 }
 0x143   : > { %v776_v15 = vpop.f32.mrb[0].mxu1  ;;  %v1021_v16 = vpop.f32.mrb[1].mxu0 }
 0x144   : > { %v1022_v17 = vadd.f32 %v1021_v16, %v1020_v14  ;;  %v1053_v18 = vpop.f32.mrb[1].mxu1  ;;  %v1023_v19 = vpop.f32.mrb[2].mxu0  ;;  %787 = sbr.rel (%p1000_p13) target bundleno = 353 (0x161), region = 77 }
 0x145   : > { %v779_v21 = vpop.f32.mrb[2].mxu1  ;;  %v1024_v22 = vpop.f32.mrb[3].mxu0 }
 0x146   : > { %v777_v23 = vadd.f32 %v1022_v17, %v776_v15  ;;  %v1054_v24 = vpop.f32.mrb[3].mxu1 }
 0x148   : > { %v782_v25 = vadd.f32 %v777_v23, %v496_v20 }
 0x14a   : > { %783 = vst [vmem:[#allocation2] sm:$0xff] %v782_v25 }
 0x151   : > { %v788_v26 = vld [vmem:[#allocation2] sm:$0xff] }
 0x152   : > { %789 = vst [vmem:[%s1398_s28] sm:$0xff] %v788_v26  ;;  %v791_v28 = vrot.slane %v788_v26, 4  ;;  %v798_v29 = vmul.f32 %v788_v26, %v788_v26 }
 0x154   : > { %v792_v30 = vadd.f32 %v791_v28, %v788_v26  ;;  %v799_v31 = vrot.slane %v798_v29, 4 }
 0x156   : > { %v793_v32 = vrot.slane %v792_v30, 2  ;;  %v800_v33 = vadd.f32 %v799_v31, %v798_v29 }
 0x158   : > { %v794_v34 = vadd.f32 %v793_v32, %v792_v30  ;;  %v801_v35 = vrot.slane %v800_v33, 2 }
 0x15a   : > { %v795_v36 = vrot.slane %v794_v34, 1  ;;  %v802_v37 = vadd.f32 %v801_v35, %v800_v33 }
 0x15c   : > { %v796_v38 = vadd.f32 %v795_v36, %v794_v34  ;;  %v803_v39 = vrot.slane %v802_v37, 1 }
 0x15e   : > { %797 = vst [vmem:[%s1403_s30] sm:$0x1] %v796_v38  ;;  %v804_v40 = vadd.f32 %v803_v39, %v802_v37 }
 0x160   : > { %805 = vst [vmem:[%s1403_s30 + $0x1] sm:$0x1] %v804_v40 }
 0x161 PF: > { %s14_s18 = sadd.s32 1, %s1198_s18   ;;  %s1464_s12 = smov %s1178_s13 }
 0x162   : > { %p11_p0 = scmp.ge.s32.totalorder %s14_s18, 26   ;;  %s1465_s13 = smov %s1275_s25 }
 0x163   : > { %s1466_s14 = smov %s1190_s16  ;;  %s1467_s15 = smov %s1194_s17 }
 0x164   : > { %s1468_s16 = smov %s1471_s19  ;;  %s1469_s17 = smov %s1475_s20 }
 0x165   :  { %13 = sbr.rel (!%p11_p0) target bundleno = 4 (0x4), region = 127 }

// kernel: _lambda_.68
= control target key start
LH: loop header
LB: loop body
LE: loop exit
PB: predicated region body
PF: predicated region fallthrough
CT: control target
= control target key end

     0   :  { %v20_v0 = vlaneseq  ;;  %s132_s1 = inlined_call_operand.vmem [shape: f32[1,512], index: 1, kind: input, shape index: {}]   ;;  %s133_s2 = inlined_call_operand.vmem [shape: f32[1,512], index: 2, kind: input, shape index: {}]   ;;  %s134_s0 = inlined_call_operand.vmem [shape: f32[8,512], index: 0, kind: input, shape index: {}]   ;;  %s135_s3 = inlined_call_operand.vmem [shape: f32[8,512], index: 3, kind: output, shape index: {}]  }
   0x1   :  { %v18_v2 = vld [vmem:[%s132_s1] sm:$0xf]  ;;  %v15_v9 = vld [vmem:[%s134_s0 + $0x8] sm:$0xff]  ;;  %v16_v14 = vld [vmem:[%s134_s0 + $0x10] sm:$0xff] }
   0x2   :  { %v21_v1 = vshrl.u32 %v20_v0, 7  ;;  %v44_v3 = vld [vmem:[%s133_s2] sm:$0xf]  ;;  %v17_v15 = vld [vmem:[%s134_s0 + $0x18] sm:$0xff] }
   0x3   :  { %v14_v8 = vld [vmem:[%s134_s0] sm:$0xff] }
   0x4   :  { %v22_v4 = vsub.s32 0, %v21_v1  ;;  %v26_v5 = vsub.s32 1, %v21_v1  ;;  %v30_v6 = vsub.s32 2, %v21_v1  ;;  %v34_v7 = vsub.s32 3, %v21_v1 }
   0x6   :  { %v23_v10 = vrot.slane %v18_v2, %v22_v4  ;;  %v49_v11 = vrot.slane %v44_v3, %v22_v4  ;;  %v27_v12 = vrot.slane %v18_v2, %v26_v5  ;;  %v53_v13 = vrot.slane %v44_v3, %v26_v5 }
   0x7   :  { %v31_v16 = vrot.slane %v18_v2, %v30_v6  ;;  %v57_v17 = vrot.slane %v44_v3, %v30_v6  ;;  %v35_v18 = vrot.slane %v18_v2, %v34_v7  ;;  %v61_v19 = vrot.slane %v44_v3, %v34_v7 }
   0x8   :  { %v40_v20 = vmul.f32 %v23_v10, %v14_v8  ;;  %v41_v21 = vmul.f32 %v27_v12, %v15_v9 }
   0x9   :  { %v42_v22 = vmul.f32 %v31_v16, %v16_v14  ;;  %v43_v23 = vmul.f32 %v35_v18, %v17_v15 }
   0xa   :  { %v66_v24 = vadd.f32 %v49_v11, %v40_v20  ;;  %v67_v25 = vadd.f32 %v53_v13, %v41_v21 }
   0xb   :  { %v68_v26 = vadd.f32 %v57_v17, %v42_v22  ;;  %v69_v27 = vadd.f32 %v61_v19, %v43_v23 }
   0xc   :  { %v70_v28 = vmax.f32 %v66_v24, 0.0  ;;  %v71_v29 = vmax.f32 %v67_v25, 0.0 }
   0xd   :  { %v72_v30 = vmax.f32 %v68_v26, 0.0  ;;  %v73_v31 = vmax.f32 %v69_v27, 0.0 }
   0xe   :  { %74 = vst [vmem:[%s135_s3] sm:$0xff] %v70_v28  ;;  %75 = vst [vmem:[%s135_s3 + $0x8] sm:$0xff] %v71_v29 }
   0xf   :  { %76 = vst [vmem:[%s135_s3 + $0x10] sm:$0xff] %v72_v30  ;;  %77 = vst [vmem:[%s135_s3 + $0x18] sm:$0xff] %v73_v31 }

// kernel: _lambda_.69
= control target key start
LH: loop header
LB: loop body
LE: loop exit
PB: predicated region body
PF: predicated region fallthrough
CT: control target
= control target key end

     0   :  { %s1364_s12 = smov 0   ;;  %s1366_s13 = smov 0   ;;  %s1640_s0 = inlined_call_operand.vmem [shape: bf16[8,4608], index: 0, kind: input, shape index: {}]   ;;  %s1641_s1 = inlined_call_operand.vmem [shape: bf16[4608,512], index: 1, kind: input, shape index: {}]   ;;  %s1642_s2 = inlined_call_operand.vmem [shape: f32[8,512], index: 2, kind: output, shape index: {0}]   ;;  %s1643_s3 = inlined_call_operand.vmem [shape: f32[8,512], index: 3, kind: output, shape index: {1}]  }
   0x1   :  { %s1368_s14 = smov 0   ;;  %s1370_s15 = smov 0  }
   0x2   :  { %s1372_s16 = smov 0   ;;  %s1374_s17 = smov 0  }
   0x3   :  { %s1376_s18 = smov 0  }
   0x4 LB: > { %s26_s19 = sadd.s32 1, %s1332_s16  ;;  %s29_s20 = sadd.s32 1, %s1336_s17  ;;  %s1340_s18 = sphi %s1376_s18, %s14_s18   ;;  %s1336_s17 = sphi %s1374_s17, %s1649_s17   ;;  %s1332_s16 = sphi %s1372_s16, %s1648_s16   ;;  %s1328_s15 = sphi %s1370_s15, %s1647_s15   ;;  %s1324_s14 = sphi %s1368_s14, %s1646_s14   ;;  %s1320_s13 = sphi %s1366_s13, %s1645_s13   ;;  %s1316_s12 = sphi %s1364_s12, %s1644_s12  }
   0x5   : > { %p27_p0 = scmp.ge.s32.totalorder %s26_s19, 9  ;;  %p77_p1 = scmp.ne.s32.totalorder %s1320_s13, %s1316_s12 }
   0x6   : > { %p78_p2 = scmp.eq.s32.totalorder %s1340_s18, 0  ;;  %s70_s24 = sadd.s32 1, %s1320_s13 }
   0x7   : > { %s1651_s19 = smov (%p27_p0, %s26_s19), 0  ;;  %s1653_s20 = smov (!%p27_p0, %s29_s20), %s1336_s17 }
   0x8   : > { %p79_p3 = por %p78_p2, %p77_p1  ;;  %p31_p4 = scmp.ge.s32.totalorder %s1653_s20, 4 }
   0x9   : > { %s65_s21 = ssub.s32 %s1332_s16, %s1651_s19  ;;  %p1096_p6 = scmp.ge.s32.totalorder %s1340_s18, 36 }
   0xa   : > { %s1655_s20 = smov (%p31_p4, %s1653_s20), 0 }
   0xb   : > { %s66_s22 = ssub.s32 %s1336_s17, %s1655_s20  ;;  %159 = sbr.rel (%p1096_p6) target bundleno = 67 (0x43), region = 16 }
   0xc   : > { %s67_s23 = sor.u32 %s66_s22, %s65_s21 }
   0xd   : > { %p68_p5 = scmp.eq.s32.totalorder %s67_s23, 0 }
   0xf   : > { %s1415_s25 = scalar_select %p68_p5, %s1320_s13, %s70_s24  }
  0x12   : > { %175 = sbr.rel (!%p79_p3) target bundleno = 67 (0x43), region = 24  ;;  %s177_s26 = sand.u32 (%p79_p3), 1, %s1320_s13  }
  0x13   : > { %s1147_s27 = sshll.u32 (%p79_p3), %s1332_s16, 8  ;;  %s1097_s28 = sshll.u32 (%p79_p3), %s177_s26, 8 }
  0x14   : > { %s182_s29 = sadd.s32 (%p79_p3), %s1336_s17, %s1147_s27  ;;  %s1429_s7 = scalar_lea.vmem (%p79_p3), [#allocation3], %s1097_s28 }
  0x15   : > { %s1100_s30 = sshll.u32 (%p79_p3), %s182_s29, 2 }
  0x16   : > { %s1424_s6 = scalar_lea.vmem (%p79_p3), %s1641_s1, %s1100_s30 }
  0x17   : > { %v200_v0 = vld [vmem:[%s1424_s6] sm:$0xf] (%p79_p3)  ;;  %v202_v1 = vld [vmem:[%s1424_s6 + $0x10] sm:$0xf] (%p79_p3) }
  0x18   : > { %v204_v2 = vld [vmem:[%s1424_s6 + $0x20] sm:$0xf] (%p79_p3)  ;;  %201 = vst [vmem:[%s1429_s7] sm:$0xf] (%p79_p3), %v200_v0  ;;  %203 = vst [vmem:[%s1429_s7 + $0x4] sm:$0xf] (%p79_p3), %v202_v1 }
  0x19   : > { %205 = vst [vmem:[%s1429_s7 + $0x8] sm:$0xf] %v204_v2  ;;  %v206_v3 = vld [vmem:[%s1424_s6 + $0x30] sm:$0xf]  ;;  %v208_v4 = vld [vmem:[%s1424_s6 + $0x40] sm:$0xf] }
  0x1a   : > { %v210_v5 = vld [vmem:[%s1424_s6 + $0x50] sm:$0xf]  ;;  %207 = vst [vmem:[%s1429_s7 + $0xc] sm:$0xf] %v206_v3  ;;  %209 = vst [vmem:[%s1429_s7 + $0x10] sm:$0xf] %v208_v4 }
  0x1b   : > { %211 = vst [vmem:[%s1429_s7 + $0x14] sm:$0xf] %v210_v5  ;;  %v212_v6 = vld [vmem:[%s1424_s6 + $0x60] sm:$0xf]  ;;  %v214_v7 = vld [vmem:[%s1424_s6 + $0x70] sm:$0xf] }
  0x1c   : > { %v216_v8 = vld [vmem:[%s1424_s6 + $0x80] sm:$0xf]  ;;  %213 = vst [vmem:[%s1429_s7 + $0x18] sm:$0xf] %v212_v6  ;;  %215 = vst [vmem:[%s1429_s7 + $0x1c] sm:$0xf] %v214_v7 }
  0x1d   : > { %217 = vst [vmem:[%s1429_s7 + $0x20] sm:$0xf] %v216_v8  ;;  %v218_v9 = vld [vmem:[%s1424_s6 + $0x90] sm:$0xf]  ;;  %v220_v10 = vld [vmem:[%s1424_s6 + $0xa0] sm:$0xf] }
  0x1e   : > { %v222_v11 = vld [vmem:[%s1424_s6 + $0xb0] sm:$0xf]  ;;  %219 = vst [vmem:[%s1429_s7 + $0x24] sm:$0xf] %v218_v9  ;;  %221 = vst [vmem:[%s1429_s7 + $0x28] sm:$0xf] %v220_v10 }
  0x1f   : > { %223 = vst [vmem:[%s1429_s7 + $0x2c] sm:$0xf] %v222_v11  ;;  %v224_v12 = vld [vmem:[%s1424_s6 + $0xc0] sm:$0xf]  ;;  %v226_v13 = vld [vmem:[%s1424_s6 + $0xd0] sm:$0xf] }
  0x20   : > { %v228_v14 = vld [vmem:[%s1424_s6 + $0xe0] sm:$0xf]  ;;  %225 = vst [vmem:[%s1429_s7 + $0x30] sm:$0xf] %v224_v12  ;;  %227 = vst [vmem:[%s1429_s7 + $0x34] sm:$0xf] %v226_v13 }
  0x21   : > { %229 = vst [vmem:[%s1429_s7 + $0x38] sm:$0xf] %v228_v14  ;;  %v230_v15 = vld [vmem:[%s1424_s6 + $0xf0] sm:$0xf]  ;;  %v232_v16 = vld [vmem:[%s1424_s6 + $0x100] sm:$0xf] }
  0x22   : > { %v234_v17 = vld [vmem:[%s1424_s6 + $0x110] sm:$0xf]  ;;  %231 = vst [vmem:[%s1429_s7 + $0x3c] sm:$0xf] %v230_v15  ;;  %233 = vst [vmem:[%s1429_s7 + $0x40] sm:$0xf] %v232_v16 }
  0x23   : > { %235 = vst [vmem:[%s1429_s7 + $0x44] sm:$0xf] %v234_v17  ;;  %v236_v18 = vld [vmem:[%s1424_s6 + $0x120] sm:$0xf]  ;;  %v238_v19 = vld [vmem:[%s1424_s6 + $0x130] sm:$0xf] }
  0x24   : > { %v240_v20 = vld [vmem:[%s1424_s6 + $0x140] sm:$0xf]  ;;  %237 = vst [vmem:[%s1429_s7 + $0x48] sm:$0xf] %v236_v18  ;;  %239 = vst [vmem:[%s1429_s7 + $0x4c] sm:$0xf] %v238_v19 }
  0x25   : > { %241 = vst [vmem:[%s1429_s7 + $0x50] sm:$0xf] %v240_v20  ;;  %v242_v21 = vld [vmem:[%s1424_s6 + $0x150] sm:$0xf]  ;;  %v244_v22 = vld [vmem:[%s1424_s6 + $0x160] sm:$0xf] }
  0x26   : > { %v246_v23 = vld [vmem:[%s1424_s6 + $0x170] sm:$0xf]  ;;  %243 = vst [vmem:[%s1429_s7 + $0x54] sm:$0xf] %v242_v21  ;;  %245 = vst [vmem:[%s1429_s7 + $0x58] sm:$0xf] %v244_v22 }
  0x27   : > { %247 = vst [vmem:[%s1429_s7 + $0x5c] sm:$0xf] %v246_v23  ;;  %v248_v24 = vld [vmem:[%s1424_s6 + $0x180] sm:$0xf]  ;;  %v250_v25 = vld [vmem:[%s1424_s6 + $0x190] sm:$0xf] }
  0x28   : > { %v252_v26 = vld [vmem:[%s1424_s6 + $0x1a0] sm:$0xf]  ;;  %249 = vst [vmem:[%s1429_s7 + $0x60] sm:$0xf] %v248_v24  ;;  %251 = vst [vmem:[%s1429_s7 + $0x64] sm:$0xf] %v250_v25 }
  0x29   : > { %253 = vst [vmem:[%s1429_s7 + $0x68] sm:$0xf] %v252_v26  ;;  %v254_v27 = vld [vmem:[%s1424_s6 + $0x1b0] sm:$0xf]  ;;  %v256_v28 = vld [vmem:[%s1424_s6 + $0x1c0] sm:$0xf] }
  0x2a   : > { %v258_v29 = vld [vmem:[%s1424_s6 + $0x1d0] sm:$0xf]  ;;  %255 = vst [vmem:[%s1429_s7 + $0x6c] sm:$0xf] %v254_v27  ;;  %257 = vst [vmem:[%s1429_s7 + $0x70] sm:$0xf] %v256_v28 }
  0x2b   : > { %259 = vst [vmem:[%s1429_s7 + $0x74] sm:$0xf] %v258_v29  ;;  %v260_v30 = vld [vmem:[%s1424_s6 + $0x1e0] sm:$0xf]  ;;  %v262_v31 = vld [vmem:[%s1424_s6 + $0x1f0] sm:$0xf] }
  0x2c   : > { %v264_v32 = vld [vmem:[%s1424_s6 + $0x200] sm:$0xf]  ;;  %261 = vst [vmem:[%s1429_s7 + $0x78] sm:$0xf] %v260_v30  ;;  %263 = vst [vmem:[%s1429_s7 + $0x7c] sm:$0xf] %v262_v31 }
  0x2d   : > { %265 = vst [vmem:[%s1429_s7 + $0x80] sm:$0xf] %v264_v32  ;;  %v266_v33 = vld [vmem:[%s1424_s6 + $0x210] sm:$0xf]  ;;  %v268_v34 = vld [vmem:[%s1424_s6 + $0x220] sm:$0xf] }
  0x2e   : > { %v270_v35 = vld [vmem:[%s1424_s6 + $0x230] sm:$0xf]  ;;  %267 = vst [vmem:[%s1429_s7 + $0x84] sm:$0xf] %v266_v33  ;;  %269 = vst [vmem:[%s1429_s7 + $0x88] sm:$0xf] %v268_v34 }
  0x2f   : > { %271 = vst [vmem:[%s1429_s7 + $0x8c] sm:$0xf] %v270_v35  ;;  %v272_v36 = vld [vmem:[%s1424_s6 + $0x240] sm:$0xf]  ;;  %v274_v37 = vld [vmem:[%s1424_s6 + $0x250] sm:$0xf] }
  0x30   : > { %v276_v38 = vld [vmem:[%s1424_s6 + $0x260] sm:$0xf]  ;;  %273 = vst [vmem:[%s1429_s7 + $0x90] sm:$0xf] %v272_v36  ;;  %275 = vst [vmem:[%s1429_s7 + $0x94] sm:$0xf] %v274_v37 }
  0x31   : > { %277 = vst [vmem:[%s1429_s7 + $0x98] sm:$0xf] %v276_v38  ;;  %v278_v39 = vld [vmem:[%s1424_s6 + $0x270] sm:$0xf]  ;;  %v280_v40 = vld [vmem:[%s1424_s6 + $0x280] sm:$0xf] }
  0x32   : > { %v282_v41 = vld [vmem:[%s1424_s6 + $0x290] sm:$0xf]  ;;  %279 = vst [vmem:[%s1429_s7 + $0x9c] sm:$0xf] %v278_v39  ;;  %281 = vst [vmem:[%s1429_s7 + $0xa0] sm:$0xf] %v280_v40 }
  0x33   : > { %283 = vst [vmem:[%s1429_s7 + $0xa4] sm:$0xf] %v282_v41  ;;  %v284_v42 = vld [vmem:[%s1424_s6 + $0x2a0] sm:$0xf]  ;;  %v286_v43 = vld [vmem:[%s1424_s6 + $0x2b0] sm:$0xf] }
  0x34   : > { %v288_v44 = vld [vmem:[%s1424_s6 + $0x2c0] sm:$0xf]  ;;  %285 = vst [vmem:[%s1429_s7 + $0xa8] sm:$0xf] %v284_v42  ;;  %287 = vst [vmem:[%s1429_s7 + $0xac] sm:$0xf] %v286_v43 }
  0x35   : > { %289 = vst [vmem:[%s1429_s7 + $0xb0] sm:$0xf] %v288_v44  ;;  %v290_v45 = vld [vmem:[%s1424_s6 + $0x2d0] sm:$0xf]  ;;  %v292_v46 = vld [vmem:[%s1424_s6 + $0x2e0] sm:$0xf] }
  0x36   : > { %v294_v47 = vld [vmem:[%s1424_s6 + $0x2f0] sm:$0xf]  ;;  %291 = vst [vmem:[%s1429_s7 + $0xb4] sm:$0xf] %v290_v45  ;;  %293 = vst [vmem:[%s1429_s7 + $0xb8] sm:$0xf] %v292_v46 }
  0x37   : > { %295 = vst [vmem:[%s1429_s7 + $0xbc] sm:$0xf] %v294_v47  ;;  %v296_v48 = vld [vmem:[%s1424_s6 + $0x300] sm:$0xf]  ;;  %v298_v49 = vld [vmem:[%s1424_s6 + $0x310] sm:$0xf] }
  0x38   : > { %v300_v50 = vld [vmem:[%s1424_s6 + $0x320] sm:$0xf]  ;;  %297 = vst [vmem:[%s1429_s7 + $0xc0] sm:$0xf] %v296_v48  ;;  %299 = vst [vmem:[%s1429_s7 + $0xc4] sm:$0xf] %v298_v49 }
  0x39   : > { %301 = vst [vmem:[%s1429_s7 + $0xc8] sm:$0xf] %v300_v50  ;;  %v302_v51 = vld [vmem:[%s1424_s6 + $0x330] sm:$0xf]  ;;  %v304_v52 = vld [vmem:[%s1424_s6 + $0x340] sm:$0xf] }
  0x3a   : > { %v306_v53 = vld [vmem:[%s1424_s6 + $0x350] sm:$0xf]  ;;  %303 = vst [vmem:[%s1429_s7 + $0xcc] sm:$0xf] %v302_v51  ;;  %305 = vst [vmem:[%s1429_s7 + $0xd0] sm:$0xf] %v304_v52 }
  0x3b   : > { %307 = vst [vmem:[%s1429_s7 + $0xd4] sm:$0xf] %v306_v53  ;;  %v308_v54 = vld [vmem:[%s1424_s6 + $0x360] sm:$0xf]  ;;  %v310_v55 = vld [vmem:[%s1424_s6 + $0x370] sm:$0xf] }
  0x3c   : > { %v312_v56 = vld [vmem:[%s1424_s6 + $0x380] sm:$0xf]  ;;  %309 = vst [vmem:[%s1429_s7 + $0xd8] sm:$0xf] %v308_v54  ;;  %311 = vst [vmem:[%s1429_s7 + $0xdc] sm:$0xf] %v310_v55 }
  0x3d   : > { %313 = vst [vmem:[%s1429_s7 + $0xe0] sm:$0xf] %v312_v56  ;;  %v314_v57 = vld [vmem:[%s1424_s6 + $0x390] sm:$0xf]  ;;  %v316_v58 = vld [vmem:[%s1424_s6 + $0x3a0] sm:$0xf] }
  0x3e   : > { %v318_v59 = vld [vmem:[%s1424_s6 + $0x3b0] sm:$0xf]  ;;  %315 = vst [vmem:[%s1429_s7 + $0xe4] sm:$0xf] %v314_v57  ;;  %317 = vst [vmem:[%s1429_s7 + $0xe8] sm:$0xf] %v316_v58 }
  0x3f   : > { %319 = vst [vmem:[%s1429_s7 + $0xec] sm:$0xf] %v318_v59  ;;  %v320_v60 = vld [vmem:[%s1424_s6 + $0x3c0] sm:$0xf]  ;;  %v322_v61 = vld [vmem:[%s1424_s6 + $0x3d0] sm:$0xf] }
  0x40   : > { %v324_v62 = vld [vmem:[%s1424_s6 + $0x3e0] sm:$0xf]  ;;  %321 = vst [vmem:[%s1429_s7 + $0xf0] sm:$0xf] %v320_v60  ;;  %323 = vst [vmem:[%s1429_s7 + $0xf4] sm:$0xf] %v322_v61 }
  0x41   : > { %325 = vst [vmem:[%s1429_s7 + $0xf8] sm:$0xf] %v324_v62  ;;  %v326_v63 = vld [vmem:[%s1424_s6 + $0x3f0] sm:$0xf] }
  0x42   : > { %327 = vst [vmem:[%s1429_s7 + $0xfc] sm:$0xf] %v326_v63 }
  0x43 PF: > { %p1101_p7 = scmp.ge.s32.totalorder %s1340_s18, 1  ;;  %p477_p8 = scmp.lt.s32.totalorder %s1340_s18, 37 }
  0x45   : > { %p478_p9 = pnand %p1101_p7, %p477_p8 }
  0x46   : > { %s484_s8 = sand.u32 (!%p478_p9), 1, %s1316_s12   ;;  %s1103_s9 = sshll.u32 (!%p478_p9), %s1324_s14, 2 }
  0x47   : > { %481 = sbr.rel (%p478_p9) target bundleno = 365 (0x16d), region = 65  ;;  %s1102_s10 = sshll.u32 (!%p478_p9), %s484_s8, 8 }
  0x48   : > { %p530_p10 = scmp.lt.s32.totalorder (!%p478_p9), %s1103_s9, 35  ;;  %p540_p11 = scmp.lt.s32.totalorder (!%p478_p9), %s1328_s15, 3 }
  0x49   : > { %s1577_s4 = scalar_lea.vmem (!%p478_p9), [#allocation3], %s1102_s10  ;;  %p1107_p12 = scmp.ne.s32.totalorder (!%p478_p9), %s1324_s14, 0 }
  0x4e   : > { %s1657_s9 = smov (!%p530_p10, %s1103_s9), 35  ;;  %s1659_s15 = smov (!%p540_p11, %s1328_s15), 3 }
  0x4f   : > { %s1104_s11 = sshll.u32 %s1657_s9, 2  ;;  %s1105_s24 = sshll.u32 %s1659_s15, 3  ;;  %v1342_v0 = vmov (!%p1107_p12), 0.0  }
  0x50   : > { %s1565_s23 = scalar_lea.vmem %s1640_s0, %s1104_s11  ;;  %s1570_s28 = scalar_lea.vmem %s1642_s2, %s1105_s24  ;;  %559 = vst [vmem:[#allocation2] sm:$0xff] (!%p1107_p12), %v1342_v0 }
  0x51   : > { %s1575_s30 = scalar_lea.vmem %s1643_s3, %s1105_s24  ;;  %558 = sbr.rel (%p1107_p12) target bundleno = 88 (0x58), region = 73 }
  0x58 PF: > { %v1250_v1 = vld [vmem:[%s1577_s4 + $0x40] sm:$0xff]   ;;  %v1254_v5 = vld [vmem:[%s1577_s4 + $0x48] sm:$0xff]   ;;  %v1258_v9 = vld [vmem:[%s1577_s4 + $0x50] sm:$0xff]   ;;  %p1144_p13 = scmp.ne.s32.totalorder %s1324_s14, 8 }
  0x59   : > { %v1251_v2 = vld [vmem:[%s1577_s4 + $0xc0] sm:$0xff]   ;;  %1148 = vmatprep.subr.bf16.mxu0 %v1250_v1  ;;  %v1255_v6 = vld [vmem:[%s1577_s4 + $0xc8] sm:$0xff]   ;;  %v1259_v10 = vld [vmem:[%s1577_s4 + $0xd0] sm:$0xff]   ;;  %v1343_v53 = vmov (!%p1144_p13), 0.0  }
  0x5a   : > { %v1252_v3 = vld [vmem:[%s1577_s4] sm:$0xff]   ;;  %1170 = vmatprep.subr.bf16.mxu1 %v1251_v2  ;;  %v1256_v7 = vld [vmem:[%s1577_s4 + $0x8] sm:$0xff]   ;;  %v1260_v11 = vld [vmem:[%s1577_s4 + $0x10] sm:$0xff]   ;;  %921 = vst [vmem:[%s1575_s30] sm:$0xff] (!%p1144_p13), %v1343_v53 }
  0x5b   : > { %v1253_v4 = vld [vmem:[%s1577_s4 + $0x80] sm:$0xff]   ;;  %1149 = vmatpush3.bf16.msra.mxu0 %v1252_v3  ;;  %v1257_v8 = vld [vmem:[%s1577_s4 + $0x88] sm:$0xff]   ;;  %v1261_v12 = vld [vmem:[%s1577_s4 + $0x90] sm:$0xff]  }
  0x5c   : > { %1171 = vmatpush3.bf16.msra.mxu1 %v1253_v4  ;;  %1150 = vmatprep.subr.bf16.mxu0 %v1254_v5  ;;  %v1262_v13 = vld [vmem:[%s1577_s4 + $0x58] sm:$0xff]   ;;  %v1266_v17 = vld [vmem:[%s1577_s4 + $0x60] sm:$0xff]   ;;  %v1270_v21 = vld [vmem:[%s1577_s4 + $0x68] sm:$0xff]  }
  0x5d   : > { %1172 = vmatprep.subr.bf16.mxu1 %v1255_v6  ;;  %v1263_v14 = vld [vmem:[%s1577_s4 + $0xd8] sm:$0xff]   ;;  %v1267_v18 = vld [vmem:[%s1577_s4 + $0xe0] sm:$0xff]   ;;  %v1271_v22 = vld [vmem:[%s1577_s4 + $0xe8] sm:$0xff]  }
  0x5e   : > { %v1264_v15 = vld [vmem:[%s1577_s4 + $0x18] sm:$0xff]   ;;  %v1268_v19 = vld [vmem:[%s1577_s4 + $0x20] sm:$0xff]   ;;  %v1272_v23 = vld [vmem:[%s1577_s4 + $0x28] sm:$0xff]  }
  0x5f   : > { %1151 = vmatpush3.bf16.msra.mxu0 %v1256_v7  ;;  %v1265_v16 = vld [vmem:[%s1577_s4 + $0x98] sm:$0xff]   ;;  %v1269_v20 = vld [vmem:[%s1577_s4 + $0xa0] sm:$0xff]   ;;  %v1273_v24 = vld [vmem:[%s1577_s4 + $0xa8] sm:$0xff]  }
  0x60   : > { %1173 = vmatpush3.bf16.msra.mxu1 %v1257_v8  ;;  %1152 = vmatprep.subr.bf16.mxu0 %v1258_v9  ;;  %v1274_v25 = vld [vmem:[%s1577_s4 + $0x70] sm:$0xff]   ;;  %v1278_v29 = vld [vmem:[%s1577_s4 + $0x78] sm:$0xff]   ;;  %v562_v34 = vld [vmem:[%s1565_s23 + $0x8] sm:$0xff] }
  0x61   : > { %1174 = vmatprep.subr.bf16.mxu1 %v1259_v10  ;;  %v1275_v26 = vld [vmem:[%s1577_s4 + $0xf0] sm:$0xff]   ;;  %v1279_v30 = vld [vmem:[%s1577_s4 + $0xf8] sm:$0xff]   ;;  %v1110_v37 = vcombine.low %v562_v34, %v562_v34  ;;  %v1111_v38 = vcombine.high %v562_v34, %v562_v34 }
  0x62   : > { %v1276_v27 = vld [vmem:[%s1577_s4 + $0x30] sm:$0xff]   ;;  %v1280_v31 = vld [vmem:[%s1577_s4 + $0x38] sm:$0xff]  }
  0x63   : > { %1153 = vmatpush3.bf16.msra.mxu0 %v1260_v11  ;;  %v1277_v28 = vld [vmem:[%s1577_s4 + $0xb0] sm:$0xff]   ;;  %v1281_v32 = vld [vmem:[%s1577_s4 + $0xb8] sm:$0xff]   ;;  %905 = vmatprep.mubr.bf16.mxu1 %v1111_v38 }
  0x64   : > { %1175 = vmatpush3.bf16.msra.mxu1 %v1261_v12  ;;  %1154 = vmatprep.subr.bf16.mxu0 %v1262_v13  ;;  %v561_v33 = vld [vmem:[%s1565_s23] sm:$0xff] }
  0x65   : > { %1176 = vmatprep.subr.bf16.mxu1 %v1263_v14  ;;  %v1108_v35 = vcombine.low %v561_v33, %v561_v33  ;;  %v1109_v36 = vcombine.high %v561_v33, %v561_v33  ;;  %v560_v47 = vld [vmem:[#allocation2] sm:$0xff] }
  0x67   : > { %1155 = vmatpush3.bf16.msra.mxu0 %v1264_v15  ;;  %865 = vmatprep.mubr.bf16.mxu0 %v1109_v36 }
  0x68   : > { %1177 = vmatpush3.bf16.msra.mxu1 %v1265_v16  ;;  %1156 = vmatprep.subr.bf16.mxu0 %v1266_v17 }
  0x69   : > { %1178 = vmatprep.subr.bf16.mxu1 %v1267_v18 }
  0x6b   : > { %1157 = vmatpush3.bf16.msra.mxu0 %v1268_v19 }
  0x6c   : > { %1179 = vmatpush3.bf16.msra.mxu1 %v1269_v20  ;;  %1158 = vmatprep.subr.bf16.mxu0 %v1270_v21 }
  0x6d   : > { %1180 = vmatprep.subr.bf16.mxu1 %v1271_v22 }
  0x6f   : > { %1159 = vmatpush3.bf16.msra.mxu0 %v1272_v23 }
  0x70   : > { %1181 = vmatpush3.bf16.msra.mxu1 %v1273_v24  ;;  %1160 = vmatprep.subr.bf16.mxu0 %v1274_v25 }
  0x71   : > { %1182 = vmatprep.subr.bf16.mxu1 %v1275_v26 }
  0x73   : > { %1161 = vmatpush3.bf16.msra.mxu0 %v1276_v27 }
  0x74   : > { %1183 = vmatpush3.bf16.msra.mxu1 %v1277_v28  ;;  %1162 = vmatprep.subr.bf16.mxu0 %v1278_v29 }
  0x75   : > { %1184 = vmatprep.subr.bf16.mxu1 %v1279_v30 }
  0x77   : > { %1163 = vmatpush3.bf16.msra.mxu0 %v1280_v31 }
  0x78   : > { %1185 = vmatpush3.bf16.msra.mxu1 %v1281_v32 }
  0x7a   : > { %866 = vmatmul.mubr.bf16.vlgmr.msra.gmra.mrb[0].mxu0 %v1108_v35 }
  0x7b   : > { %906 = vmatmul.mubr.bf16.vlgmr.msra.gmra.mrb[0].mxu1 %v1110_v37 }
 0x14d   : > { %v1164_v39 = vpop.f32.mrb[0].mxu0 }
 0x14e   : > { %v1186_v40 = vpop.f32.mrb[0].mxu1  ;;  %v1165_v41 = vpop.f32.mrb[1].mxu0 }
 0x14f   : > { %v1187_v42 = vpop.f32.mrb[1].mxu1  ;;  %v1166_v43 = vadd.f32 %v1165_v41, %v1164_v39  ;;  %v1167_v45 = vpop.f32.mrb[2].mxu0 }
 0x150   : > { %v1188_v44 = vadd.f32 %v1187_v42, %v1186_v40  ;;  %v1189_v46 = vpop.f32.mrb[2].mxu1  ;;  %v1168_v48 = vpop.f32.mrb[3].mxu0  ;;  %918 = sbr.rel (%p1144_p13) target bundleno = 365 (0x16d), region = 77 }
 0x151   : > { %v1190_v49 = vpop.f32.mrb[3].mxu1 }
 0x152   : > { %v908_v50 = vadd.f32 %v1188_v44, %v1166_v43 }
 0x154   : > { %v913_v51 = vadd.f32 %v908_v50, %v560_v47 }
 0x156   : > { %914 = vst [vmem:[#allocation2] sm:$0xff] %v913_v51 }
 0x15d   : > { %v919_v52 = vld [vmem:[#allocation2] sm:$0xff] }
 0x15e   : > { %920 = vst [vmem:[%s1570_s28] sm:$0xff] %v919_v52  ;;  %v922_v54 = vrot.slane %v919_v52, 4  ;;  %v929_v55 = vmul.f32 %v919_v52, %v919_v52 }
 0x160   : > { %v923_v56 = vadd.f32 %v922_v54, %v919_v52  ;;  %v930_v57 = vrot.slane %v929_v55, 4 }
 0x162   : > { %v924_v58 = vrot.slane %v923_v56, 2  ;;  %v931_v59 = vadd.f32 %v930_v57, %v929_v55 }
 0x164   : > { %v925_v60 = vadd.f32 %v924_v58, %v923_v56  ;;  %v932_v61 = vrot.slane %v931_v59, 2 }
 0x166   : > { %v926_v62 = vrot.slane %v925_v60, 1  ;;  %v933_v63 = vadd.f32 %v932_v61, %v931_v59 }
 0x168   : > { %v927_v0 = vadd.f32 %v926_v62, %v925_v60  ;;  %v934_v1 = vrot.slane %v933_v63, 1 }
 0x16a   : > { %928 = vst [vmem:[%s1575_s30] sm:$0x1] %v927_v0  ;;  %v935_v2 = vadd.f32 %v934_v1, %v933_v63 }
 0x16c   : > { %936 = vst [vmem:[%s1575_s30 + $0x1] sm:$0x1] %v935_v2 }
 0x16d PF: > { %s14_s18 = sadd.s32 1, %s1340_s18   ;;  %s1644_s12 = smov %s1320_s13 }
 0x16e   : > { %p11_p0 = scmp.ge.s32.totalorder %s14_s18, 38   ;;  %s1645_s13 = smov %s1415_s25 }
 0x16f   : > { %s1646_s14 = smov %s1332_s16  ;;  %s1647_s15 = smov %s1336_s17 }
 0x170   : > { %s1648_s16 = smov %s1651_s19  ;;  %s1649_s17 = smov %s1655_s20 }
 0x171   :  { %13 = sbr.rel (!%p11_p0) target bundleno = 4 (0x4), region = 127 }

// kernel: _lambda_.70
= control target key start
LH: loop header
LB: loop body
LE: loop exit
PB: predicated region body
PF: predicated region fallthrough
CT: control target
= control target key end

     0   :  { %s962_s12 = smov 0   ;;  %s964_s13 = smov 0   ;;  %s1120_s0 = inlined_call_operand.vmem [shape: bf16[8,256], index: 0, kind: input, shape index: {}]   ;;  %s1121_s1 = inlined_call_operand.vmem [shape: bf16[256,512], index: 1, kind: input, shape index: {}]   ;;  %s1122_s2 = inlined_call_operand.vmem [shape: f32[8,512], index: 2, kind: output, shape index: {0}]   ;;  %s1123_s3 = inlined_call_operand.vmem [shape: f32[8,512], index: 3, kind: output, shape index: {1}]  }
   0x1   :  { %s966_s14 = smov 0   ;;  %s968_s15 = smov 0  }
   0x2   :  { %s970_s16 = smov 0  }
   0x3 LB: > { %s29_s17 = sadd.s32 1, %s935_s15  ;;  %p77_p1 = scmp.ne.s32.totalorder %s927_s13, %s923_s12  ;;  %s939_s16 = sphi %s970_s16, %s14_s16   ;;  %s935_s15 = sphi %s968_s15, %s1127_s15   ;;  %s931_s14 = sphi %s966_s14, %s1126_s14   ;;  %s927_s13 = sphi %s964_s13, %s1125_s13   ;;  %s923_s12 = sphi %s962_s12, %s1124_s12  }
   0x4   : > { %p31_p0 = scmp.ge.s32.totalorder %s29_s17, 4  ;;  %p78_p2 = scmp.eq.s32.totalorder %s939_s16, 0 }
   0x5   : > { %s70_s19 = sadd.s32 1, %s927_s13  ;;  %p793_p5 = scmp.ge.s32.totalorder %s939_s16, 4 }
   0x6   : > { %s1129_s17 = smov (%p31_p0, %s29_s17), 0  ;;  %p79_p3 = por %p78_p2, %p77_p1 }
   0x7   : > { %s66_s18 = ssub.s32 %s935_s15, %s1129_s17  ;;  %172 = sbr.rel (%p793_p5) target bundleno = 39 (0x27), region = 20 }
   0x8   : > { %p68_p4 = scmp.eq.s32.totalorder %s66_s18, 0 }
   0xa   : > { %s997_s20 = scalar_select %p68_p4, %s927_s13, %s70_s19  }
   0xe   : > { %175 = sbr.rel (!%p79_p3) target bundleno = 39 (0x27), region = 24  ;;  %s177_s21 = sand.u32 (%p79_p3), 1, %s927_s13  }
   0xf   : > { %s795_s22 = sshll.u32 (%p79_p3), %s935_s15, 2  ;;  %s794_s23 = sshll.u32 (%p79_p3), %s177_s21, 7 }
  0x10   : > { %s1005_s26 = scalar_lea.vmem (%p79_p3), %s1121_s1, %s795_s22  ;;  %s1009_s27 = scalar_lea.vmem (%p79_p3), [#allocation3], %s794_s23 }
  0x11   : > { %v200_v0 = vld [vmem:[%s1005_s26] sm:$0xf] (%p79_p3)  ;;  %v202_v1 = vld [vmem:[%s1005_s26 + $0x10] sm:$0xf] (%p79_p3) }
  0x12   : > { %201 = vst [vmem:[%s1009_s27] sm:$0xf] (%p79_p3), %v200_v0  ;;  %203 = vst [vmem:[%s1009_s27 + $0x4] sm:$0xf] (%p79_p3), %v202_v1  ;;  %v204_v2 = vld [vmem:[%s1005_s26 + $0x20] sm:$0xf] (%p79_p3) }
  0x13   : > { %v206_v3 = vld [vmem:[%s1005_s26 + $0x30] sm:$0xf] (%p79_p3)  ;;  %v208_v4 = vld [vmem:[%s1005_s26 + $0x40] sm:$0xf] (%p79_p3)  ;;  %205 = vst [vmem:[%s1009_s27 + $0x8] sm:$0xf] (%p79_p3), %v204_v2 }
  0x14   : > { %207 = vst [vmem:[%s1009_s27 + $0xc] sm:$0xf] (%p79_p3), %v206_v3  ;;  %209 = vst [vmem:[%s1009_s27 + $0x10] sm:$0xf] (%p79_p3), %v208_v4  ;;  %v210_v5 = vld [vmem:[%s1005_s26 + $0x50] sm:$0xf] (%p79_p3) }
  0x15   : > { %v212_v6 = vld [vmem:[%s1005_s26 + $0x60] sm:$0xf]  ;;  %v214_v7 = vld [vmem:[%s1005_s26 + $0x70] sm:$0xf]  ;;  %211 = vst [vmem:[%s1009_s27 + $0x14] sm:$0xf] %v210_v5 }
  0x16   : > { %213 = vst [vmem:[%s1009_s27 + $0x18] sm:$0xf] %v212_v6  ;;  %215 = vst [vmem:[%s1009_s27 + $0x1c] sm:$0xf] %v214_v7  ;;  %v216_v8 = vld [vmem:[%s1005_s26 + $0x80] sm:$0xf] }
  0x17   : > { %v218_v9 = vld [vmem:[%s1005_s26 + $0x90] sm:$0xf]  ;;  %v220_v10 = vld [vmem:[%s1005_s26 + $0xa0] sm:$0xf]  ;;  %217 = vst [vmem:[%s1009_s27 + $0x20] sm:$0xf] %v216_v8 }
  0x18   : > { %219 = vst [vmem:[%s1009_s27 + $0x24] sm:$0xf] %v218_v9  ;;  %221 = vst [vmem:[%s1009_s27 + $0x28] sm:$0xf] %v220_v10  ;;  %v222_v11 = vld [vmem:[%s1005_s26 + $0xb0] sm:$0xf] }
  0x19   : > { %v224_v12 = vld [vmem:[%s1005_s26 + $0xc0] sm:$0xf]  ;;  %v226_v13 = vld [vmem:[%s1005_s26 + $0xd0] sm:$0xf]  ;;  %223 = vst [vmem:[%s1009_s27 + $0x2c] sm:$0xf] %v222_v11 }
  0x1a   : > { %225 = vst [vmem:[%s1009_s27 + $0x30] sm:$0xf] %v224_v12  ;;  %227 = vst [vmem:[%s1009_s27 + $0x34] sm:$0xf] %v226_v13  ;;  %v228_v14 = vld [vmem:[%s1005_s26 + $0xe0] sm:$0xf] }
  0x1b   : > { %v230_v15 = vld [vmem:[%s1005_s26 + $0xf0] sm:$0xf]  ;;  %v232_v16 = vld [vmem:[%s1005_s26 + $0x100] sm:$0xf]  ;;  %229 = vst [vmem:[%s1009_s27 + $0x38] sm:$0xf] %v228_v14 }
  0x1c   : > { %231 = vst [vmem:[%s1009_s27 + $0x3c] sm:$0xf] %v230_v15  ;;  %233 = vst [vmem:[%s1009_s27 + $0x40] sm:$0xf] %v232_v16  ;;  %v234_v17 = vld [vmem:[%s1005_s26 + $0x110] sm:$0xf] }
  0x1d   : > { %v236_v18 = vld [vmem:[%s1005_s26 + $0x120] sm:$0xf]  ;;  %v238_v19 = vld [vmem:[%s1005_s26 + $0x130] sm:$0xf]  ;;  %235 = vst [vmem:[%s1009_s27 + $0x44] sm:$0xf] %v234_v17 }
  0x1e   : > { %237 = vst [vmem:[%s1009_s27 + $0x48] sm:$0xf] %v236_v18  ;;  %239 = vst [vmem:[%s1009_s27 + $0x4c] sm:$0xf] %v238_v19  ;;  %v240_v20 = vld [vmem:[%s1005_s26 + $0x140] sm:$0xf] }
  0x1f   : > { %v242_v21 = vld [vmem:[%s1005_s26 + $0x150] sm:$0xf]  ;;  %v244_v22 = vld [vmem:[%s1005_s26 + $0x160] sm:$0xf]  ;;  %241 = vst [vmem:[%s1009_s27 + $0x50] sm:$0xf] %v240_v20 }
  0x20   : > { %243 = vst [vmem:[%s1009_s27 + $0x54] sm:$0xf] %v242_v21  ;;  %245 = vst [vmem:[%s1009_s27 + $0x58] sm:$0xf] %v244_v22  ;;  %v246_v23 = vld [vmem:[%s1005_s26 + $0x170] sm:$0xf] }
  0x21   : > { %v248_v24 = vld [vmem:[%s1005_s26 + $0x180] sm:$0xf]  ;;  %v250_v25 = vld [vmem:[%s1005_s26 + $0x190] sm:$0xf]  ;;  %247 = vst [vmem:[%s1009_s27 + $0x5c] sm:$0xf] %v246_v23 }
  0x22   : > { %249 = vst [vmem:[%s1009_s27 + $0x60] sm:$0xf] %v248_v24  ;;  %251 = vst [vmem:[%s1009_s27 + $0x64] sm:$0xf] %v250_v25  ;;  %v252_v26 = vld [vmem:[%s1005_s26 + $0x1a0] sm:$0xf] }
  0x23   : > { %v254_v27 = vld [vmem:[%s1005_s26 + $0x1b0] sm:$0xf]  ;;  %v256_v28 = vld [vmem:[%s1005_s26 + $0x1c0] sm:$0xf]  ;;  %253 = vst [vmem:[%s1009_s27 + $0x68] sm:$0xf] %v252_v26 }
  0x24   : > { %255 = vst [vmem:[%s1009_s27 + $0x6c] sm:$0xf] %v254_v27  ;;  %257 = vst [vmem:[%s1009_s27 + $0x70] sm:$0xf] %v256_v28  ;;  %v258_v29 = vld [vmem:[%s1005_s26 + $0x1d0] sm:$0xf] }
  0x25   : > { %v260_v30 = vld [vmem:[%s1005_s26 + $0x1e0] sm:$0xf]  ;;  %v262_v31 = vld [vmem:[%s1005_s26 + $0x1f0] sm:$0xf]  ;;  %259 = vst [vmem:[%s1009_s27 + $0x74] sm:$0xf] %v258_v29 }
  0x26   : > { %261 = vst [vmem:[%s1009_s27 + $0x78] sm:$0xf] %v260_v30  ;;  %263 = vst [vmem:[%s1009_s27 + $0x7c] sm:$0xf] %v262_v31 }
  0x27 PF: > { %p796_p6 = scmp.ge.s32.totalorder %s939_s16, 1  ;;  %p349_p7 = scmp.lt.s32.totalorder %s939_s16, 5 }
  0x29   : > { %p350_p8 = pnand %p796_p6, %p349_p7 }
  0x2a   : > { %s356_s28 = sand.u32 (!%p350_p8), 1, %s923_s12   ;;  %v433_v32 = vld [vmem:[%s1120_s0] sm:$0xff] (!%p350_p8)  ;;  %p412_p9 = scmp.lt.s32.totalorder (!%p350_p8), %s931_s14, 3  ;;  %v941_v51 = vmov (!%p350_p8), 0.0  }
  0x2b   : > { %353 = sbr.rel (%p350_p8) target bundleno = 308 (0x134), region = 65  ;;  %s797_s4 = sshll.u32 (!%p350_p8), %s356_s28, 7  ;;  %v801_v33 = vcombine.high (!%p350_p8), %v433_v32, %v433_v32  ;;  %v800_v50 = vcombine.low (!%p350_p8), %v433_v32, %v433_v32 }
  0x2c   : > { %s1079_s5 = scalar_lea.vmem (!%p350_p8), [#allocation3], %s797_s4 }
  0x2d   : > { %v883_v34 = vld [vmem:[%s1079_s5 + $0x40] sm:$0xff] (!%p350_p8)   ;;  %601 = vmatprep.mubr.bf16.mxu0 (!%p350_p8), %v801_v33  ;;  %v885_v36 = vld [vmem:[%s1079_s5 + $0x48] sm:$0xff] (!%p350_p8)   ;;  %v887_v38 = vld [vmem:[%s1079_s5 + $0x50] sm:$0xff] (!%p350_p8)  }
  0x2e   : > { %v884_v35 = vld [vmem:[%s1079_s5] sm:$0xff] (!%p350_p8)   ;;  %820 = vmatprep.subr.bf16.mxu0 (!%p350_p8), %v883_v34  ;;  %v886_v37 = vld [vmem:[%s1079_s5 + $0x8] sm:$0xff] (!%p350_p8)   ;;  %v888_v39 = vld [vmem:[%s1079_s5 + $0x10] sm:$0xff] (!%p350_p8)  }
  0x2f   : > { %821 = vmatpush3.bf16.msra.mxu0 (!%p350_p8), %v884_v35  ;;  %v889_v40 = vld [vmem:[%s1079_s5 + $0x58] sm:$0xff] (!%p350_p8)   ;;  %v891_v42 = vld [vmem:[%s1079_s5 + $0x60] sm:$0xff] (!%p350_p8)   ;;  %v893_v44 = vld [vmem:[%s1079_s5 + $0x68] sm:$0xff] (!%p350_p8)  }
  0x30   : > { %822 = vmatprep.subr.bf16.mxu0 (!%p350_p8), %v885_v36  ;;  %v890_v41 = vld [vmem:[%s1079_s5 + $0x18] sm:$0xff] (!%p350_p8)   ;;  %v892_v43 = vld [vmem:[%s1079_s5 + $0x20] sm:$0xff] (!%p350_p8)   ;;  %v894_v45 = vld [vmem:[%s1079_s5 + $0x28] sm:$0xff] (!%p350_p8)  }
  0x31   : > { %v895_v46 = vld [vmem:[%s1079_s5 + $0x70] sm:$0xff] (!%p350_p8)   ;;  %v897_v48 = vld [vmem:[%s1079_s5 + $0x78] sm:$0xff] (!%p350_p8)  }
  0x32   : > { %v896_v47 = vld [vmem:[%s1079_s5 + $0x30] sm:$0xff]   ;;  %v898_v49 = vld [vmem:[%s1079_s5 + $0x38] sm:$0xff]   ;;  %s1131_s14 = smov (!%p412_p9, %s931_s14), 3 }
  0x33   : > { %823 = vmatpush3.bf16.msra.mxu0 %v886_v37  ;;  %s798_s6 = sshll.u32 %s1131_s14, 3 }
  0x34   : > { %824 = vmatprep.subr.bf16.mxu0 %v887_v38  ;;  %s425_s9 = scalar_lea.vmem %s1123_s3, %s798_s6  ;;  %s417_s12 = scalar_lea.vmem %s1122_s2, %s798_s6 }
  0x35   : > { %616 = vst [vmem:[%s425_s9] sm:$0xff] %v941_v51 }
  0x37   : > { %825 = vmatpush3.bf16.msra.mxu0 %v888_v39 }
  0x38   : > { %826 = vmatprep.subr.bf16.mxu0 %v889_v40 }
  0x3b   : > { %827 = vmatpush3.bf16.msra.mxu0 %v890_v41 }
  0x3c   : > { %828 = vmatprep.subr.bf16.mxu0 %v891_v42 }
  0x3f   : > { %829 = vmatpush3.bf16.msra.mxu0 %v892_v43 }
  0x40   : > { %830 = vmatprep.subr.bf16.mxu0 %v893_v44 }
  0x43   : > { %831 = vmatpush3.bf16.msra.mxu0 %v894_v45 }
  0x44   : > { %832 = vmatprep.subr.bf16.mxu0 %v895_v46 }
  0x47   : > { %833 = vmatpush3.bf16.msra.mxu0 %v896_v47 }
  0x48   : > { %834 = vmatprep.subr.bf16.mxu0 %v897_v48 }
  0x4b   : > { %835 = vmatpush3.bf16.msra.mxu0 %v898_v49 }
  0x4e   : > { %602 = vmatmul.mubr.bf16.vlgmr.msra.gmra.mrb[0].mxu0 %v800_v50 }
 0x121   : > { %v836_v52 = vpop.f32.mrb[0].mxu0 }
 0x122   : > { %v837_v53 = vpop.f32.mrb[1].mxu0 }
 0x123   : > { %v838_v54 = vadd.f32 %v837_v53, %v836_v52  ;;  %v839_v55 = vpop.f32.mrb[2].mxu0 }
 0x124   : > { %v840_v56 = vpop.f32.mrb[3].mxu0 }
 0x125   : > { %615 = vst [vmem:[%s417_s12] sm:$0xff] %v838_v54  ;;  %v617_v57 = vrot.slane %v838_v54, 4  ;;  %v624_v58 = vmul.f32 %v838_v54, %v838_v54 }
 0x127   : > { %v618_v59 = vadd.f32 %v838_v54, %v617_v57  ;;  %v625_v60 = vrot.slane %v624_v58, 4 }
 0x129   : > { %v619_v61 = vrot.slane %v618_v59, 2  ;;  %v626_v62 = vadd.f32 %v625_v60, %v624_v58 }
 0x12b   : > { %v620_v63 = vadd.f32 %v619_v61, %v618_v59  ;;  %v627_v0 = vrot.slane %v626_v62, 2 }
 0x12d   : > { %v621_v1 = vrot.slane %v620_v63, 1  ;;  %v628_v2 = vadd.f32 %v627_v0, %v626_v62 }
 0x12f   : > { %v622_v3 = vadd.f32 %v621_v1, %v620_v63  ;;  %v629_v4 = vrot.slane %v628_v2, 1 }
 0x131   : > { %623 = vst [vmem:[%s425_s9] sm:$0x1] %v622_v3  ;;  %v630_v5 = vadd.f32 %v629_v4, %v628_v2 }
 0x133   : > { %631 = vst [vmem:[%s425_s9 + $0x1] sm:$0x1] %v630_v5 }
 0x134 PF: > { %s14_s16 = sadd.s32 1, %s939_s16   ;;  %s1124_s12 = smov %s927_s13 }
 0x135   : > { %p11_p10 = scmp.ge.s32.totalorder %s14_s16, 6   ;;  %s1125_s13 = smov %s997_s20 }
 0x136   : > { %s1126_s14 = smov %s935_s15  ;;  %s1127_s15 = smov %s1129_s17 }
 0x137   :  { %13 = sbr.rel (!%p11_p10) target bundleno = 3 (0x3), region = 127 }

// kernel: _lambda_.71
= control target key start
LH: loop header
LB: loop body
LE: loop exit
PB: predicated region body
PF: predicated region fallthrough
CT: control target
= control target key end

     0   :  { %v29_v0 = vlaneseq  ;;  %s234_s1 = inlined_call_operand.vmem [shape: f32[1,512], index: 1, kind: input, shape index: {}]   ;;  %s235_s2 = inlined_call_operand.vmem [shape: f32[1,512], index: 2, kind: input, shape index: {}]   ;;  %s236_s4 = inlined_call_operand.vmem [shape: f32[1,512], index: 4, kind: input, shape index: {}]   ;;  %s237_s0 = inlined_call_operand.vmem [shape: f32[8,512], index: 0, kind: input, shape index: {}]   ;;  %s238_s3 = inlined_call_operand.vmem [shape: f32[8,512], index: 3, kind: input, shape index: {}]   ;;  %s239_s5 = inlined_call_operand.vmem [shape: f32[1,512], index: 5, kind: input, shape index: {}]   ;;  %s240_s6 = inlined_call_operand.vmem [shape: f32[8,512], index: 6, kind: output, shape index: {}]  }
   0x1   :  { %v27_v2 = vld [vmem:[%s234_s1] sm:$0xf]  ;;  %v24_v14 = vld [vmem:[%s237_s0 + $0x8] sm:$0xff]  ;;  %v25_v20 = vld [vmem:[%s237_s0 + $0x10] sm:$0xff] }
   0x2   :  { %v30_v1 = vshrl.u32 %v29_v0, 7  ;;  %v53_v3 = vld [vmem:[%s235_s2] sm:$0xf]  ;;  %v80_v15 = vld [vmem:[%s238_s3 + $0x8] sm:$0xff]  ;;  %v81_v25 = vld [vmem:[%s238_s3 + $0x10] sm:$0xff] }
   0x3   :  { %v83_v4 = vld [vmem:[%s236_s4] sm:$0xf]  ;;  %v26_v30 = vld [vmem:[%s237_s0 + $0x18] sm:$0xff] }
   0x4   :  { %v31_v5 = vsub.s32 0, %v30_v1  ;;  %v35_v6 = vsub.s32 1, %v30_v1  ;;  %v39_v7 = vsub.s32 2, %v30_v1  ;;  %v23_v8 = vld [vmem:[%s237_s0] sm:$0xff]  ;;  %v43_v16 = vsub.s32 3, %v30_v1  ;;  %v82_v35 = vld [vmem:[%s238_s3 + $0x18] sm:$0xff] }
   0x5   :  { %v79_v9 = vld [vmem:[%s238_s3] sm:$0xff] }
   0x6   :  { %v32_v10 = vrot.slane %v27_v2, %v31_v5  ;;  %v58_v11 = vrot.slane %v53_v3, %v31_v5  ;;  %v88_v12 = vrot.slane %v83_v4, %v31_v5  ;;  %v113_v13 = vld [vmem:[%s239_s5] sm:$0xf]  ;;  %v36_v17 = vrot.slane %v27_v2, %v35_v6 }
   0x7   :  { %v62_v18 = vrot.slane %v53_v3, %v35_v6  ;;  %v92_v19 = vrot.slane %v83_v4, %v35_v6  ;;  %v40_v23 = vrot.slane %v27_v2, %v39_v7  ;;  %v66_v24 = vrot.slane %v53_v3, %v39_v7 }
   0x8   :  { %v49_v21 = vmul.f32 %v32_v10, %v23_v8  ;;  %v105_v22 = vmul.f32 %v88_v12, %v79_v9  ;;  %v118_v26 = vrot.slane %v113_v13, %v31_v5  ;;  %v50_v27 = vmul.f32 %v36_v17, %v24_v14 }
   0x9   :  { %v106_v28 = vmul.f32 %v92_v19, %v80_v15  ;;  %v96_v29 = vrot.slane %v83_v4, %v39_v7  ;;  %v51_v32 = vmul.f32 %v40_v23, %v25_v20  ;;  %v44_v33 = vrot.slane %v27_v2, %v43_v16 }
   0xa   :  { %v75_v31 = vadd.f32 %v58_v11, %v49_v21  ;;  %v70_v34 = vrot.slane %v53_v3, %v43_v16  ;;  %v76_v36 = vadd.f32 %v62_v18, %v50_v27  ;;  %v122_v37 = vrot.slane %v113_v13, %v35_v6 }
   0xb   :  { %v107_v38 = vmul.f32 %v96_v29, %v81_v25  ;;  %v100_v39 = vrot.slane %v83_v4, %v43_v16  ;;  %v77_v41 = vadd.f32 %v66_v24, %v51_v32  ;;  %v126_v42 = vrot.slane %v113_v13, %v39_v7 }
   0xc   :  { %v109_v40 = vadd.f32 %v105_v22, %v75_v31  ;;  %v52_v43 = vmul.f32 %v44_v33, %v26_v30  ;;  %v110_v44 = vadd.f32 %v106_v28, %v76_v36  ;;  %v130_v49 = vrot.slane %v113_v13, %v43_v16 }
   0xd   :  { %v108_v45 = vmul.f32 %v100_v39, %v82_v35  ;;  %v111_v47 = vadd.f32 %v107_v38, %v77_v41 }
   0xe   :  { %v135_v46 = vadd.f32 %v118_v26, %v109_v40  ;;  %v78_v48 = vadd.f32 %v70_v34, %v52_v43  ;;  %v136_v50 = vadd.f32 %v122_v37, %v110_v44 }
   0xf   :  { %v137_v52 = vadd.f32 %v126_v42, %v111_v47 }
  0x10   :  { %v139_v51 = vmax.f32 %v135_v46, 0.0  ;;  %v112_v53 = vadd.f32 %v108_v45, %v78_v48  ;;  %v140_v54 = vmax.f32 %v136_v50, 0.0 }
  0x11   :  { %v141_v55 = vmax.f32 %v137_v52, 0.0 }
  0x12   :  { %143 = vst [vmem:[%s240_s6] sm:$0xff] %v139_v51  ;;  %v138_v56 = vadd.f32 %v130_v49, %v112_v53  ;;  %144 = vst [vmem:[%s240_s6 + $0x8] sm:$0xff] %v140_v54 }
  0x13   :  { %145 = vst [vmem:[%s240_s6 + $0x10] sm:$0xff] %v141_v55 }
  0x14   :  { %v142_v57 = vmax.f32 %v138_v56, 0.0 }
  0x16   :  { %146 = vst [vmem:[%s240_s6 + $0x18] sm:$0xff] %v142_v57 }

// kernel: _lambda_.75
= control target key start
LH: loop header
LB: loop body
LE: loop exit
PB: predicated region body
PF: predicated region fallthrough
CT: control target
= control target key end

     0   :  { %v23_v0 = vlaneseq  ;;  %s160_s1 = inlined_call_operand.vmem [shape: f32[1,512], index: 1, kind: input, shape index: {}]   ;;  %s161_s2 = inlined_call_operand.vmem [shape: f32[1,512], index: 2, kind: input, shape index: {}]   ;;  %s162_s0 = inlined_call_operand.vmem [shape: f32[8,512], index: 0, kind: input, shape index: {}]   ;;  %s163_s3 = inlined_call_operand.vmem [shape: f32[8,512], index: 3, kind: input, shape index: {}]   ;;  %s164_s4 = inlined_call_operand.vmem [shape: f32[8,512], index: 4, kind: output, shape index: {}]  }
   0x1   :  { %v21_v2 = vld [vmem:[%s160_s1] sm:$0xf]  ;;  %v18_v9 = vld [vmem:[%s162_s0 + $0x8] sm:$0xff]  ;;  %v19_v14 = vld [vmem:[%s162_s0 + $0x10] sm:$0xff] }
   0x2   :  { %v24_v1 = vshrl.u32 %v23_v0, 7  ;;  %v47_v3 = vld [vmem:[%s161_s2] sm:$0xf]  ;;  %v20_v15 = vld [vmem:[%s162_s0 + $0x18] sm:$0xff]  ;;  %v74_v23 = vld [vmem:[%s163_s3 + $0x8] sm:$0xff] }
   0x3   :  { %v17_v8 = vld [vmem:[%s162_s0] sm:$0xff]  ;;  %v75_v28 = vld [vmem:[%s163_s3 + $0x10] sm:$0xff]  ;;  %v76_v29 = vld [vmem:[%s163_s3 + $0x18] sm:$0xff] }
   0x4   :  { %v25_v4 = vsub.s32 0, %v24_v1  ;;  %v29_v5 = vsub.s32 1, %v24_v1  ;;  %v33_v6 = vsub.s32 2, %v24_v1  ;;  %v37_v7 = vsub.s32 3, %v24_v1  ;;  %v73_v22 = vld [vmem:[%s163_s3] sm:$0xff] }
   0x6   :  { %v26_v10 = vrot.slane %v21_v2, %v25_v4  ;;  %v52_v11 = vrot.slane %v47_v3, %v25_v4  ;;  %v30_v12 = vrot.slane %v21_v2, %v29_v5  ;;  %v56_v13 = vrot.slane %v47_v3, %v29_v5 }
   0x7   :  { %v34_v16 = vrot.slane %v21_v2, %v33_v6  ;;  %v60_v17 = vrot.slane %v47_v3, %v33_v6  ;;  %v38_v18 = vrot.slane %v21_v2, %v37_v7  ;;  %v64_v19 = vrot.slane %v47_v3, %v37_v7 }
   0x8   :  { %v43_v20 = vmul.f32 %v26_v10, %v17_v8  ;;  %v44_v21 = vmul.f32 %v30_v12, %v18_v9 }
   0x9   :  { %v45_v24 = vmul.f32 %v34_v16, %v19_v14  ;;  %v46_v25 = vmul.f32 %v38_v18, %v20_v15 }
   0xa   :  { %v69_v26 = vadd.f32 %v52_v11, %v43_v20  ;;  %v70_v27 = vadd.f32 %v56_v13, %v44_v21 }
   0xb   :  { %v71_v30 = vadd.f32 %v60_v17, %v45_v24  ;;  %v72_v31 = vadd.f32 %v64_v19, %v46_v25 }
   0xc   :  { %v77_v32 = vadd.f32 %v73_v22, %v69_v26  ;;  %v78_v33 = vadd.f32 %v74_v23, %v70_v27 }
   0xd   :  { %v79_v34 = vadd.f32 %v75_v28, %v71_v30  ;;  %v80_v35 = vadd.f32 %v76_v29, %v72_v31 }
   0xe   :  { %v81_v36 = vmax.f32 %v77_v32, 0.0  ;;  %v82_v37 = vmax.f32 %v78_v33, 0.0 }
   0xf   :  { %v83_v38 = vmax.f32 %v79_v34, 0.0  ;;  %v84_v39 = vmax.f32 %v80_v35, 0.0 }
  0x10   :  { %85 = vst [vmem:[%s164_s4] sm:$0xff] %v81_v36  ;;  %86 = vst [vmem:[%s164_s4 + $0x8] sm:$0xff] %v82_v37 }
  0x11   :  { %87 = vst [vmem:[%s164_s4 + $0x10] sm:$0xff] %v83_v38  ;;  %88 = vst [vmem:[%s164_s4 + $0x18] sm:$0xff] %v84_v39 }

</bundles_post_ra>
